<compile_context>
chip_gen: v6e
topology: v6e:2x2x1
jax: 0.10.0
libtpu: 0.0.40
codegen_flags: <defaults>
</compile_context>

<pallas_src>
import functools

import jax
import jax.numpy as jnp
from jax.experimental import pallas as pl
from jax.experimental.pallas import tpu as pltpu


# ----------------------------------------------------------------------------
# Tiling helpers
# ----------------------------------------------------------------------------
_VMEM_BUDGET = 24 * 1024 * 1024        # double-buffered footprint target
_VMEM_LIMIT = 32 * 1024 * 1024         # explicit scoped-VMEM limit (v7x-safe)


def _choose_tile_m(m, per_row_bytes, resident_bytes, budget=_VMEM_BUDGET):
    """Largest M-tile (capped at 2048 when tiling) fitting the VMEM budget."""
    if m <= 2048 and resident_bytes + 2 * m * per_row_bytes <= budget:
        return m                                   # whole-M block, grid=(1,)
    tm = 2048
    while tm > 256 and resident_bytes + 2 * tm * per_row_bytes > budget:
        tm //= 2
    return min(tm, m)


def _mosaic_params(semantics):
    return pltpu.CompilerParams(dimension_semantics=semantics,
                                vmem_limit_bytes=_VMEM_LIMIT)


# ----------------------------------------------------------------------------
# Kernel 1: fused matmul + bias + optional ReLU (+ optional fused 2nd head)
# Used for conv1 / conv2 / conv3(+depth) / lin1 (no-GRU path).
# ----------------------------------------------------------------------------
def _mm_bias_act_kernel(*refs, activation, has_extra):
    if has_extra:
        x_ref, w_ref, b_ref, w2_ref, b2_ref, o_ref, o2_ref = refs
    else:
        x_ref, w_ref, b_ref, o_ref = refs
    acc = jnp.dot(x_ref[...], w_ref[...], preferred_element_type=jnp.float32)
    acc = acc + b_ref[...]                        # f32 epilogue (VPU)
    if activation == "relu":
        acc = jnp.maximum(acc, 0.0)
    o_ref[...] = acc.astype(o_ref.dtype)
    if has_extra:
        # Fused second head (depth 1x1 conv) on the already-resident tile.
        acc2 = jnp.dot(acc.astype(w2_ref.dtype), w2_ref[...],
                       preferred_element_type=jnp.float32) + b2_ref[...]
        o2_ref[...] = acc2.astype(o2_ref.dtype)


def matmul_bias_act(x, w, b, *, activation=None, out_dtype=jnp.float32,
                    extra_head=None, extra_dtype=jnp.float32):
    """act(x @ w + b) [+ optional fused second head on the activated tile]."""
    M, K = x.shape
    K2, N = w.shape
    assert K == K2 and b.shape == (1, N)
    xi = jnp.dtype(x.dtype).itemsize
    oi = jnp.dtype(out_dtype).itemsize
    wi = jnp.dtype(w.dtype).itemsize
    per_row = K * xi + N * oi + N * 4             # + f32 acc intermediate
    resident = K * N * wi + N * 4

    in_specs = [pl.BlockSpec((None, K), lambda i: (i, 0)),
                pl.BlockSpec((K, N), lambda i: (0, 0)),    # weights resident
                pl.BlockSpec((1, N), lambda i: (0, 0))]
    args = (x, w, b)
    if extra_head is not None:
        w2, b2 = extra_head
        N2 = w2.shape[1]
        per_row += N2 * jnp.dtype(extra_dtype).itemsize
        resident += N * N2 * jnp.dtype(w2.dtype).itemsize + N2 * 4
        in_specs += [pl.BlockSpec((N, N2), lambda i: (0, 0)),
                     pl.BlockSpec((1, N2), lambda i: (0, 0))]
        args = (x, w, b, w2, b2)

    tm = _choose_tile_m(M, per_row, resident)
    # fix the M-tile in the specs (None placeholder above was just for clarity)
    in_specs[0] = pl.BlockSpec((tm, K), lambda i: (i, 0))
    out_shape = jax.ShapeDtypeStruct((M, N), out_dtype)
    # TODO(synk): pack the 32/64/8-channel outputs lane-dense (>=128 last dim)
    # once the required (tm,O)->(tm/r,r*O) minor-dim relayout is verified to
    # lower in Mosaic; currently stores are masked below lane width 128.
    out_specs = pl.BlockSpec((tm, N), lambda i: (i, 0))
    if extra_head is not None:
        out_shape = (out_shape, jax.ShapeDtypeStruct((M, N2), extra_dtype))
        out_specs = (out_specs, pl.BlockSpec((tm, N2), lambda i: (i, 0)))

    kern = functools.partial(_mm_bias_act_kernel, activation=activation,
                             has_extra=extra_head is not None)
    # No pad / slice: cdiv grid, partial last block is clipped by Pallas and
    # the epilogue is purely row-wise.
    return pl.pallas_call(
        kern,
        out_shape=out_shape,
        grid=(pl.cdiv(M, tm),),
        in_specs=in_specs,
        out_specs=out_specs,
        compiler_params=_mosaic_params(("parallel",)),
    )(*args)


# ----------------------------------------------------------------------------
# Kernel 2: single-step head  (lin1 + ReLU + GRUCell + critic, fully fused)
# ----------------------------------------------------------------------------
def _head_step_kernel(x_ref, h_ref, m_ref, l1w_ref, l1b_ref, wih_ref, bih_ref,
                      whh_ref, bhh_ref, cw_ref, cb_ref, val_ref, hout_ref):
    H = h_ref.shape[1]
    xl = jnp.dot(x_ref[...], l1w_ref[...], preferred_element_type=jnp.float32)
    xl = jnp.maximum(xl + l1b_ref[...], 0.0)
    # torch.nn.GRUCell, gate order [r, z, n]; hidden state kept in f32
    h = h_ref[...] * m_ref[...]
    gi = jnp.dot(xl.astype(wih_ref.dtype), wih_ref[...],
                 preferred_element_type=jnp.float32) + bih_ref[...]
    gh = jnp.dot(h.astype(whh_ref.dtype), whh_ref[...],
                 preferred_element_type=jnp.float32) + bhh_ref[...]
    r = jax.nn.sigmoid(gi[:, :H] + gh[:, :H])
    z = jax.nn.sigmoid(gi[:, H:2 * H] + gh[:, H:2 * H])
    n = jnp.tanh(gi[:, 2 * H:] + r * gh[:, 2 * H:])
    hnew = (1.0 - z) * n + z * h
    hout_ref[...] = hnew.astype(hout_ref.dtype)
    # critic fused into the epilogue (single-step path only)
    val_ref[...] = (jnp.dot(hnew, cw_ref[...],
                            preferred_element_type=jnp.float32)
                    + cb_ref[...]).astype(val_ref.dtype)


def head_step(xf, h, masks, p):
    # TODO(synk): on v7x add a core-parallel batch split (2nd TensorCore idle);
    # needs B large enough that B/2 keeps a valid (>=8)-sublane block.
    B, K = xf.shape
    H = h.shape[1]
    G = 3 * H
    return pl.pallas_call(
        _head_step_kernel,
        out_shape=(jax.ShapeDtypeStruct((B, 1), jnp.float32),
                   jax.ShapeDtypeStruct((B, H), jnp.float32)),
        grid=(1,),
        in_specs=[pl.BlockSpec((B, K), lambda i: (0, 0)),
                  pl.BlockSpec((B, H), lambda i: (0, 0)),
                  pl.BlockSpec((B, 1), lambda i: (0, 0)),
                  pl.BlockSpec((K, H), lambda i: (0, 0)),
                  pl.BlockSpec((1, H), lambda i: (0, 0)),
                  pl.BlockSpec((H, G), lambda i: (0, 0)),
                  pl.BlockSpec((1, G), lambda i: (0, 0)),
                  pl.BlockSpec((H, G), lambda i: (0, 0)),
                  pl.BlockSpec((1, G), lambda i: (0, 0)),
                  pl.BlockSpec((H, 1), lambda i: (0, 0)),
                  pl.BlockSpec((1, 1), lambda i: (0, 0))],
        out_specs=(pl.BlockSpec((B, 1), lambda i: (0, 0)),
                   pl.BlockSpec((B, H), lambda i: (0, 0))),
        compiler_params=_mosaic_params(("arbitrary",)),
    )(xf, h, masks, p["lin1_w"], p["lin1_b"], p["gru_w_ih"], p["gru_b_ih"],
      p["gru_w_hh"], p["gru_b_hh"], p["critic_w"], p["critic_b"])


# ----------------------------------------------------------------------------
# Kernel 3: hoisted lin1 + x@W_ih over all T*B rows (sequence branch)
# gi is stored in bfloat16 to halve the largest sequence-path HBM intermediate.
# ----------------------------------------------------------------------------
def _lin1_gi_kernel(x_ref, l1w_ref, l1b_ref, wih_ref, bih_ref, gi_ref):
    xl = jnp.dot(x_ref[...], l1w_ref[...], preferred_element_type=jnp.float32)
    xl = jnp.maximum(xl + l1b_ref[...], 0.0)
    gi = jnp.dot(xl.astype(wih_ref.dtype), wih_ref[...],
                 preferred_element_type=jnp.float32) + bih_ref[...]
    gi_ref[...] = gi.astype(gi_ref.dtype)


def lin1_gi(xf, p):
    M, K = xf.shape
    H = p["lin1_w"].shape[1]
    G = p["gru_w_ih"].shape[1]
    resident = (K * H + H * G) * 2 + (H + G) * 4
    per_row = K * 2 + G * 2 + H * 4                    # in + out + xl scratch
    tm = _choose_tile_m(M, per_row, resident)
    return pl.pallas_call(
        _lin1_gi_kernel,
        out_shape=jax.ShapeDtypeStruct((M, G), jnp.bfloat16),
        grid=(pl.cdiv(M, tm),),
        in_specs=[pl.BlockSpec((tm, K), lambda i: (i, 0)),
                  pl.BlockSpec((K, H), lambda i: (0, 0)),
                  pl.BlockSpec((1, H), lambda i: (0, 0)),
                  pl.BlockSpec((H, G), lambda i: (0, 0)),
                  pl.BlockSpec((1, G), lambda i: (0, 0))],
        out_specs=pl.BlockSpec((tm, G), lambda i: (i, 0)),
        compiler_params=_mosaic_params(("parallel",)),
    )(xf, p["lin1_w"], p["lin1_b"], p["gru_w_ih"], p["gru_b_ih"])


# ----------------------------------------------------------------------------
# Kernel 4: fused GRU recurrence over T steps (W_hh resident, h in VMEM
# scratch).  Critic is NOT computed here anymore (hoisted out, see forward).
# ----------------------------------------------------------------------------
def _gru_seq_kernel(h0_ref, gi_ref, m_ref, whh_ref, bhh_ref, hseq_ref, h_scr):
    H = h0_ref.shape[1]

    @pl.when(pl.program_id(0) == 0)
    def _():
        h_scr[...] = h0_ref[...]

    h = h_scr[...] * m_ref[0]                    # states * masks[t]
    gi = gi_ref[0].astype(jnp.float32)           # bf16 -> f32 gate math
    # TODO(synk): at tiny B the per-step W_hh matmul is weight-push bound;
    # hold the W_hh tiles in the MXU via pltpu.matmul_push_rhs/acc_lhs once
    # before the T loop instead of re-streaming them every step.
    gh = jnp.dot(h.astype(whh_ref.dtype), whh_ref[...],
                 preferred_element_type=jnp.float32) + bhh_ref[...]
    r = jax.nn.sigmoid(gi[:, :H] + gh[:, :H])
    z = jax.nn.sigmoid(gi[:, H:2 * H] + gh[:, H:2 * H])
    n = jnp.tanh(gi[:, 2 * H:] + r * gh[:, 2 * H:])
    hnew = (1.0 - z) * n + z * h
    h_scr[...] = hnew
    hseq_ref[0] = hnew.astype(hseq_ref.dtype)


def gru_sequence(gi, masks, h0, p):
    # TODO(synk): on v7x split B across the two TensorCores with a leading
    # core-parallel grid axis (each core carrying its own h scratch).
    T, B, G = gi.shape
    H = h0.shape[1]
    return pl.pallas_call(
        _gru_seq_kernel,
        out_shape=jax.ShapeDtypeStruct((T, B, H), jnp.float32),
        grid=(T,),
        in_specs=[pl.BlockSpec((B, H), lambda t: (0, 0)),        # h0
                  pl.BlockSpec((1, B, G), lambda t: (t, 0, 0)),  # gi[t] bf16
                  pl.BlockSpec((1, B, 1), lambda t: (t, 0, 0)),  # masks[t]
                  pl.BlockSpec((H, G), lambda t: (0, 0)),        # W_hh resident
                  pl.BlockSpec((1, G), lambda t: (0, 0))],
        out_specs=pl.BlockSpec((1, B, H), lambda t: (t, 0, 0)),
        scratch_shapes=[pltpu.VMEM((B, H), jnp.float32)],
        compiler_params=_mosaic_params(("arbitrary",)),          # recurrence
    )(h0, gi, masks, p["gru_w_hh"], p["gru_b_hh"])


# ----------------------------------------------------------------------------
# Conv wrapper: NHWC im2col ((kh,kw,C) reduction order) + fused Pallas matmul.
# Optionally fuses a 1x1 second head (depth) on the activated output tile.
# ----------------------------------------------------------------------------
def conv2d_nhwc(x, wmat, b, kh, kw, stride, *, activation="relu",
                out_dtype=jnp.bfloat16, extra_head=None,
                extra_dtype=jnp.float32):
    # TODO(synk): assemble the (tile, kh*kw*C) patches inside the kernel (sum
    # of kh*kw shifted matmuls into a VMEM f32 accumulator) to remove the
    # kh*kw/stride^2 HBM im2col blow-up; the required strided window / minor-
    # dim merge could not be verified to lower in Mosaic without a TPU, so the
    # patch build stays in the XLA wrapper (single fusion, bf16) for now.
    N, H, W, C = x.shape
    Ho = (H - kh) // stride + 1
    Wo = (W - kw) // stride + 1
    cols = []
    for i in range(kh):
        for j in range(kw):
            cols.append(x[:, i:i + stride * (Ho - 1) + 1:stride,
                          j:j + stride * (Wo - 1) + 1:stride, :])
    p = jnp.stack(cols, axis=3)                       # (N,Ho,Wo,kh*kw,C)
    p = p.reshape(N * Ho * Wo, kh * kw * C)
    res = matmul_bias_act(p, wmat, b, activation=activation,
                          out_dtype=out_dtype, extra_head=extra_head,
                          extra_dtype=extra_dtype)
    O = wmat.shape[1]
    if extra_head is not None:
        out, out2 = res
        return (out.reshape(N, Ho, Wo, O),
                out2.reshape(N, Ho, Wo, extra_head[0].shape[1]))
    return res.reshape(N, Ho, Wo, O)


# ----------------------------------------------------------------------------
# Parameters: synthetic init in torch layout, then one-time TPU-layout prep
# ----------------------------------------------------------------------------
def init_params(key, num_inputs, conv_out_size, hidden=512, use_gru=True):
    ks = jax.random.split(key, 10)

    def w(k, shape, s=0.05):
        return jax.random.normal(k, shape, jnp.float32) * s

    p = {
        "conv1_w": w(ks[0], (32, num_inputs, 8, 8)),
        "conv1_b": jnp.zeros((32,), jnp.float32),
        "conv2_w": w(ks[1], (64, 32, 4, 4)),
        "conv2_b": jnp.zeros((64,), jnp.float32),
        "conv3_w": w(ks[2], (32, 64, 3, 3)),
        "conv3_b": jnp.zeros((32,), jnp.float32),
        "depth_w": w(ks[3], (8, 32, 1, 1)),
        "depth_b": jnp.zeros((8,), jnp.float32),
        "lin1_w": w(ks[4], (hidden, conv_out_size)),      # torch (out, in)
        "lin1_b": jnp.zeros((hidden,), jnp.float32),
        "critic_w": w(ks[5], (1, hidden)),
        "critic_b": jnp.zeros((1,), jnp.float32),
    }
    if use_gru:
        p["gru_w_ih"] = w(ks[6], (3 * hidden, hidden))
        p["gru_w_hh"] = w(ks[7], (3 * hidden, hidden))
        p["gru_b_ih"] = jnp.zeros((3 * hidden,), jnp.float32)
        p["gru_b_hh"] = jnp.zeros((3 * hidden,), jnp.float32)
    return p
    # TODO(synk): reference reset_parameters uses orthogonal (QR) init + relu
    # gain; replaced by deterministic Gaussian init here.


def prepare_params(raw, conv_hw, hidden=512, use_gru=True):
    """One-time layout prep: transpose/flatten/cast weights for the kernels."""
    H3, W3 = conv_hw
    C3 = 32

    def conv_w(w_oikk, scale=1.0):
        O, C, kh, kw = w_oikk.shape
        return (w_oikk * scale).transpose(2, 3, 1, 0).reshape(
            kh * kw * C, O).astype(jnp.bfloat16)

    def bias(b):
        return b.reshape(1, -1).astype(jnp.float32)

    p = {
        "conv1_w": conv_w(raw["conv1_w"], 1.0 / 255.0),   # fold input scale
        "conv1_b": bias(raw["conv1_b"]),
        "conv2_w": conv_w(raw["conv2_w"]), "conv2_b": bias(raw["conv2_b"]),
        "conv3_w": conv_w(raw["conv3_w"]), "conv3_b": bias(raw["conv3_b"]),
        "depth_w": raw["depth_w"].reshape(8, C3).T.astype(jnp.bfloat16),
        "depth_b": bias(raw["depth_b"]),
        "lin1_b": bias(raw["lin1_b"]),
        "critic_w": raw["critic_w"].T.astype(jnp.float32),
        "critic_b": bias(raw["critic_b"]),
    }
    # lin1: torch flattens conv output as NCHW (C,Ho,Wo); activations here are
    # flattened NHWC (Ho,Wo,C) -> permute the reduction rows to match.
    l1 = raw["lin1_w"].reshape(hidden, C3, H3, W3)
    p["lin1_w"] = l1.transpose(2, 3, 1, 0).reshape(
        H3 * W3 * C3, hidden).astype(jnp.bfloat16)
    if use_gru:
        p["gru_w_ih"] = raw["gru_w_ih"].T.astype(jnp.bfloat16)
        p["gru_w_hh"] = raw["gru_w_hh"].T.astype(jnp.bfloat16)
        p["gru_b_ih"] = bias(raw["gru_b_ih"])
        p["gru_b_hh"] = bias(raw["gru_b_hh"])
    return p


# ----------------------------------------------------------------------------
# Forward pass (mirrors CNNDepthPolicy.forward)
# ----------------------------------------------------------------------------
def cnn_depth_policy_forward(params, inputs, states, masks, *,
                             pred_depth=False, use_gru=True):
    # NCHW (torch) -> NHWC once at the boundary; conv stack stays NHWC so
    # there are no per-layer layout transposes.  1/255 is folded into conv1_w.
    x = jnp.transpose(inputs, (0, 2, 3, 1)).astype(jnp.bfloat16)
    x = conv2d_nhwc(x, params["conv1_w"], params["conv1_b"], 8, 8, 4)
    x = conv2d_nhwc(x, params["conv2_w"], params["conv2_b"], 4, 4, 2)

    depth = None
    if pred_depth:
        # Depth head fused into conv3's kernel epilogue (no extra pallas_call,
        # no re-read of the conv3 activation from HBM).
        x, d = conv2d_nhwc(x, params["conv3_w"], params["conv3_b"], 3, 3, 1,
                           extra_head=(params["depth_w"], params["depth_b"]))
        depth = jnp.transpose(d, (0, 3, 1, 2))           # NCHW output
    else:
        x = conv2d_nhwc(x, params["conv3_w"], params["conv3_b"], 3, 3, 1)

    N, Ho, Wo, C = x.shape
    xf = x.reshape(N, Ho * Wo * C)      # NHWC flatten (lin1_w rows permuted)

    if use_gru:
        B, Hh = states.shape
        if N == B:
            # single step: lin1 + ReLU + GRUCell + critic fused in one kernel
            value, h_new = head_step(xf, states, masks, params)
            x_out, states_out = h_new, h_new
        else:
            # sequence: hoist lin1 and the x-side GRU matmul out of the
            # recurrence (one big matmul, bf16 gi), run the recurrent part in
            # one grid=(T,) kernel with W_hh resident and h in VMEM scratch,
            # then apply the critic once over all T*B rows.
            assert N % B == 0, ("sequence batch must be a multiple of the "
                                "number of states (time-major layout)")
            T = N // B
            gi = lin1_gi(xf, params)                          # (T*B, 3H) bf16
            h_seq = gru_sequence(gi.reshape(T, B, -1),
                                 masks.reshape(T, B, 1),
                                 states, params)
            x_out = h_seq.reshape(T * B, Hh)
            # Critic hoisted out of the recurrence: one (T*B,512)x(512,1)
            # matmul (left to XLA; a dedicated N=1 pallas_call would be pure
            # masked-store overhead).
            value = x_out @ params["critic_w"] + params["critic_b"]
            states_out = h_seq[-1]
    else:
        x_out = matmul_bias_act(xf, params["lin1_w"], params["lin1_b"],
                                activation="relu", out_dtype=jnp.float32)
        states_out = states
        value = x_out @ params["critic_w"] + params["critic_b"]

    if pred_depth:
        return value, x_out, states_out, depth
    return value, x_out, states_out


# ----------------------------------------------------------------------------
if __name__ == "__main__":
    # Small shapes: conv stack needs spatial >= 36; 44 gives a 2x2x32 conv out.
    num_envs, T, num_inputs, spatial, hidden = 2, 4, 4, 44, 512
    batch = num_envs * T                                   # sequence branch

    s1 = (spatial - 8) // 4 + 1
    s2 = (s1 - 4) // 2 + 1
    s3 = (s2 - 3) // 1 + 1
    conv_out_size = 32 * s3 * s3

    key = jax.random.PRNGKey(0)
    k_in, k_st, k_p = jax.random.split(key, 3)

    inputs = jax.random.uniform(k_in, (batch, num_inputs, spatial, spatial),
                                jnp.float32, minval=0.0, maxval=255.0)
    states = jax.random.normal(k_st, (num_envs, hidden), jnp.float32) * 0.1
    masks = jnp.ones((batch, 1), jnp.float32).at[4, 0].set(0.0)

    raw = init_params(k_p, num_inputs, conv_out_size, hidden=hidden,
                      use_gru=True)
    params = prepare_params(raw, (s3, s3), hidden=hidden, use_gru=True)

    # Sequence branch (T*B inputs, B states) with depth prediction.
    fwd_seq = jax.jit(functools.partial(cnn_depth_policy_forward,
                                        pred_depth=True, use_gru=True))
    value, x_out, states_out, depth = fwd_seq(params, inputs, states, masks)
    jax.block_until_ready((value, x_out, states_out, depth))

    assert value.shape == (batch, 1)
    assert x_out.shape == (batch, hidden)
    assert states_out.shape == (num_envs, hidden)
    assert depth.shape == (batch, 8, s3, s3)
    assert bool(jnp.all(jnp.isfinite(value)))
    assert bool(jnp.all(jnp.isfinite(x_out)))
    assert bool(jnp.all(jnp.isfinite(depth)))

    # Single-step branch must agree with step 0 of the fused sequence kernel.
    fwd_one = jax.jit(functools.partial(cnn_depth_policy_forward,
                                        pred_depth=False, use_gru=True))
    v1, x1, st1 = fwd_one(params, inputs[:num_envs], states, masks[:num_envs])
    jax.block_until_ready((v1, x1, st1))
    assert v1.shape == (num_envs, 1)
    assert x1.shape == (num_envs, hidden)
    assert st1.shape == (num_envs, hidden)
    assert bool(jnp.allclose(x1, x_out[:num_envs], atol=2e-2, rtol=2e-2))
    assert bool(jnp.allclose(v1, value[:num_envs], atol=2e-2, rtol=2e-2))

    print("KERNEL_OK")
</pallas_src>

<mosaic_0001>
module attributes {stable_mosaic.version = 11 : i64} {
  func.func @_mm_bias_act_kernel(%arg0: i32, %arg1: memref<800x256xbf16, #tpu.memory_space<vmem>>, %arg2: memref<256x32xbf16, #tpu.memory_space<vmem>>, %arg3: memref<1x32xf32, #tpu.memory_space<vmem>>, %arg4: memref<800x32xbf16, #tpu.memory_space<vmem>>) attributes {dimension_semantics = [#tpu.dimension_semantics<parallel>], iteration_bounds = array<i64: 1>, scalar_prefetch = 0 : i64, scratch_operands = 0 : i64, tpu.core_type = #tpu.core_type<tc>, window_params = [{transform_indices = @transform_0, window_bounds = array<i64: 800, 256>}, {pipeline_mode = #tpu.pipeline_mode<synchronous>, transform_indices = @transform_1, window_bounds = array<i64: 256, 32>}, {pipeline_mode = #tpu.pipeline_mode<synchronous>, transform_indices = @transform_2, window_bounds = array<i64: 1, 32>}, {transform_indices = @transform_3, window_bounds = array<i64: 800, 32>}]} {
    %c0 = arith.constant 0 : index
    %c0_0 = arith.constant 0 : index
    %0 = vector.load %arg1[%c0, %c0_0] : memref<800x256xbf16, #tpu.memory_space<vmem>>, vector<800x256xbf16>
    %c0_1 = arith.constant 0 : index
    %c0_2 = arith.constant 0 : index
    %1 = vector.load %arg2[%c0_1, %c0_2] : memref<256x32xbf16, #tpu.memory_space<vmem>>, vector<256x32xbf16>
    %cst = arith.constant dense<0.000000e+00> : vector<800x32xf32>
    %2 = tpu.matmul %0, %1, %cst {dimension_numbers = #tpu.dot_dimension_numbers<[1], [0], [0], [1], [0, 0, 1, 1], [], []>} : vector<800x256xbf16>, vector<256x32xbf16>, vector<800x32xf32> -> vector<800x32xf32>
    %c0_3 = arith.constant 0 : index
    %c0_4 = arith.constant 0 : index
    %3 = vector.load %arg3[%c0_3, %c0_4] : memref<1x32xf32, #tpu.memory_space<vmem>>, vector<1x32xf32>
    %4 = vector.broadcast %3 : vector<1x32xf32> to vector<800x32xf32>
    %5 = arith.addf %2, %4 : vector<800x32xf32>
    %cst_5 = arith.constant 0.000000e+00 : f32
    %6 = vector.broadcast %cst_5 : f32 to vector<800x32xf32>
    %7 = arith.maximumf %5, %6 : vector<800x32xf32>
    %8 = arith.truncf %7 : vector<800x32xf32> to vector<800x32xbf16>
    %c0_6 = arith.constant 0 : index
    %c0_7 = arith.constant 0 : index
    %9 = vector.load %arg4[%c0_6, %c0_7] : memref<800x32xbf16, #tpu.memory_space<vmem>>, vector<800x32xbf16>
    tpu.vector_store %arg4[%c0_6, %c0_7], %8 {strides = array<i32>} : memref<800x32xbf16, #tpu.memory_space<vmem>>, vector<800x32xbf16>,
    return
  }
  func.func @transform_0(%arg0: i32) -> (i32, i32) {
    %c0_i32 = arith.constant 0 : i32
    %c0_i32_0 = arith.constant 0 : i32
    return %arg0, %c0_i32 : i32, i32
  }
  func.func @transform_1(%arg0: i32) -> (i32, i32) {
    %c0_i32 = arith.constant 0 : i32
    %c0_i32_0 = arith.constant 0 : i32
    %c0_i32_1 = arith.constant 0 : i32
    return %c0_i32, %c0_i32_0 : i32, i32
  }
  func.func @transform_2(%arg0: i32) -> (i32, i32) {
    %c0_i32 = arith.constant 0 : i32
    %c0_i32_0 = arith.constant 0 : i32
    %c0_i32_1 = arith.constant 0 : i32
    return %c0_i32, %c0_i32_0 : i32, i32
  }
  func.func @transform_3(%arg0: i32) -> (i32, i32) {
    %c0_i32 = arith.constant 0 : i32
    %c0_i32_0 = arith.constant 0 : i32
    return %arg0, %c0_i32 : i32, i32
  }
}

module attributes {stable_mosaic.version = 11 : i64} {
  func.func @_mm_bias_act_kernel(%arg0: i32, %arg1: memref<128x512xbf16, #tpu.memory_space<vmem>>, %arg2: memref<512x64xbf16, #tpu.memory_space<vmem>>, %arg3: memref<1x64xf32, #tpu.memory_space<vmem>>, %arg4: memref<128x64xbf16, #tpu.memory_space<vmem>>) attributes {dimension_semantics = [#tpu.dimension_semantics<parallel>], iteration_bounds = array<i64: 1>, scalar_prefetch = 0 : i64, scratch_operands = 0 : i64, tpu.core_type = #tpu.core_type<tc>, window_params = [{transform_indices = @transform_0, window_bounds = array<i64: 128, 512>}, {pipeline_mode = #tpu.pipeline_mode<synchronous>, transform_indices = @transform_1, window_bounds = array<i64: 512, 64>}, {pipeline_mode = #tpu.pipeline_mode<synchronous>, transform_indices = @transform_2, window_bounds = array<i64: 1, 64>}, {transform_indices = @transform_3, window_bounds = array<i64: 128, 64>}]} {
    %c0 = arith.constant 0 : index
    %c0_0 = arith.constant 0 : index
    %0 = vector.load %arg1[%c0, %c0_0] : memref<128x512xbf16, #tpu.memory_space<vmem>>, vector<128x512xbf16>
    %c0_1 = arith.constant 0 : index
    %c0_2 = arith.constant 0 : index
    %1 = vector.load %arg2[%c0_1, %c0_2] : memref<512x64xbf16, #tpu.memory_space<vmem>>, vector<512x64xbf16>
    %cst = arith.constant dense<0.000000e+00> : vector<128x64xf32>
    %2 = tpu.matmul %0, %1, %cst {dimension_numbers = #tpu.dot_dimension_numbers<[1], [0], [0], [1], [0, 0, 1, 1], [], []>} : vector<128x512xbf16>, vector<512x64xbf16>, vector<128x64xf32> -> vector<128x64xf32>
    %c0_3 = arith.constant 0 : index
    %c0_4 = arith.constant 0 : index
    %3 = vector.load %arg3[%c0_3, %c0_4] : memref<1x64xf32, #tpu.memory_space<vmem>>, vector<1x64xf32>
    %4 = vector.broadcast %3 : vector<1x64xf32> to vector<128x64xf32>
    %5 = arith.addf %2, %4 : vector<128x64xf32>
    %cst_5 = arith.constant 0.000000e+00 : f32
    %6 = vector.broadcast %cst_5 : f32 to vector<128x64xf32>
    %7 = arith.maximumf %5, %6 : vector<128x64xf32>
    %8 = arith.truncf %7 : vector<128x64xf32> to vector<128x64xbf16>
    %c0_6 = arith.constant 0 : index
    %c0_7 = arith.constant 0 : index
    %9 = vector.load %arg4[%c0_6, %c0_7] : memref<128x64xbf16, #tpu.memory_space<vmem>>, vector<128x64xbf16>
    tpu.vector_store %arg4[%c0_6, %c0_7], %8 {strides = array<i32>} : memref<128x64xbf16, #tpu.memory_space<vmem>>, vector<128x64xbf16>,
    return
  }
  func.func @transform_0(%arg0: i32) -> (i32, i32) {
    %c0_i32 = arith.constant 0 : i32
    %c0_i32_0 = arith.constant 0 : i32
    return %arg0, %c0_i32 : i32, i32
  }
  func.func @transform_1(%arg0: i32) -> (i32, i32) {
    %c0_i32 = arith.constant 0 : i32
    %c0_i32_0 = arith.constant 0 : i32
    %c0_i32_1 = arith.constant 0 : i32
    return %c0_i32, %c0_i32_0 : i32, i32
  }
  func.func @transform_2(%arg0: i32) -> (i32, i32) {
    %c0_i32 = arith.constant 0 : i32
    %c0_i32_0 = arith.constant 0 : i32
    %c0_i32_1 = arith.constant 0 : i32
    return %c0_i32, %c0_i32_0 : i32, i32
  }
  func.func @transform_3(%arg0: i32) -> (i32, i32) {
    %c0_i32 = arith.constant 0 : i32
    %c0_i32_0 = arith.constant 0 : i32
    return %arg0, %c0_i32 : i32, i32
  }
}

module attributes {stable_mosaic.version = 11 : i64} {
  func.func @_lin1_gi_kernel(%arg0: i32, %arg1: memref<8x128xbf16, #tpu.memory_space<vmem>>, %arg2: memref<128x512xbf16, #tpu.memory_space<vmem>>, %arg3: memref<1x512xf32, #tpu.memory_space<vmem>>, %arg4: memref<512x1536xbf16, #tpu.memory_space<vmem>>, %arg5: memref<1x1536xf32, #tpu.memory_space<vmem>>, %arg6: memref<8x1536xbf16, #tpu.memory_space<vmem>>) attributes {dimension_semantics = [#tpu.dimension_semantics<parallel>], iteration_bounds = array<i64: 1>, scalar_prefetch = 0 : i64, scratch_operands = 0 : i64, tpu.core_type = #tpu.core_type<tc>, window_params = [{transform_indices = @transform_0, window_bounds = array<i64: 8, 128>}, {pipeline_mode = #tpu.pipeline_mode<synchronous>, transform_indices = @transform_1, window_bounds = array<i64: 128, 512>}, {pipeline_mode = #tpu.pipeline_mode<synchronous>, transform_indices = @transform_2, window_bounds = array<i64: 1, 512>}, {pipeline_mode = #tpu.pipeline_mode<synchronous>, transform_indices = @transform_3, window_bounds = array<i64: 512, 1536>}, {pipeline_mode = #tpu.pipeline_mode<synchronous>, transform_indices = @transform_4, window_bounds = array<i64: 1, 1536>}, {transform_indices = @transform_5, window_bounds = array<i64: 8, 1536>}]} {
    %c0 = arith.constant 0 : index
    %c0_0 = arith.constant 0 : index
    %0 = vector.load %arg1[%c0, %c0_0] : memref<8x128xbf16, #tpu.memory_space<vmem>>, vector<8x128xbf16>
    %c0_1 = arith.constant 0 : index
    %c0_2 = arith.constant 0 : index
    %1 = vector.load %arg2[%c0_1, %c0_2] : memref<128x512xbf16, #tpu.memory_space<vmem>>, vector<128x512xbf16>
    %cst = arith.constant dense<0.000000e+00> : vector<8x512xf32>
    %2 = tpu.matmul %0, %1, %cst {dimension_numbers = #tpu.dot_dimension_numbers<[1], [0], [0], [1], [0, 0, 1, 1], [], []>} : vector<8x128xbf16>, vector<128x512xbf16>, vector<8x512xf32> -> vector<8x512xf32>
    %c0_3 = arith.constant 0 : index
    %c0_4 = arith.constant 0 : index
    %3 = vector.load %arg3[%c0_3, %c0_4] : memref<1x512xf32, #tpu.memory_space<vmem>>, vector<1x512xf32>
    %4 = vector.broadcast %3 : vector<1x512xf32> to vector<8x512xf32>
    %5 = arith.addf %2, %4 : vector<8x512xf32>
    %cst_5 = arith.constant 0.000000e+00 : f32
    %6 = vector.broadcast %cst_5 : f32 to vector<8x512xf32>
    %7 = arith.maximumf %5, %6 : vector<8x512xf32>
    %8 = arith.truncf %7 : vector<8x512xf32> to vector<8x512xbf16>
    %c0_6 = arith.constant 0 : index
    %c0_7 = arith.constant 0 : index
    %9 = vector.load %arg4[%c0_6, %c0_7] : memref<512x1536xbf16, #tpu.memory_space<vmem>>, vector<512x1536xbf16>
    %cst_8 = arith.constant dense<0.000000e+00> : vector<8x1536xf32>
    %10 = tpu.matmul %8, %9, %cst_8 {dimension_numbers = #tpu.dot_dimension_numbers<[1], [0], [0], [1], [0, 0, 1, 1], [], []>} : vector<8x512xbf16>, vector<512x1536xbf16>, vector<8x1536xf32> -> vector<8x1536xf32>
    %c0_9 = arith.constant 0 : index
    %c0_10 = arith.constant 0 : index
    %11 = vector.load %arg5[%c0_9, %c0_10] : memref<1x1536xf32, #tpu.memory_space<vmem>>, vector<1x1536xf32>
    %12 = vector.broadcast %11 : vector<1x1536xf32> to vector<8x1536xf32>
    %13 = arith.addf %10, %12 : vector<8x1536xf32>
    %14 = arith.truncf %13 : vector<8x1536xf32> to vector<8x1536xbf16>
    %c0_11 = arith.constant 0 : index
    %c0_12 = arith.constant 0 : index
    %15 = vector.load %arg6[%c0_11, %c0_12] : memref<8x1536xbf16, #tpu.memory_space<vmem>>, vector<8x1536xbf16>
    tpu.vector_store %arg6[%c0_11, %c0_12], %14 {strides = array<i32>} : memref<8x1536xbf16, #tpu.memory_space<vmem>>, vector<8x1536xbf16>,
    return
  }
  func.func @transform_0(%arg0: i32) -> (i32, i32) {
    %c0_i32 = arith.constant 0 : i32
    %c0_i32_0 = arith.constant 0 : i32
    return %arg0, %c0_i32 : i32, i32
  }
  func.func @transform_1(%arg0: i32) -> (i32, i32) {
    %c0_i32 = arith.constant 0 : i32
    %c0_i32_0 = arith.constant 0 : i32
    %c0_i32_1 = arith.constant 0 : i32
    return %c0_i32, %c0_i32_0 : i32, i32
  }
  func.func @transform_2(%arg0: i32) -> (i32, i32) {
    %c0_i32 = arith.constant 0 : i32
    %c0_i32_0 = arith.constant 0 : i32
    %c0_i32_1 = arith.constant 0 : i32
    return %c0_i32, %c0_i32_0 : i32, i32
  }
  func.func @transform_3(%arg0: i32) -> (i32, i32) {
    %c0_i32 = arith.constant 0 : i32
    %c0_i32_0 = arith.constant 0 : i32
    %c0_i32_1 = arith.constant 0 : i32
    return %c0_i32, %c0_i32_0 : i32, i32
  }
  func.func @transform_4(%arg0: i32) -> (i32, i32) {
    %c0_i32 = arith.constant 0 : i32
    %c0_i32_0 = arith.constant 0 : i32
    %c0_i32_1 = arith.constant 0 : i32
    return %c0_i32, %c0_i32_0 : i32, i32
  }
  func.func @transform_5(%arg0: i32) -> (i32, i32) {
    %c0_i32 = arith.constant 0 : i32
    %c0_i32_0 = arith.constant 0 : i32
    return %arg0, %c0_i32 : i32, i32
  }
}

module attributes {stable_mosaic.version = 11 : i64} {
  func.func @_mm_bias_act_kernel(%arg0: i32, %arg1: memref<32x576xbf16, #tpu.memory_space<vmem>>, %arg2: memref<576x32xbf16, #tpu.memory_space<vmem>>, %arg3: memref<1x32xf32, #tpu.memory_space<vmem>>, %arg4: memref<32x8xbf16, #tpu.memory_space<vmem>>, %arg5: memref<1x8xf32, #tpu.memory_space<vmem>>, %arg6: memref<32x32xbf16, #tpu.memory_space<vmem>>, %arg7: memref<32x8xf32, #tpu.memory_space<vmem>>) attributes {dimension_semantics = [#tpu.dimension_semantics<parallel>], iteration_bounds = array<i64: 1>, scalar_prefetch = 0 : i64, scratch_operands = 0 : i64, tpu.core_type = #tpu.core_type<tc>, window_params = [{transform_indices = @transform_0, window_bounds = array<i64: 32, 576>}, {pipeline_mode = #tpu.pipeline_mode<synchronous>, transform_indices = @transform_1, window_bounds = array<i64: 576, 32>}, {pipeline_mode = #tpu.pipeline_mode<synchronous>, transform_indices = @transform_2, window_bounds = array<i64: 1, 32>}, {pipeline_mode = #tpu.pipeline_mode<synchronous>, transform_indices = @transform_3, window_bounds = array<i64: 32, 8>}, {pipeline_mode = #tpu.pipeline_mode<synchronous>, transform_indices = @transform_4, window_bounds = array<i64: 1, 8>}, {transform_indices = @transform_5, window_bounds = array<i64: 32, 32>}, {transform_indices = @transform_6, window_bounds = array<i64: 32, 8>}]} {
    %c0 = arith.constant 0 : index
    %c0_0 = arith.constant 0 : index
    %0 = vector.load %arg1[%c0, %c0_0] : memref<32x576xbf16, #tpu.memory_space<vmem>>, vector<32x576xbf16>
    %c0_1 = arith.constant 0 : index
    %c0_2 = arith.constant 0 : index
    %1 = vector.load %arg2[%c0_1, %c0_2] : memref<576x32xbf16, #tpu.memory_space<vmem>>, vector<576x32xbf16>
    %cst = arith.constant dense<0.000000e+00> : vector<32x32xf32>
    %2 = tpu.matmul %0, %1, %cst {dimension_numbers = #tpu.dot_dimension_numbers<[1], [0], [0], [1], [0, 0, 1, 1], [], []>} : vector<32x576xbf16>, vector<576x32xbf16>, vector<32x32xf32> -> vector<32x32xf32>
    %c0_3 = arith.constant 0 : index
    %c0_4 = arith.constant 0 : index
    %3 = vector.load %arg3[%c0_3, %c0_4] : memref<1x32xf32, #tpu.memory_space<vmem>>, vector<1x32xf32>
    %4 = vector.broadcast %3 : vector<1x32xf32> to vector<32x32xf32>
    %5 = arith.addf %2, %4 : vector<32x32xf32>
    %cst_5 = arith.constant 0.000000e+00 : f32
    %6 = vector.broadcast %cst_5 : f32 to vector<32x32xf32>
    %7 = arith.maximumf %5, %6 : vector<32x32xf32>
    %8 = arith.truncf %7 : vector<32x32xf32> to vector<32x32xbf16>
    %c0_6 = arith.constant 0 : index
    %c0_7 = arith.constant 0 : index
    %9 = vector.load %arg6[%c0_6, %c0_7] : memref<32x32xbf16, #tpu.memory_space<vmem>>, vector<32x32xbf16>
    tpu.vector_store %arg6[%c0_6, %c0_7], %8 {strides = array<i32>} : memref<32x32xbf16, #tpu.memory_space<vmem>>, vector<32x32xbf16>,
    %10 = arith.truncf %7 : vector<32x32xf32> to vector<32x32xbf16>
    %c0_8 = arith.constant 0 : index
    %c0_9 = arith.constant 0 : index
    %11 = vector.load %arg4[%c0_8, %c0_9] : memref<32x8xbf16, #tpu.memory_space<vmem>>, vector<32x8xbf16>
    %cst_10 = arith.constant dense<0.000000e+00> : vector<32x8xf32>
    %12 = tpu.matmul %10, %11, %cst_10 {dimension_numbers = #tpu.dot_dimension_numbers<[1], [0], [0], [1], [0, 0, 1, 1], [], []>} : vector<32x32xbf16>, vector<32x8xbf16>, vector<32x8xf32> -> vector<32x8xf32>
    %c0_11 = arith.constant 0 : index
    %c0_12 = arith.constant 0 : index
    %13 = vector.load %arg5[%c0_11, %c0_12] : memref<1x8xf32, #tpu.memory_space<vmem>>, vector<1x8xf32>
    %14 = vector.broadcast %13 : vector<1x8xf32> to vector<32x8xf32>
    %15 = arith.addf %12, %14 : vector<32x8xf32>
    %c0_13 = arith.constant 0 : index
    %c0_14 = arith.constant 0 : index
    %16 = vector.load %arg7[%c0_13, %c0_14] : memref<32x8xf32, #tpu.memory_space<vmem>>, vector<32x8xf32>
    tpu.vector_store %arg7[%c0_13, %c0_14], %15 {strides = array<i32>} : memref<32x8xf32, #tpu.memory_space<vmem>>, vector<32x8xf32>,
    return
  }
  func.func @transform_0(%arg0: i32) -> (i32, i32) {
    %c0_i32 = arith.constant 0 : i32
    %c0_i32_0 = arith.constant 0 : i32
    return %arg0, %c0_i32 : i32, i32
  }
  func.func @transform_1(%arg0: i32) -> (i32, i32) {
    %c0_i32 = arith.constant 0 : i32
    %c0_i32_0 = arith.constant 0 : i32
    %c0_i32_1 = arith.constant 0 : i32
    return %c0_i32, %c0_i32_0 : i32, i32
  }
  func.func @transform_2(%arg0: i32) -> (i32, i32) {
    %c0_i32 = arith.constant 0 : i32
    %c0_i32_0 = arith.constant 0 : i32
    %c0_i32_1 = arith.constant 0 : i32
    return %c0_i32, %c0_i32_0 : i32, i32
  }
  func.func @transform_3(%arg0: i32) -> (i32, i32) {
    %c0_i32 = arith.constant 0 : i32
    %c0_i32_0 = arith.constant 0 : i32
    %c0_i32_1 = arith.constant 0 : i32
    return %c0_i32, %c0_i32_0 : i32, i32
  }
  func.func @transform_4(%arg0: i32) -> (i32, i32) {
    %c0_i32 = arith.constant 0 : i32
    %c0_i32_0 = arith.constant 0 : i32
    %c0_i32_1 = arith.constant 0 : i32
    return %c0_i32, %c0_i32_0 : i32, i32
  }
  func.func @transform_5(%arg0: i32) -> (i32, i32) {
    %c0_i32 = arith.constant 0 : i32
    %c0_i32_0 = arith.constant 0 : i32
    return %arg0, %c0_i32 : i32, i32
  }
  func.func @transform_6(%arg0: i32) -> (i32, i32) {
    %c0_i32 = arith.constant 0 : i32
    %c0_i32_0 = arith.constant 0 : i32
    return %arg0, %c0_i32 : i32, i32
  }
}

module attributes {stable_mosaic.version = 11 : i64} {
  func.func @_gru_seq_kernel(%arg0: i32, %arg1: memref<2x512xf32, #tpu.memory_space<vmem>>, %arg2: memref<1x2x1536xbf16, #tpu.memory_space<vmem>>, %arg3: memref<1x2x1xf32, #tpu.memory_space<vmem>>, %arg4: memref<512x1536xbf16, #tpu.memory_space<vmem>>, %arg5: memref<1x1536xf32, #tpu.memory_space<vmem>>, %arg6: memref<1x2x512xf32, #tpu.memory_space<vmem>>, %arg7: memref<2x512xf32, #tpu.memory_space<vmem>>) attributes {dimension_semantics = [#tpu.dimension_semantics<arbitrary>], iteration_bounds = array<i64: 4>, scalar_prefetch = 0 : i64, scratch_operands = 1 : i64, tpu.core_type = #tpu.core_type<tc>, window_params = [{pipeline_mode = #tpu.pipeline_mode<synchronous>, transform_indices = @transform_0, window_bounds = array<i64: 2, 512>}, {transform_indices = @transform_1, window_bounds = array<i64: 1, 2, 1536>}, {transform_indices = @transform_2, window_bounds = array<i64: 1, 2, 1>}, {pipeline_mode = #tpu.pipeline_mode<synchronous>, transform_indices = @transform_3, window_bounds = array<i64: 512, 1536>}, {pipeline_mode = #tpu.pipeline_mode<synchronous>, transform_indices = @transform_4, window_bounds = array<i64: 1, 1536>}, {transform_indices = @transform_5, window_bounds = array<i64: 1, 2, 512>}]} {
    %c0_i32 = arith.constant 0 : i32
    %0 = arith.cmpi eq, %arg0, %c0_i32 : i32
    %1 = arith.extui %0 : i1 to i32
    %c0_i32_0 = arith.constant 0 : i32
    %2 = arith.cmpi ne, %1, %c0_i32_0 : i32
    scf.if %2 {
      %c0_20 = arith.constant 0 : index
      %c0_21 = arith.constant 0 : index
      %47 = vector.load %arg1[%c0_20, %c0_21] : memref<2x512xf32, #tpu.memory_space<vmem>>, vector<2x512xf32>
      %c0_22 = arith.constant 0 : index
      %c0_23 = arith.constant 0 : index
      %48 = vector.load %arg7[%c0_22, %c0_23] : memref<2x512xf32, #tpu.memory_space<vmem>>, vector<2x512xf32>
      tpu.vector_store %arg7[%c0_22, %c0_23], %47 {strides = array<i32>} : memref<2x512xf32, #tpu.memory_space<vmem>>, vector<2x512xf32>,
    } else {
    }
    %c0 = arith.constant 0 : index
    %c0_1 = arith.constant 0 : index
    %3 = vector.load %arg7[%c0, %c0_1] : memref<2x512xf32, #tpu.memory_space<vmem>>, vector<2x512xf32>
    %c0_2 = arith.constant 0 : index
    %c0_3 = arith.constant 0 : index
    %c0_4 = arith.constant 0 : index
    %4 = vector.load %arg3[%c0_2, %c0_3, %c0_4] : memref<1x2x1xf32, #tpu.memory_space<vmem>>, vector<1x2x1xf32>
    %5 = vector.shape_cast %4 : vector<1x2x1xf32> to vector<2x1xf32>
    %6 = vector.broadcast %5 : vector<2x1xf32> to vector<2x512xf32>
    %7 = arith.mulf %3, %6 : vector<2x512xf32>
    %c0_5 = arith.constant 0 : index
    %c0_6 = arith.constant 0 : index
    %c0_7 = arith.constant 0 : index
    %8 = vector.load %arg2[%c0_5, %c0_6, %c0_7] : memref<1x2x1536xbf16, #tpu.memory_space<vmem>>, vector<1x2x1536xbf16>
    %9 = vector.shape_cast %8 : vector<1x2x1536xbf16> to vector<2x1536xbf16>
    %10 = arith.extf %9 : vector<2x1536xbf16> to vector<2x1536xf32>
    %11 = arith.truncf %7 : vector<2x512xf32> to vector<2x512xbf16>
    %c0_8 = arith.constant 0 : index
    %c0_9 = arith.constant 0 : index
    %12 = vector.load %arg4[%c0_8, %c0_9] : memref<512x1536xbf16, #tpu.memory_space<vmem>>, vector<512x1536xbf16>
    %cst = arith.constant dense<0.000000e+00> : vector<2x1536xf32>
    %13 = tpu.matmul %11, %12, %cst {dimension_numbers = #tpu.dot_dimension_numbers<[1], [0], [0], [1], [0, 0, 1, 1], [], []>} : vector<2x512xbf16>, vector<512x1536xbf16>, vector<2x1536xf32> -> vector<2x1536xf32>
    %c0_10 = arith.constant 0 : index
    %c0_11 = arith.constant 0 : index
    %14 = vector.load %arg5[%c0_10, %c0_11] : memref<1x1536xf32, #tpu.memory_space<vmem>>, vector<1x1536xf32>
    %15 = vector.broadcast %14 : vector<1x1536xf32> to vector<2x1536xf32>
    %16 = arith.addf %13, %15 : vector<2x1536xf32>
    %17 = vector.extract_strided_slice %10 {offsets = [0, 0], sizes = [2, 512], strides = [1, 1]} : vector<2x1536xf32> to vector<2x512xf32>
    %18 = vector.extract_strided_slice %16 {offsets = [0, 0], sizes = [2, 512], strides = [1, 1]} : vector<2x1536xf32> to vector<2x512xf32>
    %19 = arith.addf %17, %18 : vector<2x512xf32>
    %20 = arith.negf %19 : vector<2x512xf32>
    %21 = math.exp %20 : vector<2x512xf32>
    %cst_12 = arith.constant 1.000000e+00 : f32
    %22 = vector.broadcast %cst_12 : f32 to vector<2x512xf32>
    %23 = arith.addf %22, %21 : vector<2x512xf32>
    %24 = arith.divf %22, %23 : vector<2x512xf32>
    %25 = vector.extract_strided_slice %10 {offsets = [0, 512], sizes = [2, 512], strides = [1, 1]} : vector<2x1536xf32> to vector<2x512xf32>
    %26 = vector.extract_strided_slice %16 {offsets = [0, 512], sizes = [2, 512], strides = [1, 1]} : vector<2x1536xf32> to vector<2x512xf32>
    %27 = arith.addf %25, %26 : vector<2x512xf32>
    %28 = arith.negf %27 : vector<2x512xf32>
    %29 = math.exp %28 : vector<2x512xf32>
    %cst_13 = arith.constant 1.000000e+00 : f32
    %30 = vector.broadcast %cst_13 : f32 to vector<2x512xf32>
    %31 = arith.addf %30, %29 : vector<2x512xf32>
    %32 = arith.divf %30, %31 : vector<2x512xf32>
    %33 = vector.extract_strided_slice %10 {offsets = [0, 1024], sizes = [2, 512], strides = [1, 1]} : vector<2x1536xf32> to vector<2x512xf32>
    %34 = vector.extract_strided_slice %16 {offsets = [0, 1024], sizes = [2, 512], strides = [1, 1]} : vector<2x1536xf32> to vector<2x512xf32>
    %35 = arith.mulf %24, %34 : vector<2x512xf32>
    %36 = arith.addf %33, %35 : vector<2x512xf32>
    %37 = math.tanh %36 : vector<2x512xf32>
    %cst_14 = arith.constant 1.000000e+00 : f32
    %38 = vector.broadcast %cst_14 : f32 to vector<2x512xf32>
    %39 = arith.subf %38, %32 : vector<2x512xf32>
    %40 = arith.mulf %39, %37 : vector<2x512xf32>
    %41 = arith.mulf %32, %7 : vector<2x512xf32>
    %42 = arith.addf %40, %41 : vector<2x512xf32>
    %c0_15 = arith.constant 0 : index
    %c0_16 = arith.constant 0 : index
    %43 = vector.load %arg7[%c0_15, %c0_16] : memref<2x512xf32, #tpu.memory_space<vmem>>, vector<2x512xf32>
    tpu.vector_store %arg7[%c0_15, %c0_16], %42 {strides = array<i32>} : memref<2x512xf32, #tpu.memory_space<vmem>>, vector<2x512xf32>,
    %c0_17 = arith.constant 0 : index
    %c0_18 = arith.constant 0 : index
    %c0_19 = arith.constant 0 : index
    %44 = vector.load %arg6[%c0_17, %c0_18, %c0_19] : memref<1x2x512xf32, #tpu.memory_space<vmem>>, vector<1x2x512xf32>
    %45 = vector.shape_cast %44 : vector<1x2x512xf32> to vector<2x512xf32>
    %46 = vector.shape_cast %42 : vector<2x512xf32> to vector<1x2x512xf32>
    tpu.vector_store %arg6[%c0_17, %c0_18, %c0_19], %46 {strides = array<i32>} : memref<1x2x512xf32, #tpu.memory_space<vmem>>, vector<1x2x512xf32>,
    return
  }
  func.func @transform_0(%arg0: i32) -> (i32, i32) {
    %c0_i32 = arith.constant 0 : i32
    %c0_i32_0 = arith.constant 0 : i32
    %c0_i32_1 = arith.constant 0 : i32
    return %c0_i32, %c0_i32_0 : i32, i32
  }
  func.func @transform_1(%arg0: i32) -> (i32, i32, i32) {
    %c0_i32 = arith.constant 0 : i32
    %c0_i32_0 = arith.constant 0 : i32
    %c0_i32_1 = arith.constant 0 : i32
    return %arg0, %c0_i32, %c0_i32_0 : i32, i32, i32
  }
  func.func @transform_2(%arg0: i32) -> (i32, i32, i32) {
    %c0_i32 = arith.constant 0 : i32
    %c0_i32_0 = arith.constant 0 : i32
    %c0_i32_1 = arith.constant 0 : i32
    return %arg0, %c0_i32, %c0_i32_0 : i32, i32, i32
  }
  func.func @transform_3(%arg0: i32) -> (i32, i32) {
    %c0_i32 = arith.constant 0 : i32
    %c0_i32_0 = arith.constant 0 : i32
    %c0_i32_1 = arith.constant 0 : i32
    return %c0_i32, %c0_i32_0 : i32, i32
  }
  func.func @transform_4(%arg0: i32) -> (i32, i32) {
    %c0_i32 = arith.constant 0 : i32
    %c0_i32_0 = arith.constant 0 : i32
    %c0_i32_1 = arith.constant 0 : i32
    return %c0_i32, %c0_i32_0 : i32, i32
  }
  func.func @transform_5(%arg0: i32) -> (i32, i32, i32) {
    %c0_i32 = arith.constant 0 : i32
    %c0_i32_0 = arith.constant 0 : i32
    %c0_i32_1 = arith.constant 0 : i32
    return %arg0, %c0_i32, %c0_i32_0 : i32, i32, i32
  }
}

</mosaic_0001>

<bundles_post_ra>
// kernel: cnn_depth_policy_forward.5
= control target key start
LH: loop header
LB: loop body
LE: loop exit
PB: predicated region body
PF: predicated region fallthrough
CT: control target
= control target key end

     0   :  { %v2303_v0 = vmov 0   ;;  %vm1683_vm0 = vcmask 257024   ;;  %s3220_s1 = inlined_call_operand.vmem [shape: bf16[256,32], index: 1, kind: input, shape index: {}]   ;;  %s3221_s0 = inlined_call_operand.vmem [shape: bf16[800,256], index: 0, kind: input, shape index: {}]   ;;  %s3222_s2 = inlined_call_operand.vmem [shape: f32[1,32], index: 2, kind: input, shape index: {}]   ;;  %s3223_s3 = inlined_call_operand.vmem [shape: bf16[800,32], index: 3, kind: output, shape index: {}]  }
   0x1   :  { %750 = vmatprep.subr.bf16.mxu0 %v2303_v0  ;;  %2105 = vmatprep.subr.bf16.mxu1 %v2303_v0  ;;  %v2138_v1 = vld [vmem:[%s3220_s1 + $0x38] sm:$0xff]   ;;  %v2139_v2 = vld [vmem:[%s3220_s1 + $0x30] sm:$0xff]   ;;  %v2140_v3 = vld [vmem:[%s3220_s1 + $0x28] sm:$0xff]  }
   0x2   :  { %751 = vmatpush1.bf16.msra.mxu0 %v2138_v1  ;;  %2121 = vmatpush1.bf16.msra.mxu1 %v2138_v1  ;;  %v2141_v4 = vld [vmem:[%s3220_s1 + $0x20] sm:$0xff]   ;;  %v2142_v5 = vld [vmem:[%s3220_s1 + $0x18] sm:$0xff]   ;;  %v2143_v7 = vld [vmem:[%s3220_s1 + $0x10] sm:$0xff]  }
   0x3   :  { %752 = vmatprep.subr.bf16.mxu0 %v2303_v0  ;;  %2106 = vmatprep.subr.bf16.mxu1 %v2303_v0  ;;  %v2156_v6 = vld [vmem:[%s3221_s0 + $0x4] ss:$8 sps:$4 sm:$0xff]   ;;  %v2159_v8 = vld [vmem:[%s3221_s0 + $0x194] ss:$8 sps:$4 sm:$0xff]   ;;  %v2154_v19 = vld [vmem:[%s3221_s0] ss:$8 sps:$4 sm:$0xff]  }
   0x4   :  { %782 = vmatprep.mubr.bf16.mxu0 %v2156_v6  ;;  %982 = vmatprep.mubr.bf16.mxu1 %v2159_v8  ;;  %v2144_v9 = vld [vmem:[%s3220_s1 + $0x8] sm:$0xff]   ;;  %v2145_v10 = vld [vmem:[%s3220_s1] sm:$0xff]   ;;  %v2146_v11 = vld [vmem:[%s3220_s1 + $0x78] sm:$0xff]  }
   0x5   :  { %v2147_v12 = vld [vmem:[%s3220_s1 + $0x70] sm:$0xff]   ;;  %v2148_v13 = vld [vmem:[%s3220_s1 + $0x68] sm:$0xff]   ;;  %v2149_v14 = vld [vmem:[%s3220_s1 + $0x60] sm:$0xff]  }
   0x6   :  { %753 = vmatpush1.bf16.msra.mxu0 %v2139_v2  ;;  %2122 = vmatpush1.bf16.msra.mxu1 %v2139_v2  ;;  %v2150_v15 = vld [vmem:[%s3220_s1 + $0x58] sm:$0xff]   ;;  %v2151_v16 = vld [vmem:[%s3220_s1 + $0x50] sm:$0xff]   ;;  %v2152_v17 = vld [vmem:[%s3220_s1 + $0x48] sm:$0xff]  }
   0x7   :  { %754 = vmatprep.subr.bf16.mxu0 %v2303_v0  ;;  %2107 = vmatprep.subr.bf16.mxu1 %v2303_v0  ;;  %v2153_v18 = vld [vmem:[%s3220_s1 + $0x40] sm:$0xff]   ;;  %v2157_v20 = vld [vmem:[%s3221_s0 + $0x190] ss:$8 sps:$4 sm:$0xff]   ;;  %v2160_v21 = vld [vmem:[%s3221_s0 + $0x14] ss:$8 sps:$4 sm:$0xff]  }
   0x8   :  { %v2162_v22 = vld [vmem:[%s3221_s0 + $0x1a4] ss:$8 sps:$4 sm:$0xff]   ;;  %v2164_v23 = vld [vmem:[%s3221_s0 + $0x10] ss:$8 sps:$4 sm:$0xff]   ;;  %v2165_v24 = vld [vmem:[%s3221_s0 + $0x1a0] ss:$8 sps:$4 sm:$0xff]  }
   0x9   :  { %v2166_v25 = vld [vmem:[%s3221_s0 + $0x24] ss:$8 sps:$4 sm:$0xff]   ;;  %v2168_v26 = vld [vmem:[%s3221_s0 + $0x1b4] ss:$8 sps:$4 sm:$0xff]   ;;  %v2170_v27 = vld [vmem:[%s3221_s0 + $0x20] ss:$8 sps:$4 sm:$0xff]  }
   0xa   :  { %755 = vmatpush1.bf16.msra.mxu0 %v2140_v3  ;;  %2123 = vmatpush1.bf16.msra.mxu1 %v2140_v3  ;;  %v2171_v28 = vld [vmem:[%s3221_s0 + $0x1b0] ss:$8 sps:$4 sm:$0xff]   ;;  %v2172_v29 = vld [vmem:[%s3221_s0 + $0x34] ss:$8 sps:$4 sm:$0xff]   ;;  %v2174_v30 = vld [vmem:[%s3221_s0 + $0x1c4] ss:$8 sps:$4 sm:$0xff]  }
   0xb   :  { %756 = vmatprep.subr.bf16.mxu0 %v2303_v0  ;;  %2108 = vmatprep.subr.bf16.mxu1 %v2303_v0  ;;  %v2176_v31 = vld [vmem:[%s3221_s0 + $0x30] ss:$8 sps:$4 sm:$0xff]   ;;  %v2177_v32 = vld [vmem:[%s3221_s0 + $0x1c0] ss:$8 sps:$4 sm:$0xff]   ;;  %v2178_v33 = vld [vmem:[%s3221_s0 + $0x44] ss:$8 sps:$4 sm:$0xff]  }
   0xc   :  { %v2180_v34 = vld [vmem:[%s3221_s0 + $0x1d4] ss:$8 sps:$4 sm:$0xff]   ;;  %v2182_v35 = vld [vmem:[%s3221_s0 + $0x40] ss:$8 sps:$4 sm:$0xff]   ;;  %v2183_v36 = vld [vmem:[%s3221_s0 + $0x1d0] ss:$8 sps:$4 sm:$0xff]  }
   0xd   :  { %v2184_v37 = vld [vmem:[%s3221_s0 + $0x54] ss:$8 sps:$4 sm:$0xff]   ;;  %v2186_v38 = vld [vmem:[%s3221_s0 + $0x1e4] ss:$8 sps:$4 sm:$0xff]   ;;  %v2188_v39 = vld [vmem:[%s3221_s0 + $0x50] ss:$8 sps:$4 sm:$0xff]  }
   0xe   :  { %757 = vmatpush1.bf16.msra.mxu0 %v2141_v4  ;;  %2124 = vmatpush1.bf16.msra.mxu1 %v2141_v4  ;;  %v2189_v40 = vld [vmem:[%s3221_s0 + $0x1e0] ss:$8 sps:$4 sm:$0xff]   ;;  %v2190_v41 = vld [vmem:[%s3221_s0 + $0x64] ss:$8 sps:$4 sm:$0xff]   ;;  %v2192_v42 = vld [vmem:[%s3221_s0 + $0x1f4] ss:$8 sps:$4 sm:$0xff]  }
   0xf   :  { %758 = vmatprep.subr.bf16.mxu0 %v2303_v0  ;;  %2109 = vmatprep.subr.bf16.mxu1 %v2303_v0  ;;  %v2194_v43 = vld [vmem:[%s3221_s0 + $0x60] ss:$8 sps:$4 sm:$0xff]   ;;  %v2195_v44 = vld [vmem:[%s3221_s0 + $0x1f0] ss:$8 sps:$4 sm:$0xff]   ;;  %v2196_v45 = vld [vmem:[%s3221_s0 + $0x74] ss:$8 sps:$4 sm:$0xff]  }
  0x10   :  { %v2198_v46 = vld [vmem:[%s3221_s0 + $0x204] ss:$8 sps:$4 sm:$0xff]   ;;  %v2200_v47 = vld [vmem:[%s3221_s0 + $0x70] ss:$8 sps:$4 sm:$0xff]   ;;  %v2201_v48 = vld [vmem:[%s3221_s0 + $0x200] ss:$8 sps:$4 sm:$0xff]  }
  0x11   :  { %v2202_v49 = vld [vmem:[%s3221_s0 + $0x84] ss:$8 sps:$4 sm:$0xff]   ;;  %v2204_v50 = vld [vmem:[%s3221_s0 + $0x214] ss:$8 sps:$4 sm:$0xff]   ;;  %v2206_v51 = vld [vmem:[%s3221_s0 + $0x80] ss:$8 sps:$4 sm:$0xff]  }
  0x12   :  { %759 = vmatpush1.bf16.msra.mxu0 %v2142_v5  ;;  %2125 = vmatpush1.bf16.msra.mxu1 %v2142_v5  ;;  %v2207_v52 = vld [vmem:[%s3221_s0 + $0x210] ss:$8 sps:$4 sm:$0xff]   ;;  %v2208_v53 = vld [vmem:[%s3221_s0 + $0x94] ss:$8 sps:$4 sm:$0xff]   ;;  %v2210_v54 = vld [vmem:[%s3221_s0 + $0x224] ss:$8 sps:$4 sm:$0xff]  }
  0x13   :  { %760 = vmatprep.subr.bf16.mxu0 %v2303_v0  ;;  %2110 = vmatprep.subr.bf16.mxu1 %v2303_v0  ;;  %v2212_v55 = vld [vmem:[%s3221_s0 + $0x90] ss:$8 sps:$4 sm:$0xff]   ;;  %v2213_v56 = vld [vmem:[%s3221_s0 + $0x220] ss:$8 sps:$4 sm:$0xff]   ;;  %v2214_v57 = vld [vmem:[%s3221_s0 + $0xa4] ss:$8 sps:$4 sm:$0xff]  }
  0x14   :  { %v2216_v58 = vld [vmem:[%s3221_s0 + $0x234] ss:$8 sps:$4 sm:$0xff]   ;;  %v2218_v59 = vld [vmem:[%s3221_s0 + $0xa0] ss:$8 sps:$4 sm:$0xff]   ;;  %v2219_v60 = vld [vmem:[%s3221_s0 + $0x230] ss:$8 sps:$4 sm:$0xff]  }
  0x15   :  { %v2220_v61 = vld [vmem:[%s3221_s0 + $0xb4] ss:$8 sps:$4 sm:$0xff]   ;;  %v2222_v62 = vld [vmem:[%s3221_s0 + $0x244] ss:$8 sps:$4 sm:$0xff]   ;;  %v2224_v63 = vld [vmem:[%s3221_s0 + $0xb0] ss:$8 sps:$4 sm:$0xff]  }
  0x16   :  { %761 = vmatpush1.bf16.msra.mxu0 %v2143_v7  ;;  %2126 = vmatpush1.bf16.msra.mxu1 %v2143_v7  ;;  %v2226_v1 = vld [vmem:[%s3221_s0 + $0xc4] ss:$8 sps:$4 sm:$0xff]   ;;  %v2228_v2 = vld [vmem:[%s3221_s0 + $0x254] ss:$8 sps:$4 sm:$0xff]   ;;  %v2230_v3 = vld [vmem:[%s3221_s0 + $0xc0] ss:$8 sps:$4 sm:$0xff]  }
  0x17   :  { %762 = vmatprep.subr.bf16.mxu0 %v2303_v0  ;;  %2111 = vmatprep.subr.bf16.mxu1 %v2303_v0  ;;  %v2231_v4 = vld [vmem:[%s3221_s0 + $0x250] ss:$8 sps:$4 sm:$0xff]   ;;  %v2232_v5 = vld [vmem:[%s3221_s0 + $0xd4] ss:$8 sps:$4 sm:$0xff]   ;;  %v2234_v6 = vld [vmem:[%s3221_s0 + $0x264] ss:$8 sps:$4 sm:$0xff]  }
  0x18   :  { %v2236_v7 = vld [vmem:[%s3221_s0 + $0xd0] ss:$8 sps:$4 sm:$0xff]   ;;  %v2237_v8 = vld [vmem:[%s3221_s0 + $0x260] ss:$8 sps:$4 sm:$0xff]  }
  0x1a   :  { %763 = vmatpush1.bf16.msra.mxu0 %v2144_v9  ;;  %2127 = vmatpush1.bf16.msra.mxu1 %v2144_v9  ;;  %v2238_v9 = vld [vmem:[%s3221_s0 + $0xe4] ss:$8 sps:$4 sm:$0xff]  }
  0x1b   :  { %764 = vmatprep.subr.bf16.mxu0 %v2303_v0  ;;  %2112 = vmatprep.subr.bf16.mxu1 %v2303_v0 }
  0x1e   :  { %765 = vmatpush1.bf16.msra.mxu0 %v2145_v10  ;;  %2128 = vmatpush1.bf16.msra.mxu1 %v2145_v10  ;;  %v2240_v10 = vld [vmem:[%s3221_s0 + $0x274] ss:$8 sps:$4 sm:$0xff]  }
  0x1f   :  { %766 = vmatprep.subr.bf16.mxu0 %v2303_v0  ;;  %2113 = vmatprep.subr.bf16.mxu1 %v2303_v0 }
  0x22   :  { %767 = vmatpush2.bf16.msra.mxu0 %v2146_v11  ;;  %2129 = vmatpush2.bf16.msra.mxu1 %v2146_v11  ;;  %v2242_v11 = vld [vmem:[%s3221_s0 + $0xe0] ss:$8 sps:$4 sm:$0xff]  }
  0x23   :  { %768 = vmatprep.subr.bf16.mxu0 %v2303_v0  ;;  %2114 = vmatprep.subr.bf16.mxu1 %v2303_v0 }
  0x26   :  { %769 = vmatpush2.bf16.msra.mxu0 %v2147_v12  ;;  %2130 = vmatpush2.bf16.msra.mxu1 %v2147_v12  ;;  %v2243_v12 = vld [vmem:[%s3221_s0 + $0x270] ss:$8 sps:$4 sm:$0xff]  }
  0x27   :  { %770 = vmatprep.subr.bf16.mxu0 %v2303_v0  ;;  %2115 = vmatprep.subr.bf16.mxu1 %v2303_v0 }
  0x2a   :  { %771 = vmatpush2.bf16.msra.mxu0 %v2148_v13  ;;  %2131 = vmatpush2.bf16.msra.mxu1 %v2148_v13  ;;  %v2244_v13 = vld [vmem:[%s3221_s0 + $0xf4] ss:$8 sps:$4 sm:$0xff]  }
  0x2b   :  { %772 = vmatprep.subr.bf16.mxu0 %v2303_v0  ;;  %2116 = vmatprep.subr.bf16.mxu1 %v2303_v0 }
  0x2e   :  { %773 = vmatpush2.bf16.msra.mxu0 %v2149_v14  ;;  %2132 = vmatpush2.bf16.msra.mxu1 %v2149_v14  ;;  %v2246_v14 = vld [vmem:[%s3221_s0 + $0x284] ss:$8 sps:$4 sm:$0xff]  }
  0x2f   :  { %774 = vmatprep.subr.bf16.mxu0 %v2303_v0  ;;  %2117 = vmatprep.subr.bf16.mxu1 %v2303_v0 }
  0x32   :  { %775 = vmatpush2.bf16.msra.mxu0 %v2150_v15  ;;  %2133 = vmatpush2.bf16.msra.mxu1 %v2150_v15  ;;  %v2248_v15 = vld [vmem:[%s3221_s0 + $0xf0] ss:$8 sps:$4 sm:$0xff]  }
  0x33   :  { %776 = vmatprep.subr.bf16.mxu0 %v2303_v0  ;;  %2118 = vmatprep.subr.bf16.mxu1 %v2303_v0 }
  0x36   :  { %777 = vmatpush2.bf16.msra.mxu0 %v2151_v16  ;;  %2134 = vmatpush2.bf16.msra.mxu1 %v2151_v16  ;;  %v2249_v16 = vld [vmem:[%s3221_s0 + $0x280] ss:$8 sps:$4 sm:$0xff]  }
  0x37   :  { %778 = vmatprep.subr.bf16.mxu0 %v2303_v0  ;;  %2119 = vmatprep.subr.bf16.mxu1 %v2303_v0 }
  0x3a   :  { %779 = vmatpush2.bf16.msra.mxu0 %v2152_v17  ;;  %2135 = vmatpush2.bf16.msra.mxu1 %v2152_v17  ;;  %v2250_v17 = vld [vmem:[%s3221_s0 + $0x104] ss:$8 sps:$4 sm:$0xff]  }
  0x3b   :  { %780 = vmatprep.subr.bf16.mxu0 %v2303_v0  ;;  %2120 = vmatprep.subr.bf16.mxu1 %v2303_v0  ;;  %v2225_v0 = vld [vmem:[%s3221_s0 + $0x240] ss:$8 sps:$4 sm:$0xff]  }
  0x3e   :  { %781 = vmatpush2.bf16.msra.mxu0 %v2153_v18  ;;  %2136 = vmatpush2.bf16.msra.mxu1 %v2153_v18  ;;  %v2252_v18 = vld [vmem:[%s3221_s0 + $0x294] ss:$8 sps:$4 sm:$0xff]  }
  0x41   :  { %783 = vmatmul.mubr.bf16.vlgmr.msra.gmra.mxu0 %v2154_v19  ;;  %983 = vmatmul.mubr.bf16.vlgmr.msra.gmra.mxu1 %v2157_v20  ;;  %v2254_v19 = vld [vmem:[%s3221_s0 + $0x100] ss:$8 sps:$4 sm:$0xff]   ;;  %v2255_v20 = vld [vmem:[%s3221_s0 + $0x290] ss:$8 sps:$4 sm:$0xff]  }
  0x42   :  { %790 = vmatprep.mubr.bf16.mxu0 %v2160_v21  ;;  %990 = vmatprep.mubr.bf16.mxu1 %v2162_v22  ;;  %v2256_v21 = vld [vmem:[%s3221_s0 + $0x114] ss:$8 sps:$4 sm:$0xff]   ;;  %v2258_v22 = vld [vmem:[%s3221_s0 + $0x2a4] ss:$8 sps:$4 sm:$0xff]  }
  0x49   :  { %791 = vmatmul.mubr.bf16.gmra.mxu0 %v2164_v23  ;;  %991 = vmatmul.mubr.bf16.gmra.mxu1 %v2165_v24  ;;  %v2260_v23 = vld [vmem:[%s3221_s0 + $0x110] ss:$8 sps:$4 sm:$0xff]   ;;  %v2261_v24 = vld [vmem:[%s3221_s0 + $0x2a0] ss:$8 sps:$4 sm:$0xff]  }
  0x4a   :  { %798 = vmatprep.mubr.bf16.mxu0 %v2166_v25  ;;  %998 = vmatprep.mubr.bf16.mxu1 %v2168_v26  ;;  %v2262_v25 = vld [vmem:[%s3221_s0 + $0x124] ss:$8 sps:$4 sm:$0xff]   ;;  %v2264_v26 = vld [vmem:[%s3221_s0 + $0x2b4] ss:$8 sps:$4 sm:$0xff]  }
  0x51   :  { %799 = vmatmul.mubr.bf16.gmra.mxu0 %v2170_v27  ;;  %999 = vmatmul.mubr.bf16.gmra.mxu1 %v2171_v28  ;;  %v2266_v27 = vld [vmem:[%s3221_s0 + $0x120] ss:$8 sps:$4 sm:$0xff]   ;;  %v2267_v28 = vld [vmem:[%s3221_s0 + $0x2b0] ss:$8 sps:$4 sm:$0xff]  }
  0x52   :  { %806 = vmatprep.mubr.bf16.mxu0 %v2172_v29  ;;  %1006 = vmatprep.mubr.bf16.mxu1 %v2174_v30  ;;  %v2268_v29 = vld [vmem:[%s3221_s0 + $0x134] ss:$8 sps:$4 sm:$0xff]   ;;  %v2270_v30 = vld [vmem:[%s3221_s0 + $0x2c4] ss:$8 sps:$4 sm:$0xff]  }
  0x59   :  { %807 = vmatmul.mubr.bf16.gmra.mxu0 %v2176_v31  ;;  %1007 = vmatmul.mubr.bf16.gmra.mxu1 %v2177_v32  ;;  %v2272_v31 = vld [vmem:[%s3221_s0 + $0x130] ss:$8 sps:$4 sm:$0xff]   ;;  %v2273_v32 = vld [vmem:[%s3221_s0 + $0x2c0] ss:$8 sps:$4 sm:$0xff]  }
  0x5a   :  { %814 = vmatprep.mubr.bf16.mxu0 %v2178_v33  ;;  %1014 = vmatprep.mubr.bf16.mxu1 %v2180_v34  ;;  %v2274_v33 = vld [vmem:[%s3221_s0 + $0x144] ss:$8 sps:$4 sm:$0xff]   ;;  %v2276_v34 = vld [vmem:[%s3221_s0 + $0x2d4] ss:$8 sps:$4 sm:$0xff]  }
  0x61   :  { %815 = vmatmul.mubr.bf16.gmra.mxu0 %v2182_v35  ;;  %1015 = vmatmul.mubr.bf16.gmra.mxu1 %v2183_v36  ;;  %v2278_v35 = vld [vmem:[%s3221_s0 + $0x140] ss:$8 sps:$4 sm:$0xff]   ;;  %v2279_v36 = vld [vmem:[%s3221_s0 + $0x2d0] ss:$8 sps:$4 sm:$0xff]  }
  0x62   :  { %822 = vmatprep.mubr.bf16.mxu0 %v2184_v37  ;;  %1022 = vmatprep.mubr.bf16.mxu1 %v2186_v38  ;;  %v2280_v37 = vld [vmem:[%s3221_s0 + $0x154] ss:$8 sps:$4 sm:$0xff]   ;;  %v2282_v38 = vld [vmem:[%s3221_s0 + $0x2e4] ss:$8 sps:$4 sm:$0xff]  }
  0x69   :  { %823 = vmatmul.mubr.bf16.gmra.mxu0 %v2188_v39  ;;  %1023 = vmatmul.mubr.bf16.gmra.mxu1 %v2189_v40  ;;  %v2284_v39 = vld [vmem:[%s3221_s0 + $0x150] ss:$8 sps:$4 sm:$0xff]   ;;  %v2285_v40 = vld [vmem:[%s3221_s0 + $0x2e0] ss:$8 sps:$4 sm:$0xff]  }
  0x6a   :  { %830 = vmatprep.mubr.bf16.mxu0 %v2190_v41  ;;  %1030 = vmatprep.mubr.bf16.mxu1 %v2192_v42  ;;  %v2286_v41 = vld [vmem:[%s3221_s0 + $0x164] ss:$8 sps:$4 sm:$0xff]   ;;  %v2288_v42 = vld [vmem:[%s3221_s0 + $0x2f4] ss:$8 sps:$4 sm:$0xff]  }
  0x71   :  { %831 = vmatmul.mubr.bf16.gmra.mxu0 %v2194_v43  ;;  %1031 = vmatmul.mubr.bf16.gmra.mxu1 %v2195_v44  ;;  %v2290_v43 = vld [vmem:[%s3221_s0 + $0x160] ss:$8 sps:$4 sm:$0xff]   ;;  %v2291_v44 = vld [vmem:[%s3221_s0 + $0x2f0] ss:$8 sps:$4 sm:$0xff]  }
  0x72   :  { %838 = vmatprep.mubr.bf16.mxu0 %v2196_v45  ;;  %1038 = vmatprep.mubr.bf16.mxu1 %v2198_v46  ;;  %v2292_v45 = vld [vmem:[%s3221_s0 + $0x174] ss:$8 sps:$4 sm:$0xff]   ;;  %v2294_v46 = vld [vmem:[%s3221_s0 + $0x304] ss:$8 sps:$4 sm:$0xff]  }
  0x79   :  { %839 = vmatmul.mubr.bf16.gmra.mxu0 %v2200_v47  ;;  %1039 = vmatmul.mubr.bf16.gmra.mxu1 %v2201_v48  ;;  %v2296_v47 = vld [vmem:[%s3221_s0 + $0x170] ss:$8 sps:$4 sm:$0xff]   ;;  %v2297_v48 = vld [vmem:[%s3221_s0 + $0x300] ss:$8 sps:$4 sm:$0xff]  }
  0x7a   :  { %846 = vmatprep.mubr.bf16.mxu0 %v2202_v49  ;;  %1046 = vmatprep.mubr.bf16.mxu1 %v2204_v50  ;;  %v2298_v49 = vld [vmem:[%s3221_s0 + $0x184] ss:$8 sps:$4 sm:$0xff]   ;;  %v2300_v50 = vld [vmem:[%s3221_s0 + $0x314] ss:$8 sps:$4 sm:$0xff]  }
  0x81   :  { %847 = vmatmul.mubr.bf16.gmra.mxu0 %v2206_v51  ;;  %1047 = vmatmul.mubr.bf16.gmra.mxu1 %v2207_v52  ;;  %v63_v51 = vld [vmem:[%s3221_s0 + $0x180] sm:$0xff]  ;;  %v64_v52 = vld [vmem:[%s3221_s0 + $0x188] sm:$0xff] }
  0x82   :  { %854 = vmatprep.mubr.bf16.mxu0 %v2208_v53  ;;  %1054 = vmatprep.mubr.bf16.mxu1 %v2210_v54  ;;  %v113_v53 = vld [vmem:[%s3221_s0 + $0x310] sm:$0xff]  ;;  %v114_v54 = vld [vmem:[%s3221_s0 + $0x318] sm:$0xff] }
  0x89   :  { %855 = vmatmul.mubr.bf16.gmra.mxu0 %v2212_v55  ;;  %1055 = vmatmul.mubr.bf16.gmra.mxu1 %v2213_v56  ;;  %v1837_v55 = vcombine.low %v63_v51, %v64_v52  ;;  %v1887_v56 = vcombine.low %v113_v53, %v114_v54 }
  0x8a   :  { %862 = vmatprep.mubr.bf16.mxu0 %v2214_v57  ;;  %1062 = vmatprep.mubr.bf16.mxu1 %v2216_v58  ;;  %v2713_v57 = vld [vmem:[%s3222_s2] ss:$0 sm:$0xff] }
  0x91   :  { %863 = vmatmul.mubr.bf16.gmra.mxu0 %v2218_v59  ;;  %1063 = vmatmul.mubr.bf16.gmra.mxu1 %v2219_v60 }
  0x92   :  { %870 = vmatprep.mubr.bf16.mxu0 %v2220_v61  ;;  %1070 = vmatprep.mubr.bf16.mxu1 %v2222_v62 }
  0x99   :  { %871 = vmatmul.mubr.bf16.gmra.mxu0 %v2224_v63  ;;  %1071 = vmatmul.mubr.bf16.gmra.mxu1 %v2225_v0 }
  0x9a   :  { %878 = vmatprep.mubr.bf16.mxu0 %v2226_v1  ;;  %1078 = vmatprep.mubr.bf16.mxu1 %v2228_v2 }
  0xa1   :  { %879 = vmatmul.mubr.bf16.gmra.mxu0 %v2230_v3  ;;  %1079 = vmatmul.mubr.bf16.gmra.mxu1 %v2231_v4 }
  0xa2   :  { %886 = vmatprep.mubr.bf16.mxu0 %v2232_v5  ;;  %1086 = vmatprep.mubr.bf16.mxu1 %v2234_v6 }
  0xa9   :  { %887 = vmatmul.mubr.bf16.gmra.mxu0 %v2236_v7  ;;  %1087 = vmatmul.mubr.bf16.gmra.mxu1 %v2237_v8 }
  0xaa   :  { %894 = vmatprep.mubr.bf16.mxu0 %v2238_v9  ;;  %1094 = vmatprep.mubr.bf16.mxu1 %v2240_v10 }
  0xb1   :  { %895 = vmatmul.mubr.bf16.gmra.mxu0 %v2242_v11  ;;  %1095 = vmatmul.mubr.bf16.gmra.mxu1 %v2243_v12 }
  0xb2   :  { %902 = vmatprep.mubr.bf16.mxu0 %v2244_v13  ;;  %1102 = vmatprep.mubr.bf16.mxu1 %v2246_v14 }
  0xb9   :  { %903 = vmatmul.mubr.bf16.gmra.mxu0 %v2248_v15  ;;  %1103 = vmatmul.mubr.bf16.gmra.mxu1 %v2249_v16 }
  0xba   :  { %910 = vmatprep.mubr.bf16.mxu0 %v2250_v17  ;;  %1110 = vmatprep.mubr.bf16.mxu1 %v2252_v18 }
  0xc1   :  { %911 = vmatmul.mubr.bf16.gmra.mxu0 %v2254_v19  ;;  %1111 = vmatmul.mubr.bf16.gmra.mxu1 %v2255_v20 }
  0xc2   :  { %918 = vmatprep.mubr.bf16.mxu0 %v2256_v21  ;;  %1118 = vmatprep.mubr.bf16.mxu1 %v2258_v22 }
  0xc9   :  { %919 = vmatmul.mubr.bf16.gmra.mxu0 %v2260_v23  ;;  %1119 = vmatmul.mubr.bf16.gmra.mxu1 %v2261_v24 }
  0xca   :  { %926 = vmatprep.mubr.bf16.mxu0 %v2262_v25  ;;  %1126 = vmatprep.mubr.bf16.mxu1 %v2264_v26 }
  0xd1   :  { %927 = vmatmul.mubr.bf16.gmra.mxu0 %v2266_v27  ;;  %1127 = vmatmul.mubr.bf16.gmra.mxu1 %v2267_v28 }
  0xd2   :  { %934 = vmatprep.mubr.bf16.mxu0 %v2268_v29  ;;  %1134 = vmatprep.mubr.bf16.mxu1 %v2270_v30 }
  0xd9   :  { %935 = vmatmul.mubr.bf16.gmra.mxu0 %v2272_v31  ;;  %1135 = vmatmul.mubr.bf16.gmra.mxu1 %v2273_v32 }
  0xda   :  { %942 = vmatprep.mubr.bf16.mxu0 %v2274_v33  ;;  %1142 = vmatprep.mubr.bf16.mxu1 %v2276_v34 }
  0xe1   :  { %943 = vmatmul.mubr.bf16.gmra.mxu0 %v2278_v35  ;;  %1143 = vmatmul.mubr.bf16.gmra.mxu1 %v2279_v36 }
  0xe2   :  { %950 = vmatprep.mubr.bf16.mxu0 %v2280_v37  ;;  %1150 = vmatprep.mubr.bf16.mxu1 %v2282_v38 }
  0xe9   :  { %951 = vmatmul.mubr.bf16.gmra.mxu0 %v2284_v39  ;;  %1151 = vmatmul.mubr.bf16.gmra.mxu1 %v2285_v40 }
  0xea   :  { %958 = vmatprep.mubr.bf16.mxu0 %v2286_v41  ;;  %1158 = vmatprep.mubr.bf16.mxu1 %v2288_v42 }
  0xf1   :  { %959 = vmatmul.mubr.bf16.gmra.mxu0 %v2290_v43  ;;  %1159 = vmatmul.mubr.bf16.gmra.mxu1 %v2291_v44 }
  0xf2   :  { %966 = vmatprep.mubr.bf16.mxu0 %v2292_v45  ;;  %1166 = vmatprep.mubr.bf16.mxu1 %v2294_v46 }
  0xf9   :  { %967 = vmatmul.mubr.bf16.gmra.mxu0 %v2296_v47  ;;  %1167 = vmatmul.mubr.bf16.gmra.mxu1 %v2297_v48 }
  0xfa   :  { %974 = vmatprep.mubr.bf16.mxu0 %v2298_v49  ;;  %1174 = vmatprep.mubr.bf16.mxu1 %v2300_v50 }
 0x101   :  { %v784_v58 = vpop.f32.mrf.mxu0  ;;  %975 = vmatmul.mubr.bf16.gmra.mxu0 %v1837_v55  ;;  %v984_v59 = vpop.f32.mrf.mxu1  ;;  %1175 = vmatmul.mubr.bf16.gmra.mxu1 %v1887_v56 }
 0x102   :  { %v785_v60 = vadd.f32 %v2713_v57, %v784_v58  ;;  %v985_v61 = vadd.f32 %v2713_v57, %v984_v59 }
 0x103   :  { %v786_v62 = vpop.f32.mrf.mxu0  ;;  %v986_v63 = vpop.f32.mrf.mxu1 }
 0x104   :  { %v1183_v0 = vmax.f32 %v785_v60, 0.0  ;;  %v1233_v1 = vmax.f32 %v985_v61, 0.0 }
 0x105   :  { %v787_v2 = vpop.f32.mrf.mxu0  ;;  %v987_v3 = vpop.f32.mrf.mxu1 }
 0x106   :  { %v2005_v4 = vpack.c.bf16 %v1183_v0, %v1183_v0  ;;  %v2055_v5 = vpack.c.bf16 %v1233_v1, %v1233_v1  ;;  %v788_v6 = vadd.f32 %v2713_v57, %v787_v2  ;;  %v988_v7 = vadd.f32 %v2713_v57, %v987_v3 }
 0x107   :  { %v789_v8 = vpop.f32.mrf.mxu0  ;;  %v989_v9 = vpop.f32.mrf.mxu1 }
 0x108   :  { %1684 = vst.msk [vmem:[%s3223_s3] sm:$0xf] %vm1683_vm0, %v2005_v4  ;;  %1734 = vst.msk [vmem:[%s3223_s3 + $0xc8] sm:$0xf] %vm1683_vm0, %v2055_v5  ;;  %v1184_v10 = vmax.f32 %v788_v6, 0.0  ;;  %v1234_v11 = vmax.f32 %v988_v7, 0.0 }
 0x109   :  { %v792_v12 = vpop.f32.mrf.mxu0  ;;  %v992_v13 = vpop.f32.mrf.mxu1 }
 0x10a   :  { %v2006_v14 = vpack.c.bf16 %v1184_v10, %v1184_v10  ;;  %v2056_v15 = vpack.c.bf16 %v1234_v11, %v1234_v11  ;;  %v793_v16 = vadd.f32 %v2713_v57, %v792_v12  ;;  %v993_v17 = vadd.f32 %v2713_v57, %v992_v13 }
 0x10b   :  { %v794_v18 = vpop.f32.mrf.mxu0  ;;  %v994_v19 = vpop.f32.mrf.mxu1 }
 0x10c   :  { %1685 = vst.msk [vmem:[%s3223_s3 + $0x4] sm:$0xf] %vm1683_vm0, %v2006_v14  ;;  %1735 = vst.msk [vmem:[%s3223_s3 + $0xcc] sm:$0xf] %vm1683_vm0, %v2056_v15  ;;  %v1185_v20 = vmax.f32 %v793_v16, 0.0  ;;  %v1235_v21 = vmax.f32 %v993_v17, 0.0 }
 0x10d   :  { %v795_v22 = vpop.f32.mrf.mxu0  ;;  %v995_v23 = vpop.f32.mrf.mxu1 }
 0x10e   :  { %v2007_v24 = vpack.c.bf16 %v1185_v20, %v1185_v20  ;;  %v2057_v25 = vpack.c.bf16 %v1235_v21, %v1235_v21  ;;  %v796_v26 = vadd.f32 %v2713_v57, %v795_v22  ;;  %v996_v27 = vadd.f32 %v2713_v57, %v995_v23 }
 0x10f   :  { %v797_v28 = vpop.f32.mrf.mxu0  ;;  %v997_v29 = vpop.f32.mrf.mxu1 }
 0x110   :  { %1686 = vst.msk [vmem:[%s3223_s3 + $0x8] sm:$0xf] %vm1683_vm0, %v2007_v24  ;;  %1736 = vst.msk [vmem:[%s3223_s3 + $0xd0] sm:$0xf] %vm1683_vm0, %v2057_v25  ;;  %v1186_v30 = vmax.f32 %v796_v26, 0.0  ;;  %v1236_v31 = vmax.f32 %v996_v27, 0.0 }
 0x111   :  { %v800_v32 = vpop.f32.mrf.mxu0  ;;  %v1000_v33 = vpop.f32.mrf.mxu1 }
 0x112   :  { %v2008_v34 = vpack.c.bf16 %v1186_v30, %v1186_v30  ;;  %v2058_v35 = vpack.c.bf16 %v1236_v31, %v1236_v31  ;;  %v801_v36 = vadd.f32 %v2713_v57, %v800_v32  ;;  %v1001_v37 = vadd.f32 %v2713_v57, %v1000_v33 }
 0x113   :  { %v802_v38 = vpop.f32.mrf.mxu0  ;;  %v1002_v39 = vpop.f32.mrf.mxu1 }
 0x114   :  { %1687 = vst.msk [vmem:[%s3223_s3 + $0xc] sm:$0xf] %vm1683_vm0, %v2008_v34  ;;  %1737 = vst.msk [vmem:[%s3223_s3 + $0xd4] sm:$0xf] %vm1683_vm0, %v2058_v35  ;;  %v1187_v40 = vmax.f32 %v801_v36, 0.0  ;;  %v1237_v41 = vmax.f32 %v1001_v37, 0.0 }
 0x115   :  { %v803_v42 = vpop.f32.mrf.mxu0  ;;  %v1003_v43 = vpop.f32.mrf.mxu1 }
 0x116   :  { %v2009_v44 = vpack.c.bf16 %v1187_v40, %v1187_v40  ;;  %v2059_v45 = vpack.c.bf16 %v1237_v41, %v1237_v41  ;;  %v804_v46 = vadd.f32 %v2713_v57, %v803_v42  ;;  %v1004_v47 = vadd.f32 %v2713_v57, %v1003_v43 }
 0x117   :  { %v805_v48 = vpop.f32.mrf.mxu0  ;;  %v1005_v49 = vpop.f32.mrf.mxu1 }
 0x118   :  { %1688 = vst.msk [vmem:[%s3223_s3 + $0x10] sm:$0xf] %vm1683_vm0, %v2009_v44  ;;  %1738 = vst.msk [vmem:[%s3223_s3 + $0xd8] sm:$0xf] %vm1683_vm0, %v2059_v45  ;;  %v1188_v50 = vmax.f32 %v804_v46, 0.0  ;;  %v1238_v51 = vmax.f32 %v1004_v47, 0.0 }
 0x119   :  { %v808_v52 = vpop.f32.mrf.mxu0  ;;  %v1008_v53 = vpop.f32.mrf.mxu1 }
 0x11a   :  { %v2010_v54 = vpack.c.bf16 %v1188_v50, %v1188_v50  ;;  %v2060_v55 = vpack.c.bf16 %v1238_v51, %v1238_v51  ;;  %v809_v56 = vadd.f32 %v2713_v57, %v808_v52  ;;  %v1009_v58 = vadd.f32 %v2713_v57, %v1008_v53 }
 0x11b   :  { %v810_v59 = vpop.f32.mrf.mxu0  ;;  %v1010_v60 = vpop.f32.mrf.mxu1 }
 0x11c   :  { %1689 = vst.msk [vmem:[%s3223_s3 + $0x14] sm:$0xf] %vm1683_vm0, %v2010_v54  ;;  %1739 = vst.msk [vmem:[%s3223_s3 + $0xdc] sm:$0xf] %vm1683_vm0, %v2060_v55  ;;  %v1189_v61 = vmax.f32 %v809_v56, 0.0  ;;  %v1239_v62 = vmax.f32 %v1009_v58, 0.0 }
 0x11d   :  { %v811_v63 = vpop.f32.mrf.mxu0  ;;  %v1011_v0 = vpop.f32.mrf.mxu1 }
 0x11e   :  { %v2011_v1 = vpack.c.bf16 %v1189_v61, %v1189_v61  ;;  %v2061_v2 = vpack.c.bf16 %v1239_v62, %v1239_v62  ;;  %v812_v3 = vadd.f32 %v2713_v57, %v811_v63  ;;  %v1012_v4 = vadd.f32 %v2713_v57, %v1011_v0 }
 0x11f   :  { %v813_v5 = vpop.f32.mrf.mxu0  ;;  %v1013_v6 = vpop.f32.mrf.mxu1 }
 0x120   :  { %1690 = vst.msk [vmem:[%s3223_s3 + $0x18] sm:$0xf] %vm1683_vm0, %v2011_v1  ;;  %1740 = vst.msk [vmem:[%s3223_s3 + $0xe0] sm:$0xf] %vm1683_vm0, %v2061_v2  ;;  %v1190_v7 = vmax.f32 %v812_v3, 0.0  ;;  %v1240_v8 = vmax.f32 %v1012_v4, 0.0 }
 0x121   :  { %v816_v9 = vpop.f32.mrf.mxu0  ;;  %v1016_v10 = vpop.f32.mrf.mxu1 }
 0x122   :  { %v2012_v11 = vpack.c.bf16 %v1190_v7, %v1190_v7  ;;  %v2062_v12 = vpack.c.bf16 %v1240_v8, %v1240_v8  ;;  %v817_v13 = vadd.f32 %v2713_v57, %v816_v9  ;;  %v1017_v14 = vadd.f32 %v2713_v57, %v1016_v10 }
 0x123   :  { %v818_v15 = vpop.f32.mrf.mxu0  ;;  %v1018_v16 = vpop.f32.mrf.mxu1 }
 0x124   :  { %1691 = vst.msk [vmem:[%s3223_s3 + $0x1c] sm:$0xf] %vm1683_vm0, %v2012_v11  ;;  %1741 = vst.msk [vmem:[%s3223_s3 + $0xe4] sm:$0xf] %vm1683_vm0, %v2062_v12  ;;  %v1191_v17 = vmax.f32 %v817_v13, 0.0  ;;  %v1241_v18 = vmax.f32 %v1017_v14, 0.0 }
 0x125   :  { %v819_v19 = vpop.f32.mrf.mxu0  ;;  %v1019_v20 = vpop.f32.mrf.mxu1 }
 0x126   :  { %v2013_v21 = vpack.c.bf16 %v1191_v17, %v1191_v17  ;;  %v2063_v22 = vpack.c.bf16 %v1241_v18, %v1241_v18  ;;  %v820_v23 = vadd.f32 %v2713_v57, %v819_v19  ;;  %v1020_v24 = vadd.f32 %v2713_v57, %v1019_v20 }
 0x127   :  { %v821_v25 = vpop.f32.mrf.mxu0  ;;  %v1021_v26 = vpop.f32.mrf.mxu1 }
 0x128   :  { %1692 = vst.msk [vmem:[%s3223_s3 + $0x20] sm:$0xf] %vm1683_vm0, %v2013_v21  ;;  %1742 = vst.msk [vmem:[%s3223_s3 + $0xe8] sm:$0xf] %vm1683_vm0, %v2063_v22  ;;  %v1192_v27 = vmax.f32 %v820_v23, 0.0  ;;  %v1242_v28 = vmax.f32 %v1020_v24, 0.0 }
 0x129   :  { %v824_v29 = vpop.f32.mrf.mxu0  ;;  %v1024_v30 = vpop.f32.mrf.mxu1 }
 0x12a   :  { %v2014_v31 = vpack.c.bf16 %v1192_v27, %v1192_v27  ;;  %v2064_v32 = vpack.c.bf16 %v1242_v28, %v1242_v28  ;;  %v825_v33 = vadd.f32 %v2713_v57, %v824_v29  ;;  %v1025_v34 = vadd.f32 %v2713_v57, %v1024_v30 }
 0x12b   :  { %v826_v35 = vpop.f32.mrf.mxu0  ;;  %v1026_v36 = vpop.f32.mrf.mxu1 }
 0x12c   :  { %1693 = vst.msk [vmem:[%s3223_s3 + $0x24] sm:$0xf] %vm1683_vm0, %v2014_v31  ;;  %1743 = vst.msk [vmem:[%s3223_s3 + $0xec] sm:$0xf] %vm1683_vm0, %v2064_v32  ;;  %v1193_v37 = vmax.f32 %v825_v33, 0.0  ;;  %v1243_v38 = vmax.f32 %v1025_v34, 0.0 }
 0x12d   :  { %v827_v39 = vpop.f32.mrf.mxu0  ;;  %v1027_v40 = vpop.f32.mrf.mxu1 }
 0x12e   :  { %v2015_v41 = vpack.c.bf16 %v1193_v37, %v1193_v37  ;;  %v2065_v42 = vpack.c.bf16 %v1243_v38, %v1243_v38  ;;  %v828_v43 = vadd.f32 %v2713_v57, %v827_v39  ;;  %v1028_v44 = vadd.f32 %v2713_v57, %v1027_v40 }
 0x12f   :  { %v829_v45 = vpop.f32.mrf.mxu0  ;;  %v1029_v46 = vpop.f32.mrf.mxu1 }
 0x130   :  { %1694 = vst.msk [vmem:[%s3223_s3 + $0x28] sm:$0xf] %vm1683_vm0, %v2015_v41  ;;  %1744 = vst.msk [vmem:[%s3223_s3 + $0xf0] sm:$0xf] %vm1683_vm0, %v2065_v42  ;;  %v1194_v47 = vmax.f32 %v828_v43, 0.0  ;;  %v1244_v48 = vmax.f32 %v1028_v44, 0.0 }
 0x131   :  { %v832_v49 = vpop.f32.mrf.mxu0  ;;  %v1032_v50 = vpop.f32.mrf.mxu1 }
 0x132   :  { %v2016_v51 = vpack.c.bf16 %v1194_v47, %v1194_v47  ;;  %v2066_v52 = vpack.c.bf16 %v1244_v48, %v1244_v48  ;;  %v833_v53 = vadd.f32 %v2713_v57, %v832_v49  ;;  %v1033_v54 = vadd.f32 %v2713_v57, %v1032_v50 }
 0x133   :  { %v834_v55 = vpop.f32.mrf.mxu0  ;;  %v1034_v56 = vpop.f32.mrf.mxu1 }
 0x134   :  { %1695 = vst.msk [vmem:[%s3223_s3 + $0x2c] sm:$0xf] %vm1683_vm0, %v2016_v51  ;;  %1745 = vst.msk [vmem:[%s3223_s3 + $0xf4] sm:$0xf] %vm1683_vm0, %v2066_v52  ;;  %v1195_v58 = vmax.f32 %v833_v53, 0.0  ;;  %v1245_v59 = vmax.f32 %v1033_v54, 0.0 }
 0x135   :  { %v835_v60 = vpop.f32.mrf.mxu0  ;;  %v1035_v61 = vpop.f32.mrf.mxu1 }
 0x136   :  { %v2017_v62 = vpack.c.bf16 %v1195_v58, %v1195_v58  ;;  %v2067_v63 = vpack.c.bf16 %v1245_v59, %v1245_v59  ;;  %v836_v0 = vadd.f32 %v2713_v57, %v835_v60  ;;  %v1036_v1 = vadd.f32 %v2713_v57, %v1035_v61 }
 0x137   :  { %v837_v2 = vpop.f32.mrf.mxu0  ;;  %v1037_v3 = vpop.f32.mrf.mxu1 }
 0x138   :  { %1696 = vst.msk [vmem:[%s3223_s3 + $0x30] sm:$0xf] %vm1683_vm0, %v2017_v62  ;;  %1746 = vst.msk [vmem:[%s3223_s3 + $0xf8] sm:$0xf] %vm1683_vm0, %v2067_v63  ;;  %v1196_v4 = vmax.f32 %v836_v0, 0.0  ;;  %v1246_v5 = vmax.f32 %v1036_v1, 0.0 }
 0x139   :  { %v840_v6 = vpop.f32.mrf.mxu0  ;;  %v1040_v7 = vpop.f32.mrf.mxu1 }
 0x13a   :  { %v2018_v8 = vpack.c.bf16 %v1196_v4, %v1196_v4  ;;  %v2068_v9 = vpack.c.bf16 %v1246_v5, %v1246_v5  ;;  %v841_v10 = vadd.f32 %v2713_v57, %v840_v6  ;;  %v1041_v11 = vadd.f32 %v2713_v57, %v1040_v7 }
 0x13b   :  { %v842_v12 = vpop.f32.mrf.mxu0  ;;  %v1042_v13 = vpop.f32.mrf.mxu1 }
 0x13c   :  { %1697 = vst.msk [vmem:[%s3223_s3 + $0x34] sm:$0xf] %vm1683_vm0, %v2018_v8  ;;  %1747 = vst.msk [vmem:[%s3223_s3 + $0xfc] sm:$0xf] %vm1683_vm0, %v2068_v9  ;;  %v1197_v14 = vmax.f32 %v841_v10, 0.0  ;;  %v1247_v15 = vmax.f32 %v1041_v11, 0.0 }
 0x13d   :  { %v843_v16 = vpop.f32.mrf.mxu0  ;;  %v1043_v17 = vpop.f32.mrf.mxu1 }
 0x13e   :  { %v2019_v18 = vpack.c.bf16 %v1197_v14, %v1197_v14  ;;  %v2069_v19 = vpack.c.bf16 %v1247_v15, %v1247_v15  ;;  %v844_v20 = vadd.f32 %v2713_v57, %v843_v16  ;;  %v1044_v21 = vadd.f32 %v2713_v57, %v1043_v17 }
 0x13f   :  { %v845_v22 = vpop.f32.mrf.mxu0  ;;  %v1045_v23 = vpop.f32.mrf.mxu1 }
 0x140   :  { %1698 = vst.msk [vmem:[%s3223_s3 + $0x38] sm:$0xf] %vm1683_vm0, %v2019_v18  ;;  %1748 = vst.msk [vmem:[%s3223_s3 + $0x100] sm:$0xf] %vm1683_vm0, %v2069_v19  ;;  %v1198_v24 = vmax.f32 %v844_v20, 0.0  ;;  %v1248_v25 = vmax.f32 %v1044_v21, 0.0 }
 0x141   :  { %v848_v26 = vpop.f32.mrf.mxu0  ;;  %v1048_v27 = vpop.f32.mrf.mxu1 }
 0x142   :  { %v2020_v28 = vpack.c.bf16 %v1198_v24, %v1198_v24  ;;  %v2070_v29 = vpack.c.bf16 %v1248_v25, %v1248_v25  ;;  %v849_v30 = vadd.f32 %v2713_v57, %v848_v26  ;;  %v1049_v31 = vadd.f32 %v2713_v57, %v1048_v27 }
 0x143   :  { %v850_v32 = vpop.f32.mrf.mxu0  ;;  %v1050_v33 = vpop.f32.mrf.mxu1 }
 0x144   :  { %1699 = vst.msk [vmem:[%s3223_s3 + $0x3c] sm:$0xf] %vm1683_vm0, %v2020_v28  ;;  %1749 = vst.msk [vmem:[%s3223_s3 + $0x104] sm:$0xf] %vm1683_vm0, %v2070_v29  ;;  %v1199_v34 = vmax.f32 %v849_v30, 0.0  ;;  %v1249_v35 = vmax.f32 %v1049_v31, 0.0 }
 0x145   :  { %v851_v36 = vpop.f32.mrf.mxu0  ;;  %v1051_v37 = vpop.f32.mrf.mxu1 }
 0x146   :  { %v2021_v38 = vpack.c.bf16 %v1199_v34, %v1199_v34  ;;  %v2071_v39 = vpack.c.bf16 %v1249_v35, %v1249_v35  ;;  %v852_v40 = vadd.f32 %v2713_v57, %v851_v36  ;;  %v1052_v41 = vadd.f32 %v2713_v57, %v1051_v37 }
 0x147   :  { %v853_v42 = vpop.f32.mrf.mxu0  ;;  %v1053_v43 = vpop.f32.mrf.mxu1 }
 0x148   :  { %1700 = vst.msk [vmem:[%s3223_s3 + $0x40] sm:$0xf] %vm1683_vm0, %v2021_v38  ;;  %1750 = vst.msk [vmem:[%s3223_s3 + $0x108] sm:$0xf] %vm1683_vm0, %v2071_v39  ;;  %v1200_v44 = vmax.f32 %v852_v40, 0.0  ;;  %v1250_v45 = vmax.f32 %v1052_v41, 0.0 }
 0x149   :  { %v856_v46 = vpop.f32.mrf.mxu0  ;;  %v1056_v47 = vpop.f32.mrf.mxu1 }
 0x14a   :  { %v2022_v48 = vpack.c.bf16 %v1200_v44, %v1200_v44  ;;  %v2072_v49 = vpack.c.bf16 %v1250_v45, %v1250_v45  ;;  %v857_v50 = vadd.f32 %v2713_v57, %v856_v46  ;;  %v1057_v51 = vadd.f32 %v2713_v57, %v1056_v47 }
 0x14b   :  { %v858_v52 = vpop.f32.mrf.mxu0  ;;  %v1058_v53 = vpop.f32.mrf.mxu1 }
 0x14c   :  { %1701 = vst.msk [vmem:[%s3223_s3 + $0x44] sm:$0xf] %vm1683_vm0, %v2022_v48  ;;  %1751 = vst.msk [vmem:[%s3223_s3 + $0x10c] sm:$0xf] %vm1683_vm0, %v2072_v49  ;;  %v1201_v54 = vmax.f32 %v857_v50, 0.0  ;;  %v1251_v55 = vmax.f32 %v1057_v51, 0.0 }
 0x14d   :  { %v859_v56 = vpop.f32.mrf.mxu0  ;;  %v1059_v58 = vpop.f32.mrf.mxu1 }
 0x14e   :  { %v2023_v59 = vpack.c.bf16 %v1201_v54, %v1201_v54  ;;  %v2073_v60 = vpack.c.bf16 %v1251_v55, %v1251_v55  ;;  %v860_v61 = vadd.f32 %v2713_v57, %v859_v56  ;;  %v1060_v62 = vadd.f32 %v2713_v57, %v1059_v58 }
 0x14f   :  { %v861_v63 = vpop.f32.mrf.mxu0  ;;  %v1061_v0 = vpop.f32.mrf.mxu1 }
 0x150   :  { %1702 = vst.msk [vmem:[%s3223_s3 + $0x48] sm:$0xf] %vm1683_vm0, %v2023_v59  ;;  %1752 = vst.msk [vmem:[%s3223_s3 + $0x110] sm:$0xf] %vm1683_vm0, %v2073_v60  ;;  %v1202_v1 = vmax.f32 %v860_v61, 0.0  ;;  %v1252_v2 = vmax.f32 %v1060_v62, 0.0 }
 0x151   :  { %v864_v3 = vpop.f32.mrf.mxu0  ;;  %v1064_v4 = vpop.f32.mrf.mxu1 }
 0x152   :  { %v2024_v5 = vpack.c.bf16 %v1202_v1, %v1202_v1  ;;  %v2074_v6 = vpack.c.bf16 %v1252_v2, %v1252_v2  ;;  %v865_v7 = vadd.f32 %v2713_v57, %v864_v3  ;;  %v1065_v8 = vadd.f32 %v2713_v57, %v1064_v4 }
 0x153   :  { %v866_v9 = vpop.f32.mrf.mxu0  ;;  %v1066_v10 = vpop.f32.mrf.mxu1 }
 0x154   :  { %1703 = vst.msk [vmem:[%s3223_s3 + $0x4c] sm:$0xf] %vm1683_vm0, %v2024_v5  ;;  %1753 = vst.msk [vmem:[%s3223_s3 + $0x114] sm:$0xf] %vm1683_vm0, %v2074_v6  ;;  %v1203_v11 = vmax.f32 %v865_v7, 0.0  ;;  %v1253_v12 = vmax.f32 %v1065_v8, 0.0 }
 0x155   :  { %v867_v13 = vpop.f32.mrf.mxu0  ;;  %v1067_v14 = vpop.f32.mrf.mxu1 }
 0x156   :  { %v2025_v15 = vpack.c.bf16 %v1203_v11, %v1203_v11  ;;  %v2075_v16 = vpack.c.bf16 %v1253_v12, %v1253_v12  ;;  %v868_v17 = vadd.f32 %v2713_v57, %v867_v13  ;;  %v1068_v18 = vadd.f32 %v2713_v57, %v1067_v14 }
 0x157   :  { %v869_v19 = vpop.f32.mrf.mxu0  ;;  %v1069_v20 = vpop.f32.mrf.mxu1 }
 0x158   :  { %1704 = vst.msk [vmem:[%s3223_s3 + $0x50] sm:$0xf] %vm1683_vm0, %v2025_v15  ;;  %1754 = vst.msk [vmem:[%s3223_s3 + $0x118] sm:$0xf] %vm1683_vm0, %v2075_v16  ;;  %v1204_v21 = vmax.f32 %v868_v17, 0.0  ;;  %v1254_v22 = vmax.f32 %v1068_v18, 0.0 }
 0x159   :  { %v872_v23 = vpop.f32.mrf.mxu0  ;;  %v1072_v24 = vpop.f32.mrf.mxu1 }
 0x15a   :  { %v2026_v25 = vpack.c.bf16 %v1204_v21, %v1204_v21  ;;  %v2076_v26 = vpack.c.bf16 %v1254_v22, %v1254_v22  ;;  %v873_v27 = vadd.f32 %v2713_v57, %v872_v23  ;;  %v1073_v28 = vadd.f32 %v2713_v57, %v1072_v24 }
 0x15b   :  { %v874_v29 = vpop.f32.mrf.mxu0  ;;  %v1074_v30 = vpop.f32.mrf.mxu1 }
 0x15c   :  { %1705 = vst.msk [vmem:[%s3223_s3 + $0x54] sm:$0xf] %vm1683_vm0, %v2026_v25  ;;  %1755 = vst.msk [vmem:[%s3223_s3 + $0x11c] sm:$0xf] %vm1683_vm0, %v2076_v26  ;;  %v1205_v31 = vmax.f32 %v873_v27, 0.0  ;;  %v1255_v32 = vmax.f32 %v1073_v28, 0.0 }
 0x15d   :  { %v875_v33 = vpop.f32.mrf.mxu0  ;;  %v1075_v34 = vpop.f32.mrf.mxu1 }
 0x15e   :  { %v2027_v35 = vpack.c.bf16 %v1205_v31, %v1205_v31  ;;  %v2077_v36 = vpack.c.bf16 %v1255_v32, %v1255_v32  ;;  %v876_v37 = vadd.f32 %v2713_v57, %v875_v33  ;;  %v1076_v38 = vadd.f32 %v2713_v57, %v1075_v34 }
 0x15f   :  { %v877_v39 = vpop.f32.mrf.mxu0  ;;  %v1077_v40 = vpop.f32.mrf.mxu1 }
 0x160   :  { %1706 = vst.msk [vmem:[%s3223_s3 + $0x58] sm:$0xf] %vm1683_vm0, %v2027_v35  ;;  %1756 = vst.msk [vmem:[%s3223_s3 + $0x120] sm:$0xf] %vm1683_vm0, %v2077_v36  ;;  %v1206_v41 = vmax.f32 %v876_v37, 0.0  ;;  %v1256_v42 = vmax.f32 %v1076_v38, 0.0 }
 0x161   :  { %v880_v43 = vpop.f32.mrf.mxu0  ;;  %v1080_v44 = vpop.f32.mrf.mxu1 }
 0x162   :  { %v2028_v45 = vpack.c.bf16 %v1206_v41, %v1206_v41  ;;  %v2078_v46 = vpack.c.bf16 %v1256_v42, %v1256_v42  ;;  %v881_v47 = vadd.f32 %v2713_v57, %v880_v43  ;;  %v1081_v48 = vadd.f32 %v2713_v57, %v1080_v44 }
 0x163   :  { %v882_v49 = vpop.f32.mrf.mxu0  ;;  %v1082_v50 = vpop.f32.mrf.mxu1 }
 0x164   :  { %1707 = vst.msk [vmem:[%s3223_s3 + $0x5c] sm:$0xf] %vm1683_vm0, %v2028_v45  ;;  %1757 = vst.msk [vmem:[%s3223_s3 + $0x124] sm:$0xf] %vm1683_vm0, %v2078_v46  ;;  %v1207_v51 = vmax.f32 %v881_v47, 0.0  ;;  %v1257_v52 = vmax.f32 %v1081_v48, 0.0 }
 0x165   :  { %v883_v53 = vpop.f32.mrf.mxu0  ;;  %v1083_v54 = vpop.f32.mrf.mxu1 }
 0x166   :  { %v2029_v55 = vpack.c.bf16 %v1207_v51, %v1207_v51  ;;  %v2079_v56 = vpack.c.bf16 %v1257_v52, %v1257_v52  ;;  %v884_v58 = vadd.f32 %v2713_v57, %v883_v53  ;;  %v1084_v59 = vadd.f32 %v2713_v57, %v1083_v54 }
 0x167   :  { %v885_v60 = vpop.f32.mrf.mxu0  ;;  %v1085_v61 = vpop.f32.mrf.mxu1 }
 0x168   :  { %1708 = vst.msk [vmem:[%s3223_s3 + $0x60] sm:$0xf] %vm1683_vm0, %v2029_v55  ;;  %1758 = vst.msk [vmem:[%s3223_s3 + $0x128] sm:$0xf] %vm1683_vm0, %v2079_v56  ;;  %v1208_v62 = vmax.f32 %v884_v58, 0.0  ;;  %v1258_v63 = vmax.f32 %v1084_v59, 0.0 }
 0x169   :  { %v888_v0 = vpop.f32.mrf.mxu0  ;;  %v1088_v1 = vpop.f32.mrf.mxu1 }
 0x16a   :  { %v2030_v2 = vpack.c.bf16 %v1208_v62, %v1208_v62  ;;  %v2080_v3 = vpack.c.bf16 %v1258_v63, %v1258_v63  ;;  %v889_v4 = vadd.f32 %v2713_v57, %v888_v0  ;;  %v1089_v5 = vadd.f32 %v2713_v57, %v1088_v1 }
 0x16b   :  { %v890_v6 = vpop.f32.mrf.mxu0  ;;  %v1090_v7 = vpop.f32.mrf.mxu1 }
 0x16c   :  { %1709 = vst.msk [vmem:[%s3223_s3 + $0x64] sm:$0xf] %vm1683_vm0, %v2030_v2  ;;  %1759 = vst.msk [vmem:[%s3223_s3 + $0x12c] sm:$0xf] %vm1683_vm0, %v2080_v3  ;;  %v1209_v8 = vmax.f32 %v889_v4, 0.0  ;;  %v1259_v9 = vmax.f32 %v1089_v5, 0.0 }
 0x16d   :  { %v891_v10 = vpop.f32.mrf.mxu0  ;;  %v1091_v11 = vpop.f32.mrf.mxu1 }
 0x16e   :  { %v2031_v12 = vpack.c.bf16 %v1209_v8, %v1209_v8  ;;  %v2081_v13 = vpack.c.bf16 %v1259_v9, %v1259_v9  ;;  %v892_v14 = vadd.f32 %v2713_v57, %v891_v10  ;;  %v1092_v15 = vadd.f32 %v2713_v57, %v1091_v11 }
 0x16f   :  { %v893_v16 = vpop.f32.mrf.mxu0  ;;  %v1093_v17 = vpop.f32.mrf.mxu1 }
 0x170   :  { %1710 = vst.msk [vmem:[%s3223_s3 + $0x68] sm:$0xf] %vm1683_vm0, %v2031_v12  ;;  %1760 = vst.msk [vmem:[%s3223_s3 + $0x130] sm:$0xf] %vm1683_vm0, %v2081_v13  ;;  %v1210_v18 = vmax.f32 %v892_v14, 0.0  ;;  %v1260_v19 = vmax.f32 %v1092_v15, 0.0 }
 0x171   :  { %v896_v20 = vpop.f32.mrf.mxu0  ;;  %v1096_v21 = vpop.f32.mrf.mxu1 }
 0x172   :  { %v2032_v22 = vpack.c.bf16 %v1210_v18, %v1210_v18  ;;  %v2082_v23 = vpack.c.bf16 %v1260_v19, %v1260_v19  ;;  %v897_v24 = vadd.f32 %v2713_v57, %v896_v20  ;;  %v1097_v25 = vadd.f32 %v2713_v57, %v1096_v21 }
 0x173   :  { %v898_v26 = vpop.f32.mrf.mxu0  ;;  %v1098_v27 = vpop.f32.mrf.mxu1 }
 0x174   :  { %1711 = vst.msk [vmem:[%s3223_s3 + $0x6c] sm:$0xf] %vm1683_vm0, %v2032_v22  ;;  %1761 = vst.msk [vmem:[%s3223_s3 + $0x134] sm:$0xf] %vm1683_vm0, %v2082_v23  ;;  %v1211_v28 = vmax.f32 %v897_v24, 0.0  ;;  %v1261_v29 = vmax.f32 %v1097_v25, 0.0 }
 0x175   :  { %v899_v30 = vpop.f32.mrf.mxu0  ;;  %v1099_v31 = vpop.f32.mrf.mxu1 }
 0x176   :  { %v2033_v32 = vpack.c.bf16 %v1211_v28, %v1211_v28  ;;  %v2083_v33 = vpack.c.bf16 %v1261_v29, %v1261_v29  ;;  %v900_v34 = vadd.f32 %v2713_v57, %v899_v30  ;;  %v1100_v35 = vadd.f32 %v2713_v57, %v1099_v31 }
 0x177   :  { %v901_v36 = vpop.f32.mrf.mxu0  ;;  %v1101_v37 = vpop.f32.mrf.mxu1 }
 0x178   :  { %1712 = vst.msk [vmem:[%s3223_s3 + $0x70] sm:$0xf] %vm1683_vm0, %v2033_v32  ;;  %1762 = vst.msk [vmem:[%s3223_s3 + $0x138] sm:$0xf] %vm1683_vm0, %v2083_v33  ;;  %v1212_v38 = vmax.f32 %v900_v34, 0.0  ;;  %v1262_v39 = vmax.f32 %v1100_v35, 0.0 }
 0x179   :  { %v904_v40 = vpop.f32.mrf.mxu0  ;;  %v1104_v41 = vpop.f32.mrf.mxu1 }
 0x17a   :  { %v2034_v42 = vpack.c.bf16 %v1212_v38, %v1212_v38  ;;  %v2084_v43 = vpack.c.bf16 %v1262_v39, %v1262_v39  ;;  %v905_v44 = vadd.f32 %v2713_v57, %v904_v40  ;;  %v1105_v45 = vadd.f32 %v2713_v57, %v1104_v41 }
 0x17b   :  { %v906_v46 = vpop.f32.mrf.mxu0  ;;  %v1106_v47 = vpop.f32.mrf.mxu1 }
 0x17c   :  { %1713 = vst.msk [vmem:[%s3223_s3 + $0x74] sm:$0xf] %vm1683_vm0, %v2034_v42  ;;  %1763 = vst.msk [vmem:[%s3223_s3 + $0x13c] sm:$0xf] %vm1683_vm0, %v2084_v43  ;;  %v1213_v48 = vmax.f32 %v905_v44, 0.0  ;;  %v1263_v49 = vmax.f32 %v1105_v45, 0.0 }
 0x17d   :  { %v907_v50 = vpop.f32.mrf.mxu0  ;;  %v1107_v51 = vpop.f32.mrf.mxu1 }
 0x17e   :  { %v2035_v52 = vpack.c.bf16 %v1213_v48, %v1213_v48  ;;  %v2085_v53 = vpack.c.bf16 %v1263_v49, %v1263_v49  ;;  %v908_v54 = vadd.f32 %v2713_v57, %v907_v50  ;;  %v1108_v55 = vadd.f32 %v2713_v57, %v1107_v51 }
 0x17f   :  { %v909_v56 = vpop.f32.mrf.mxu0  ;;  %v1109_v58 = vpop.f32.mrf.mxu1 }
 0x180   :  { %1714 = vst.msk [vmem:[%s3223_s3 + $0x78] sm:$0xf] %vm1683_vm0, %v2035_v52  ;;  %1764 = vst.msk [vmem:[%s3223_s3 + $0x140] sm:$0xf] %vm1683_vm0, %v2085_v53  ;;  %v1214_v59 = vmax.f32 %v908_v54, 0.0  ;;  %v1264_v60 = vmax.f32 %v1108_v55, 0.0 }
 0x181   :  { %v912_v61 = vpop.f32.mrf.mxu0  ;;  %v1112_v62 = vpop.f32.mrf.mxu1 }
 0x182   :  { %v2036_v63 = vpack.c.bf16 %v1214_v59, %v1214_v59  ;;  %v2086_v0 = vpack.c.bf16 %v1264_v60, %v1264_v60  ;;  %v913_v1 = vadd.f32 %v2713_v57, %v912_v61  ;;  %v1113_v2 = vadd.f32 %v2713_v57, %v1112_v62 }
 0x183   :  { %v914_v3 = vpop.f32.mrf.mxu0  ;;  %v1114_v4 = vpop.f32.mrf.mxu1 }
 0x184   :  { %1715 = vst.msk [vmem:[%s3223_s3 + $0x7c] sm:$0xf] %vm1683_vm0, %v2036_v63  ;;  %1765 = vst.msk [vmem:[%s3223_s3 + $0x144] sm:$0xf] %vm1683_vm0, %v2086_v0  ;;  %v1215_v5 = vmax.f32 %v913_v1, 0.0  ;;  %v1265_v6 = vmax.f32 %v1113_v2, 0.0 }
 0x185   :  { %v915_v7 = vpop.f32.mrf.mxu0  ;;  %v1115_v8 = vpop.f32.mrf.mxu1 }
 0x186   :  { %v2037_v9 = vpack.c.bf16 %v1215_v5, %v1215_v5  ;;  %v2087_v10 = vpack.c.bf16 %v1265_v6, %v1265_v6  ;;  %v916_v11 = vadd.f32 %v2713_v57, %v915_v7  ;;  %v1116_v12 = vadd.f32 %v2713_v57, %v1115_v8 }
 0x187   :  { %v917_v13 = vpop.f32.mrf.mxu0  ;;  %v1117_v14 = vpop.f32.mrf.mxu1 }
 0x188   :  { %1716 = vst.msk [vmem:[%s3223_s3 + $0x80] sm:$0xf] %vm1683_vm0, %v2037_v9  ;;  %1766 = vst.msk [vmem:[%s3223_s3 + $0x148] sm:$0xf] %vm1683_vm0, %v2087_v10  ;;  %v1216_v15 = vmax.f32 %v916_v11, 0.0  ;;  %v1266_v16 = vmax.f32 %v1116_v12, 0.0 }
 0x189   :  { %v920_v17 = vpop.f32.mrf.mxu0  ;;  %v1120_v18 = vpop.f32.mrf.mxu1 }
 0x18a   :  { %v2038_v19 = vpack.c.bf16 %v1216_v15, %v1216_v15  ;;  %v2088_v20 = vpack.c.bf16 %v1266_v16, %v1266_v16  ;;  %v921_v21 = vadd.f32 %v2713_v57, %v920_v17  ;;  %v1121_v22 = vadd.f32 %v2713_v57, %v1120_v18 }
 0x18b   :  { %v922_v23 = vpop.f32.mrf.mxu0  ;;  %v1122_v24 = vpop.f32.mrf.mxu1 }
 0x18c   :  { %1717 = vst.msk [vmem:[%s3223_s3 + $0x84] sm:$0xf] %vm1683_vm0, %v2038_v19  ;;  %1767 = vst.msk [vmem:[%s3223_s3 + $0x14c] sm:$0xf] %vm1683_vm0, %v2088_v20  ;;  %v1217_v25 = vmax.f32 %v921_v21, 0.0  ;;  %v1267_v26 = vmax.f32 %v1121_v22, 0.0 }
 0x18d   :  { %v923_v27 = vpop.f32.mrf.mxu0  ;;  %v1123_v28 = vpop.f32.mrf.mxu1 }
 0x18e   :  { %v2039_v29 = vpack.c.bf16 %v1217_v25, %v1217_v25  ;;  %v2089_v30 = vpack.c.bf16 %v1267_v26, %v1267_v26  ;;  %v924_v31 = vadd.f32 %v2713_v57, %v923_v27  ;;  %v1124_v32 = vadd.f32 %v2713_v57, %v1123_v28 }
 0x18f   :  { %v925_v33 = vpop.f32.mrf.mxu0  ;;  %v1125_v34 = vpop.f32.mrf.mxu1 }
 0x190   :  { %1718 = vst.msk [vmem:[%s3223_s3 + $0x88] sm:$0xf] %vm1683_vm0, %v2039_v29  ;;  %1768 = vst.msk [vmem:[%s3223_s3 + $0x150] sm:$0xf] %vm1683_vm0, %v2089_v30  ;;  %v1218_v35 = vmax.f32 %v924_v31, 0.0  ;;  %v1268_v36 = vmax.f32 %v1124_v32, 0.0 }
 0x191   :  { %v928_v37 = vpop.f32.mrf.mxu0  ;;  %v1128_v38 = vpop.f32.mrf.mxu1 }
 0x192   :  { %v2040_v39 = vpack.c.bf16 %v1218_v35, %v1218_v35  ;;  %v2090_v40 = vpack.c.bf16 %v1268_v36, %v1268_v36  ;;  %v929_v41 = vadd.f32 %v2713_v57, %v928_v37  ;;  %v1129_v42 = vadd.f32 %v2713_v57, %v1128_v38 }
 0x193   :  { %v930_v43 = vpop.f32.mrf.mxu0  ;;  %v1130_v44 = vpop.f32.mrf.mxu1 }
 0x194   :  { %1719 = vst.msk [vmem:[%s3223_s3 + $0x8c] sm:$0xf] %vm1683_vm0, %v2040_v39  ;;  %1769 = vst.msk [vmem:[%s3223_s3 + $0x154] sm:$0xf] %vm1683_vm0, %v2090_v40  ;;  %v1219_v45 = vmax.f32 %v929_v41, 0.0  ;;  %v1269_v46 = vmax.f32 %v1129_v42, 0.0 }
 0x195   :  { %v931_v47 = vpop.f32.mrf.mxu0  ;;  %v1131_v48 = vpop.f32.mrf.mxu1 }
 0x196   :  { %v2041_v49 = vpack.c.bf16 %v1219_v45, %v1219_v45  ;;  %v2091_v50 = vpack.c.bf16 %v1269_v46, %v1269_v46  ;;  %v932_v51 = vadd.f32 %v2713_v57, %v931_v47  ;;  %v1132_v52 = vadd.f32 %v2713_v57, %v1131_v48 }
 0x197   :  { %v933_v53 = vpop.f32.mrf.mxu0  ;;  %v1133_v54 = vpop.f32.mrf.mxu1 }
 0x198   :  { %1720 = vst.msk [vmem:[%s3223_s3 + $0x90] sm:$0xf] %vm1683_vm0, %v2041_v49  ;;  %1770 = vst.msk [vmem:[%s3223_s3 + $0x158] sm:$0xf] %vm1683_vm0, %v2091_v50  ;;  %v1220_v55 = vmax.f32 %v932_v51, 0.0  ;;  %v1270_v56 = vmax.f32 %v1132_v52, 0.0 }
 0x199   :  { %v936_v58 = vpop.f32.mrf.mxu0  ;;  %v1136_v59 = vpop.f32.mrf.mxu1 }
 0x19a   :  { %v2042_v60 = vpack.c.bf16 %v1220_v55, %v1220_v55  ;;  %v2092_v61 = vpack.c.bf16 %v1270_v56, %v1270_v56  ;;  %v937_v62 = vadd.f32 %v2713_v57, %v936_v58  ;;  %v1137_v63 = vadd.f32 %v2713_v57, %v1136_v59 }
 0x19b   :  { %v938_v0 = vpop.f32.mrf.mxu0  ;;  %v1138_v1 = vpop.f32.mrf.mxu1 }
 0x19c   :  { %1721 = vst.msk [vmem:[%s3223_s3 + $0x94] sm:$0xf] %vm1683_vm0, %v2042_v60  ;;  %1771 = vst.msk [vmem:[%s3223_s3 + $0x15c] sm:$0xf] %vm1683_vm0, %v2092_v61  ;;  %v1221_v2 = vmax.f32 %v937_v62, 0.0  ;;  %v1271_v3 = vmax.f32 %v1137_v63, 0.0 }
 0x19d   :  { %v939_v4 = vpop.f32.mrf.mxu0  ;;  %v1139_v5 = vpop.f32.mrf.mxu1 }
 0x19e   :  { %v2043_v6 = vpack.c.bf16 %v1221_v2, %v1221_v2  ;;  %v2093_v7 = vpack.c.bf16 %v1271_v3, %v1271_v3  ;;  %v940_v8 = vadd.f32 %v2713_v57, %v939_v4  ;;  %v1140_v9 = vadd.f32 %v2713_v57, %v1139_v5 }
 0x19f   :  { %v941_v10 = vpop.f32.mrf.mxu0  ;;  %v1141_v11 = vpop.f32.mrf.mxu1 }
 0x1a0   :  { %1722 = vst.msk [vmem:[%s3223_s3 + $0x98] sm:$0xf] %vm1683_vm0, %v2043_v6  ;;  %1772 = vst.msk [vmem:[%s3223_s3 + $0x160] sm:$0xf] %vm1683_vm0, %v2093_v7  ;;  %v1222_v12 = vmax.f32 %v940_v8, 0.0  ;;  %v1272_v13 = vmax.f32 %v1140_v9, 0.0 }
 0x1a1   :  { %v944_v14 = vpop.f32.mrf.mxu0  ;;  %v1144_v15 = vpop.f32.mrf.mxu1 }
 0x1a2   :  { %v2044_v16 = vpack.c.bf16 %v1222_v12, %v1222_v12  ;;  %v2094_v17 = vpack.c.bf16 %v1272_v13, %v1272_v13  ;;  %v945_v18 = vadd.f32 %v2713_v57, %v944_v14  ;;  %v1145_v19 = vadd.f32 %v2713_v57, %v1144_v15 }
 0x1a3   :  { %v946_v20 = vpop.f32.mrf.mxu0  ;;  %v1146_v21 = vpop.f32.mrf.mxu1 }
 0x1a4   :  { %1723 = vst.msk [vmem:[%s3223_s3 + $0x9c] sm:$0xf] %vm1683_vm0, %v2044_v16  ;;  %1773 = vst.msk [vmem:[%s3223_s3 + $0x164] sm:$0xf] %vm1683_vm0, %v2094_v17  ;;  %v1223_v22 = vmax.f32 %v945_v18, 0.0  ;;  %v1273_v23 = vmax.f32 %v1145_v19, 0.0 }
 0x1a5   :  { %v947_v24 = vpop.f32.mrf.mxu0  ;;  %v1147_v25 = vpop.f32.mrf.mxu1 }
 0x1a6   :  { %v2045_v26 = vpack.c.bf16 %v1223_v22, %v1223_v22  ;;  %v2095_v27 = vpack.c.bf16 %v1273_v23, %v1273_v23  ;;  %v948_v28 = vadd.f32 %v2713_v57, %v947_v24  ;;  %v1148_v29 = vadd.f32 %v2713_v57, %v1147_v25 }
 0x1a7   :  { %v949_v30 = vpop.f32.mrf.mxu0  ;;  %v1149_v31 = vpop.f32.mrf.mxu1 }
 0x1a8   :  { %1724 = vst.msk [vmem:[%s3223_s3 + $0xa0] sm:$0xf] %vm1683_vm0, %v2045_v26  ;;  %1774 = vst.msk [vmem:[%s3223_s3 + $0x168] sm:$0xf] %vm1683_vm0, %v2095_v27  ;;  %v1224_v32 = vmax.f32 %v948_v28, 0.0  ;;  %v1274_v33 = vmax.f32 %v1148_v29, 0.0 }
 0x1a9   :  { %v952_v34 = vpop.f32.mrf.mxu0  ;;  %v1152_v35 = vpop.f32.mrf.mxu1 }
 0x1aa   :  { %v2046_v36 = vpack.c.bf16 %v1224_v32, %v1224_v32  ;;  %v2096_v37 = vpack.c.bf16 %v1274_v33, %v1274_v33  ;;  %v953_v38 = vadd.f32 %v2713_v57, %v952_v34  ;;  %v1153_v39 = vadd.f32 %v2713_v57, %v1152_v35  ;;  %v3140_v57 = vld [vmem:[%s3222_s2] ss:$0 sm:$0xff] }
 0x1ab   :  { %v954_v40 = vpop.f32.mrf.mxu0  ;;  %v1154_v41 = vpop.f32.mrf.mxu1 }
 0x1ac   :  { %1725 = vst.msk [vmem:[%s3223_s3 + $0xa4] sm:$0xf] %vm1683_vm0, %v2046_v36  ;;  %1775 = vst.msk [vmem:[%s3223_s3 + $0x16c] sm:$0xf] %vm1683_vm0, %v2096_v37  ;;  %v1225_v42 = vmax.f32 %v953_v38, 0.0  ;;  %v1275_v43 = vmax.f32 %v1153_v39, 0.0 }
 0x1ad   :  { %v955_v44 = vpop.f32.mrf.mxu0  ;;  %v1155_v45 = vpop.f32.mrf.mxu1 }
 0x1ae   :  { %v2047_v46 = vpack.c.bf16 %v1225_v42, %v1225_v42  ;;  %v2097_v47 = vpack.c.bf16 %v1275_v43, %v1275_v43  ;;  %v956_v48 = vadd.f32 %v3140_v57, %v955_v44  ;;  %v1156_v49 = vadd.f32 %v3140_v57, %v1155_v45 }
 0x1af   :  { %v957_v50 = vpop.f32.mrf.mxu0  ;;  %v1157_v51 = vpop.f32.mrf.mxu1 }
 0x1b0   :  { %1726 = vst.msk [vmem:[%s3223_s3 + $0xa8] sm:$0xf] %vm1683_vm0, %v2047_v46  ;;  %1776 = vst.msk [vmem:[%s3223_s3 + $0x170] sm:$0xf] %vm1683_vm0, %v2097_v47  ;;  %v1226_v52 = vmax.f32 %v956_v48, 0.0  ;;  %v1276_v53 = vmax.f32 %v1156_v49, 0.0 }
 0x1b1   :  { %v960_v54 = vpop.f32.mrf.mxu0  ;;  %v1160_v55 = vpop.f32.mrf.mxu1 }
 0x1b2   :  { %v2048_v56 = vpack.c.bf16 %v1226_v52, %v1226_v52  ;;  %v2098_v58 = vpack.c.bf16 %v1276_v53, %v1276_v53  ;;  %v961_v59 = vadd.f32 %v3140_v57, %v960_v54  ;;  %v1161_v60 = vadd.f32 %v3140_v57, %v1160_v55 }
 0x1b3   :  { %v962_v61 = vpop.f32.mrf.mxu0  ;;  %v1162_v62 = vpop.f32.mrf.mxu1 }
 0x1b4   :  { %1727 = vst.msk [vmem:[%s3223_s3 + $0xac] sm:$0xf] %vm1683_vm0, %v2048_v56  ;;  %1777 = vst.msk [vmem:[%s3223_s3 + $0x174] sm:$0xf] %vm1683_vm0, %v2098_v58  ;;  %v1227_v63 = vmax.f32 %v961_v59, 0.0  ;;  %v1277_v0 = vmax.f32 %v1161_v60, 0.0 }
 0x1b5   :  { %v963_v1 = vpop.f32.mrf.mxu0  ;;  %v1163_v2 = vpop.f32.mrf.mxu1 }
 0x1b6   :  { %v2049_v3 = vpack.c.bf16 %v1227_v63, %v1227_v63  ;;  %v2099_v4 = vpack.c.bf16 %v1277_v0, %v1277_v0  ;;  %v964_v5 = vadd.f32 %v3140_v57, %v963_v1  ;;  %v1164_v6 = vadd.f32 %v3140_v57, %v1163_v2 }
 0x1b7   :  { %v965_v7 = vpop.f32.mrf.mxu0  ;;  %v1165_v8 = vpop.f32.mrf.mxu1 }
 0x1b8   :  { %1728 = vst.msk [vmem:[%s3223_s3 + $0xb0] sm:$0xf] %vm1683_vm0, %v2049_v3  ;;  %1778 = vst.msk [vmem:[%s3223_s3 + $0x178] sm:$0xf] %vm1683_vm0, %v2099_v4  ;;  %v1228_v9 = vmax.f32 %v964_v5, 0.0  ;;  %v1278_v10 = vmax.f32 %v1164_v6, 0.0 }
 0x1b9   :  { %v968_v11 = vpop.f32.mrf.mxu0  ;;  %v1168_v12 = vpop.f32.mrf.mxu1 }
 0x1ba   :  { %v2050_v13 = vpack.c.bf16 %v1228_v9, %v1228_v9  ;;  %v2100_v14 = vpack.c.bf16 %v1278_v10, %v1278_v10  ;;  %v969_v15 = vadd.f32 %v3140_v57, %v968_v11  ;;  %v1169_v16 = vadd.f32 %v3140_v57, %v1168_v12 }
 0x1bb   :  { %v970_v17 = vpop.f32.mrf.mxu0  ;;  %v1170_v18 = vpop.f32.mrf.mxu1 }
 0x1bc   :  { %1729 = vst.msk [vmem:[%s3223_s3 + $0xb4] sm:$0xf] %vm1683_vm0, %v2050_v13  ;;  %1779 = vst.msk [vmem:[%s3223_s3 + $0x17c] sm:$0xf] %vm1683_vm0, %v2100_v14  ;;  %v1229_v19 = vmax.f32 %v969_v15, 0.0  ;;  %v1279_v20 = vmax.f32 %v1169_v16, 0.0 }
 0x1bd   :  { %v971_v21 = vpop.f32.mrf.mxu0  ;;  %v1171_v22 = vpop.f32.mrf.mxu1 }
 0x1be   :  { %v2051_v23 = vpack.c.bf16 %v1229_v19, %v1229_v19  ;;  %v2101_v24 = vpack.c.bf16 %v1279_v20, %v1279_v20  ;;  %v972_v25 = vadd.f32 %v3140_v57, %v971_v21  ;;  %v1172_v26 = vadd.f32 %v3140_v57, %v1171_v22 }
 0x1bf   :  { %v973_v27 = vpop.f32.mrf.mxu0  ;;  %v1173_v28 = vpop.f32.mrf.mxu1 }
 0x1c0   :  { %1730 = vst.msk [vmem:[%s3223_s3 + $0xb8] sm:$0xf] %vm1683_vm0, %v2051_v23  ;;  %1780 = vst.msk [vmem:[%s3223_s3 + $0x180] sm:$0xf] %vm1683_vm0, %v2101_v24  ;;  %v1230_v29 = vmax.f32 %v972_v25, 0.0  ;;  %v1280_v30 = vmax.f32 %v1172_v26, 0.0 }
 0x1c1   :  { %v976_v31 = vpop.f32.mrf.mxu0  ;;  %v1176_v32 = vpop.f32.mrf.mxu1 }
 0x1c2   :  { %v2052_v33 = vpack.c.bf16 %v1230_v29, %v1230_v29  ;;  %v2102_v34 = vpack.c.bf16 %v1280_v30, %v1280_v30  ;;  %v977_v35 = vadd.f32 %v3140_v57, %v976_v31  ;;  %v1177_v36 = vadd.f32 %v3140_v57, %v1176_v32 }
 0x1c3   :  { %v978_v37 = vpop.f32.mrf.mxu0  ;;  %v1178_v38 = vpop.f32.mrf.mxu1 }
 0x1c4   :  { %1731 = vst.msk [vmem:[%s3223_s3 + $0xbc] sm:$0xf] %vm1683_vm0, %v2052_v33  ;;  %1781 = vst.msk [vmem:[%s3223_s3 + $0x184] sm:$0xf] %vm1683_vm0, %v2102_v34  ;;  %v1231_v39 = vmax.f32 %v977_v35, 0.0  ;;  %v1281_v40 = vmax.f32 %v1177_v36, 0.0 }
 0x1c5   :  { %v979_v41 = vpop.f32.mrf.mxu0  ;;  %v1179_v42 = vpop.f32.mrf.mxu1 }
 0x1c6   :  { %v2053_v43 = vpack.c.bf16 %v1231_v39, %v1231_v39  ;;  %v2103_v44 = vpack.c.bf16 %v1281_v40, %v1281_v40  ;;  %v980_v45 = vadd.f32 %v3140_v57, %v979_v41  ;;  %v1180_v46 = vadd.f32 %v3140_v57, %v1179_v42 }
 0x1c7   :  { %v981_v47 = vpop.f32.mrf.mxu0  ;;  %v1181_v48 = vpop.f32.mrf.mxu1 }
 0x1c8   :  { %1732 = vst.msk [vmem:[%s3223_s3 + $0xc0] sm:$0xf] %vm1683_vm0, %v2053_v43  ;;  %1782 = vst.msk [vmem:[%s3223_s3 + $0x188] sm:$0xf] %vm1683_vm0, %v2103_v44  ;;  %v1232_v49 = vmax.f32 %v980_v45, 0.0  ;;  %v1282_v50 = vmax.f32 %v1180_v46, 0.0 }
 0x1ca   :  { %v2054_v51 = vpack.c.bf16 %v1232_v49, %v1232_v49  ;;  %v2104_v52 = vpack.c.bf16 %v1282_v50, %v1282_v50 }
 0x1cc   :  { %1733 = vst.msk [vmem:[%s3223_s3 + $0xc4] sm:$0xf] %vm1683_vm0, %v2054_v51  ;;  %1783 = vst.msk [vmem:[%s3223_s3 + $0x18c] sm:$0xf] %vm1683_vm0, %v2104_v52 }

// kernel: cnn_depth_policy_forward.6
= control target key start
LH: loop header
LB: loop body
LE: loop exit
PB: predicated region body
PF: predicated region fallthrough
CT: control target
= control target key end

     0   :  { %vm744_vm0 = vcmask 519168   ;;  %s1367_s1 = inlined_call_operand.vmem [shape: bf16[512,64], index: 1, kind: input, shape index: {}]   ;;  %s1368_s0 = inlined_call_operand.vmem [shape: bf16[128,512], index: 0, kind: input, shape index: {}]   ;;  %s1369_s2 = inlined_call_operand.vmem [shape: f32[1,64], index: 2, kind: input, shape index: {}]   ;;  %s1370_s3 = inlined_call_operand.vmem [shape: bf16[128,64], index: 3, kind: output, shape index: {}]  }
   0x1   :  { %v990_v0 = vld [vmem:[%s1367_s1 + $0x78] sm:$0xff]   ;;  %v994_v4 = vld [vmem:[%s1367_s1 + $0x70] sm:$0xff]   ;;  %v998_v8 = vld [vmem:[%s1367_s1 + $0x68] sm:$0xff]  }
   0x2   :  { %v991_v1 = vld [vmem:[%s1367_s1 + $0xf8] sm:$0xff]   ;;  %862 = vmatprep.subr.bf16.mxu0 %v990_v0  ;;  %v995_v5 = vld [vmem:[%s1367_s1 + $0xf0] sm:$0xff]   ;;  %v999_v9 = vld [vmem:[%s1367_s1 + $0xe8] sm:$0xff]  }
   0x3   :  { %v992_v2 = vld [vmem:[%s1367_s1 + $0x38] sm:$0xff]   ;;  %926 = vmatprep.subr.bf16.mxu1 %v991_v1  ;;  %v996_v6 = vld [vmem:[%s1367_s1 + $0x30] sm:$0xff]   ;;  %v1000_v10 = vld [vmem:[%s1367_s1 + $0x28] sm:$0xff]  }
   0x4   :  { %v993_v3 = vld [vmem:[%s1367_s1 + $0xb8] sm:$0xff]   ;;  %863 = vmatpush3.bf16.msra.mxu0 %v992_v2  ;;  %v997_v7 = vld [vmem:[%s1367_s1 + $0xb0] sm:$0xff]   ;;  %v1001_v11 = vld [vmem:[%s1367_s1 + $0xa8] sm:$0xff]  }
   0x5   :  { %927 = vmatpush3.bf16.msra.mxu1 %v993_v3  ;;  %864 = vmatprep.subr.bf16.mxu0 %v994_v4  ;;  %v1002_v12 = vld [vmem:[%s1367_s1 + $0x60] sm:$0xff]   ;;  %v1006_v16 = vld [vmem:[%s1367_s1 + $0x58] sm:$0xff]   ;;  %v1010_v20 = vld [vmem:[%s1367_s1 + $0x50] sm:$0xff]  }
   0x6   :  { %928 = vmatprep.subr.bf16.mxu1 %v995_v5  ;;  %v1003_v13 = vld [vmem:[%s1367_s1 + $0xe0] sm:$0xff]   ;;  %v1007_v17 = vld [vmem:[%s1367_s1 + $0xd8] sm:$0xff]   ;;  %v1011_v21 = vld [vmem:[%s1367_s1 + $0xd0] sm:$0xff]  }
   0x7   :  { %v1004_v14 = vld [vmem:[%s1367_s1 + $0x20] sm:$0xff]   ;;  %v1008_v18 = vld [vmem:[%s1367_s1 + $0x18] sm:$0xff]   ;;  %v1012_v22 = vld [vmem:[%s1367_s1 + $0x10] sm:$0xff]  }
   0x8   :  { %865 = vmatpush3.bf16.msra.mxu0 %v996_v6  ;;  %v1005_v15 = vld [vmem:[%s1367_s1 + $0xa0] sm:$0xff]   ;;  %v1009_v19 = vld [vmem:[%s1367_s1 + $0x98] sm:$0xff]   ;;  %v1013_v23 = vld [vmem:[%s1367_s1 + $0x90] sm:$0xff]  }
   0x9   :  { %929 = vmatpush3.bf16.msra.mxu1 %v997_v7  ;;  %866 = vmatprep.subr.bf16.mxu0 %v998_v8  ;;  %v1014_v24 = vld [vmem:[%s1367_s1 + $0x48] sm:$0xff]   ;;  %v1018_v28 = vld [vmem:[%s1367_s1 + $0x40] sm:$0xff]  }
   0xa   :  { %930 = vmatprep.subr.bf16.mxu1 %v999_v9  ;;  %v1015_v25 = vld [vmem:[%s1367_s1 + $0xc8] sm:$0xff]   ;;  %v1019_v29 = vld [vmem:[%s1367_s1 + $0xc0] sm:$0xff]  }
   0xb   :  { %v1016_v26 = vld [vmem:[%s1367_s1 + $0x8] sm:$0xff]   ;;  %v1020_v30 = vld [vmem:[%s1367_s1] sm:$0xff]  }
   0xc   :  { %867 = vmatpush3.bf16.msra.mxu0 %v1000_v10  ;;  %v1017_v27 = vld [vmem:[%s1367_s1 + $0x88] sm:$0xff]   ;;  %v1021_v31 = vld [vmem:[%s1367_s1 + $0x80] sm:$0xff]  }
   0xd   :  { %931 = vmatpush3.bf16.msra.mxu1 %v1001_v11  ;;  %868 = vmatprep.subr.bf16.mxu0 %v1002_v12  ;;  %v1022_v32 = vld [vmem:[%s1368_s0] ss:$16 sps:$4 sm:$0xff]   ;;  %v1024_v33 = vld [vmem:[%s1368_s0 + $0x4] ss:$16 sps:$4 sm:$0xff]   ;;  %v1025_v34 = vld [vmem:[%s1368_s0 + $0x8] ss:$16 sps:$4 sm:$0xff]  }
   0xe   :  { %932 = vmatprep.subr.bf16.mxu1 %v1003_v13  ;;  %v1027_v35 = vld [vmem:[%s1368_s0 + $0xc] ss:$16 sps:$4 sm:$0xff]   ;;  %502 = vmatprep.mubr.bf16.mxu0 %v1024_v33  ;;  %v1028_v36 = vld [vmem:[%s1368_s0 + $0x24] ss:$16 sps:$4 sm:$0xff]   ;;  %v1032_v38 = vld [vmem:[%s1368_s0 + $0x20] ss:$16 sps:$4 sm:$0xff]  }
   0xf   :  { %599 = vmatprep.mubr.bf16.mxu1 %v1027_v35  ;;  %v1030_v37 = vld [vmem:[%s1368_s0 + $0x2c] ss:$16 sps:$4 sm:$0xff]   ;;  %v1033_v39 = vld [vmem:[%s1368_s0 + $0x28] ss:$16 sps:$4 sm:$0xff]   ;;  %v1034_v40 = vld [vmem:[%s1368_s0 + $0x44] ss:$16 sps:$4 sm:$0xff]  }
  0x10   :  { %869 = vmatpush3.bf16.msra.mxu0 %v1004_v14  ;;  %v1036_v41 = vld [vmem:[%s1368_s0 + $0x4c] ss:$16 sps:$4 sm:$0xff]   ;;  %v1038_v42 = vld [vmem:[%s1368_s0 + $0x40] ss:$16 sps:$4 sm:$0xff]   ;;  %v1039_v43 = vld [vmem:[%s1368_s0 + $0x48] ss:$16 sps:$4 sm:$0xff]  }
  0x11   :  { %933 = vmatpush3.bf16.msra.mxu1 %v1005_v15  ;;  %870 = vmatprep.subr.bf16.mxu0 %v1006_v16  ;;  %v1040_v44 = vld [vmem:[%s1368_s0 + $0x64] ss:$16 sps:$4 sm:$0xff]   ;;  %v1042_v45 = vld [vmem:[%s1368_s0 + $0x6c] ss:$16 sps:$4 sm:$0xff]   ;;  %v1044_v46 = vld [vmem:[%s1368_s0 + $0x60] ss:$16 sps:$4 sm:$0xff]  }
  0x12   :  { %934 = vmatprep.subr.bf16.mxu1 %v1007_v17  ;;  %v1045_v47 = vld [vmem:[%s1368_s0 + $0x68] ss:$16 sps:$4 sm:$0xff]   ;;  %v1046_v48 = vld [vmem:[%s1368_s0 + $0x84] ss:$16 sps:$4 sm:$0xff]   ;;  %v1048_v49 = vld [vmem:[%s1368_s0 + $0x8c] ss:$16 sps:$4 sm:$0xff]  }
  0x13   :  { %v1050_v50 = vld [vmem:[%s1368_s0 + $0x80] ss:$16 sps:$4 sm:$0xff]   ;;  %v1051_v51 = vld [vmem:[%s1368_s0 + $0x88] ss:$16 sps:$4 sm:$0xff]   ;;  %v1052_v52 = vld [vmem:[%s1368_s0 + $0xa4] ss:$16 sps:$4 sm:$0xff]  }
  0x14   :  { %871 = vmatpush3.bf16.msra.mxu0 %v1008_v18  ;;  %v1054_v53 = vld [vmem:[%s1368_s0 + $0xac] ss:$16 sps:$4 sm:$0xff]   ;;  %v1056_v54 = vld [vmem:[%s1368_s0 + $0xa0] ss:$16 sps:$4 sm:$0xff]   ;;  %v1057_v55 = vld [vmem:[%s1368_s0 + $0xa8] ss:$16 sps:$4 sm:$0xff]  }
  0x15   :  { %935 = vmatpush3.bf16.msra.mxu1 %v1009_v19  ;;  %872 = vmatprep.subr.bf16.mxu0 %v1010_v20  ;;  %v1058_v56 = vld [vmem:[%s1368_s0 + $0xc4] ss:$16 sps:$4 sm:$0xff]   ;;  %v1060_v57 = vld [vmem:[%s1368_s0 + $0xcc] ss:$16 sps:$4 sm:$0xff]   ;;  %v1062_v58 = vld [vmem:[%s1368_s0 + $0xc0] ss:$16 sps:$4 sm:$0xff]  }
  0x16   :  { %936 = vmatprep.subr.bf16.mxu1 %v1011_v21  ;;  %v1063_v59 = vld [vmem:[%s1368_s0 + $0xc8] ss:$16 sps:$4 sm:$0xff]   ;;  %v1064_v60 = vld [vmem:[%s1368_s0 + $0xe4] ss:$16 sps:$4 sm:$0xff]   ;;  %v1066_v61 = vld [vmem:[%s1368_s0 + $0xec] ss:$16 sps:$4 sm:$0xff]  }
  0x17   :  { %v1068_v62 = vld [vmem:[%s1368_s0 + $0xe0] ss:$16 sps:$4 sm:$0xff]   ;;  %v1069_v63 = vld [vmem:[%s1368_s0 + $0xe8] ss:$16 sps:$4 sm:$0xff]  }
  0x18   :  { %873 = vmatpush3.bf16.msra.mxu0 %v1012_v22  ;;  %v1285_v2 = vld [vmem:[%s1369_s2] ss:$0 sm:$0xff] }
  0x19   :  { %937 = vmatpush3.bf16.msra.mxu1 %v1013_v23  ;;  %874 = vmatprep.subr.bf16.mxu0 %v1014_v24 }
  0x1a   :  { %938 = vmatprep.subr.bf16.mxu1 %v1015_v25 }
  0x1c   :  { %875 = vmatpush3.bf16.msra.mxu0 %v1016_v26 }
  0x1d   :  { %939 = vmatpush3.bf16.msra.mxu1 %v1017_v27  ;;  %876 = vmatprep.subr.bf16.mxu0 %v1018_v28 }
  0x1e   :  { %940 = vmatprep.subr.bf16.mxu1 %v1019_v29 }
  0x20   :  { %877 = vmatpush3.bf16.msra.mxu0 %v1020_v30 }
  0x21   :  { %941 = vmatpush3.bf16.msra.mxu1 %v1021_v31 }
  0x23   :  { %503 = vmatmul.mubr.bf16.vlgmr.msra.gmra.mxu0 %v1022_v32 }
  0x24   :  { %600 = vmatmul.mubr.bf16.vlgmr.msra.gmra.mxu1 %v1025_v34  ;;  %510 = vmatprep.mubr.bf16.mxu0 %v1028_v36 }
  0x25   :  { %607 = vmatprep.mubr.bf16.mxu1 %v1030_v37 }
  0x2b   :  { %511 = vmatmul.mubr.bf16.gmra.mxu0 %v1032_v38 }
  0x2c   :  { %608 = vmatmul.mubr.bf16.gmra.mxu1 %v1033_v39  ;;  %518 = vmatprep.mubr.bf16.mxu0 %v1034_v40 }
  0x2d   :  { %615 = vmatprep.mubr.bf16.mxu1 %v1036_v41 }
  0x33   :  { %519 = vmatmul.mubr.bf16.gmra.mxu0 %v1038_v42 }
  0x34   :  { %616 = vmatmul.mubr.bf16.gmra.mxu1 %v1039_v43  ;;  %526 = vmatprep.mubr.bf16.mxu0 %v1040_v44 }
  0x35   :  { %623 = vmatprep.mubr.bf16.mxu1 %v1042_v45 }
  0x3b   :  { %527 = vmatmul.mubr.bf16.gmra.mxu0 %v1044_v46 }
  0x3c   :  { %624 = vmatmul.mubr.bf16.gmra.mxu1 %v1045_v47  ;;  %534 = vmatprep.mubr.bf16.mxu0 %v1046_v48 }
  0x3d   :  { %631 = vmatprep.mubr.bf16.mxu1 %v1048_v49 }
  0x43   :  { %535 = vmatmul.mubr.bf16.gmra.mxu0 %v1050_v50 }
  0x44   :  { %632 = vmatmul.mubr.bf16.gmra.mxu1 %v1051_v51  ;;  %542 = vmatprep.mubr.bf16.mxu0 %v1052_v52 }
  0x45   :  { %639 = vmatprep.mubr.bf16.mxu1 %v1054_v53 }
  0x4b   :  { %543 = vmatmul.mubr.bf16.gmra.mxu0 %v1056_v54 }
  0x4c   :  { %640 = vmatmul.mubr.bf16.gmra.mxu1 %v1057_v55  ;;  %550 = vmatprep.mubr.bf16.mxu0 %v1058_v56 }
  0x4d   :  { %647 = vmatprep.mubr.bf16.mxu1 %v1060_v57 }
  0x53   :  { %551 = vmatmul.mubr.bf16.gmra.mxu0 %v1062_v58 }
  0x54   :  { %648 = vmatmul.mubr.bf16.gmra.mxu1 %v1063_v59  ;;  %558 = vmatprep.mubr.bf16.mxu0 %v1064_v60 }
  0x55   :  { %655 = vmatprep.mubr.bf16.mxu1 %v1066_v61 }
  0x5b   :  { %559 = vmatmul.mubr.bf16.gmra.mxu0 %v1068_v62 }
  0x5c   :  { %656 = vmatmul.mubr.bf16.gmra.mxu1 %v1069_v63 }
  0xe3   :  { %v878_v0 = vpop.f32.mrf.mxu0 }
  0xe4   :  { %v942_v1 = vpop.f32.mrf.mxu1 }
  0xe5   :  { %v879_v3 = vpop.f32.mrf.mxu0 }
  0xe6   :  { %v880_v4 = vadd.f32 %v879_v3, %v878_v0  ;;  %v943_v5 = vpop.f32.mrf.mxu1 }
  0xe7   :  { %v881_v6 = vpop.f32.mrf.mxu0  ;;  %v944_v8 = vadd.f32 %v943_v5, %v942_v1 }
  0xe8   :  { %v505_v7 = vadd.f32 %v880_v4, %v1285_v2  ;;  %v945_v9 = vpop.f32.mrf.mxu1 }
  0xe9   :  { %v882_v10 = vpop.f32.mrf.mxu0 }
  0xea   :  { %v602_v11 = vadd.f32 %v944_v8, %v505_v7  ;;  %v883_v12 = vadd.f32 %v882_v10, %v881_v6  ;;  %v946_v13 = vpop.f32.mrf.mxu1 }
  0xeb   :  { %v884_v14 = vpop.f32.mrf.mxu0  ;;  %v947_v17 = vadd.f32 %v946_v13, %v945_v9 }
  0xec   :  { %v664_v15 = vmax.f32 %v602_v11, 0.0  ;;  %v508_v16 = vadd.f32 %v883_v12, %v1285_v2  ;;  %v948_v18 = vpop.f32.mrf.mxu1 }
  0xed   :  { %v885_v19 = vpop.f32.mrf.mxu0 }
  0xee   :  { %v846_v20 = vpack.c.bf16 %v664_v15, %v664_v15  ;;  %v605_v21 = vadd.f32 %v947_v17, %v508_v16  ;;  %v886_v22 = vadd.f32 %v885_v19, %v884_v14  ;;  %v949_v23 = vpop.f32.mrf.mxu1 }
  0xef   :  { %v887_v24 = vpop.f32.mrf.mxu0  ;;  %v950_v27 = vadd.f32 %v949_v23, %v948_v18 }
  0xf0   :  { %745 = vst.msk [vmem:[%s1370_s3] sm:$0xf] %vm744_vm0, %v846_v20  ;;  %v665_v25 = vmax.f32 %v605_v21, 0.0  ;;  %v513_v26 = vadd.f32 %v886_v22, %v1285_v2  ;;  %v951_v28 = vpop.f32.mrf.mxu1 }
  0xf1   :  { %v888_v29 = vpop.f32.mrf.mxu0 }
  0xf2   :  { %v847_v30 = vpack.c.bf16 %v665_v25, %v665_v25  ;;  %v610_v31 = vadd.f32 %v950_v27, %v513_v26  ;;  %v889_v32 = vadd.f32 %v888_v29, %v887_v24  ;;  %v952_v33 = vpop.f32.mrf.mxu1 }
  0xf3   :  { %v890_v34 = vpop.f32.mrf.mxu0  ;;  %v953_v37 = vadd.f32 %v952_v33, %v951_v28 }
  0xf4   :  { %746 = vst.msk [vmem:[%s1370_s3 + $0x4] sm:$0xf] %vm744_vm0, %v847_v30  ;;  %v666_v35 = vmax.f32 %v610_v31, 0.0  ;;  %v516_v36 = vadd.f32 %v889_v32, %v1285_v2  ;;  %v954_v38 = vpop.f32.mrf.mxu1 }
  0xf5   :  { %v891_v39 = vpop.f32.mrf.mxu0 }
  0xf6   :  { %v848_v40 = vpack.c.bf16 %v666_v35, %v666_v35  ;;  %v613_v41 = vadd.f32 %v953_v37, %v516_v36  ;;  %v892_v42 = vadd.f32 %v891_v39, %v890_v34  ;;  %v955_v43 = vpop.f32.mrf.mxu1 }
  0xf7   :  { %v893_v44 = vpop.f32.mrf.mxu0  ;;  %v956_v47 = vadd.f32 %v955_v43, %v954_v38 }
  0xf8   :  { %747 = vst.msk [vmem:[%s1370_s3 + $0x8] sm:$0xf] %vm744_vm0, %v848_v40  ;;  %v667_v45 = vmax.f32 %v613_v41, 0.0  ;;  %v521_v46 = vadd.f32 %v892_v42, %v1285_v2  ;;  %v957_v48 = vpop.f32.mrf.mxu1 }
  0xf9   :  { %v894_v49 = vpop.f32.mrf.mxu0 }
  0xfa   :  { %v849_v50 = vpack.c.bf16 %v667_v45, %v667_v45  ;;  %v618_v51 = vadd.f32 %v956_v47, %v521_v46  ;;  %v895_v52 = vadd.f32 %v894_v49, %v893_v44  ;;  %v958_v53 = vpop.f32.mrf.mxu1 }
  0xfb   :  { %v896_v54 = vpop.f32.mrf.mxu0  ;;  %v959_v57 = vadd.f32 %v958_v53, %v957_v48 }
  0xfc   :  { %748 = vst.msk [vmem:[%s1370_s3 + $0xc] sm:$0xf] %vm744_vm0, %v849_v50  ;;  %v668_v55 = vmax.f32 %v618_v51, 0.0  ;;  %v524_v56 = vadd.f32 %v895_v52, %v1285_v2  ;;  %v960_v58 = vpop.f32.mrf.mxu1 }
  0xfd   :  { %v897_v59 = vpop.f32.mrf.mxu0 }
  0xfe   :  { %v850_v60 = vpack.c.bf16 %v668_v55, %v668_v55  ;;  %v621_v61 = vadd.f32 %v959_v57, %v524_v56  ;;  %v898_v62 = vadd.f32 %v897_v59, %v896_v54  ;;  %v961_v63 = vpop.f32.mrf.mxu1 }
  0xff   :  { %v899_v0 = vpop.f32.mrf.mxu0  ;;  %v962_v4 = vadd.f32 %v961_v63, %v960_v58 }
 0x100   :  { %749 = vst.msk [vmem:[%s1370_s3 + $0x10] sm:$0xf] %vm744_vm0, %v850_v60  ;;  %v669_v1 = vmax.f32 %v621_v61, 0.0  ;;  %v529_v3 = vadd.f32 %v898_v62, %v1285_v2  ;;  %v963_v5 = vpop.f32.mrf.mxu1 }
 0x101   :  { %v900_v6 = vpop.f32.mrf.mxu0 }
 0x102   :  { %v851_v7 = vpack.c.bf16 %v669_v1, %v669_v1  ;;  %v626_v8 = vadd.f32 %v962_v4, %v529_v3  ;;  %v901_v9 = vadd.f32 %v900_v6, %v899_v0  ;;  %v964_v10 = vpop.f32.mrf.mxu1 }
 0x103   :  { %v902_v11 = vpop.f32.mrf.mxu0  ;;  %v965_v14 = vadd.f32 %v964_v10, %v963_v5 }
 0x104   :  { %750 = vst.msk [vmem:[%s1370_s3 + $0x14] sm:$0xf] %vm744_vm0, %v851_v7  ;;  %v670_v12 = vmax.f32 %v626_v8, 0.0  ;;  %v532_v13 = vadd.f32 %v901_v9, %v1285_v2  ;;  %v966_v15 = vpop.f32.mrf.mxu1 }
 0x105   :  { %v903_v16 = vpop.f32.mrf.mxu0 }
 0x106   :  { %v852_v17 = vpack.c.bf16 %v670_v12, %v670_v12  ;;  %v629_v18 = vadd.f32 %v965_v14, %v532_v13  ;;  %v904_v19 = vadd.f32 %v903_v16, %v902_v11  ;;  %v967_v20 = vpop.f32.mrf.mxu1 }
 0x107   :  { %v905_v21 = vpop.f32.mrf.mxu0  ;;  %v968_v24 = vadd.f32 %v967_v20, %v966_v15 }
 0x108   :  { %751 = vst.msk [vmem:[%s1370_s3 + $0x18] sm:$0xf] %vm744_vm0, %v852_v17  ;;  %v671_v22 = vmax.f32 %v629_v18, 0.0  ;;  %v537_v23 = vadd.f32 %v904_v19, %v1285_v2  ;;  %v969_v25 = vpop.f32.mrf.mxu1 }
 0x109   :  { %v906_v26 = vpop.f32.mrf.mxu0 }
 0x10a   :  { %v853_v27 = vpack.c.bf16 %v671_v22, %v671_v22  ;;  %v634_v28 = vadd.f32 %v968_v24, %v537_v23  ;;  %v907_v29 = vadd.f32 %v906_v26, %v905_v21  ;;  %v970_v30 = vpop.f32.mrf.mxu1 }
 0x10b   :  { %v908_v31 = vpop.f32.mrf.mxu0  ;;  %v971_v34 = vadd.f32 %v970_v30, %v969_v25 }
 0x10c   :  { %752 = vst.msk [vmem:[%s1370_s3 + $0x1c] sm:$0xf] %vm744_vm0, %v853_v27  ;;  %v672_v32 = vmax.f32 %v634_v28, 0.0  ;;  %v540_v33 = vadd.f32 %v907_v29, %v1285_v2  ;;  %v972_v35 = vpop.f32.mrf.mxu1 }
 0x10d   :  { %v909_v36 = vpop.f32.mrf.mxu0 }
 0x10e   :  { %v854_v37 = vpack.c.bf16 %v672_v32, %v672_v32  ;;  %v637_v38 = vadd.f32 %v971_v34, %v540_v33  ;;  %v910_v39 = vadd.f32 %v909_v36, %v908_v31  ;;  %v973_v40 = vpop.f32.mrf.mxu1 }
 0x10f   :  { %v911_v41 = vpop.f32.mrf.mxu0  ;;  %v974_v44 = vadd.f32 %v973_v40, %v972_v35 }
 0x110   :  { %753 = vst.msk [vmem:[%s1370_s3 + $0x20] sm:$0xf] %vm744_vm0, %v854_v37  ;;  %v673_v42 = vmax.f32 %v637_v38, 0.0  ;;  %v545_v43 = vadd.f32 %v910_v39, %v1285_v2  ;;  %v975_v45 = vpop.f32.mrf.mxu1 }
 0x111   :  { %v912_v46 = vpop.f32.mrf.mxu0 }
 0x112   :  { %v855_v47 = vpack.c.bf16 %v673_v42, %v673_v42  ;;  %v642_v48 = vadd.f32 %v974_v44, %v545_v43  ;;  %v913_v49 = vadd.f32 %v912_v46, %v911_v41  ;;  %v976_v50 = vpop.f32.mrf.mxu1 }
 0x113   :  { %v914_v51 = vpop.f32.mrf.mxu0  ;;  %v977_v54 = vadd.f32 %v976_v50, %v975_v45 }
 0x114   :  { %754 = vst.msk [vmem:[%s1370_s3 + $0x24] sm:$0xf] %vm744_vm0, %v855_v47  ;;  %v674_v52 = vmax.f32 %v642_v48, 0.0  ;;  %v548_v53 = vadd.f32 %v913_v49, %v1285_v2  ;;  %v978_v55 = vpop.f32.mrf.mxu1 }
 0x115   :  { %v915_v56 = vpop.f32.mrf.mxu0 }
 0x116   :  { %v856_v57 = vpack.c.bf16 %v674_v52, %v674_v52  ;;  %v645_v58 = vadd.f32 %v977_v54, %v548_v53  ;;  %v916_v59 = vadd.f32 %v915_v56, %v914_v51  ;;  %v979_v60 = vpop.f32.mrf.mxu1 }
 0x117   :  { %v917_v61 = vpop.f32.mrf.mxu0  ;;  %v980_v0 = vadd.f32 %v979_v60, %v978_v55 }
 0x118   :  { %755 = vst.msk [vmem:[%s1370_s3 + $0x28] sm:$0xf] %vm744_vm0, %v856_v57  ;;  %v675_v62 = vmax.f32 %v645_v58, 0.0  ;;  %v553_v63 = vadd.f32 %v916_v59, %v1285_v2  ;;  %v981_v1 = vpop.f32.mrf.mxu1 }
 0x119   :  { %v918_v3 = vpop.f32.mrf.mxu0 }
 0x11a   :  { %v857_v4 = vpack.c.bf16 %v675_v62, %v675_v62  ;;  %v650_v5 = vadd.f32 %v980_v0, %v553_v63  ;;  %v919_v6 = vadd.f32 %v918_v3, %v917_v61  ;;  %v982_v7 = vpop.f32.mrf.mxu1 }
 0x11b   :  { %v920_v8 = vpop.f32.mrf.mxu0  ;;  %v983_v11 = vadd.f32 %v982_v7, %v981_v1 }
 0x11c   :  { %756 = vst.msk [vmem:[%s1370_s3 + $0x2c] sm:$0xf] %vm744_vm0, %v857_v4  ;;  %v676_v9 = vmax.f32 %v650_v5, 0.0  ;;  %v556_v10 = vadd.f32 %v919_v6, %v1285_v2  ;;  %v984_v12 = vpop.f32.mrf.mxu1 }
 0x11d   :  { %v921_v13 = vpop.f32.mrf.mxu0 }
 0x11e   :  { %v858_v14 = vpack.c.bf16 %v676_v9, %v676_v9  ;;  %v653_v15 = vadd.f32 %v983_v11, %v556_v10  ;;  %v922_v16 = vadd.f32 %v921_v13, %v920_v8  ;;  %v985_v17 = vpop.f32.mrf.mxu1 }
 0x11f   :  { %v923_v18 = vpop.f32.mrf.mxu0  ;;  %v986_v21 = vadd.f32 %v985_v17, %v984_v12 }
 0x120   :  { %757 = vst.msk [vmem:[%s1370_s3 + $0x30] sm:$0xf] %vm744_vm0, %v858_v14  ;;  %v677_v19 = vmax.f32 %v653_v15, 0.0  ;;  %v561_v20 = vadd.f32 %v922_v16, %v1285_v2  ;;  %v987_v22 = vpop.f32.mrf.mxu1 }
 0x121   :  { %v924_v23 = vpop.f32.mrf.mxu0 }
 0x122   :  { %v859_v24 = vpack.c.bf16 %v677_v19, %v677_v19  ;;  %v658_v25 = vadd.f32 %v986_v21, %v561_v20  ;;  %v925_v26 = vadd.f32 %v924_v23, %v923_v18  ;;  %v988_v27 = vpop.f32.mrf.mxu1 }
 0x123   :  { %v989_v30 = vadd.f32 %v988_v27, %v987_v22 }
 0x124   :  { %758 = vst.msk [vmem:[%s1370_s3 + $0x34] sm:$0xf] %vm744_vm0, %v859_v24  ;;  %v678_v28 = vmax.f32 %v658_v25, 0.0  ;;  %v564_v29 = vadd.f32 %v925_v26, %v1285_v2 }
 0x126   :  { %v860_v31 = vpack.c.bf16 %v678_v28, %v678_v28  ;;  %v661_v32 = vadd.f32 %v989_v30, %v564_v29 }
 0x128   :  { %759 = vst.msk [vmem:[%s1370_s3 + $0x38] sm:$0xf] %vm744_vm0, %v860_v31  ;;  %v679_v33 = vmax.f32 %v661_v32, 0.0 }
 0x12a   :  { %v861_v34 = vpack.c.bf16 %v679_v33, %v679_v33 }
 0x12c   :  { %760 = vst.msk [vmem:[%s1370_s3 + $0x3c] sm:$0xf] %vm744_vm0, %v861_v34 }

// kernel: cnn_depth_policy_forward.7
= control target key start
LH: loop header
LB: loop body
LE: loop exit
PB: predicated region body
PF: predicated region fallthrough
CT: control target
= control target key end

     0   :  { %vm381_vm0 = vcmask 523264   ;;  %s1096_s0 = inlined_call_operand.vmem [shape: bf16[32,576], index: 0, kind: input, shape index: {}]   ;;  %s1097_s1 = inlined_call_operand.vmem [shape: bf16[576,32], index: 1, kind: input, shape index: {}]   ;;  %s1098_s2 = inlined_call_operand.vmem [shape: f32[1,32], index: 2, kind: input, shape index: {}]   ;;  %s1099_s3 = inlined_call_operand.vmem [shape: bf16[32,8], index: 3, kind: input, shape index: {}]   ;;  %s1100_s4 = inlined_call_operand.vmem [shape: f32[1,8], index: 4, kind: input, shape index: {}]   ;;  %s1101_s5 = inlined_call_operand.vmem [shape: bf16[32,32], index: 5, kind: output, shape index: {0}]   ;;  %s1102_s6 = inlined_call_operand.hbm [shape: f32[32,8], index: 6, kind: output, shape index: {1}]  }
   0x1   :  { %v815_v0 = vld [vmem:[%s1097_s1 + $0x78] sm:$0xff]   ;;  %v819_v4 = vld [vmem:[%s1097_s1 + $0x70] sm:$0xff]   ;;  %v823_v8 = vld [vmem:[%s1097_s1 + $0x68] sm:$0xff]  }
   0x2   :  { %v816_v1 = vld [vmem:[%s1097_s1 + $0xf8] sm:$0xff]   ;;  %726 = vmatprep.subr.bf16.mxu0 %v815_v0  ;;  %v820_v5 = vld [vmem:[%s1097_s1 + $0xf0] sm:$0xff]   ;;  %v824_v9 = vld [vmem:[%s1097_s1 + $0xe8] sm:$0xff]  }
   0x3   :  { %v817_v2 = vld [vmem:[%s1097_s1 + $0x38] sm:$0xff]   ;;  %754 = vmatprep.subr.bf16.mxu1 %v816_v1  ;;  %v821_v6 = vld [vmem:[%s1097_s1 + $0x30] sm:$0xff]   ;;  %v825_v10 = vld [vmem:[%s1097_s1 + $0x28] sm:$0xff]  }
   0x4   :  { %v818_v3 = vld [vmem:[%s1097_s1 + $0xb8] sm:$0xff]   ;;  %727 = vmatpush3.bf16.msra.mxu0 %v817_v2  ;;  %v822_v7 = vld [vmem:[%s1097_s1 + $0xb0] sm:$0xff]   ;;  %v826_v11 = vld [vmem:[%s1097_s1 + $0xa8] sm:$0xff]  }
   0x5   :  { %755 = vmatpush3.bf16.msra.mxu1 %v818_v3  ;;  %728 = vmatprep.subr.bf16.mxu0 %v819_v4  ;;  %v827_v12 = vld [vmem:[%s1097_s1 + $0x60] sm:$0xff]   ;;  %v831_v16 = vld [vmem:[%s1097_s1 + $0x58] sm:$0xff]   ;;  %v835_v20 = vld [vmem:[%s1097_s1 + $0x50] sm:$0xff]  }
   0x6   :  { %756 = vmatprep.subr.bf16.mxu1 %v820_v5  ;;  %v828_v13 = vld [vmem:[%s1097_s1 + $0xe0] sm:$0xff]   ;;  %v832_v17 = vld [vmem:[%s1097_s1 + $0xd8] sm:$0xff]   ;;  %v836_v21 = vld [vmem:[%s1097_s1 + $0xd0] sm:$0xff]  }
   0x7   :  { %v829_v14 = vld [vmem:[%s1097_s1 + $0x20] sm:$0xff]   ;;  %v833_v18 = vld [vmem:[%s1097_s1 + $0x18] sm:$0xff]   ;;  %v837_v22 = vld [vmem:[%s1097_s1 + $0x10] sm:$0xff]  }
   0x8   :  { %729 = vmatpush3.bf16.msra.mxu0 %v821_v6  ;;  %v830_v15 = vld [vmem:[%s1097_s1 + $0xa0] sm:$0xff]   ;;  %v834_v19 = vld [vmem:[%s1097_s1 + $0x98] sm:$0xff]   ;;  %v838_v23 = vld [vmem:[%s1097_s1 + $0x90] sm:$0xff]  }
   0x9   :  { %757 = vmatpush3.bf16.msra.mxu1 %v822_v7  ;;  %730 = vmatprep.subr.bf16.mxu0 %v823_v8  ;;  %v839_v24 = vld [vmem:[%s1097_s1 + $0x48] sm:$0xff]   ;;  %v843_v28 = vld [vmem:[%s1097_s1 + $0x40] sm:$0xff]   ;;  %v853_v36 = vld [vmem:[%s1097_s1 + $0x118] sm:$0xff]  }
   0xa   :  { %758 = vmatprep.subr.bf16.mxu1 %v824_v9  ;;  %v840_v25 = vld [vmem:[%s1097_s1 + $0xc8] sm:$0xff]   ;;  %v844_v29 = vld [vmem:[%s1097_s1 + $0xc0] sm:$0xff]   ;;  %v854_v37 = vld [vmem:[%s1097_s1 + $0x110] sm:$0xff]  }
   0xb   :  { %v841_v26 = vld [vmem:[%s1097_s1 + $0x8] sm:$0xff]   ;;  %v845_v30 = vld [vmem:[%s1097_s1] sm:$0xff]  }
   0xc   :  { %731 = vmatpush3.bf16.msra.mxu0 %v825_v10  ;;  %v842_v27 = vld [vmem:[%s1097_s1 + $0x88] sm:$0xff]   ;;  %v846_v31 = vld [vmem:[%s1097_s1 + $0x80] sm:$0xff]  }
   0xd   :  { %759 = vmatpush3.bf16.msra.mxu1 %v826_v11  ;;  %732 = vmatprep.subr.bf16.mxu0 %v827_v12  ;;  %v847_v32 = vld [vmem:[%s1096_s0] ss:$20 sps:$4 sm:$0xff]   ;;  %v849_v33 = vld [vmem:[%s1096_s0 + $0x4] ss:$20 sps:$4 sm:$0xff]   ;;  %v850_v34 = vld [vmem:[%s1096_s0 + $0x8] ss:$20 sps:$4 sm:$0xff]  }
   0xe   :  { %760 = vmatprep.subr.bf16.mxu1 %v828_v13  ;;  %v852_v35 = vld [vmem:[%s1096_s0 + $0xc] ss:$20 sps:$4 sm:$0xff]   ;;  %420 = vmatprep.mubr.bf16.mxu0 %v849_v33  ;;  %v857_v39 = vld [vmem:[%s1096_s0 + $0x34] ss:$20 sps:$4 sm:$0xff]   ;;  %v860_v42 = vld [vmem:[%s1096_s0 + $0x30] ss:$20 sps:$4 sm:$0xff]  }
   0xf   :  { %469 = vmatprep.mubr.bf16.mxu1 %v852_v35  ;;  %v855_v38 = vld [vmem:[%s1096_s0 + $0x2c] ss:$20 sps:$4 sm:$0xff]   ;;  %v859_v40 = vld [vmem:[%s1096_s0 + $0x28] ss:$20 sps:$4 sm:$0xff]   ;;  %v863_v43 = vld [vmem:[%s1096_s0 + $0x10] ss:$20 sps:$4 sm:$0xff]  }
  0x10   :  { %733 = vmatpush3.bf16.msra.mxu0 %v829_v14  ;;  %v861_v41 = vld [vmem:[%s1097_s1 + $0x108] sm:$0xff]   ;;  %v862_v44 = vld [vmem:[%s1097_s1 + $0x100] sm:$0xff]  }
  0x11   :  { %761 = vmatpush3.bf16.msra.mxu1 %v830_v15  ;;  %734 = vmatprep.subr.bf16.mxu0 %v831_v16 }
  0x12   :  { %762 = vmatprep.subr.bf16.mxu1 %v832_v17 }
  0x14   :  { %735 = vmatpush3.bf16.msra.mxu0 %v833_v18 }
  0x15   :  { %763 = vmatpush3.bf16.msra.mxu1 %v834_v19  ;;  %736 = vmatprep.subr.bf16.mxu0 %v835_v20 }
  0x16   :  { %764 = vmatprep.subr.bf16.mxu1 %v836_v21 }
  0x18   :  { %737 = vmatpush3.bf16.msra.mxu0 %v837_v22 }
  0x19   :  { %765 = vmatpush3.bf16.msra.mxu1 %v838_v23  ;;  %738 = vmatprep.subr.bf16.mxu0 %v839_v24 }
  0x1a   :  { %766 = vmatprep.subr.bf16.mxu1 %v840_v25 }
  0x1c   :  { %739 = vmatpush3.bf16.msra.mxu0 %v841_v26 }
  0x1d   :  { %767 = vmatpush3.bf16.msra.mxu1 %v842_v27  ;;  %740 = vmatprep.subr.bf16.mxu0 %v843_v28 }
  0x1e   :  { %768 = vmatprep.subr.bf16.mxu1 %v844_v29 }
  0x20   :  { %741 = vmatpush3.bf16.msra.mxu0 %v845_v30 }
  0x21   :  { %769 = vmatpush3.bf16.msra.mxu1 %v846_v31  ;;  %792 = vmatprep.subr.bf16.mxu0 %v853_v36 }
  0x23   :  { %421 = vmatmul.mubr.bf16.vlgmr.msra.gmra.mxu0 %v847_v32 }
  0x24   :  { %470 = vmatmul.mubr.bf16.vlgmr.msra.gmra.mxu1 %v850_v34  ;;  %793 = vmatpush3.bf16.msra.mxu0 %v853_v36 }
  0x25   :  { %794 = vmatprep.subr.bf16.mxu0 %v854_v37  ;;  %428 = vmatprep.mubr.bf16.mxu0 %v855_v38 }
  0x26   :  { %477 = vmatprep.mubr.bf16.mxu1 %v857_v39 }
  0x28   :  { %795 = vmatpush3.bf16.msra.mxu0 %v854_v37 }
  0x29   :  { %796 = vmatprep.subr.bf16.mxu0 %v861_v41 }
  0x2b   :  { %429 = vmatmul.mubr.bf16.gmra.mxu0 %v859_v40 }
  0x2c   :  { %12 = vsyncpa [#allocation3], 0  ;;  %478 = vmatmul.mubr.bf16.gmra.mxu1 %v860_v42  ;;  %800 = vmatprep.mubr.msk.bf16.mxu0 %vm381_vm0, %v863_v43  ;;  %v864_v45 = vld [vmem:[%s1096_s0 + $0x38] ss:$20 sps:$4 sm:$0xff]   ;;  %v866_v47 = vld [vmem:[%s1099_s3] sm:$0xff]   ;;  %vm555_vm1 = vcmask 257024  }
  0x2d   :  { %797 = vmatpush3.bf16.msra.mxu0 %v861_v41  ;;  %v865_v46 = vld [vmem:[%s1099_s3 + $0x8] sm:$0xff]   ;;  %v664_v60 = vld [vmem:[%s1098_s2] ss:$0 sm:$0xff]  ;;  %vm583_vm2 = vcmask 261120   ;;  %vm639_vm3 = vcmask 64512   ;;  %s889_s29 = smov [#allocation2]  }
  0x2e   :  { %798 = vmatprep.subr.bf16.mxu0 %v862_v44  ;;  %804 = vmatprep.subr.bf16.mxu1 %v865_v46  ;;  %v717_v35 = vld [vmem:[%s1100_s4] ss:$0 sm:$0xff]  ;;  %s651_s30 = sshll.u32 %s889_s29, 4  ;;  %s652_s30 = int_to_ptr.vmem [resolvable:$true] %s651_s30 }
  0x2f   :  { %805 = vmatpush3.bf16.msra.mxu1 %v865_v46  ;;  %p872_p1 = scmp.lt.s32.totalorder %s652_s30, %s652_s30 }
  0x30   :  { %806 = vmatprep.subr.bf16.mxu1 %v866_v47 }
  0x31   :  { %799 = vmatpush3.bf16.msra.mxu0 %v862_v44 }
  0x33   :  { %807 = vmatpush3.bf16.msra.mxu1 %v866_v47 }
  0x34   :  { %801 = vmatmul.mubr.msk.bf16.vlgmr.msra.gmra.mxu0 %vm381_vm0, %v864_v45 }
  0xe3   :  { %v742_v48 = vpop.f32.mrf.mxu0 }
  0xe4   :  { %v770_v49 = vpop.f32.mrf.mxu1 }
  0xe5   :  { %v743_v50 = vpop.f32.mrf.mxu0 }
  0xe6   :  { %v771_v51 = vpop.f32.mrf.mxu1  ;;  %v744_v58 = vadd.f32 %v743_v50, %v742_v48 }
  0xe7   :  { %v745_v52 = vpop.f32.mrf.mxu0  ;;  %v772_v4 = vadd.f32 %v771_v51, %v770_v49 }
  0xe8   :  { %v773_v53 = vpop.f32.mrf.mxu1  ;;  %v423_v3 = vadd.f32 %v744_v58, %v664_v60 }
  0xe9   :  { %v746_v54 = vpop.f32.mrf.mxu0 }
  0xea   :  { %v774_v55 = vpop.f32.mrf.mxu1  ;;  %v747_v5 = vadd.f32 %v746_v54, %v745_v52  ;;  %v472_v15 = vadd.f32 %v772_v4, %v423_v3 }
  0xeb   :  { %v748_v56 = vpop.f32.mrf.mxu0  ;;  %v775_v18 = vadd.f32 %v774_v55, %v773_v53 }
  0xec   :  { %v776_v57 = vpop.f32.mrf.mxu1  ;;  %v426_v13 = vadd.f32 %v747_v5, %v664_v60 }
  0xed   :  { %v749_v59 = vpop.f32.mrf.mxu0 }
  0xee   :  { %v750_v61 = vadd.f32 %v749_v59, %v748_v56  ;;  %v777_v62 = vpop.f32.mrf.mxu1  ;;  %v475_v25 = vadd.f32 %v775_v18, %v426_v13 }
  0xef   :  { %v778_v63 = vadd.f32 %v777_v62, %v776_v57  ;;  %v751_v0 = vpop.f32.mrf.mxu0 }
  0xf0   :  { %v431_v1 = vadd.f32 %v750_v61, %v664_v60  ;;  %v779_v2 = vpop.f32.mrf.mxu1 }
  0xf1   :  { %v752_v6 = vpop.f32.mrf.mxu0 }
  0xf2   :  { %v753_v7 = vadd.f32 %v752_v6, %v751_v0  ;;  %v780_v8 = vpop.f32.mrf.mxu1  ;;  %v480_v9 = vadd.f32 %v778_v63, %v431_v1 }
  0xf3   :  { %v781_v11 = vadd.f32 %v780_v8, %v779_v2 }
  0xf4   :  { %v434_v10 = vadd.f32 %v753_v7, %v664_v60  ;;  %v802_v12 = vpop.f32.mrf.mxu0 }
  0xf5   :  { %v529_v14 = vadd.f32 %v802_v12, %v480_v9 }
  0xf6   :  { %v520_v16 = vpop.f32.mrf.mxu0  ;;  %v483_v17 = vadd.f32 %v781_v11, %v434_v10 }
  0xf7   :  { %v537_v19 = vmax.f32 %v529_v14, 0.0  ;;  %v521_v20 = vadd.f32 %v520_v16, %v472_v15 }
  0xf8   :  { %v803_v21 = vpop.f32.mrf.mxu0 }
  0xf9   :  { %v724_v22 = vpack.c.bf16 %v537_v19, %v537_v19  ;;  %v535_v23 = vmax.f32 %v521_v20, 0.0  ;;  %v532_v24 = vadd.f32 %v803_v21, %v483_v17 }
  0xfa   :  { %v523_v26 = vpop.f32.mrf.mxu0 }
  0xfb   :  { %558 = vst.msk [vmem:[%s1101_s5 + $0x8] sm:$0xf] %vm555_vm1, %v724_v22  ;;  %v722_v27 = vpack.c.bf16 %v535_v23, %v535_v23  ;;  %v538_v28 = vmax.f32 %v532_v24, 0.0  ;;  %v524_v29 = vadd.f32 %v523_v26, %v475_v25 }
  0xfd   :  { %556 = vst.msk [vmem:[%s1101_s5] sm:$0xf] %vm555_vm1, %v722_v27  ;;  %v725_v30 = vpack.c.bf16 %v538_v28, %v538_v28  ;;  %v536_v31 = vmax.f32 %v524_v29, 0.0  ;;  %v540_v34 = vpack.c.bf16 %v538_v28, %v537_v19 }
  0xff   :  { %559 = vst.msk [vmem:[%s1101_s5 + $0xc] sm:$0xf] %vm555_vm1, %v725_v30  ;;  %v539_v32 = vpack.c.bf16 %v536_v31, %v535_v23  ;;  %v723_v33 = vpack.c.bf16 %v536_v31, %v536_v31 }
 0x101   :  { %557 = vst.msk [vmem:[%s1101_s5 + $0x4] sm:$0xf] %vm555_vm1, %v723_v33  ;;  %808 = vmatprep.mubr.msk.bf16.mxu1 %vm583_vm2, %v539_v32  ;;  %s867_s5 = scalar_lea.vmem %s652_s30, 512 }
 0x102   :  { %809 = vmatmul.mubr.msk.bf16.vlgmr.msra.gmra.mxu1 %vm583_vm2, %v540_v34  ;;  %p868_p0 = scmp.ne.s32.totalorder %s652_s30, %s867_s5  ;;  %p873_p2 = scmp.lt.s32.totalorder %s867_s5, %s867_s5 }
 0x104   :  { %p874_p3 = por %p873_p2, %p872_p1 }
 0x106   :  { %p875_p4 = pnand %p874_p3, %p868_p0 }
 0x1c2   :  { %v810_v36 = vpop.f32.mrf.mxu1 }
 0x1c3   :  { %v633_v37 = vadd.f32 %v810_v36, %v717_v35 }
 0x1c4   :  { %v624_v38 = vpop.f32.mrf.mxu1 }
 0x1c5   :  { %642 = vst.msk [vmem:[#allocation2 + $0x10] sm:$0xff] %vm639_vm3, %v633_v37  ;;  %v625_v39 = vadd.f32 %v717_v35, %v624_v38 }
 0x1c6   :  { %v811_v40 = vpop.f32.mrf.mxu1 }
 0x1c7   :  { %640 = vst.msk [vmem:[#allocation2] sm:$0xff] %vm639_vm3, %v625_v39  ;;  %v636_v41 = vadd.f32 %v811_v40, %v717_v35 }
 0x1c8   :  { %v627_v42 = vpop.f32.mrf.mxu1 }
 0x1c9   :  { %643 = vst.msk [vmem:[#allocation2 + $0x18] sm:$0xff] %vm639_vm3, %v636_v41  ;;  %v628_v43 = vadd.f32 %v717_v35, %v627_v42 }
 0x1cb   :  { %641 = vst.msk [vmem:[#allocation2 + $0x8] sm:$0xff] %vm639_vm3, %v628_v43 }
 0x1cc   :  { %878 = shalt.err (!%p875_p4)
}
 0x1cd   :  { %s890_s4 = smov 128   ;;  %s891_s7 = smov 8  }
 0x1ce   :  { %657 = dma.vmem_to_hbm [thread:$0]  %s652_s30, 512, %s1102_s6, [#allocation3], %s890_s4, %s890_s4, %s891_s7  }
 0x1cf   :  { %887 = dma.done.wait [#allocation3], 512  }
 0x1d0   :  { %888 = vsyncadd [#allocation3], 4294966784 }
 0x1d1   :  { %663 = vsyncpa [#allocation3], 1 }

// kernel: cnn_depth_policy_forward.8
= control target key start
LH: loop header
LB: loop body
LE: loop exit
PB: predicated region body
PF: predicated region fallthrough
CT: control target
= control target key end

     0   :  { %v4297_v1 = vmov 0   ;;  %s5678_s1 = inlined_call_operand.vmem [shape: bf16[128,512], index: 1, kind: input, shape index: {}]   ;;  %s5679_s3 = inlined_call_operand.vmem [shape: bf16[512,1536], index: 3, kind: input, shape index: {}]   ;;  %s5680_s0 = inlined_call_operand.vmem [shape: bf16[8,128], index: 0, kind: input, shape index: {}]   ;;  %s5681_s2 = inlined_call_operand.vmem [shape: f32[1,512], index: 2, kind: input, shape index: {}]   ;;  %s5682_s4 = inlined_call_operand.vmem [shape: f32[1,1536], index: 4, kind: input, shape index: {}]   ;;  %s5683_s5 = inlined_call_operand.vmem [shape: bf16[8,1536], index: 5, kind: output, shape index: {}]  }
   0x1   :  { %v3673_v0 = vld [vmem:[%s5678_s1 + $0xe4] ss:$16 sps:$4 sm:$0xff]   ;;  %268 = vmatprep.mubr.bf16.mxu0 %v4297_v1  ;;  %309 = vmatprep.mubr.bf16.mxu1 %v4297_v1  ;;  %v3675_v2 = vld [vmem:[%s5678_s1 + $0xec] ss:$16 sps:$4 sm:$0xff]   ;;  %v3677_v3 = vld [vmem:[%s5678_s1 + $0xe0] ss:$16 sps:$4 sm:$0xff]  }
   0x2   :  { %236 = vmatprep.subr.bf16.mxu0 %v3673_v0  ;;  %v3678_v4 = vld [vmem:[%s5678_s1 + $0xe8] ss:$16 sps:$4 sm:$0xff]   ;;  %277 = vmatprep.subr.bf16.mxu1 %v3675_v2  ;;  %v3679_v5 = vld [vmem:[%s5678_s1 + $0xc4] ss:$16 sps:$4 sm:$0xff]   ;;  %v3681_v6 = vld [vmem:[%s5678_s1 + $0xcc] ss:$16 sps:$4 sm:$0xff]  }
   0x3   :  { %237 = vmatpush1.bf16.msra.mxu0 %v3677_v3  ;;  %278 = vmatpush1.bf16.msra.mxu1 %v3678_v4  ;;  %v3683_v7 = vld [vmem:[%s5678_s1 + $0xc0] ss:$16 sps:$4 sm:$0xff]   ;;  %v3684_v8 = vld [vmem:[%s5678_s1 + $0xc8] ss:$16 sps:$4 sm:$0xff]   ;;  %v3685_v9 = vld [vmem:[%s5678_s1 + $0xa4] ss:$16 sps:$4 sm:$0xff]  }
   0x4   :  { %238 = vmatprep.subr.bf16.mxu0 %v3679_v5  ;;  %279 = vmatprep.subr.bf16.mxu1 %v3681_v6  ;;  %v3687_v10 = vld [vmem:[%s5678_s1 + $0xac] ss:$16 sps:$4 sm:$0xff]   ;;  %v3689_v11 = vld [vmem:[%s5678_s1 + $0xa0] ss:$16 sps:$4 sm:$0xff]   ;;  %v3690_v12 = vld [vmem:[%s5678_s1 + $0xa8] ss:$16 sps:$4 sm:$0xff]  }
   0x5   :  { %v3691_v13 = vld [vmem:[%s5678_s1 + $0x84] ss:$16 sps:$4 sm:$0xff]   ;;  %v3693_v14 = vld [vmem:[%s5678_s1 + $0x8c] ss:$16 sps:$4 sm:$0xff]   ;;  %v3695_v15 = vld [vmem:[%s5678_s1 + $0x80] ss:$16 sps:$4 sm:$0xff]  }
   0x6   :  { %v3696_v16 = vld [vmem:[%s5678_s1 + $0x88] ss:$16 sps:$4 sm:$0xff]   ;;  %v3697_v17 = vld [vmem:[%s5678_s1 + $0x64] ss:$16 sps:$4 sm:$0xff]   ;;  %v3699_v18 = vld [vmem:[%s5678_s1 + $0x6c] ss:$16 sps:$4 sm:$0xff]  }
   0x7   :  { %239 = vmatpush1.bf16.msra.mxu0 %v3683_v7  ;;  %280 = vmatpush1.bf16.msra.mxu1 %v3684_v8  ;;  %v3701_v19 = vld [vmem:[%s5678_s1 + $0x60] ss:$16 sps:$4 sm:$0xff]   ;;  %v3702_v20 = vld [vmem:[%s5678_s1 + $0x68] ss:$16 sps:$4 sm:$0xff]   ;;  %v3703_v21 = vld [vmem:[%s5678_s1 + $0x44] ss:$16 sps:$4 sm:$0xff]  }
   0x8   :  { %240 = vmatprep.subr.bf16.mxu0 %v3685_v9  ;;  %281 = vmatprep.subr.bf16.mxu1 %v3687_v10  ;;  %v3705_v22 = vld [vmem:[%s5678_s1 + $0x4c] ss:$16 sps:$4 sm:$0xff]   ;;  %v3707_v23 = vld [vmem:[%s5678_s1 + $0x40] ss:$16 sps:$4 sm:$0xff]   ;;  %v3708_v24 = vld [vmem:[%s5678_s1 + $0x48] ss:$16 sps:$4 sm:$0xff]  }
   0x9   :  { %v3709_v25 = vld [vmem:[%s5678_s1 + $0x24] ss:$16 sps:$4 sm:$0xff]   ;;  %v3711_v26 = vld [vmem:[%s5678_s1 + $0x2c] ss:$16 sps:$4 sm:$0xff]   ;;  %v3713_v27 = vld [vmem:[%s5678_s1 + $0x20] ss:$16 sps:$4 sm:$0xff]  }
   0xa   :  { %v3714_v28 = vld [vmem:[%s5678_s1 + $0x28] ss:$16 sps:$4 sm:$0xff]   ;;  %v3715_v29 = vld [vmem:[%s5678_s1 + $0x4] ss:$16 sps:$4 sm:$0xff]   ;;  %v3717_v30 = vld [vmem:[%s5678_s1 + $0xc] ss:$16 sps:$4 sm:$0xff]  }
   0xb   :  { %241 = vmatpush1.bf16.msra.mxu0 %v3689_v11  ;;  %282 = vmatpush1.bf16.msra.mxu1 %v3690_v12  ;;  %v3719_v31 = vld [vmem:[%s5678_s1] ss:$16 sps:$4 sm:$0xff]   ;;  %v3720_v32 = vld [vmem:[%s5678_s1 + $0x8] ss:$16 sps:$4 sm:$0xff]   ;;  %v3723_v33 = vld [vmem:[%s5679_s3 + $0x2a4] ss:$48 sps:$4 sm:$0xff]  }
   0xc   :  { %242 = vmatprep.subr.bf16.mxu0 %v3691_v13  ;;  %283 = vmatprep.subr.bf16.mxu1 %v3693_v14  ;;  %v3726_v34 = vld [vmem:[%s5679_s3 + $0x8a4] ss:$48 sps:$4 sm:$0xff]   ;;  %v21_v35 = vld [vmem:[%s5680_s0] sm:$0xf] }
   0xd   :  { %v3721_v36 = vld [vmem:[%s5679_s3 + $0x2a0] ss:$48 sps:$4 sm:$0xff]   ;;  %v3729_v38 = vld [vmem:[%s5679_s3 + $0x244] ss:$48 sps:$4 sm:$0xff]  }
   0xe   :  { %v3724_v37 = vld [vmem:[%s5679_s3 + $0x8a0] ss:$48 sps:$4 sm:$0xff]   ;;  %v3732_v39 = vld [vmem:[%s5679_s3 + $0x844] ss:$48 sps:$4 sm:$0xff]  }
   0xf   :  { %243 = vmatpush1.bf16.msra.mxu0 %v3695_v15  ;;  %284 = vmatpush1.bf16.msra.mxu1 %v3696_v16  ;;  %v3727_v40 = vld [vmem:[%s5679_s3 + $0x240] ss:$48 sps:$4 sm:$0xff]   ;;  %v3735_v42 = vld [vmem:[%s5679_s3 + $0x1e4] ss:$48 sps:$4 sm:$0xff]  }
  0x10   :  { %244 = vmatprep.subr.bf16.mxu0 %v3697_v17  ;;  %285 = vmatprep.subr.bf16.mxu1 %v3699_v18  ;;  %v3730_v41 = vld [vmem:[%s5679_s3 + $0x840] ss:$48 sps:$4 sm:$0xff]   ;;  %v3738_v43 = vld [vmem:[%s5679_s3 + $0x7e4] ss:$48 sps:$4 sm:$0xff]  }
  0x11   :  { %v3733_v44 = vld [vmem:[%s5679_s3 + $0x1e0] ss:$48 sps:$4 sm:$0xff]   ;;  %v3741_v46 = vld [vmem:[%s5679_s3 + $0x184] ss:$48 sps:$4 sm:$0xff]  }
  0x12   :  { %v3736_v45 = vld [vmem:[%s5679_s3 + $0x7e0] ss:$48 sps:$4 sm:$0xff]   ;;  %v3744_v47 = vld [vmem:[%s5679_s3 + $0x784] ss:$48 sps:$4 sm:$0xff]  }
  0x13   :  { %245 = vmatpush1.bf16.msra.mxu0 %v3701_v19  ;;  %286 = vmatpush1.bf16.msra.mxu1 %v3702_v20  ;;  %v3739_v48 = vld [vmem:[%s5679_s3 + $0x180] ss:$48 sps:$4 sm:$0xff]   ;;  %v3747_v50 = vld [vmem:[%s5679_s3 + $0x124] ss:$48 sps:$4 sm:$0xff]  }
  0x14   :  { %246 = vmatprep.subr.bf16.mxu0 %v3703_v21  ;;  %287 = vmatprep.subr.bf16.mxu1 %v3705_v22  ;;  %v3742_v49 = vld [vmem:[%s5679_s3 + $0x780] ss:$48 sps:$4 sm:$0xff]   ;;  %v3750_v51 = vld [vmem:[%s5679_s3 + $0x724] ss:$48 sps:$4 sm:$0xff]  }
  0x15   :  { %v3745_v52 = vld [vmem:[%s5679_s3 + $0x120] ss:$48 sps:$4 sm:$0xff]   ;;  %v3753_v54 = vld [vmem:[%s5679_s3 + $0xc4] ss:$48 sps:$4 sm:$0xff]  }
  0x16   :  { %v3748_v53 = vld [vmem:[%s5679_s3 + $0x720] ss:$48 sps:$4 sm:$0xff]   ;;  %v3756_v55 = vld [vmem:[%s5679_s3 + $0x6c4] ss:$48 sps:$4 sm:$0xff]  }
  0x17   :  { %247 = vmatpush1.bf16.msra.mxu0 %v3707_v23  ;;  %288 = vmatpush1.bf16.msra.mxu1 %v3708_v24  ;;  %v3751_v56 = vld [vmem:[%s5679_s3 + $0xc0] ss:$48 sps:$4 sm:$0xff]   ;;  %v3759_v58 = vld [vmem:[%s5679_s3 + $0x64] ss:$48 sps:$4 sm:$0xff]  }
  0x18   :  { %248 = vmatprep.subr.bf16.mxu0 %v3709_v25  ;;  %289 = vmatprep.subr.bf16.mxu1 %v3711_v26  ;;  %v3754_v57 = vld [vmem:[%s5679_s3 + $0x6c0] ss:$48 sps:$4 sm:$0xff]   ;;  %v3762_v59 = vld [vmem:[%s5679_s3 + $0x664] ss:$48 sps:$4 sm:$0xff]  }
  0x19   :  { %v3757_v60 = vld [vmem:[%s5679_s3 + $0x60] ss:$48 sps:$4 sm:$0xff]   ;;  %v3765_v62 = vld [vmem:[%s5679_s3 + $0x4] ss:$48 sps:$4 sm:$0xff]  }
  0x1a   :  { %v3760_v61 = vld [vmem:[%s5679_s3 + $0x660] ss:$48 sps:$4 sm:$0xff]   ;;  %v3768_v63 = vld [vmem:[%s5679_s3 + $0x604] ss:$48 sps:$4 sm:$0xff]  }
  0x1b   :  { %249 = vmatpush1.bf16.msra.mxu0 %v3713_v27  ;;  %290 = vmatpush1.bf16.msra.mxu1 %v3714_v28  ;;  %v3763_v0 = vld [vmem:[%s5679_s3] ss:$48 sps:$4 sm:$0xff]   ;;  %v3771_v2 = vld [vmem:[%s5679_s3 + $0x5a4] ss:$48 sps:$4 sm:$0xff]  }
  0x1c   :  { %250 = vmatprep.subr.bf16.mxu0 %v3715_v29  ;;  %291 = vmatprep.subr.bf16.mxu1 %v3717_v30  ;;  %v3766_v1 = vld [vmem:[%s5679_s3 + $0x600] ss:$48 sps:$4 sm:$0xff]   ;;  %v3774_v3 = vld [vmem:[%s5679_s3 + $0xba4] ss:$48 sps:$4 sm:$0xff]  }
  0x1d   :  { %v3769_v4 = vld [vmem:[%s5679_s3 + $0x5a0] ss:$48 sps:$4 sm:$0xff]   ;;  %v3777_v6 = vld [vmem:[%s5679_s3 + $0x544] ss:$48 sps:$4 sm:$0xff]  }
  0x1e   :  { %v3772_v5 = vld [vmem:[%s5679_s3 + $0xba0] ss:$48 sps:$4 sm:$0xff]   ;;  %v3780_v7 = vld [vmem:[%s5679_s3 + $0xb44] ss:$48 sps:$4 sm:$0xff]  }
  0x1f   :  { %251 = vmatpush1.bf16.msra.mxu0 %v3719_v31  ;;  %292 = vmatpush1.bf16.msra.mxu1 %v3720_v32  ;;  %v3775_v8 = vld [vmem:[%s5679_s3 + $0x540] ss:$48 sps:$4 sm:$0xff]   ;;  %v3783_v10 = vld [vmem:[%s5679_s3 + $0x4e4] ss:$48 sps:$4 sm:$0xff]  }
  0x20   :  { %2694 = vmatprep.subr.bf16.mxu0 %v3723_v33  ;;  %2735 = vmatprep.subr.bf16.mxu1 %v3726_v34  ;;  %v3778_v9 = vld [vmem:[%s5679_s3 + $0xb40] ss:$48 sps:$4 sm:$0xff]   ;;  %v3786_v11 = vld [vmem:[%s5679_s3 + $0xae4] ss:$48 sps:$4 sm:$0xff]   ;;  %v3819_v34 = vld [vmem:[%s5679_s3 + $0x2ac] ss:$48 sps:$4 sm:$0xff]  }
  0x21   :  { %v3781_v12 = vld [vmem:[%s5679_s3 + $0x4e0] ss:$48 sps:$4 sm:$0xff]   ;;  %v3789_v14 = vld [vmem:[%s5679_s3 + $0x484] ss:$48 sps:$4 sm:$0xff]  }
  0x22   :  { %269 = vmatmul.mubr.bf16.vlgmr.msra.gmra.mxu0 %v21_v35  ;;  %310 = vmatmul.mubr.bf16.vlgmr.msra.gmra.mxu1 %v21_v35  ;;  %v3784_v13 = vld [vmem:[%s5679_s3 + $0xae0] ss:$48 sps:$4 sm:$0xff]   ;;  %v3792_v15 = vld [vmem:[%s5679_s3 + $0xa84] ss:$48 sps:$4 sm:$0xff]   ;;  %v3822_v35 = vld [vmem:[%s5679_s3 + $0x8ac] ss:$48 sps:$4 sm:$0xff]  }
  0x23   :  { %2695 = vmatpush1.bf16.msra.mxu0 %v3721_v36  ;;  %2736 = vmatpush1.bf16.msra.mxu1 %v3724_v37  ;;  %v3787_v16 = vld [vmem:[%s5679_s3 + $0x480] ss:$48 sps:$4 sm:$0xff]   ;;  %v3795_v18 = vld [vmem:[%s5679_s3 + $0x424] ss:$48 sps:$4 sm:$0xff]   ;;  %v56_v36 = vlaneseq }
  0x24   :  { %2696 = vmatprep.subr.bf16.mxu0 %v3729_v38  ;;  %2737 = vmatprep.subr.bf16.mxu1 %v3732_v39  ;;  %v3790_v17 = vld [vmem:[%s5679_s3 + $0xa80] ss:$48 sps:$4 sm:$0xff]   ;;  %v3798_v19 = vld [vmem:[%s5679_s3 + $0xa24] ss:$48 sps:$4 sm:$0xff]  }
  0x25   :  { %v3793_v20 = vld [vmem:[%s5679_s3 + $0x420] ss:$48 sps:$4 sm:$0xff]   ;;  %v3801_v22 = vld [vmem:[%s5679_s3 + $0x3c4] ss:$48 sps:$4 sm:$0xff]   ;;  %v4625_v37 = vshrl.u32 %v56_v36, 7 }
  0x26   :  { %v3796_v21 = vld [vmem:[%s5679_s3 + $0xa20] ss:$48 sps:$4 sm:$0xff]   ;;  %v3804_v23 = vld [vmem:[%s5679_s3 + $0x9c4] ss:$48 sps:$4 sm:$0xff]   ;;  %v3868_v36 = vld [vmem:[%s5679_s3 + $0xba8] ss:$48 sps:$4 sm:$0xff]  }
  0x27   :  { %2697 = vmatpush1.bf16.msra.mxu0 %v3727_v40  ;;  %2738 = vmatpush1.bf16.msra.mxu1 %v3730_v41  ;;  %v3799_v24 = vld [vmem:[%s5679_s3 + $0x3c0] ss:$48 sps:$4 sm:$0xff]   ;;  %v3807_v26 = vld [vmem:[%s5679_s3 + $0x364] ss:$48 sps:$4 sm:$0xff]   ;;  %v4628_v38 = vsub.s32 0, %v4625_v37  ;;  %v4631_v39 = vsub.s32 2, %v4625_v37 }
  0x28   :  { %2698 = vmatprep.subr.bf16.mxu0 %v3735_v42  ;;  %2739 = vmatprep.subr.bf16.mxu1 %v3738_v43  ;;  %v3802_v25 = vld [vmem:[%s5679_s3 + $0x9c0] ss:$48 sps:$4 sm:$0xff]   ;;  %v3810_v27 = vld [vmem:[%s5679_s3 + $0x964] ss:$48 sps:$4 sm:$0xff]   ;;  %v4637_v41 = vsub.s32 1, %v4625_v37  ;;  %v4640_v42 = vsub.s32 3, %v4625_v37 }
  0x29   :  { %v3805_v28 = vld [vmem:[%s5679_s3 + $0x360] ss:$48 sps:$4 sm:$0xff]   ;;  %v3813_v30 = vld [vmem:[%s5679_s3 + $0x304] ss:$48 sps:$4 sm:$0xff]  }
  0x2a   :  { %v3808_v29 = vld [vmem:[%s5679_s3 + $0x960] ss:$48 sps:$4 sm:$0xff]   ;;  %v3816_v31 = vld [vmem:[%s5679_s3 + $0x904] ss:$48 sps:$4 sm:$0xff]  }
  0x2b   :  { %2699 = vmatpush1.bf16.msra.mxu0 %v3733_v44  ;;  %2740 = vmatpush1.bf16.msra.mxu1 %v3736_v45  ;;  %v3811_v32 = vld [vmem:[%s5679_s3 + $0x300] ss:$48 sps:$4 sm:$0xff]  }
  0x2c   :  { %2700 = vmatprep.subr.bf16.mxu0 %v3741_v46  ;;  %2741 = vmatprep.subr.bf16.mxu1 %v3744_v47  ;;  %v3814_v33 = vld [vmem:[%s5679_s3 + $0x900] ss:$48 sps:$4 sm:$0xff]  }
  0x2d   :  { %v54_v40 = vld [vmem:[%s5681_s2] sm:$0xf] }
  0x2e   :  { %v59_v43 = vrot.slane %v54_v40, %v4628_v38  ;;  %v67_v44 = vrot.slane %v54_v40, %v4631_v39  ;;  %v63_v45 = vrot.slane %v54_v40, %v4637_v41  ;;  %v71_v46 = vrot.slane %v54_v40, %v4640_v42  ;;  %v3873_v40 = vld [vmem:[%s5679_s3 + $0x54c] ss:$48 sps:$4 sm:$0xff]  }
  0x2f   :  { %2701 = vmatpush1.bf16.msra.mxu0 %v3739_v48  ;;  %2742 = vmatpush1.bf16.msra.mxu1 %v3742_v49 }
  0x30   :  { %2702 = vmatprep.subr.bf16.mxu0 %v3747_v50  ;;  %2743 = vmatprep.subr.bf16.mxu1 %v3750_v51 }
  0x33   :  { %2703 = vmatpush1.bf16.msra.mxu0 %v3745_v52  ;;  %2744 = vmatpush1.bf16.msra.mxu1 %v3748_v53 }
  0x34   :  { %2704 = vmatprep.subr.bf16.mxu0 %v3753_v54  ;;  %2745 = vmatprep.subr.bf16.mxu1 %v3756_v55 }
  0x37   :  { %2705 = vmatpush1.bf16.msra.mxu0 %v3751_v56  ;;  %2746 = vmatpush1.bf16.msra.mxu1 %v3754_v57 }
  0x38   :  { %2706 = vmatprep.subr.bf16.mxu0 %v3759_v58  ;;  %2747 = vmatprep.subr.bf16.mxu1 %v3762_v59 }
  0x3b   :  { %2707 = vmatpush1.bf16.msra.mxu0 %v3757_v60  ;;  %2748 = vmatpush1.bf16.msra.mxu1 %v3760_v61 }
  0x3c   :  { %2708 = vmatprep.subr.bf16.mxu0 %v3765_v62  ;;  %2749 = vmatprep.subr.bf16.mxu1 %v3768_v63 }
  0x3f   :  { %2709 = vmatpush1.bf16.msra.mxu0 %v3763_v0  ;;  %2750 = vmatpush1.bf16.msra.mxu1 %v3766_v1 }
  0x40   :  { %2710 = vmatprep.subr.bf16.mxu0 %v3771_v2  ;;  %2751 = vmatprep.subr.bf16.mxu1 %v3774_v3  ;;  %v3817_v2 = vld [vmem:[%s5679_s3 + $0x2a8] ss:$48 sps:$4 sm:$0xff]  }
  0x41   :  { %v3820_v3 = vld [vmem:[%s5679_s3 + $0x8a8] ss:$48 sps:$4 sm:$0xff]  }
  0x43   :  { %2711 = vmatpush2.bf16.msra.mxu0 %v3769_v4  ;;  %2752 = vmatpush2.bf16.msra.mxu1 %v3772_v5  ;;  %v3825_v5 = vld [vmem:[%s5679_s3 + $0x24c] ss:$48 sps:$4 sm:$0xff]  }
  0x44   :  { %2712 = vmatprep.subr.bf16.mxu0 %v3777_v6  ;;  %2753 = vmatprep.subr.bf16.mxu1 %v3780_v7  ;;  %v3828_v6 = vld [vmem:[%s5679_s3 + $0x84c] ss:$48 sps:$4 sm:$0xff]   ;;  %v3823_v7 = vld [vmem:[%s5679_s3 + $0x248] ss:$48 sps:$4 sm:$0xff]  }
  0x47   :  { %2713 = vmatpush2.bf16.msra.mxu0 %v3775_v8  ;;  %2754 = vmatpush2.bf16.msra.mxu1 %v3778_v9  ;;  %v3826_v8 = vld [vmem:[%s5679_s3 + $0x848] ss:$48 sps:$4 sm:$0xff]   ;;  %v3831_v9 = vld [vmem:[%s5679_s3 + $0x1ec] ss:$48 sps:$4 sm:$0xff]  }
  0x48   :  { %2714 = vmatprep.subr.bf16.mxu0 %v3783_v10  ;;  %2755 = vmatprep.subr.bf16.mxu1 %v3786_v11  ;;  %v3834_v10 = vld [vmem:[%s5679_s3 + $0x7ec] ss:$48 sps:$4 sm:$0xff]   ;;  %v3829_v11 = vld [vmem:[%s5679_s3 + $0x1e8] ss:$48 sps:$4 sm:$0xff]  }
  0x4b   :  { %2715 = vmatpush2.bf16.msra.mxu0 %v3781_v12  ;;  %2756 = vmatpush2.bf16.msra.mxu1 %v3784_v13  ;;  %v3832_v12 = vld [vmem:[%s5679_s3 + $0x7e8] ss:$48 sps:$4 sm:$0xff]   ;;  %v3837_v13 = vld [vmem:[%s5679_s3 + $0x18c] ss:$48 sps:$4 sm:$0xff]  }
  0x4c   :  { %2716 = vmatprep.subr.bf16.mxu0 %v3789_v14  ;;  %2757 = vmatprep.subr.bf16.mxu1 %v3792_v15  ;;  %v3840_v14 = vld [vmem:[%s5679_s3 + $0x78c] ss:$48 sps:$4 sm:$0xff]   ;;  %v3835_v15 = vld [vmem:[%s5679_s3 + $0x188] ss:$48 sps:$4 sm:$0xff]  }
  0x4f   :  { %2717 = vmatpush2.bf16.msra.mxu0 %v3787_v16  ;;  %2758 = vmatpush2.bf16.msra.mxu1 %v3790_v17  ;;  %v3838_v16 = vld [vmem:[%s5679_s3 + $0x788] ss:$48 sps:$4 sm:$0xff]   ;;  %v3843_v17 = vld [vmem:[%s5679_s3 + $0x12c] ss:$48 sps:$4 sm:$0xff]  }
  0x50   :  { %2718 = vmatprep.subr.bf16.mxu0 %v3795_v18  ;;  %2759 = vmatprep.subr.bf16.mxu1 %v3798_v19  ;;  %v3846_v18 = vld [vmem:[%s5679_s3 + $0x72c] ss:$48 sps:$4 sm:$0xff]   ;;  %v3841_v19 = vld [vmem:[%s5679_s3 + $0x128] ss:$48 sps:$4 sm:$0xff]  }
  0x53   :  { %2719 = vmatpush2.bf16.msra.mxu0 %v3793_v20  ;;  %2760 = vmatpush2.bf16.msra.mxu1 %v3796_v21  ;;  %v3844_v20 = vld [vmem:[%s5679_s3 + $0x728] ss:$48 sps:$4 sm:$0xff]   ;;  %v3849_v21 = vld [vmem:[%s5679_s3 + $0xcc] ss:$48 sps:$4 sm:$0xff]  }
  0x54   :  { %2720 = vmatprep.subr.bf16.mxu0 %v3801_v22  ;;  %2761 = vmatprep.subr.bf16.mxu1 %v3804_v23  ;;  %v3852_v22 = vld [vmem:[%s5679_s3 + $0x6cc] ss:$48 sps:$4 sm:$0xff]   ;;  %v3847_v23 = vld [vmem:[%s5679_s3 + $0xc8] ss:$48 sps:$4 sm:$0xff]  }
  0x57   :  { %2721 = vmatpush2.bf16.msra.mxu0 %v3799_v24  ;;  %2762 = vmatpush2.bf16.msra.mxu1 %v3802_v25  ;;  %v3850_v24 = vld [vmem:[%s5679_s3 + $0x6c8] ss:$48 sps:$4 sm:$0xff]   ;;  %v3855_v25 = vld [vmem:[%s5679_s3 + $0x6c] ss:$48 sps:$4 sm:$0xff]  }
  0x58   :  { %2722 = vmatprep.subr.bf16.mxu0 %v3807_v26  ;;  %2763 = vmatprep.subr.bf16.mxu1 %v3810_v27  ;;  %v3858_v26 = vld [vmem:[%s5679_s3 + $0x66c] ss:$48 sps:$4 sm:$0xff]   ;;  %v3853_v27 = vld [vmem:[%s5679_s3 + $0x68] ss:$48 sps:$4 sm:$0xff]  }
  0x5b   :  { %2723 = vmatpush2.bf16.msra.mxu0 %v3805_v28  ;;  %2764 = vmatpush2.bf16.msra.mxu1 %v3808_v29  ;;  %v3856_v28 = vld [vmem:[%s5679_s3 + $0x668] ss:$48 sps:$4 sm:$0xff]   ;;  %v3861_v29 = vld [vmem:[%s5679_s3 + $0xc] ss:$48 sps:$4 sm:$0xff]  }
  0x5c   :  { %2724 = vmatprep.subr.bf16.mxu0 %v3813_v30  ;;  %2765 = vmatprep.subr.bf16.mxu1 %v3816_v31  ;;  %v3864_v30 = vld [vmem:[%s5679_s3 + $0x60c] ss:$48 sps:$4 sm:$0xff]   ;;  %v3859_v31 = vld [vmem:[%s5679_s3 + $0x8] ss:$48 sps:$4 sm:$0xff]  }
  0x5f   :  { %2725 = vmatpush2.bf16.msra.mxu0 %v3811_v32  ;;  %2766 = vmatpush2.bf16.msra.mxu1 %v3814_v33  ;;  %v3862_v32 = vld [vmem:[%s5679_s3 + $0x608] ss:$48 sps:$4 sm:$0xff]   ;;  %v3867_v33 = vld [vmem:[%s5679_s3 + $0x5ac] ss:$48 sps:$4 sm:$0xff]  }
  0x60   :  { %2776 = vmatprep.subr.bf16.mxu0 %v3819_v34  ;;  %2817 = vmatprep.subr.bf16.mxu1 %v3822_v35  ;;  %v3870_v34 = vld [vmem:[%s5679_s3 + $0xbac] ss:$48 sps:$4 sm:$0xff]   ;;  %v3865_v35 = vld [vmem:[%s5679_s3 + $0x5a8] ss:$48 sps:$4 sm:$0xff]  }
  0xe2   :  { %v270_v47 = vpop.f32.mrf.mxu0  ;;  %v311_v48 = vpop.f32.mrf.mxu1 }
  0xe3   :  { %v271_v49 = vadd.f32 %v270_v47, %v59_v43  ;;  %v312_v50 = vadd.f32 %v311_v48, %v67_v44  ;;  %v3876_v43 = vld [vmem:[%s5679_s3 + $0xb4c] ss:$48 sps:$4 sm:$0xff]   ;;  %v3871_v44 = vld [vmem:[%s5679_s3 + $0x548] ss:$48 sps:$4 sm:$0xff]  }
  0xe4   :  { %v272_v51 = vpop.f32.mrf.mxu0  ;;  %v313_v52 = vpop.f32.mrf.mxu1  ;;  %v3882_v47 = vld [vmem:[%s5679_s3 + $0xaec] ss:$48 sps:$4 sm:$0xff]   ;;  %v3877_v48 = vld [vmem:[%s5679_s3 + $0x4e8] ss:$48 sps:$4 sm:$0xff]  }
  0xe5   :  { %v320_v53 = vmax.f32 %v312_v50, 0.0  ;;  %v273_v54 = vadd.f32 %v272_v51, %v63_v45  ;;  %v314_v55 = vadd.f32 %v313_v52, %v71_v46  ;;  %v318_v56 = vmax.f32 %v271_v49, 0.0  ;;  %v3874_v45 = vld [vmem:[%s5679_s3 + $0xb48] ss:$48 sps:$4 sm:$0xff]   ;;  %v3879_v46 = vld [vmem:[%s5679_s3 + $0x4ec] ss:$48 sps:$4 sm:$0xff]  }
  0xe6   :  { %v274_v57 = vpop.f32.mrf.mxu0  ;;  %v315_v58 = vpop.f32.mrf.mxu1  ;;  %v3880_v49 = vld [vmem:[%s5679_s3 + $0xae8] ss:$48 sps:$4 sm:$0xff]   ;;  %v3885_v50 = vld [vmem:[%s5679_s3 + $0x48c] ss:$48 sps:$4 sm:$0xff]  }
  0xe7   :  { %v319_v59 = vmax.f32 %v273_v54, 0.0  ;;  %v321_v60 = vmax.f32 %v314_v55, 0.0  ;;  %v4646_v61 = vpack.c.bf16 %v320_v53, %v320_v53  ;;  %v4658_v4 = vpack.c.bf16 %v318_v56, %v318_v56  ;;  %v3888_v51 = vld [vmem:[%s5679_s3 + $0xa8c] ss:$48 sps:$4 sm:$0xff]   ;;  %v3883_v52 = vld [vmem:[%s5679_s3 + $0x488] ss:$48 sps:$4 sm:$0xff]  }
  0xe8   :  { %v275_v62 = vpop.f32.mrf.mxu0  ;;  %v316_v63 = vpop.f32.mrf.mxu1  ;;  %v3886_v53 = vld [vmem:[%s5679_s3 + $0xa88] ss:$48 sps:$4 sm:$0xff]   ;;  %v3891_v54 = vld [vmem:[%s5679_s3 + $0x42c] ss:$48 sps:$4 sm:$0xff]  }
  0xe9   :  { %v4648_v0 = vpack.c.bf16 %v319_v59, %v319_v59  ;;  %v4650_v1 = vpack.c.bf16 %v321_v60, %v321_v60  ;;  %v3894_v55 = vld [vmem:[%s5679_s3 + $0xa2c] ss:$48 sps:$4 sm:$0xff]   ;;  %v3889_v56 = vld [vmem:[%s5679_s3 + $0x428] ss:$48 sps:$4 sm:$0xff]  }
  0xea   :  { %v3892_v57 = vld [vmem:[%s5679_s3 + $0xa28] ss:$48 sps:$4 sm:$0xff]   ;;  %v3897_v58 = vld [vmem:[%s5679_s3 + $0x3cc] ss:$48 sps:$4 sm:$0xff]  }
  0xeb   :  { %2726 = vmatprep.mubr.bf16.mxu0 %v4648_v0  ;;  %2767 = vmatprep.mubr.bf16.mxu1 %v4650_v1  ;;  %v3900_v59 = vld [vmem:[%s5679_s3 + $0x9cc] ss:$48 sps:$4 sm:$0xff]   ;;  %v3895_v60 = vld [vmem:[%s5679_s3 + $0x3c8] ss:$48 sps:$4 sm:$0xff]  }
  0xec   :  { %2727 = vmatmul.mubr.bf16.vlgmr.msra.gmra.mxu0 %v4658_v4  ;;  %2768 = vmatmul.mubr.bf16.vlgmr.msra.gmra.mxu1 %v4646_v61  ;;  %v3898_v62 = vld [vmem:[%s5679_s3 + $0x9c8] ss:$48 sps:$4 sm:$0xff]   ;;  %v3903_v63 = vld [vmem:[%s5679_s3 + $0x36c] ss:$48 sps:$4 sm:$0xff]  }
  0xed   :  { %2777 = vmatpush1.bf16.msra.mxu0 %v3817_v2  ;;  %2818 = vmatpush1.bf16.msra.mxu1 %v3820_v3  ;;  %v3906_v2 = vld [vmem:[%s5679_s3 + $0x96c] ss:$48 sps:$4 sm:$0xff]   ;;  %v3901_v3 = vld [vmem:[%s5679_s3 + $0x368] ss:$48 sps:$4 sm:$0xff]  }
  0xee   :  { %2808 = vmatprep.mubr.bf16.mxu0 %v4648_v0  ;;  %2849 = vmatprep.mubr.bf16.mxu1 %v4650_v1 }
  0xef   :  { %2778 = vmatprep.subr.bf16.mxu0 %v3825_v5  ;;  %2819 = vmatprep.subr.bf16.mxu1 %v3828_v6  ;;  %v3904_v5 = vld [vmem:[%s5679_s3 + $0x968] ss:$48 sps:$4 sm:$0xff]   ;;  %v3909_v6 = vld [vmem:[%s5679_s3 + $0x30c] ss:$48 sps:$4 sm:$0xff]  }
  0xf1   :  { %2779 = vmatpush1.bf16.msra.mxu0 %v3823_v7  ;;  %2820 = vmatpush1.bf16.msra.mxu1 %v3826_v8  ;;  %v3912_v7 = vld [vmem:[%s5679_s3 + $0x90c] ss:$48 sps:$4 sm:$0xff]   ;;  %v3907_v8 = vld [vmem:[%s5679_s3 + $0x308] ss:$48 sps:$4 sm:$0xff]  }
  0xf2   :  { %2780 = vmatprep.subr.bf16.mxu0 %v3831_v9  ;;  %2821 = vmatprep.subr.bf16.mxu1 %v3834_v10  ;;  %v3910_v9 = vld [vmem:[%s5679_s3 + $0x908] ss:$48 sps:$4 sm:$0xff]   ;;  %v3915_v10 = vld [vmem:[%s5679_s3 + $0x2b4] ss:$48 sps:$4 sm:$0xff]  }
  0xf5   :  { %2781 = vmatpush1.bf16.msra.mxu0 %v3829_v11  ;;  %2822 = vmatpush1.bf16.msra.mxu1 %v3832_v12  ;;  %v3918_v11 = vld [vmem:[%s5679_s3 + $0x8b4] ss:$48 sps:$4 sm:$0xff]   ;;  %v3913_v12 = vld [vmem:[%s5679_s3 + $0x2b0] ss:$48 sps:$4 sm:$0xff]  }
  0xf6   :  { %2782 = vmatprep.subr.bf16.mxu0 %v3837_v13  ;;  %2823 = vmatprep.subr.bf16.mxu1 %v3840_v14  ;;  %v3916_v13 = vld [vmem:[%s5679_s3 + $0x8b0] ss:$48 sps:$4 sm:$0xff]   ;;  %v3921_v14 = vld [vmem:[%s5679_s3 + $0x254] ss:$48 sps:$4 sm:$0xff]  }
  0xf9   :  { %2783 = vmatpush1.bf16.msra.mxu0 %v3835_v15  ;;  %2824 = vmatpush1.bf16.msra.mxu1 %v3838_v16  ;;  %v3924_v15 = vld [vmem:[%s5679_s3 + $0x854] ss:$48 sps:$4 sm:$0xff]   ;;  %v3919_v16 = vld [vmem:[%s5679_s3 + $0x250] ss:$48 sps:$4 sm:$0xff]  }
  0xfa   :  { %2784 = vmatprep.subr.bf16.mxu0 %v3843_v17  ;;  %2825 = vmatprep.subr.bf16.mxu1 %v3846_v18  ;;  %v3922_v17 = vld [vmem:[%s5679_s3 + $0x850] ss:$48 sps:$4 sm:$0xff]   ;;  %v3927_v18 = vld [vmem:[%s5679_s3 + $0x1f4] ss:$48 sps:$4 sm:$0xff]  }
  0xfd   :  { %2785 = vmatpush1.bf16.msra.mxu0 %v3841_v19  ;;  %2826 = vmatpush1.bf16.msra.mxu1 %v3844_v20  ;;  %v3930_v19 = vld [vmem:[%s5679_s3 + $0x7f4] ss:$48 sps:$4 sm:$0xff]   ;;  %v3925_v20 = vld [vmem:[%s5679_s3 + $0x1f0] ss:$48 sps:$4 sm:$0xff]  }
  0xfe   :  { %2786 = vmatprep.subr.bf16.mxu0 %v3849_v21  ;;  %2827 = vmatprep.subr.bf16.mxu1 %v3852_v22  ;;  %v3928_v21 = vld [vmem:[%s5679_s3 + $0x7f0] ss:$48 sps:$4 sm:$0xff]   ;;  %v3933_v22 = vld [vmem:[%s5679_s3 + $0x194] ss:$48 sps:$4 sm:$0xff]  }
 0x101   :  { %2787 = vmatpush1.bf16.msra.mxu0 %v3847_v23  ;;  %2828 = vmatpush1.bf16.msra.mxu1 %v3850_v24  ;;  %v3936_v23 = vld [vmem:[%s5679_s3 + $0x794] ss:$48 sps:$4 sm:$0xff]   ;;  %v3931_v24 = vld [vmem:[%s5679_s3 + $0x190] ss:$48 sps:$4 sm:$0xff]  }
 0x102   :  { %2788 = vmatprep.subr.bf16.mxu0 %v3855_v25  ;;  %2829 = vmatprep.subr.bf16.mxu1 %v3858_v26  ;;  %v3934_v25 = vld [vmem:[%s5679_s3 + $0x790] ss:$48 sps:$4 sm:$0xff]   ;;  %v3939_v26 = vld [vmem:[%s5679_s3 + $0x134] ss:$48 sps:$4 sm:$0xff]  }
 0x105   :  { %2789 = vmatpush1.bf16.msra.mxu0 %v3853_v27  ;;  %2830 = vmatpush1.bf16.msra.mxu1 %v3856_v28  ;;  %v3942_v27 = vld [vmem:[%s5679_s3 + $0x734] ss:$48 sps:$4 sm:$0xff]   ;;  %v3937_v28 = vld [vmem:[%s5679_s3 + $0x130] ss:$48 sps:$4 sm:$0xff]  }
 0x106   :  { %2790 = vmatprep.subr.bf16.mxu0 %v3861_v29  ;;  %2831 = vmatprep.subr.bf16.mxu1 %v3864_v30  ;;  %v3940_v29 = vld [vmem:[%s5679_s3 + $0x730] ss:$48 sps:$4 sm:$0xff]   ;;  %v3945_v30 = vld [vmem:[%s5679_s3 + $0xd4] ss:$48 sps:$4 sm:$0xff]  }
 0x109   :  { %2791 = vmatpush1.bf16.msra.mxu0 %v3859_v31  ;;  %2832 = vmatpush1.bf16.msra.mxu1 %v3862_v32  ;;  %v3948_v31 = vld [vmem:[%s5679_s3 + $0x6d4] ss:$48 sps:$4 sm:$0xff]   ;;  %v3943_v32 = vld [vmem:[%s5679_s3 + $0xd0] ss:$48 sps:$4 sm:$0xff]  }
 0x10a   :  { %2792 = vmatprep.subr.bf16.mxu0 %v3867_v33  ;;  %2833 = vmatprep.subr.bf16.mxu1 %v3870_v34  ;;  %v3946_v33 = vld [vmem:[%s5679_s3 + $0x6d0] ss:$48 sps:$4 sm:$0xff]   ;;  %v3951_v34 = vld [vmem:[%s5679_s3 + $0x74] ss:$48 sps:$4 sm:$0xff]  }
 0x10d   :  { %2793 = vmatpush2.bf16.msra.mxu0 %v3865_v35  ;;  %2834 = vmatpush2.bf16.msra.mxu1 %v3868_v36  ;;  %v3954_v35 = vld [vmem:[%s5679_s3 + $0x674] ss:$48 sps:$4 sm:$0xff]   ;;  %v3949_v36 = vld [vmem:[%s5679_s3 + $0x70] ss:$48 sps:$4 sm:$0xff]  }
 0x10e   :  { %2794 = vmatprep.subr.bf16.mxu0 %v3873_v40  ;;  %2835 = vmatprep.subr.bf16.mxu1 %v3876_v43  ;;  %v3952_v40 = vld [vmem:[%s5679_s3 + $0x670] ss:$48 sps:$4 sm:$0xff]   ;;  %v3957_v43 = vld [vmem:[%s5679_s3 + $0x14] ss:$48 sps:$4 sm:$0xff]  }
 0x111   :  { %2795 = vmatpush2.bf16.msra.mxu0 %v3871_v44  ;;  %2836 = vmatpush2.bf16.msra.mxu1 %v3874_v45  ;;  %v3960_v44 = vld [vmem:[%s5679_s3 + $0x614] ss:$48 sps:$4 sm:$0xff]   ;;  %v3955_v45 = vld [vmem:[%s5679_s3 + $0x10] ss:$48 sps:$4 sm:$0xff]  }
 0x112   :  { %2796 = vmatprep.subr.bf16.mxu0 %v3879_v46  ;;  %2837 = vmatprep.subr.bf16.mxu1 %v3882_v47  ;;  %v3958_v46 = vld [vmem:[%s5679_s3 + $0x610] ss:$48 sps:$4 sm:$0xff]   ;;  %v3963_v47 = vld [vmem:[%s5679_s3 + $0x5b4] ss:$48 sps:$4 sm:$0xff]  }
 0x115   :  { %2797 = vmatpush2.bf16.msra.mxu0 %v3877_v48  ;;  %2838 = vmatpush2.bf16.msra.mxu1 %v3880_v49  ;;  %v3966_v48 = vld [vmem:[%s5679_s3 + $0xbb4] ss:$48 sps:$4 sm:$0xff]   ;;  %v3961_v49 = vld [vmem:[%s5679_s3 + $0x5b0] ss:$48 sps:$4 sm:$0xff]  }
 0x116   :  { %2798 = vmatprep.subr.bf16.mxu0 %v3885_v50  ;;  %2839 = vmatprep.subr.bf16.mxu1 %v3888_v51  ;;  %v3964_v50 = vld [vmem:[%s5679_s3 + $0xbb0] ss:$48 sps:$4 sm:$0xff]   ;;  %v3969_v51 = vld [vmem:[%s5679_s3 + $0x554] ss:$48 sps:$4 sm:$0xff]  }
 0x119   :  { %2799 = vmatpush2.bf16.msra.mxu0 %v3883_v52  ;;  %2840 = vmatpush2.bf16.msra.mxu1 %v3886_v53  ;;  %v3972_v52 = vld [vmem:[%s5679_s3 + $0xb54] ss:$48 sps:$4 sm:$0xff]   ;;  %v3967_v53 = vld [vmem:[%s5679_s3 + $0x550] ss:$48 sps:$4 sm:$0xff]  }
 0x11a   :  { %2800 = vmatprep.subr.bf16.mxu0 %v3891_v54  ;;  %2841 = vmatprep.subr.bf16.mxu1 %v3894_v55  ;;  %v3970_v54 = vld [vmem:[%s5679_s3 + $0xb50] ss:$48 sps:$4 sm:$0xff]   ;;  %v3975_v55 = vld [vmem:[%s5679_s3 + $0x4f4] ss:$48 sps:$4 sm:$0xff]  }
 0x11d   :  { %2801 = vmatpush2.bf16.msra.mxu0 %v3889_v56  ;;  %2842 = vmatpush2.bf16.msra.mxu1 %v3892_v57  ;;  %v3978_v56 = vld [vmem:[%s5679_s3 + $0xaf4] ss:$48 sps:$4 sm:$0xff]   ;;  %v3973_v57 = vld [vmem:[%s5679_s3 + $0x4f0] ss:$48 sps:$4 sm:$0xff]  }
 0x11e   :  { %2802 = vmatprep.subr.bf16.mxu0 %v3897_v58  ;;  %2843 = vmatprep.subr.bf16.mxu1 %v3900_v59  ;;  %v3976_v58 = vld [vmem:[%s5679_s3 + $0xaf0] ss:$48 sps:$4 sm:$0xff]   ;;  %v3981_v59 = vld [vmem:[%s5679_s3 + $0x494] ss:$48 sps:$4 sm:$0xff]  }
 0x121   :  { %2803 = vmatpush2.bf16.msra.mxu0 %v3895_v60  ;;  %2844 = vmatpush2.bf16.msra.mxu1 %v3898_v62  ;;  %v3984_v60 = vld [vmem:[%s5679_s3 + $0xa94] ss:$48 sps:$4 sm:$0xff]   ;;  %v3979_v62 = vld [vmem:[%s5679_s3 + $0x490] ss:$48 sps:$4 sm:$0xff]  }
 0x122   :  { %2804 = vmatprep.subr.bf16.mxu0 %v3903_v63  ;;  %2845 = vmatprep.subr.bf16.mxu1 %v3906_v2  ;;  %v3982_v63 = vld [vmem:[%s5679_s3 + $0xa90] ss:$48 sps:$4 sm:$0xff]   ;;  %v3987_v2 = vld [vmem:[%s5679_s3 + $0x434] ss:$48 sps:$4 sm:$0xff]  }
 0x125   :  { %2805 = vmatpush2.bf16.msra.mxu0 %v3901_v3  ;;  %2846 = vmatpush2.bf16.msra.mxu1 %v3904_v5  ;;  %v3990_v3 = vld [vmem:[%s5679_s3 + $0xa34] ss:$48 sps:$4 sm:$0xff]   ;;  %v3985_v5 = vld [vmem:[%s5679_s3 + $0x430] ss:$48 sps:$4 sm:$0xff]  }
 0x126   :  { %2806 = vmatprep.subr.bf16.mxu0 %v3909_v6  ;;  %2847 = vmatprep.subr.bf16.mxu1 %v3912_v7  ;;  %v3988_v6 = vld [vmem:[%s5679_s3 + $0xa30] ss:$48 sps:$4 sm:$0xff]   ;;  %v3993_v7 = vld [vmem:[%s5679_s3 + $0x3d4] ss:$48 sps:$4 sm:$0xff]  }
 0x129   :  { %2807 = vmatpush2.bf16.msra.mxu0 %v3907_v8  ;;  %2848 = vmatpush2.bf16.msra.mxu1 %v3910_v9  ;;  %v3996_v8 = vld [vmem:[%s5679_s3 + $0x9d4] ss:$48 sps:$4 sm:$0xff]   ;;  %v3991_v9 = vld [vmem:[%s5679_s3 + $0x3d0] ss:$48 sps:$4 sm:$0xff]  }
 0x12a   :  { %2858 = vmatprep.subr.bf16.mxu0 %v3915_v10  ;;  %2899 = vmatprep.subr.bf16.mxu1 %v3918_v11  ;;  %v3994_v10 = vld [vmem:[%s5679_s3 + $0x9d0] ss:$48 sps:$4 sm:$0xff]   ;;  %v3999_v11 = vld [vmem:[%s5679_s3 + $0x374] ss:$48 sps:$4 sm:$0xff]  }
 0x12c   :  { %2809 = vmatmul.mubr.bf16.vlgmr.msra.gmra.mxu0 %v4658_v4  ;;  %2850 = vmatmul.mubr.bf16.vlgmr.msra.gmra.mxu1 %v4646_v61 }
 0x12d   :  { %2859 = vmatpush1.bf16.msra.mxu0 %v3913_v12  ;;  %2890 = vmatprep.mubr.bf16.mxu0 %v4648_v0  ;;  %v4002_v12 = vld [vmem:[%s5679_s3 + $0x974] ss:$48 sps:$4 sm:$0xff]  }
 0x12e   :  { %2900 = vmatpush1.bf16.msra.mxu1 %v3916_v13  ;;  %2931 = vmatprep.mubr.bf16.mxu1 %v4650_v1  ;;  %v3997_v13 = vld [vmem:[%s5679_s3 + $0x370] ss:$48 sps:$4 sm:$0xff]  }
 0x12f   :  { %2860 = vmatprep.subr.bf16.mxu0 %v3921_v14  ;;  %2901 = vmatprep.subr.bf16.mxu1 %v3924_v15  ;;  %v4000_v14 = vld [vmem:[%s5679_s3 + $0x970] ss:$48 sps:$4 sm:$0xff]   ;;  %v4005_v15 = vld [vmem:[%s5679_s3 + $0x314] ss:$48 sps:$4 sm:$0xff]  }
 0x131   :  { %2861 = vmatpush1.bf16.msra.mxu0 %v3919_v16  ;;  %v4008_v16 = vld [vmem:[%s5679_s3 + $0x914] ss:$48 sps:$4 sm:$0xff]  }
 0x132   :  { %2902 = vmatpush1.bf16.msra.mxu1 %v3922_v17  ;;  %2862 = vmatprep.subr.bf16.mxu0 %v3927_v18  ;;  %v4003_v17 = vld [vmem:[%s5679_s3 + $0x310] ss:$48 sps:$4 sm:$0xff]  }
 0x133   :  { %2903 = vmatprep.subr.bf16.mxu1 %v3930_v19  ;;  %v4006_v18 = vld [vmem:[%s5679_s3 + $0x910] ss:$48 sps:$4 sm:$0xff]   ;;  %v4011_v19 = vld [vmem:[%s5679_s3 + $0x2bc] ss:$48 sps:$4 sm:$0xff]  }
 0x135   :  { %2863 = vmatpush1.bf16.msra.mxu0 %v3925_v20  ;;  %v4014_v20 = vld [vmem:[%s5679_s3 + $0x8bc] ss:$48 sps:$4 sm:$0xff]  }
 0x136   :  { %2904 = vmatpush1.bf16.msra.mxu1 %v3928_v21  ;;  %2864 = vmatprep.subr.bf16.mxu0 %v3933_v22  ;;  %v4009_v21 = vld [vmem:[%s5679_s3 + $0x2b8] ss:$48 sps:$4 sm:$0xff]  }
 0x137   :  { %2905 = vmatprep.subr.bf16.mxu1 %v3936_v23  ;;  %v4012_v22 = vld [vmem:[%s5679_s3 + $0x8b8] ss:$48 sps:$4 sm:$0xff]   ;;  %v4017_v23 = vld [vmem:[%s5679_s3 + $0x25c] ss:$48 sps:$4 sm:$0xff]  }
 0x139   :  { %2865 = vmatpush1.bf16.msra.mxu0 %v3931_v24  ;;  %v4020_v24 = vld [vmem:[%s5679_s3 + $0x85c] ss:$48 sps:$4 sm:$0xff]  }
 0x13a   :  { %2906 = vmatpush1.bf16.msra.mxu1 %v3934_v25  ;;  %2866 = vmatprep.subr.bf16.mxu0 %v3939_v26  ;;  %v4015_v25 = vld [vmem:[%s5679_s3 + $0x258] ss:$48 sps:$4 sm:$0xff]  }
 0x13b   :  { %2907 = vmatprep.subr.bf16.mxu1 %v3942_v27  ;;  %v4018_v26 = vld [vmem:[%s5679_s3 + $0x858] ss:$48 sps:$4 sm:$0xff]   ;;  %v4023_v27 = vld [vmem:[%s5679_s3 + $0x1fc] ss:$48 sps:$4 sm:$0xff]  }
 0x13d   :  { %2867 = vmatpush1.bf16.msra.mxu0 %v3937_v28  ;;  %v4026_v28 = vld [vmem:[%s5679_s3 + $0x7fc] ss:$48 sps:$4 sm:$0xff]  }
 0x13e   :  { %2908 = vmatpush1.bf16.msra.mxu1 %v3940_v29  ;;  %2868 = vmatprep.subr.bf16.mxu0 %v3945_v30  ;;  %v4021_v29 = vld [vmem:[%s5679_s3 + $0x1f8] ss:$48 sps:$4 sm:$0xff]  }
 0x13f   :  { %2909 = vmatprep.subr.bf16.mxu1 %v3948_v31  ;;  %v4024_v30 = vld [vmem:[%s5679_s3 + $0x7f8] ss:$48 sps:$4 sm:$0xff]   ;;  %v4029_v31 = vld [vmem:[%s5679_s3 + $0x19c] ss:$48 sps:$4 sm:$0xff]  }
 0x141   :  { %2869 = vmatpush1.bf16.msra.mxu0 %v3943_v32  ;;  %v4032_v32 = vld [vmem:[%s5679_s3 + $0x79c] ss:$48 sps:$4 sm:$0xff]  }
 0x142   :  { %2910 = vmatpush1.bf16.msra.mxu1 %v3946_v33  ;;  %2870 = vmatprep.subr.bf16.mxu0 %v3951_v34  ;;  %v4027_v33 = vld [vmem:[%s5679_s3 + $0x198] ss:$48 sps:$4 sm:$0xff]  }
 0x143   :  { %2911 = vmatprep.subr.bf16.mxu1 %v3954_v35  ;;  %v4030_v34 = vld [vmem:[%s5679_s3 + $0x798] ss:$48 sps:$4 sm:$0xff]   ;;  %v4035_v35 = vld [vmem:[%s5679_s3 + $0x13c] ss:$48 sps:$4 sm:$0xff]  }
 0x145   :  { %2871 = vmatpush1.bf16.msra.mxu0 %v3949_v36  ;;  %v4038_v36 = vld [vmem:[%s5679_s3 + $0x73c] ss:$48 sps:$4 sm:$0xff]  }
 0x146   :  { %2912 = vmatpush1.bf16.msra.mxu1 %v3952_v40  ;;  %2872 = vmatprep.subr.bf16.mxu0 %v3957_v43  ;;  %v4033_v40 = vld [vmem:[%s5679_s3 + $0x138] ss:$48 sps:$4 sm:$0xff]  }
 0x147   :  { %2913 = vmatprep.subr.bf16.mxu1 %v3960_v44  ;;  %v4036_v43 = vld [vmem:[%s5679_s3 + $0x738] ss:$48 sps:$4 sm:$0xff]   ;;  %v4041_v44 = vld [vmem:[%s5679_s3 + $0xdc] ss:$48 sps:$4 sm:$0xff]  }
 0x149   :  { %2873 = vmatpush1.bf16.msra.mxu0 %v3955_v45  ;;  %v4044_v45 = vld [vmem:[%s5679_s3 + $0x6dc] ss:$48 sps:$4 sm:$0xff]  }
 0x14a   :  { %2914 = vmatpush1.bf16.msra.mxu1 %v3958_v46  ;;  %2874 = vmatprep.subr.bf16.mxu0 %v3963_v47  ;;  %v4039_v46 = vld [vmem:[%s5679_s3 + $0xd8] ss:$48 sps:$4 sm:$0xff]  }
 0x14b   :  { %2915 = vmatprep.subr.bf16.mxu1 %v3966_v48  ;;  %v4042_v47 = vld [vmem:[%s5679_s3 + $0x6d8] ss:$48 sps:$4 sm:$0xff]   ;;  %v4047_v48 = vld [vmem:[%s5679_s3 + $0x7c] ss:$48 sps:$4 sm:$0xff]  }
 0x14d   :  { %2875 = vmatpush2.bf16.msra.mxu0 %v3961_v49  ;;  %v4050_v49 = vld [vmem:[%s5679_s3 + $0x67c] ss:$48 sps:$4 sm:$0xff]  }
 0x14e   :  { %2916 = vmatpush2.bf16.msra.mxu1 %v3964_v50  ;;  %2876 = vmatprep.subr.bf16.mxu0 %v3969_v51  ;;  %v4045_v50 = vld [vmem:[%s5679_s3 + $0x78] ss:$48 sps:$4 sm:$0xff]  }
 0x14f   :  { %2917 = vmatprep.subr.bf16.mxu1 %v3972_v52  ;;  %v4048_v51 = vld [vmem:[%s5679_s3 + $0x678] ss:$48 sps:$4 sm:$0xff]   ;;  %v4053_v52 = vld [vmem:[%s5679_s3 + $0x1c] ss:$48 sps:$4 sm:$0xff]  }
 0x151   :  { %2877 = vmatpush2.bf16.msra.mxu0 %v3967_v53  ;;  %v4056_v53 = vld [vmem:[%s5679_s3 + $0x61c] ss:$48 sps:$4 sm:$0xff]  }
 0x152   :  { %2918 = vmatpush2.bf16.msra.mxu1 %v3970_v54  ;;  %2878 = vmatprep.subr.bf16.mxu0 %v3975_v55  ;;  %v4051_v54 = vld [vmem:[%s5679_s3 + $0x18] ss:$48 sps:$4 sm:$0xff]  }
 0x153   :  { %2919 = vmatprep.subr.bf16.mxu1 %v3978_v56  ;;  %v4054_v55 = vld [vmem:[%s5679_s3 + $0x618] ss:$48 sps:$4 sm:$0xff]   ;;  %v4059_v56 = vld [vmem:[%s5679_s3 + $0x5bc] ss:$48 sps:$4 sm:$0xff]  }
 0x155   :  { %2879 = vmatpush2.bf16.msra.mxu0 %v3973_v57  ;;  %v4062_v57 = vld [vmem:[%s5679_s3 + $0xbbc] ss:$48 sps:$4 sm:$0xff]  }
 0x156   :  { %2920 = vmatpush2.bf16.msra.mxu1 %v3976_v58  ;;  %2880 = vmatprep.subr.bf16.mxu0 %v3981_v59  ;;  %v4057_v58 = vld [vmem:[%s5679_s3 + $0x5b8] ss:$48 sps:$4 sm:$0xff]  }
 0x157   :  { %2921 = vmatprep.subr.bf16.mxu1 %v3984_v60  ;;  %v4060_v59 = vld [vmem:[%s5679_s3 + $0xbb8] ss:$48 sps:$4 sm:$0xff]   ;;  %v4065_v60 = vld [vmem:[%s5679_s3 + $0x55c] ss:$48 sps:$4 sm:$0xff]  }
 0x159   :  { %2881 = vmatpush2.bf16.msra.mxu0 %v3979_v62  ;;  %v4068_v62 = vld [vmem:[%s5679_s3 + $0xb5c] ss:$48 sps:$4 sm:$0xff]  }
 0x15a   :  { %2922 = vmatpush2.bf16.msra.mxu1 %v3982_v63  ;;  %2882 = vmatprep.subr.bf16.mxu0 %v3987_v2  ;;  %v4063_v63 = vld [vmem:[%s5679_s3 + $0x558] ss:$48 sps:$4 sm:$0xff]  }
 0x15b   :  { %2923 = vmatprep.subr.bf16.mxu1 %v3990_v3  ;;  %v4066_v2 = vld [vmem:[%s5679_s3 + $0xb58] ss:$48 sps:$4 sm:$0xff]   ;;  %v4071_v3 = vld [vmem:[%s5679_s3 + $0x4fc] ss:$48 sps:$4 sm:$0xff]  }
 0x15d   :  { %2883 = vmatpush2.bf16.msra.mxu0 %v3985_v5  ;;  %v4074_v5 = vld [vmem:[%s5679_s3 + $0xafc] ss:$48 sps:$4 sm:$0xff]  }
 0x15e   :  { %2924 = vmatpush2.bf16.msra.mxu1 %v3988_v6  ;;  %2884 = vmatprep.subr.bf16.mxu0 %v3993_v7  ;;  %v4069_v6 = vld [vmem:[%s5679_s3 + $0x4f8] ss:$48 sps:$4 sm:$0xff]  }
 0x15f   :  { %2925 = vmatprep.subr.bf16.mxu1 %v3996_v8  ;;  %v4072_v7 = vld [vmem:[%s5679_s3 + $0xaf8] ss:$48 sps:$4 sm:$0xff]   ;;  %v4077_v8 = vld [vmem:[%s5679_s3 + $0x49c] ss:$48 sps:$4 sm:$0xff]  }
 0x161   :  { %2885 = vmatpush2.bf16.msra.mxu0 %v3991_v9  ;;  %v4080_v9 = vld [vmem:[%s5679_s3 + $0xa9c] ss:$48 sps:$4 sm:$0xff]  }
 0x162   :  { %2926 = vmatpush2.bf16.msra.mxu1 %v3994_v10  ;;  %2886 = vmatprep.subr.bf16.mxu0 %v3999_v11  ;;  %v4075_v10 = vld [vmem:[%s5679_s3 + $0x498] ss:$48 sps:$4 sm:$0xff]  }
 0x163   :  { %2927 = vmatprep.subr.bf16.mxu1 %v4002_v12  ;;  %v4078_v11 = vld [vmem:[%s5679_s3 + $0xa98] ss:$48 sps:$4 sm:$0xff]   ;;  %v4083_v12 = vld [vmem:[%s5679_s3 + $0x43c] ss:$48 sps:$4 sm:$0xff]  }
 0x165   :  { %2887 = vmatpush2.bf16.msra.mxu0 %v3997_v13  ;;  %v4086_v13 = vld [vmem:[%s5679_s3 + $0xa3c] ss:$48 sps:$4 sm:$0xff]  }
 0x166   :  { %2928 = vmatpush2.bf16.msra.mxu1 %v4000_v14  ;;  %2888 = vmatprep.subr.bf16.mxu0 %v4005_v15  ;;  %v4081_v14 = vld [vmem:[%s5679_s3 + $0x438] ss:$48 sps:$4 sm:$0xff]  }
 0x167   :  { %2929 = vmatprep.subr.bf16.mxu1 %v4008_v16  ;;  %v4084_v15 = vld [vmem:[%s5679_s3 + $0xa38] ss:$48 sps:$4 sm:$0xff]   ;;  %v4089_v16 = vld [vmem:[%s5679_s3 + $0x3dc] ss:$48 sps:$4 sm:$0xff]  }
 0x169   :  { %2889 = vmatpush2.bf16.msra.mxu0 %v4003_v17  ;;  %v4092_v17 = vld [vmem:[%s5679_s3 + $0x9dc] ss:$48 sps:$4 sm:$0xff]  }
 0x16a   :  { %2930 = vmatpush2.bf16.msra.mxu1 %v4006_v18  ;;  %2940 = vmatprep.subr.bf16.mxu0 %v4011_v19  ;;  %v4087_v18 = vld [vmem:[%s5679_s3 + $0x3d8] ss:$48 sps:$4 sm:$0xff]  }
 0x16b   :  { %2981 = vmatprep.subr.bf16.mxu1 %v4014_v20  ;;  %v4090_v19 = vld [vmem:[%s5679_s3 + $0x9d8] ss:$48 sps:$4 sm:$0xff]   ;;  %v4095_v20 = vld [vmem:[%s5679_s3 + $0x37c] ss:$48 sps:$4 sm:$0xff]  }
 0x16c   :  { %2891 = vmatmul.mubr.bf16.vlgmr.msra.gmra.mxu0 %v4658_v4 }
 0x16d   :  { %2932 = vmatmul.mubr.bf16.vlgmr.msra.gmra.mxu1 %v4646_v61  ;;  %2941 = vmatpush1.bf16.msra.mxu0 %v4009_v21  ;;  %v4098_v21 = vld [vmem:[%s5679_s3 + $0x97c] ss:$48 sps:$4 sm:$0xff]  }
 0x16e   :  { %2972 = vmatprep.mubr.bf16.mxu0 %v4648_v0  ;;  %2982 = vmatpush1.bf16.msra.mxu1 %v4012_v22  ;;  %v4093_v22 = vld [vmem:[%s5679_s3 + $0x378] ss:$48 sps:$4 sm:$0xff]  }
 0x16f   :  { %3013 = vmatprep.mubr.bf16.mxu1 %v4650_v1  ;;  %2942 = vmatprep.subr.bf16.mxu0 %v4017_v23  ;;  %v4096_v23 = vld [vmem:[%s5679_s3 + $0x978] ss:$48 sps:$4 sm:$0xff]  }
 0x170   :  { %2983 = vmatprep.subr.bf16.mxu1 %v4020_v24  ;;  %v4101_v24 = vld [vmem:[%s5679_s3 + $0x31c] ss:$48 sps:$4 sm:$0xff]  }
 0x171   :  { %2943 = vmatpush1.bf16.msra.mxu0 %v4015_v25  ;;  %v4104_v25 = vld [vmem:[%s5679_s3 + $0x91c] ss:$48 sps:$4 sm:$0xff]  }
 0x172   :  { %2984 = vmatpush1.bf16.msra.mxu1 %v4018_v26  ;;  %2944 = vmatprep.subr.bf16.mxu0 %v4023_v27  ;;  %v4099_v26 = vld [vmem:[%s5679_s3 + $0x318] ss:$48 sps:$4 sm:$0xff]  }
 0x173   :  { %2985 = vmatprep.subr.bf16.mxu1 %v4026_v28  ;;  %v4102_v27 = vld [vmem:[%s5679_s3 + $0x918] ss:$48 sps:$4 sm:$0xff]   ;;  %v4107_v28 = vld [vmem:[%s5679_s3 + $0x2c4] ss:$48 sps:$4 sm:$0xff]  }
 0x175   :  { %2945 = vmatpush1.bf16.msra.mxu0 %v4021_v29  ;;  %v5244_v29 = vld [vmem:[%s5682_s4] sm:$0xff] }
 0x176   :  { %2986 = vmatpush1.bf16.msra.mxu1 %v4024_v30  ;;  %2946 = vmatprep.subr.bf16.mxu0 %v4029_v31  ;;  %v4110_v30 = vld [vmem:[%s5679_s3 + $0x8c4] ss:$48 sps:$4 sm:$0xff]   ;;  %v4105_v31 = vld [vmem:[%s5679_s3 + $0x2c0] ss:$48 sps:$4 sm:$0xff]  }
 0x177   :  { %2987 = vmatprep.subr.bf16.mxu1 %v4032_v32  ;;  %v717_v32 = vrot.slane %v5244_v29, %v4628_v38 }
 0x179   :  { %2947 = vmatpush1.bf16.msra.mxu0 %v4027_v33  ;;  %v4108_v33 = vld [vmem:[%s5679_s3 + $0x8c0] ss:$48 sps:$4 sm:$0xff]  }
 0x17a   :  { %2988 = vmatpush1.bf16.msra.mxu1 %v4030_v34  ;;  %2948 = vmatprep.subr.bf16.mxu0 %v4035_v35  ;;  %v721_v34 = vrot.slane %v5244_v29, %v4637_v41  ;;  %v4113_v35 = vld [vmem:[%s5679_s3 + $0x264] ss:$48 sps:$4 sm:$0xff]  }
 0x17b   :  { %2989 = vmatprep.subr.bf16.mxu1 %v4038_v36 }
 0x17d   :  { %2949 = vmatpush1.bf16.msra.mxu0 %v4033_v40 }
 0x17e   :  { %2990 = vmatpush1.bf16.msra.mxu1 %v4036_v43  ;;  %2950 = vmatprep.subr.bf16.mxu0 %v4041_v44  ;;  %v4116_v43 = vld [vmem:[%s5679_s3 + $0x864] ss:$48 sps:$4 sm:$0xff]  }
 0x17f   :  { %2991 = vmatprep.subr.bf16.mxu1 %v4044_v45  ;;  %v4111_v45 = vld [vmem:[%s5679_s3 + $0x260] ss:$48 sps:$4 sm:$0xff]  }
 0x181   :  { %2951 = vmatpush1.bf16.msra.mxu0 %v4039_v46 }
 0x182   :  { %2992 = vmatpush1.bf16.msra.mxu1 %v4042_v47  ;;  %2952 = vmatprep.subr.bf16.mxu0 %v4047_v48  ;;  %v4114_v48 = vld [vmem:[%s5679_s3 + $0x860] ss:$48 sps:$4 sm:$0xff]  }
 0x183   :  { %2993 = vmatprep.subr.bf16.mxu1 %v4050_v49  ;;  %v4119_v49 = vld [vmem:[%s5679_s3 + $0x204] ss:$48 sps:$4 sm:$0xff]  }
 0x185   :  { %2953 = vmatpush1.bf16.msra.mxu0 %v4045_v50 }
 0x186   :  { %2994 = vmatpush1.bf16.msra.mxu1 %v4048_v51  ;;  %2954 = vmatprep.subr.bf16.mxu0 %v4053_v52  ;;  %v4122_v51 = vld [vmem:[%s5679_s3 + $0x804] ss:$48 sps:$4 sm:$0xff]  }
 0x187   :  { %2995 = vmatprep.subr.bf16.mxu1 %v4056_v53 }
 0x189   :  { %2955 = vmatpush1.bf16.msra.mxu0 %v4051_v54 }
 0x18a   :  { %2996 = vmatpush1.bf16.msra.mxu1 %v4054_v55  ;;  %2956 = vmatprep.subr.bf16.mxu0 %v4059_v56  ;;  %v4117_v56 = vld [vmem:[%s5679_s3 + $0x200] ss:$48 sps:$4 sm:$0xff]  }
 0x18b   :  { %2997 = vmatprep.subr.bf16.mxu1 %v4062_v57 }
 0x18d   :  { %2957 = vmatpush2.bf16.msra.mxu0 %v4057_v58 }
 0x18e   :  { %2998 = vmatpush2.bf16.msra.mxu1 %v4060_v59  ;;  %2958 = vmatprep.subr.bf16.mxu0 %v4065_v60  ;;  %v4120_v59 = vld [vmem:[%s5679_s3 + $0x800] ss:$48 sps:$4 sm:$0xff]   ;;  %v4125_v60 = vld [vmem:[%s5679_s3 + $0x1a4] ss:$48 sps:$4 sm:$0xff]  }
 0x18f   :  { %2999 = vmatprep.subr.bf16.mxu1 %v4068_v62 }
 0x191   :  { %2959 = vmatpush2.bf16.msra.mxu0 %v4063_v63  ;;  %v4128_v63 = vld [vmem:[%s5679_s3 + $0x7a4] ss:$48 sps:$4 sm:$0xff]  }
 0x192   :  { %3000 = vmatpush2.bf16.msra.mxu1 %v4066_v2  ;;  %2960 = vmatprep.subr.bf16.mxu0 %v4071_v3  ;;  %v4123_v2 = vld [vmem:[%s5679_s3 + $0x1a0] ss:$48 sps:$4 sm:$0xff]  }
 0x193   :  { %3001 = vmatprep.subr.bf16.mxu1 %v4074_v5  ;;  %v4126_v3 = vld [vmem:[%s5679_s3 + $0x7a0] ss:$48 sps:$4 sm:$0xff]   ;;  %v4131_v5 = vld [vmem:[%s5679_s3 + $0x144] ss:$48 sps:$4 sm:$0xff]  }
 0x195   :  { %2961 = vmatpush2.bf16.msra.mxu0 %v4069_v6  ;;  %v4134_v6 = vld [vmem:[%s5679_s3 + $0x744] ss:$48 sps:$4 sm:$0xff]  }
 0x196   :  { %3002 = vmatpush2.bf16.msra.mxu1 %v4072_v7  ;;  %2962 = vmatprep.subr.bf16.mxu0 %v4077_v8  ;;  %v4129_v7 = vld [vmem:[%s5679_s3 + $0x140] ss:$48 sps:$4 sm:$0xff]  }
 0x197   :  { %3003 = vmatprep.subr.bf16.mxu1 %v4080_v9  ;;  %v4132_v8 = vld [vmem:[%s5679_s3 + $0x740] ss:$48 sps:$4 sm:$0xff]   ;;  %v4137_v9 = vld [vmem:[%s5679_s3 + $0xe4] ss:$48 sps:$4 sm:$0xff]  }
 0x199   :  { %2963 = vmatpush2.bf16.msra.mxu0 %v4075_v10  ;;  %v4140_v10 = vld [vmem:[%s5679_s3 + $0x6e4] ss:$48 sps:$4 sm:$0xff]  }
 0x19a   :  { %3004 = vmatpush2.bf16.msra.mxu1 %v4078_v11  ;;  %2964 = vmatprep.subr.bf16.mxu0 %v4083_v12  ;;  %v4135_v11 = vld [vmem:[%s5679_s3 + $0xe0] ss:$48 sps:$4 sm:$0xff]  }
 0x19b   :  { %3005 = vmatprep.subr.bf16.mxu1 %v4086_v13  ;;  %v4138_v12 = vld [vmem:[%s5679_s3 + $0x6e0] ss:$48 sps:$4 sm:$0xff]   ;;  %v4143_v13 = vld [vmem:[%s5679_s3 + $0x84] ss:$48 sps:$4 sm:$0xff]  }
 0x19d   :  { %2965 = vmatpush2.bf16.msra.mxu0 %v4081_v14  ;;  %v4146_v14 = vld [vmem:[%s5679_s3 + $0x684] ss:$48 sps:$4 sm:$0xff]  }
 0x19e   :  { %3006 = vmatpush2.bf16.msra.mxu1 %v4084_v15  ;;  %2966 = vmatprep.subr.bf16.mxu0 %v4089_v16  ;;  %v4141_v15 = vld [vmem:[%s5679_s3 + $0x80] ss:$48 sps:$4 sm:$0xff]  }
 0x19f   :  { %3007 = vmatprep.subr.bf16.mxu1 %v4092_v17  ;;  %v4144_v16 = vld [vmem:[%s5679_s3 + $0x680] ss:$48 sps:$4 sm:$0xff]   ;;  %v4149_v17 = vld [vmem:[%s5679_s3 + $0x24] ss:$48 sps:$4 sm:$0xff]  }
 0x1a1   :  { %2967 = vmatpush2.bf16.msra.mxu0 %v4087_v18  ;;  %v4152_v18 = vld [vmem:[%s5679_s3 + $0x624] ss:$48 sps:$4 sm:$0xff]  }
 0x1a2   :  { %3008 = vmatpush2.bf16.msra.mxu1 %v4090_v19  ;;  %2968 = vmatprep.subr.bf16.mxu0 %v4095_v20  ;;  %v4147_v19 = vld [vmem:[%s5679_s3 + $0x20] ss:$48 sps:$4 sm:$0xff]  }
 0x1a3   :  { %3009 = vmatprep.subr.bf16.mxu1 %v4098_v21  ;;  %v4150_v20 = vld [vmem:[%s5679_s3 + $0x620] ss:$48 sps:$4 sm:$0xff]   ;;  %v4155_v21 = vld [vmem:[%s5679_s3 + $0x5c4] ss:$48 sps:$4 sm:$0xff]  }
 0x1a5   :  { %2969 = vmatpush2.bf16.msra.mxu0 %v4093_v22  ;;  %v4158_v22 = vld [vmem:[%s5679_s3 + $0xbc4] ss:$48 sps:$4 sm:$0xff]  }
 0x1a6   :  { %3010 = vmatpush2.bf16.msra.mxu1 %v4096_v23  ;;  %2970 = vmatprep.subr.bf16.mxu0 %v4101_v24  ;;  %v4153_v23 = vld [vmem:[%s5679_s3 + $0x5c0] ss:$48 sps:$4 sm:$0xff]  }
 0x1a7   :  { %3011 = vmatprep.subr.bf16.mxu1 %v4104_v25  ;;  %v4156_v24 = vld [vmem:[%s5679_s3 + $0xbc0] ss:$48 sps:$4 sm:$0xff]   ;;  %v4161_v25 = vld [vmem:[%s5679_s3 + $0x564] ss:$48 sps:$4 sm:$0xff]  }
 0x1a9   :  { %2971 = vmatpush2.bf16.msra.mxu0 %v4099_v26  ;;  %v4164_v26 = vld [vmem:[%s5679_s3 + $0xb64] ss:$48 sps:$4 sm:$0xff]  }
 0x1aa   :  { %3012 = vmatpush2.bf16.msra.mxu1 %v4102_v27  ;;  %3022 = vmatprep.subr.bf16.mxu0 %v4107_v28  ;;  %v4159_v27 = vld [vmem:[%s5679_s3 + $0x560] ss:$48 sps:$4 sm:$0xff]  }
 0x1ab   :  { %3063 = vmatprep.subr.bf16.mxu1 %v4110_v30  ;;  %v4162_v28 = vld [vmem:[%s5679_s3 + $0xb60] ss:$48 sps:$4 sm:$0xff]   ;;  %v4167_v30 = vld [vmem:[%s5679_s3 + $0x504] ss:$48 sps:$4 sm:$0xff]  }
 0x1ac   :  { %2973 = vmatmul.mubr.bf16.vlgmr.msra.gmra.mxu0 %v4658_v4  ;;  %v2728_v36 = vpop.f32.mrf.mxu0  ;;  %v2769_v40 = vpop.f32.mrf.mxu1 }
 0x1ad   :  { %3014 = vmatmul.mubr.bf16.vlgmr.msra.gmra.mxu1 %v4646_v61  ;;  %v2729_v44 = vadd.f32 %v2728_v36, %v717_v32  ;;  %3023 = vmatpush1.bf16.msra.mxu0 %v4105_v31  ;;  %v4170_v31 = vld [vmem:[%s5679_s3 + $0xb04] ss:$48 sps:$4 sm:$0xff]   ;;  %v4165_v32 = vld [vmem:[%s5679_s3 + $0x500] ss:$48 sps:$4 sm:$0xff]  }
 0x1ae   :  { %3054 = vmatprep.mubr.bf16.mxu0 %v4648_v0  ;;  %3064 = vmatpush1.bf16.msra.mxu1 %v4108_v33  ;;  %v2730_v46 = vpop.f32.mrf.mxu0  ;;  %v2771_v47 = vpop.f32.mrf.mxu1  ;;  %v4168_v33 = vld [vmem:[%s5679_s3 + $0xb00] ss:$48 sps:$4 sm:$0xff]  }
 0x1af   :  { %3095 = vmatprep.mubr.bf16.mxu1 %v4650_v1  ;;  %v2731_v50 = vadd.f32 %v2730_v46, %v721_v34  ;;  %3024 = vmatprep.subr.bf16.mxu0 %v4113_v35  ;;  %v2770_v54 = vadd.f32 %v2769_v40, %v2729_v44  ;;  %v4173_v34 = vld [vmem:[%s5679_s3 + $0x4a4] ss:$48 sps:$4 sm:$0xff]   ;;  %v4171_v36 = vld [vmem:[%s5679_s3 + $0x4a0] ss:$48 sps:$4 sm:$0xff]  }
 0x1b0   :  { %3065 = vmatprep.subr.bf16.mxu1 %v4116_v43  ;;  %v2732_v52 = vpop.f32.mrf.mxu0  ;;  %v2773_v53 = vpop.f32.mrf.mxu1  ;;  %v4176_v35 = vld [vmem:[%s5679_s3 + $0xaa4] ss:$48 sps:$4 sm:$0xff]   ;;  %v4174_v40 = vld [vmem:[%s5679_s3 + $0xaa0] ss:$48 sps:$4 sm:$0xff]  }
 0x1b1   :  { %v2772_v55 = vadd.f32 %v2771_v47, %v2731_v50  ;;  %3025 = vmatpush1.bf16.msra.mxu0 %v4111_v45  ;;  %v4179_v43 = vld [vmem:[%s5679_s3 + $0x444] ss:$48 sps:$4 sm:$0xff]   ;;  %v4177_v45 = vld [vmem:[%s5679_s3 + $0x440] ss:$48 sps:$4 sm:$0xff]  }
 0x1b2   :  { %3066 = vmatpush1.bf16.msra.mxu1 %v4114_v48  ;;  %v2733_v57 = vpop.f32.mrf.mxu0  ;;  %v2774_v58 = vpop.f32.mrf.mxu1  ;;  %3026 = vmatprep.subr.bf16.mxu0 %v4119_v49  ;;  %v4182_v44 = vld [vmem:[%s5679_s3 + $0xa44] ss:$48 sps:$4 sm:$0xff]   ;;  %v4180_v46 = vld [vmem:[%s5679_s3 + $0xa40] ss:$48 sps:$4 sm:$0xff]  }
 0x1b3   :  { %v3666_v62 = vpack.c.bf16 %v2772_v55, %v2770_v54  ;;  %3067 = vmatprep.subr.bf16.mxu1 %v4122_v51  ;;  %v4185_v47 = vld [vmem:[%s5679_s3 + $0x3e4] ss:$48 sps:$4 sm:$0xff]   ;;  %v4183_v49 = vld [vmem:[%s5679_s3 + $0x3e0] ss:$48 sps:$4 sm:$0xff]  }
 0x1b4   :  { %v4188_v48 = vld [vmem:[%s5679_s3 + $0x9e4] ss:$48 sps:$4 sm:$0xff]   ;;  %v4186_v50 = vld [vmem:[%s5679_s3 + $0x9e0] ss:$48 sps:$4 sm:$0xff]  }
 0x1b5   :  { %3234 = vst [vmem:[%s5683_s5] sm:$0xff] %v3666_v62  ;;  %3027 = vmatpush1.bf16.msra.mxu0 %v4117_v56  ;;  %v4191_v51 = vld [vmem:[%s5679_s3 + $0x384] ss:$48 sps:$4 sm:$0xff]   ;;  %v4189_v53 = vld [vmem:[%s5679_s3 + $0x380] ss:$48 sps:$4 sm:$0xff]   ;;  %v725_v62 = vrot.slane %v5244_v29, %v4631_v39 }
 0x1b6   :  { %3068 = vmatpush1.bf16.msra.mxu1 %v4120_v59  ;;  %3028 = vmatprep.subr.bf16.mxu0 %v4125_v60  ;;  %v4194_v52 = vld [vmem:[%s5679_s3 + $0x984] ss:$48 sps:$4 sm:$0xff]   ;;  %v4192_v54 = vld [vmem:[%s5679_s3 + $0x980] ss:$48 sps:$4 sm:$0xff]   ;;  %v4203_v59 = vld [vmem:[%s5679_s3 + $0x2cc] ss:$48 sps:$4 sm:$0xff]  }
 0x1b7   :  { %3069 = vmatprep.subr.bf16.mxu1 %v4128_v63  ;;  %v4197_v55 = vld [vmem:[%s5679_s3 + $0x324] ss:$48 sps:$4 sm:$0xff]   ;;  %v4195_v57 = vld [vmem:[%s5679_s3 + $0x320] ss:$48 sps:$4 sm:$0xff]   ;;  %v4206_v60 = vld [vmem:[%s5679_s3 + $0x8cc] ss:$48 sps:$4 sm:$0xff]  }
 0x1b8   :  { %v4200_v56 = vld [vmem:[%s5679_s3 + $0x924] ss:$48 sps:$4 sm:$0xff]   ;;  %v4198_v58 = vld [vmem:[%s5679_s3 + $0x920] ss:$48 sps:$4 sm:$0xff]   ;;  %v4201_v63 = vld [vmem:[%s5679_s3 + $0x2c8] ss:$48 sps:$4 sm:$0xff]  }
 0x1b9   :  { %3029 = vmatpush1.bf16.msra.mxu0 %v4123_v2  ;;  %v4204_v2 = vld [vmem:[%s5679_s3 + $0x8c8] ss:$48 sps:$4 sm:$0xff]  }
 0x1ba   :  { %3070 = vmatpush1.bf16.msra.mxu1 %v4126_v3  ;;  %3030 = vmatprep.subr.bf16.mxu0 %v4131_v5  ;;  %v729_v3 = vrot.slane %v5244_v29, %v4640_v42  ;;  %v4209_v5 = vld [vmem:[%s5679_s3 + $0x26c] ss:$48 sps:$4 sm:$0xff]  }
 0x1bb   :  { %3071 = vmatprep.subr.bf16.mxu1 %v4134_v6 }
 0x1bd   :  { %3031 = vmatpush1.bf16.msra.mxu0 %v4129_v7 }
 0x1be   :  { %3072 = vmatpush1.bf16.msra.mxu1 %v4132_v8  ;;  %3032 = vmatprep.subr.bf16.mxu0 %v4137_v9  ;;  %v4212_v8 = vld [vmem:[%s5679_s3 + $0x86c] ss:$48 sps:$4 sm:$0xff]  }
 0x1bf   :  { %3073 = vmatprep.subr.bf16.mxu1 %v4140_v10  ;;  %v4207_v10 = vld [vmem:[%s5679_s3 + $0x268] ss:$48 sps:$4 sm:$0xff]  }
 0x1c1   :  { %3033 = vmatpush1.bf16.msra.mxu0 %v4135_v11 }
 0x1c2   :  { %3074 = vmatpush1.bf16.msra.mxu1 %v4138_v12  ;;  %3034 = vmatprep.subr.bf16.mxu0 %v4143_v13  ;;  %v4210_v13 = vld [vmem:[%s5679_s3 + $0x868] ss:$48 sps:$4 sm:$0xff]  }
 0x1c3   :  { %3075 = vmatprep.subr.bf16.mxu1 %v4146_v14  ;;  %v4215_v14 = vld [vmem:[%s5679_s3 + $0x20c] ss:$48 sps:$4 sm:$0xff]  }
 0x1c5   :  { %3035 = vmatpush1.bf16.msra.mxu0 %v4141_v15 }
 0x1c6   :  { %3076 = vmatpush1.bf16.msra.mxu1 %v4144_v16  ;;  %3036 = vmatprep.subr.bf16.mxu0 %v4149_v17  ;;  %v4218_v16 = vld [vmem:[%s5679_s3 + $0x80c] ss:$48 sps:$4 sm:$0xff]  }
 0x1c7   :  { %3077 = vmatprep.subr.bf16.mxu1 %v4152_v18 }
 0x1c9   :  { %3037 = vmatpush1.bf16.msra.mxu0 %v4147_v19 }
 0x1ca   :  { %3078 = vmatpush1.bf16.msra.mxu1 %v4150_v20  ;;  %3038 = vmatprep.subr.bf16.mxu0 %v4155_v21  ;;  %v4213_v20 = vld [vmem:[%s5679_s3 + $0x208] ss:$48 sps:$4 sm:$0xff]  }
 0x1cb   :  { %3079 = vmatprep.subr.bf16.mxu1 %v4158_v22 }
 0x1cd   :  { %3039 = vmatpush2.bf16.msra.mxu0 %v4153_v23  ;;  %v4221_v23 = vld [vmem:[%s5679_s3 + $0x1ac] ss:$48 sps:$4 sm:$0xff]  }
 0x1ce   :  { %3080 = vmatpush2.bf16.msra.mxu1 %v4156_v24  ;;  %3040 = vmatprep.subr.bf16.mxu0 %v4161_v25  ;;  %v4224_v25 = vld [vmem:[%s5679_s3 + $0x7ac] ss:$48 sps:$4 sm:$0xff]  }
 0x1cf   :  { %3081 = vmatprep.subr.bf16.mxu1 %v4164_v26  ;;  %v4219_v26 = vld [vmem:[%s5679_s3 + $0x1a8] ss:$48 sps:$4 sm:$0xff]  }
 0x1d1   :  { %3041 = vmatpush2.bf16.msra.mxu0 %v4159_v27  ;;  %v4222_v27 = vld [vmem:[%s5679_s3 + $0x7a8] ss:$48 sps:$4 sm:$0xff]  }
 0x1d2   :  { %3082 = vmatpush2.bf16.msra.mxu1 %v4162_v28  ;;  %3042 = vmatprep.subr.bf16.mxu0 %v4167_v30  ;;  %v4227_v28 = vld [vmem:[%s5679_s3 + $0x14c] ss:$48 sps:$4 sm:$0xff]  }
 0x1d3   :  { %3083 = vmatprep.subr.bf16.mxu1 %v4170_v31  ;;  %v4230_v30 = vld [vmem:[%s5679_s3 + $0x74c] ss:$48 sps:$4 sm:$0xff]   ;;  %v4225_v31 = vld [vmem:[%s5679_s3 + $0x148] ss:$48 sps:$4 sm:$0xff]  }
 0x1d5   :  { %3043 = vmatpush2.bf16.msra.mxu0 %v4165_v32  ;;  %v4228_v32 = vld [vmem:[%s5679_s3 + $0x748] ss:$48 sps:$4 sm:$0xff]  }
 0x1d6   :  { %3084 = vmatpush2.bf16.msra.mxu1 %v4168_v33  ;;  %3044 = vmatprep.subr.bf16.mxu0 %v4173_v34  ;;  %v4233_v33 = vld [vmem:[%s5679_s3 + $0xec] ss:$48 sps:$4 sm:$0xff]  }
 0x1d7   :  { %3085 = vmatprep.subr.bf16.mxu1 %v4176_v35  ;;  %v4236_v34 = vld [vmem:[%s5679_s3 + $0x6ec] ss:$48 sps:$4 sm:$0xff]   ;;  %v4231_v35 = vld [vmem:[%s5679_s3 + $0xe8] ss:$48 sps:$4 sm:$0xff]  }
 0x1d9   :  { %3045 = vmatpush2.bf16.msra.mxu0 %v4171_v36  ;;  %v4234_v36 = vld [vmem:[%s5679_s3 + $0x6e8] ss:$48 sps:$4 sm:$0xff]  }
 0x1da   :  { %3086 = vmatpush2.bf16.msra.mxu1 %v4174_v40  ;;  %3046 = vmatprep.subr.bf16.mxu0 %v4179_v43  ;;  %v4239_v40 = vld [vmem:[%s5679_s3 + $0x8c] ss:$48 sps:$4 sm:$0xff]  }
 0x1db   :  { %3087 = vmatprep.subr.bf16.mxu1 %v4182_v44  ;;  %v4242_v43 = vld [vmem:[%s5679_s3 + $0x68c] ss:$48 sps:$4 sm:$0xff]   ;;  %v4237_v44 = vld [vmem:[%s5679_s3 + $0x88] ss:$48 sps:$4 sm:$0xff]  }
 0x1dd   :  { %3047 = vmatpush2.bf16.msra.mxu0 %v4177_v45  ;;  %v4240_v45 = vld [vmem:[%s5679_s3 + $0x688] ss:$48 sps:$4 sm:$0xff]  }
 0x1de   :  { %3088 = vmatpush2.bf16.msra.mxu1 %v4180_v46  ;;  %3048 = vmatprep.subr.bf16.mxu0 %v4185_v47  ;;  %v4245_v46 = vld [vmem:[%s5679_s3 + $0x2c] ss:$48 sps:$4 sm:$0xff]  }
 0x1df   :  { %3089 = vmatprep.subr.bf16.mxu1 %v4188_v48  ;;  %v4248_v47 = vld [vmem:[%s5679_s3 + $0x62c] ss:$48 sps:$4 sm:$0xff]   ;;  %v4243_v48 = vld [vmem:[%s5679_s3 + $0x28] ss:$48 sps:$4 sm:$0xff]  }
 0x1e1   :  { %3049 = vmatpush2.bf16.msra.mxu0 %v4183_v49  ;;  %v4246_v49 = vld [vmem:[%s5679_s3 + $0x628] ss:$48 sps:$4 sm:$0xff]  }
 0x1e2   :  { %3090 = vmatpush2.bf16.msra.mxu1 %v4186_v50  ;;  %3050 = vmatprep.subr.bf16.mxu0 %v4191_v51  ;;  %v4251_v50 = vld [vmem:[%s5679_s3 + $0x5cc] ss:$48 sps:$4 sm:$0xff]  }
 0x1e3   :  { %3091 = vmatprep.subr.bf16.mxu1 %v4194_v52  ;;  %v4254_v51 = vld [vmem:[%s5679_s3 + $0xbcc] ss:$48 sps:$4 sm:$0xff]   ;;  %v4249_v52 = vld [vmem:[%s5679_s3 + $0x5c8] ss:$48 sps:$4 sm:$0xff]  }
 0x1e5   :  { %3051 = vmatpush2.bf16.msra.mxu0 %v4189_v53  ;;  %v4252_v53 = vld [vmem:[%s5679_s3 + $0xbc8] ss:$48 sps:$4 sm:$0xff]  }
 0x1e6   :  { %3092 = vmatpush2.bf16.msra.mxu1 %v4192_v54  ;;  %3052 = vmatprep.subr.bf16.mxu0 %v4197_v55  ;;  %v4257_v54 = vld [vmem:[%s5679_s3 + $0x56c] ss:$48 sps:$4 sm:$0xff]  }
 0x1e7   :  { %3093 = vmatprep.subr.bf16.mxu1 %v4200_v56  ;;  %v4260_v55 = vld [vmem:[%s5679_s3 + $0xb6c] ss:$48 sps:$4 sm:$0xff]   ;;  %v4255_v56 = vld [vmem:[%s5679_s3 + $0x568] ss:$48 sps:$4 sm:$0xff]  }
 0x1e9   :  { %3053 = vmatpush2.bf16.msra.mxu0 %v4195_v57  ;;  %v4258_v57 = vld [vmem:[%s5679_s3 + $0xb68] ss:$48 sps:$4 sm:$0xff]  }
 0x1ea   :  { %3094 = vmatpush2.bf16.msra.mxu1 %v4198_v58  ;;  %3104 = vmatprep.subr.bf16.mxu0 %v4203_v59  ;;  %v4263_v58 = vld [vmem:[%s5679_s3 + $0x50c] ss:$48 sps:$4 sm:$0xff]  }
 0x1eb   :  { %3145 = vmatprep.subr.bf16.mxu1 %v4206_v60  ;;  %v4266_v59 = vld [vmem:[%s5679_s3 + $0xb0c] ss:$48 sps:$4 sm:$0xff]   ;;  %v4261_v60 = vld [vmem:[%s5679_s3 + $0x508] ss:$48 sps:$4 sm:$0xff]  }
 0x1ec   :  { %v2810_v6 = vpop.f32.mrf.mxu0  ;;  %v2851_v7 = vpop.f32.mrf.mxu1  ;;  %3055 = vmatmul.mubr.bf16.vlgmr.msra.gmra.mxu0 %v4658_v4 }
 0x1ed   :  { %v2811_v9 = vadd.f32 %v2810_v6, %v725_v62  ;;  %3096 = vmatmul.mubr.bf16.vlgmr.msra.gmra.mxu1 %v4646_v61  ;;  %3105 = vmatpush1.bf16.msra.mxu0 %v4201_v63  ;;  %v4264_v62 = vld [vmem:[%s5679_s3 + $0xb08] ss:$48 sps:$4 sm:$0xff]   ;;  %v4269_v63 = vld [vmem:[%s5679_s3 + $0x4ac] ss:$48 sps:$4 sm:$0xff]  }
 0x1ee   :  { %3136 = vmatprep.mubr.bf16.mxu0 %v4648_v0  ;;  %3146 = vmatpush1.bf16.msra.mxu1 %v4204_v2  ;;  %v2812_v11 = vpop.f32.mrf.mxu0  ;;  %v2853_v12 = vpop.f32.mrf.mxu1  ;;  %v4272_v2 = vld [vmem:[%s5679_s3 + $0xaac] ss:$48 sps:$4 sm:$0xff]  }
 0x1ef   :  { %3177 = vmatprep.mubr.bf16.mxu1 %v4650_v1  ;;  %v2813_v15 = vadd.f32 %v2812_v11, %v729_v3  ;;  %3106 = vmatprep.subr.bf16.mxu0 %v4209_v5  ;;  %v2852_v18 = vadd.f32 %v2851_v7, %v2811_v9  ;;  %v4216_v1 = vld [vmem:[%s5679_s3 + $0x808] ss:$48 sps:$4 sm:$0xff]   ;;  %v4275_v6 = vld [vmem:[%s5679_s3 + $0x44c] ss:$48 sps:$4 sm:$0xff]  }
 0x1f0   :  { %v2814_v0 = vpop.f32.mrf.mxu0  ;;  %v2855_v17 = vpop.f32.mrf.mxu1  ;;  %3147 = vmatprep.subr.bf16.mxu1 %v4212_v8  ;;  %v4267_v3 = vld [vmem:[%s5679_s3 + $0x4a8] ss:$48 sps:$4 sm:$0xff]   ;;  %v4278_v7 = vld [vmem:[%s5679_s3 + $0xa4c] ss:$48 sps:$4 sm:$0xff]  }
 0x1f1   :  { %v2854_v19 = vadd.f32 %v2853_v12, %v2813_v15  ;;  %3107 = vmatpush1.bf16.msra.mxu0 %v4207_v10  ;;  %v4270_v5 = vld [vmem:[%s5679_s3 + $0xaa8] ss:$48 sps:$4 sm:$0xff]   ;;  %v4281_v10 = vld [vmem:[%s5679_s3 + $0x3ec] ss:$48 sps:$4 sm:$0xff]  }
 0x1f2   :  { %3148 = vmatpush1.bf16.msra.mxu1 %v4210_v13  ;;  %v2815_v21 = vpop.f32.mrf.mxu0  ;;  %v2856_v22 = vpop.f32.mrf.mxu1  ;;  %3108 = vmatprep.subr.bf16.mxu0 %v4215_v14  ;;  %v4273_v8 = vld [vmem:[%s5679_s3 + $0x448] ss:$48 sps:$4 sm:$0xff]   ;;  %v4284_v11 = vld [vmem:[%s5679_s3 + $0x9ec] ss:$48 sps:$4 sm:$0xff]  }
 0x1f3   :  { %v3667_v24 = vpack.c.bf16 %v2854_v19, %v2852_v18  ;;  %3149 = vmatprep.subr.bf16.mxu1 %v4218_v16  ;;  %v4276_v9 = vld [vmem:[%s5679_s3 + $0xa48] ss:$48 sps:$4 sm:$0xff]   ;;  %v4287_v14 = vld [vmem:[%s5679_s3 + $0x38c] ss:$48 sps:$4 sm:$0xff]   ;;  %v736_v22 = vsub.s32 5, %v4625_v37 }
 0x1f4   :  { %v4279_v12 = vld [vmem:[%s5679_s3 + $0x3e8] ss:$48 sps:$4 sm:$0xff]   ;;  %v4290_v15 = vld [vmem:[%s5679_s3 + $0x98c] ss:$48 sps:$4 sm:$0xff]  }
 0x1f5   :  { %3235 = vst [vmem:[%s5683_s5 + $0x8] sm:$0xff] %v3667_v24  ;;  %3109 = vmatpush1.bf16.msra.mxu0 %v4213_v20  ;;  %v4282_v13 = vld [vmem:[%s5679_s3 + $0x9e8] ss:$48 sps:$4 sm:$0xff]   ;;  %v4293_v17 = vld [vmem:[%s5679_s3 + $0x32c] ss:$48 sps:$4 sm:$0xff]   ;;  %v732_v20 = vsub.s32 4, %v4625_v37 }
 0x1f6   :  { %3150 = vmatpush1.bf16.msra.mxu1 %v4216_v1  ;;  %3110 = vmatprep.subr.bf16.mxu0 %v4221_v23  ;;  %v4285_v16 = vld [vmem:[%s5679_s3 + $0x388] ss:$48 sps:$4 sm:$0xff]   ;;  %v4296_v18 = vld [vmem:[%s5679_s3 + $0x92c] ss:$48 sps:$4 sm:$0xff]   ;;  %v737_v23 = vrot.slane %v5244_v29, %v736_v22 }
 0x1f7   :  { %3151 = vmatprep.subr.bf16.mxu1 %v4224_v25  ;;  %v4288_v0 = vld [vmem:[%s5679_s3 + $0x988] ss:$48 sps:$4 sm:$0xff]   ;;  %v733_v1 = vrot.slane %v5244_v29, %v732_v20 }
 0x1f8   :  { %v4291_v19 = vld [vmem:[%s5679_s3 + $0x328] ss:$48 sps:$4 sm:$0xff]  }
 0x1f9   :  { %3111 = vmatpush1.bf16.msra.mxu0 %v4219_v26  ;;  %v4294_v21 = vld [vmem:[%s5679_s3 + $0x928] ss:$48 sps:$4 sm:$0xff]  }
 0x1fa   :  { %3152 = vmatpush1.bf16.msra.mxu1 %v4222_v27  ;;  %3112 = vmatprep.subr.bf16.mxu0 %v4227_v28 }
 0x1fb   :  { %3153 = vmatprep.subr.bf16.mxu1 %v4230_v30 }
 0x1fd   :  { %3113 = vmatpush1.bf16.msra.mxu0 %v4225_v31 }
 0x1fe   :  { %3154 = vmatpush1.bf16.msra.mxu1 %v4228_v32  ;;  %3114 = vmatprep.subr.bf16.mxu0 %v4233_v33 }
 0x1ff   :  { %3155 = vmatprep.subr.bf16.mxu1 %v4236_v34 }
 0x201   :  { %3115 = vmatpush1.bf16.msra.mxu0 %v4231_v35 }
 0x202   :  { %3156 = vmatpush1.bf16.msra.mxu1 %v4234_v36  ;;  %3116 = vmatprep.subr.bf16.mxu0 %v4239_v40 }
 0x203   :  { %3157 = vmatprep.subr.bf16.mxu1 %v4242_v43  ;;  %v744_v43 = vsub.s32 7, %v4625_v37 }
 0x205   :  { %3117 = vmatpush1.bf16.msra.mxu0 %v4237_v44  ;;  %v745_v44 = vrot.slane %v5244_v29, %v744_v43 }
 0x206   :  { %3158 = vmatpush1.bf16.msra.mxu1 %v4240_v45  ;;  %3118 = vmatprep.subr.bf16.mxu0 %v4245_v46 }
 0x207   :  { %3159 = vmatprep.subr.bf16.mxu1 %v4248_v47 }
 0x209   :  { %3119 = vmatpush1.bf16.msra.mxu0 %v4243_v48 }
 0x20a   :  { %3160 = vmatpush1.bf16.msra.mxu1 %v4246_v49  ;;  %3120 = vmatprep.subr.bf16.mxu0 %v4251_v50 }
 0x20b   :  { %3161 = vmatprep.subr.bf16.mxu1 %v4254_v51 }
 0x20d   :  { %3121 = vmatpush2.bf16.msra.mxu0 %v4249_v52 }
 0x20e   :  { %3162 = vmatpush2.bf16.msra.mxu1 %v4252_v53  ;;  %3122 = vmatprep.subr.bf16.mxu0 %v4257_v54 }
 0x20f   :  { %3163 = vmatprep.subr.bf16.mxu1 %v4260_v55 }
 0x211   :  { %3123 = vmatpush2.bf16.msra.mxu0 %v4255_v56 }
 0x212   :  { %3164 = vmatpush2.bf16.msra.mxu1 %v4258_v57  ;;  %3124 = vmatprep.subr.bf16.mxu0 %v4263_v58 }
 0x213   :  { %3165 = vmatprep.subr.bf16.mxu1 %v4266_v59 }
 0x215   :  { %3125 = vmatpush2.bf16.msra.mxu0 %v4261_v60 }
 0x216   :  { %3166 = vmatpush2.bf16.msra.mxu1 %v4264_v62  ;;  %3126 = vmatprep.subr.bf16.mxu0 %v4269_v63 }
 0x217   :  { %3167 = vmatprep.subr.bf16.mxu1 %v4272_v2 }
 0x219   :  { %3127 = vmatpush2.bf16.msra.mxu0 %v4267_v3 }
 0x21a   :  { %3168 = vmatpush2.bf16.msra.mxu1 %v4270_v5  ;;  %3128 = vmatprep.subr.bf16.mxu0 %v4275_v6 }
 0x21b   :  { %3169 = vmatprep.subr.bf16.mxu1 %v4278_v7 }
 0x21d   :  { %3129 = vmatpush2.bf16.msra.mxu0 %v4273_v8 }
 0x21e   :  { %3170 = vmatpush2.bf16.msra.mxu1 %v4276_v9  ;;  %3130 = vmatprep.subr.bf16.mxu0 %v4281_v10 }
 0x21f   :  { %3171 = vmatprep.subr.bf16.mxu1 %v4284_v11 }
 0x221   :  { %3131 = vmatpush2.bf16.msra.mxu0 %v4279_v12 }
 0x222   :  { %3172 = vmatpush2.bf16.msra.mxu1 %v4282_v13  ;;  %3132 = vmatprep.subr.bf16.mxu0 %v4287_v14 }
 0x223   :  { %3173 = vmatprep.subr.bf16.mxu1 %v4290_v15 }
 0x225   :  { %3133 = vmatpush2.bf16.msra.mxu0 %v4285_v16 }
 0x226   :  { %3174 = vmatpush2.bf16.msra.mxu1 %v4288_v0  ;;  %3134 = vmatprep.subr.bf16.mxu0 %v4293_v17 }
 0x227   :  { %3175 = vmatprep.subr.bf16.mxu1 %v4296_v18 }
 0x229   :  { %3135 = vmatpush2.bf16.msra.mxu0 %v4291_v19 }
 0x22a   :  { %3176 = vmatpush2.bf16.msra.mxu1 %v4294_v21 }
 0x22c   :  { %v2892_v24 = vpop.f32.mrf.mxu0  ;;  %3137 = vmatmul.mubr.bf16.vlgmr.msra.gmra.mxu0 %v4658_v4  ;;  %v740_v4 = vsub.s32 6, %v4625_v37  ;;  %v711_v37 = vld [vmem:[%s5682_s4 + $0x8] sm:$0xf] }
 0x22d   :  { %v2893_v25 = vadd.f32 %v2892_v24, %v733_v1  ;;  %v2933_v26 = vpop.f32.mrf.mxu1  ;;  %3178 = vmatmul.mubr.bf16.vlgmr.msra.gmra.mxu1 %v4646_v61  ;;  %v753_v58 = vrot.slane %v711_v37, %v4637_v41  ;;  %v761_v41 = vrot.slane %v711_v37, %v4640_v42 }
 0x22e   :  { %v2894_v27 = vpop.f32.mrf.mxu0  ;;  %v741_v61 = vrot.slane %v5244_v29, %v740_v4  ;;  %v749_v29 = vrot.slane %v711_v37, %v4628_v38  ;;  %v757_v38 = vrot.slane %v711_v37, %v4631_v39 }
 0x22f   :  { %v2895_v28 = vadd.f32 %v2894_v27, %v737_v23  ;;  %v2935_v30 = vpop.f32.mrf.mxu1  ;;  %v2934_v32 = vadd.f32 %v2933_v26, %v2893_v25 }
 0x230   :  { %v2896_v31 = vpop.f32.mrf.mxu0 }
 0x231   :  { %v2936_v33 = vadd.f32 %v2935_v30, %v2895_v28  ;;  %v2937_v34 = vpop.f32.mrf.mxu1 }
 0x232   :  { %v2897_v35 = vpop.f32.mrf.mxu0 }
 0x233   :  { %v3668_v36 = vpack.c.bf16 %v2936_v33, %v2934_v32  ;;  %v2938_v40 = vpop.f32.mrf.mxu1 }
 0x235   :  { %3236 = vst [vmem:[%s5683_s5 + $0x10] sm:$0xff] %v3668_v36 }
 0x26c   :  { %v2974_v45 = vpop.f32.mrf.mxu0 }
 0x26d   :  { %v2975_v46 = vadd.f32 %v2974_v45, %v741_v61  ;;  %v3015_v47 = vpop.f32.mrf.mxu1 }
 0x26e   :  { %v2976_v48 = vpop.f32.mrf.mxu0 }
 0x26f   :  { %v2977_v49 = vadd.f32 %v2976_v48, %v745_v44  ;;  %v3017_v50 = vpop.f32.mrf.mxu1  ;;  %v3016_v52 = vadd.f32 %v3015_v47, %v2975_v46 }
 0x270   :  { %v2978_v51 = vpop.f32.mrf.mxu0 }
 0x271   :  { %v3018_v53 = vadd.f32 %v3017_v50, %v2977_v49  ;;  %v3019_v54 = vpop.f32.mrf.mxu1 }
 0x272   :  { %v2979_v55 = vpop.f32.mrf.mxu0 }
 0x273   :  { %v3669_v56 = vpack.c.bf16 %v3018_v53, %v3016_v52  ;;  %v3020_v57 = vpop.f32.mrf.mxu1 }
 0x275   :  { %3237 = vst [vmem:[%s5683_s5 + $0x18] sm:$0xff] %v3669_v56 }
 0x2ac   :  { %v3056_v59 = vpop.f32.mrf.mxu0 }
 0x2ad   :  { %v3057_v60 = vadd.f32 %v3056_v59, %v749_v29  ;;  %v3097_v62 = vpop.f32.mrf.mxu1 }
 0x2ae   :  { %v3058_v63 = vpop.f32.mrf.mxu0 }
 0x2af   :  { %v3059_v2 = vadd.f32 %v3058_v63, %v753_v58  ;;  %v3099_v3 = vpop.f32.mrf.mxu1  ;;  %v3098_v6 = vadd.f32 %v3097_v62, %v3057_v60 }
 0x2b0   :  { %v3060_v5 = vpop.f32.mrf.mxu0 }
 0x2b1   :  { %v3100_v7 = vadd.f32 %v3099_v3, %v3059_v2  ;;  %v3101_v8 = vpop.f32.mrf.mxu1 }
 0x2b2   :  { %v3061_v9 = vpop.f32.mrf.mxu0 }
 0x2b3   :  { %v3670_v10 = vpack.c.bf16 %v3100_v7, %v3098_v6  ;;  %v3102_v11 = vpop.f32.mrf.mxu1 }
 0x2b5   :  { %3238 = vst [vmem:[%s5683_s5 + $0x20] sm:$0xff] %v3670_v10 }
 0x2ec   :  { %v3138_v12 = vpop.f32.mrf.mxu0 }
 0x2ed   :  { %v3139_v13 = vadd.f32 %v3138_v12, %v757_v38  ;;  %v3179_v14 = vpop.f32.mrf.mxu1 }
 0x2ee   :  { %v3140_v15 = vpop.f32.mrf.mxu0 }
 0x2ef   :  { %v3141_v16 = vadd.f32 %v3140_v15, %v761_v41  ;;  %v3181_v0 = vpop.f32.mrf.mxu1  ;;  %v3180_v18 = vadd.f32 %v3179_v14, %v3139_v13 }
 0x2f0   :  { %v3142_v17 = vpop.f32.mrf.mxu0 }
 0x2f1   :  { %v3182_v19 = vadd.f32 %v3181_v0, %v3141_v16  ;;  %v3183_v20 = vpop.f32.mrf.mxu1 }
 0x2f2   :  { %v3143_v21 = vpop.f32.mrf.mxu0 }
 0x2f3   :  { %v3671_v22 = vpack.c.bf16 %v3182_v19, %v3180_v18  ;;  %v3184_v1 = vpop.f32.mrf.mxu1 }
 0x2f5   :  { %3239 = vst [vmem:[%s5683_s5 + $0x28] sm:$0xff] %v3671_v22 }

// kernel: cnn_depth_policy_forward.9
= control target key start
LH: loop header
LB: loop body
LE: loop exit
PB: predicated region body
PF: predicated region fallthrough
CT: control target
= control target key end

     0   :  { %s4345_s18 = smov 0   ;;  %s5637_s0 = inlined_call_operand.vmem [shape: f32[2,512], index: 0, kind: input, shape index: {}]   ;;  %s5638_s1 = inlined_call_operand.vmem [shape: bf16[4,2,1536], index: 1, kind: input, shape index: {}]   ;;  %s5639_s2 = inlined_call_operand.vmem [shape: f32[4,2,1], index: 2, kind: input, shape index: {}]   ;;  %s5640_s3 = inlined_call_operand.vmem [shape: bf16[512,1536], index: 3, kind: input, shape index: {}]   ;;  %s5641_s4 = inlined_call_operand.vmem [shape: f32[1,1536], index: 4, kind: input, shape index: {}]   ;;  %s5642_s5 = inlined_call_operand.vmem [shape: f32[4,2,512], index: 5, kind: output, shape index: {}]  }
   0x1 LB: > { %s3307_s19 = sadd.s32 4294967295, %s4310_s18   ;;  %p3311_p0 = scmp.ge.s32.totalorder %s4310_s18, 1  ;;  %s4310_s18 = sphi %s4345_s18, %s15_s18  }
   0x2   : > { %p195_p1 = scmp.lt.s32.totalorder %s4310_s18, 5 }
   0x4   : > { %p196_p2 = pnand %p3311_p0, %p195_p1 }
   0x5   : > { %p226_p3 = scmp.lt.s32.totalorder (!%p196_p2), %s3307_s19, 3  ;;  %p3315_p4 = scmp.ne.s32.totalorder (!%p196_p2), %s3307_s19, 0 }
   0x6   : > { %199 = sbr.rel (%p196_p2) target bundleno = 704 (0x2c0), region = 40 }
   0xb   : > { %s227_s20 = scalar_select %p226_p3, %s3307_s19, 3 }
   0xc   : > { %242 = sbr.rel (%p3315_p4) target bundleno = 19 (0x13), region = 44 }
   0xd   : > { %s3705_s21 = smul.u32 12, %s227_s20  ;;  %s3312_s22 = sshll.u32 %s227_s20, 1 }
   0xe   : > { %s233_s25 = scalar_lea.vmem %s5639_s2, %s3312_s22  ;;  %s3704_s26 = sshll.u32 %s227_s20, 3 }
   0xf   : > { %s4359_s29 = scalar_lea.vmem %s5638_s1, %s3705_s21  ;;  %s4364_s7 = scalar_lea.vmem %s5642_s5, %s3704_s26 }
  0x11   : > { %v243_v0 = vld [vmem:[%s5637_s0] sm:$0xff] }
  0x12   : > { %244 = vst [vmem:[#allocation2] sm:$0xff] %v243_v0 }
  0x13 PF: > { %v246_v1 = vld [vmem:[%s233_s25] sm:$0x3]  ;;  %v4312_v2 = vmov 0   ;;  %v3718_v3 = vld [vmem:[%s5640_s3 + $0x2a4] ss:$48 sps:$4 sm:$0xff]  }
  0x14   : > { %3717 = vset.pattern.permute.xlu0 %v4312_v2  ;;  %v3720_v4 = vld [vmem:[%s5640_s3 + $0x2a0] ss:$48 sps:$4 sm:$0xff]   ;;  %v3721_v5 = vld [vmem:[%s5640_s3 + $0x8a4] ss:$48 sps:$4 sm:$0xff]   ;;  %2659 = vmatprep.subr.bf16.mxu0 %v3718_v3  ;;  %v3816_v3 = vld [vmem:[%s5640_s3 + $0x2ac] ss:$48 sps:$4 sm:$0xff]  }
  0x15   : > { %249 = vperm.xlu0 %3717, %v246_v1   ;;  %v3723_v6 = vld [vmem:[%s5640_s3 + $0x8a0] ss:$48 sps:$4 sm:$0xff]   ;;  %v3724_v7 = vld [vmem:[%s5640_s3 + $0x244] ss:$48 sps:$4 sm:$0xff]   ;;  %2660 = vmatpush1.bf16.msra.mxu0 %v3720_v4  ;;  %v3819_v4 = vld [vmem:[%s5640_s3 + $0x8ac] ss:$48 sps:$4 sm:$0xff]  }
  0x16   : > { %2700 = vmatprep.subr.bf16.mxu1 %v3721_v5  ;;  %v3726_v8 = vld [vmem:[%s5640_s3 + $0x240] ss:$48 sps:$4 sm:$0xff]   ;;  %2661 = vmatprep.subr.bf16.mxu0 %v3724_v7  ;;  %v3727_v9 = vld [vmem:[%s5640_s3 + $0x844] ss:$48 sps:$4 sm:$0xff]   ;;  %v4313_v5 = vmov 269488144   ;;  %v254_v7 = vlaneseq }
  0x17   : > { %2701 = vmatpush1.bf16.msra.mxu1 %v3723_v6  ;;  %v3729_v10 = vld [vmem:[%s5640_s3 + $0x840] ss:$48 sps:$4 sm:$0xff]   ;;  %v3730_v11 = vld [vmem:[%s5640_s3 + $0x1e4] ss:$48 sps:$4 sm:$0xff]   ;;  %v252_v6 = vunpack.c.l.s4 %v4313_v5  ;;  %v3882_v5 = vld [vmem:[%s5640_s3 + $0x48c] ss:$48 sps:$4 sm:$0xff]  }
  0x18   : > { %2702 = vmatprep.subr.bf16.mxu1 %v3727_v9  ;;  %v3733_v12 = vld [vmem:[%s5640_s3 + $0x7e4] ss:$48 sps:$4 sm:$0xff]   ;;  %v3732_v13 = vld [vmem:[%s5640_s3 + $0x1e0] ss:$48 sps:$4 sm:$0xff]   ;;  %v4567_v9 = vshrl.u32 %v254_v7, 7 }
  0x19   : > { %2662 = vmatpush1.bf16.msra.mxu0 %v3726_v8  ;;  %v3735_v14 = vld [vmem:[%s5640_s3 + $0x7e0] ss:$48 sps:$4 sm:$0xff]   ;;  %v3736_v15 = vld [vmem:[%s5640_s3 + $0x184] ss:$48 sps:$4 sm:$0xff]   ;;  %v253_v8 = vunpack.c.0.s8 %v252_v6  ;;  %v3877_v6 = vld [vmem:[%s5640_s3 + $0xae8] ss:$48 sps:$4 sm:$0xff]  }
  0x1a   : > { %2663 = vmatprep.subr.bf16.mxu0 %v3730_v11  ;;  %v3739_v16 = vld [vmem:[%s5640_s3 + $0x784] ss:$48 sps:$4 sm:$0xff]   ;;  %v3738_v17 = vld [vmem:[%s5640_s3 + $0x180] ss:$48 sps:$4 sm:$0xff]   ;;  %v3885_v7 = vld [vmem:[%s5640_s3 + $0xa8c] ss:$48 sps:$4 sm:$0xff]  }
  0x1b   : > { %2703 = vmatpush1.bf16.msra.mxu1 %v3729_v10  ;;  %v3741_v18 = vld [vmem:[%s5640_s3 + $0x780] ss:$48 sps:$4 sm:$0xff]   ;;  %v3742_v19 = vld [vmem:[%s5640_s3 + $0x124] ss:$48 sps:$4 sm:$0xff]   ;;  %v4314_v10 = vmov 1983009808  }
  0x1c   : > { %2704 = vmatprep.subr.bf16.mxu1 %v3733_v12  ;;  %v3745_v20 = vld [vmem:[%s5640_s3 + $0x724] ss:$48 sps:$4 sm:$0xff]   ;;  %v3744_v21 = vld [vmem:[%s5640_s3 + $0x120] ss:$48 sps:$4 sm:$0xff]   ;;  %v268_v11 = vunpack.c.l.s4 %v4314_v10  ;;  %v256_v12 = vsub.s32 %v253_v8, %v4567_v9  ;;  %v3880_v8 = vld [vmem:[%s5640_s3 + $0x488] ss:$48 sps:$4 sm:$0xff]  }
  0x1d   : > { %2664 = vmatpush1.bf16.msra.mxu0 %v3732_v13  ;;  %v3747_v22 = vld [vmem:[%s5640_s3 + $0x720] ss:$48 sps:$4 sm:$0xff]   ;;  %v3748_v23 = vld [vmem:[%s5640_s3 + $0xc4] ss:$48 sps:$4 sm:$0xff]   ;;  %v3888_v10 = vld [vmem:[%s5640_s3 + $0x42c] ss:$48 sps:$4 sm:$0xff]  }
  0x1e   : > { %2665 = vmatprep.subr.bf16.mxu0 %v3736_v15  ;;  %v3751_v24 = vld [vmem:[%s5640_s3 + $0x6c4] ss:$48 sps:$4 sm:$0xff]   ;;  %v3750_v25 = vld [vmem:[%s5640_s3 + $0xc0] ss:$48 sps:$4 sm:$0xff]   ;;  %v269_v13 = vunpack.c.0.s8 %v268_v11  ;;  %v3883_v11 = vld [vmem:[%s5640_s3 + $0xa88] ss:$48 sps:$4 sm:$0xff]  }
  0x1f   : > { %2705 = vmatpush1.bf16.msra.mxu1 %v3735_v14  ;;  %v3753_v26 = vld [vmem:[%s5640_s3 + $0x6c0] ss:$48 sps:$4 sm:$0xff]   ;;  %v3754_v27 = vld [vmem:[%s5640_s3 + $0x64] ss:$48 sps:$4 sm:$0xff]  }
  0x20   : > { %2706 = vmatprep.subr.bf16.mxu1 %v3739_v16  ;;  %v3757_v28 = vld [vmem:[%s5640_s3 + $0x664] ss:$48 sps:$4 sm:$0xff]   ;;  %v3756_v29 = vld [vmem:[%s5640_s3 + $0x60] ss:$48 sps:$4 sm:$0xff]   ;;  %v4571_v16 = vsub.s32 %v269_v13, %v4567_v9  ;;  %v3886_v13 = vld [vmem:[%s5640_s3 + $0x428] ss:$48 sps:$4 sm:$0xff]  }
  0x21   : > { %2666 = vmatpush1.bf16.msra.mxu0 %v3738_v17  ;;  %v3759_v30 = vld [vmem:[%s5640_s3 + $0x660] ss:$48 sps:$4 sm:$0xff]   ;;  %v3760_v31 = vld [vmem:[%s5640_s3 + $0x4] ss:$48 sps:$4 sm:$0xff]  }
  0x22   : > { %2667 = vmatprep.subr.bf16.mxu0 %v3742_v19  ;;  %v3763_v32 = vld [vmem:[%s5640_s3 + $0x604] ss:$48 sps:$4 sm:$0xff]   ;;  %v3762_v33 = vld [vmem:[%s5640_s3] ss:$48 sps:$4 sm:$0xff]  }
  0x23   : > { %2707 = vmatpush1.bf16.msra.mxu1 %v3741_v18  ;;  %v3765_v34 = vld [vmem:[%s5640_s3 + $0x600] ss:$48 sps:$4 sm:$0xff]   ;;  %v3766_v35 = vld [vmem:[%s5640_s3 + $0x5a4] ss:$48 sps:$4 sm:$0xff]  }
  0x24   : > { %2708 = vmatprep.subr.bf16.mxu1 %v3745_v20  ;;  %v3769_v36 = vld [vmem:[%s5640_s3 + $0xba4] ss:$48 sps:$4 sm:$0xff]   ;;  %v3768_v37 = vld [vmem:[%s5640_s3 + $0x5a0] ss:$48 sps:$4 sm:$0xff]  }
  0x25   : > { %2668 = vmatpush1.bf16.msra.mxu0 %v3744_v21  ;;  %v3771_v38 = vld [vmem:[%s5640_s3 + $0xba0] ss:$48 sps:$4 sm:$0xff]   ;;  %v3772_v39 = vld [vmem:[%s5640_s3 + $0x544] ss:$48 sps:$4 sm:$0xff]  }
  0x26   : > { %2669 = vmatprep.subr.bf16.mxu0 %v3748_v23  ;;  %v3775_v40 = vld [vmem:[%s5640_s3 + $0xb44] ss:$48 sps:$4 sm:$0xff]   ;;  %v3774_v41 = vld [vmem:[%s5640_s3 + $0x540] ss:$48 sps:$4 sm:$0xff]  }
  0x27   : > { %2709 = vmatpush1.bf16.msra.mxu1 %v3747_v22  ;;  %v3777_v42 = vld [vmem:[%s5640_s3 + $0xb40] ss:$48 sps:$4 sm:$0xff]   ;;  %v3778_v43 = vld [vmem:[%s5640_s3 + $0x4e4] ss:$48 sps:$4 sm:$0xff]  }
  0x28   : > { %2710 = vmatprep.subr.bf16.mxu1 %v3751_v24  ;;  %v3781_v44 = vld [vmem:[%s5640_s3 + $0xae4] ss:$48 sps:$4 sm:$0xff]   ;;  %v3780_v45 = vld [vmem:[%s5640_s3 + $0x4e0] ss:$48 sps:$4 sm:$0xff]  }
  0x29   : > { %2670 = vmatpush1.bf16.msra.mxu0 %v3750_v25  ;;  %v3783_v46 = vld [vmem:[%s5640_s3 + $0xae0] ss:$48 sps:$4 sm:$0xff]   ;;  %v3784_v47 = vld [vmem:[%s5640_s3 + $0x484] ss:$48 sps:$4 sm:$0xff]   ;;  %v3814_v25 = vld [vmem:[%s5640_s3 + $0x2a8] ss:$48 sps:$4 sm:$0xff]  }
  0x2a   : > { %2671 = vmatprep.subr.bf16.mxu0 %v3754_v27  ;;  %v3787_v48 = vld [vmem:[%s5640_s3 + $0xa84] ss:$48 sps:$4 sm:$0xff]   ;;  %v3786_v49 = vld [vmem:[%s5640_s3 + $0x480] ss:$48 sps:$4 sm:$0xff]   ;;  %v3817_v27 = vld [vmem:[%s5640_s3 + $0x8a8] ss:$48 sps:$4 sm:$0xff]  }
  0x2b   : > { %2711 = vmatpush1.bf16.msra.mxu1 %v3753_v26  ;;  %v3789_v50 = vld [vmem:[%s5640_s3 + $0xa80] ss:$48 sps:$4 sm:$0xff]   ;;  %v3790_v51 = vld [vmem:[%s5640_s3 + $0x424] ss:$48 sps:$4 sm:$0xff]  }
  0x2c   : > { %2712 = vmatprep.subr.bf16.mxu1 %v3757_v28  ;;  %v3793_v52 = vld [vmem:[%s5640_s3 + $0xa24] ss:$48 sps:$4 sm:$0xff]   ;;  %v3792_v53 = vld [vmem:[%s5640_s3 + $0x420] ss:$48 sps:$4 sm:$0xff]  }
  0x2d   : > { %2672 = vmatpush1.bf16.msra.mxu0 %v3756_v29  ;;  %v3795_v54 = vld [vmem:[%s5640_s3 + $0xa20] ss:$48 sps:$4 sm:$0xff]   ;;  %v3796_v55 = vld [vmem:[%s5640_s3 + $0x3c4] ss:$48 sps:$4 sm:$0xff]   ;;  %v3822_v29 = vld [vmem:[%s5640_s3 + $0x24c] ss:$48 sps:$4 sm:$0xff]  }
  0x2e   : > { %2673 = vmatprep.subr.bf16.mxu0 %v3760_v31  ;;  %v3799_v56 = vld [vmem:[%s5640_s3 + $0x9c4] ss:$48 sps:$4 sm:$0xff]   ;;  %v3798_v57 = vld [vmem:[%s5640_s3 + $0x3c0] ss:$48 sps:$4 sm:$0xff]   ;;  %v3825_v31 = vld [vmem:[%s5640_s3 + $0x84c] ss:$48 sps:$4 sm:$0xff]  }
  0x2f   : > { %2713 = vmatpush1.bf16.msra.mxu1 %v3759_v30  ;;  %v3801_v58 = vld [vmem:[%s5640_s3 + $0x9c0] ss:$48 sps:$4 sm:$0xff]   ;;  %v3802_v59 = vld [vmem:[%s5640_s3 + $0x364] ss:$48 sps:$4 sm:$0xff]  }
  0x30   : > { %2714 = vmatprep.subr.bf16.mxu1 %v3763_v32  ;;  %v3805_v60 = vld [vmem:[%s5640_s3 + $0x964] ss:$48 sps:$4 sm:$0xff]   ;;  %v3804_v61 = vld [vmem:[%s5640_s3 + $0x360] ss:$48 sps:$4 sm:$0xff]   ;;  %v3820_v32 = vld [vmem:[%s5640_s3 + $0x248] ss:$48 sps:$4 sm:$0xff]  }
  0x31   : > { %2674 = vmatpush1.bf16.msra.mxu0 %v3762_v33  ;;  %v3807_v62 = vld [vmem:[%s5640_s3 + $0x960] ss:$48 sps:$4 sm:$0xff]   ;;  %v3808_v63 = vld [vmem:[%s5640_s3 + $0x304] ss:$48 sps:$4 sm:$0xff]   ;;  %v3828_v33 = vld [vmem:[%s5640_s3 + $0x1ec] ss:$48 sps:$4 sm:$0xff]  }
  0x32   : > { %2675 = vmatprep.subr.bf16.mxu0 %v3766_v35  ;;  %v3811_v0 = vld [vmem:[%s5640_s3 + $0x904] ss:$48 sps:$4 sm:$0xff]   ;;  %v3810_v1 = vld [vmem:[%s5640_s3 + $0x300] ss:$48 sps:$4 sm:$0xff]   ;;  %v3831_v35 = vld [vmem:[%s5640_s3 + $0x7ec] ss:$48 sps:$4 sm:$0xff]  }
  0x33   : > { %2715 = vmatpush1.bf16.msra.mxu1 %v3765_v34  ;;  %v3813_v2 = vld [vmem:[%s5640_s3 + $0x900] ss:$48 sps:$4 sm:$0xff]   ;;  %v3823_v34 = vld [vmem:[%s5640_s3 + $0x848] ss:$48 sps:$4 sm:$0xff]  }
  0x34   : > { %2716 = vmatprep.subr.bf16.mxu1 %v3769_v36  ;;  %v245_v15 = vld [vmem:[#allocation2] sm:$0xff]  ;;  %v3826_v36 = vld [vmem:[%s5640_s3 + $0x1e8] ss:$48 sps:$4 sm:$0xff]  }
  0x35   : > { %2676 = vmatpush2.bf16.msra.mxu0 %v3768_v37  ;;  %v3834_v37 = vld [vmem:[%s5640_s3 + $0x18c] ss:$48 sps:$4 sm:$0xff]  }
  0x36   : > { %2677 = vmatprep.subr.bf16.mxu0 %v3772_v39  ;;  %v3837_v39 = vld [vmem:[%s5640_s3 + $0x78c] ss:$48 sps:$4 sm:$0xff]  }
  0x37   : > { %2717 = vmatpush2.bf16.msra.mxu1 %v3771_v38  ;;  %v3829_v38 = vld [vmem:[%s5640_s3 + $0x7e8] ss:$48 sps:$4 sm:$0xff]  }
  0x38   : > { %2718 = vmatprep.subr.bf16.mxu1 %v3775_v40  ;;  %v3832_v40 = vld [vmem:[%s5640_s3 + $0x188] ss:$48 sps:$4 sm:$0xff]  }
  0x39   : > { %2678 = vmatpush2.bf16.msra.mxu0 %v3774_v41  ;;  %v3840_v41 = vld [vmem:[%s5640_s3 + $0x12c] ss:$48 sps:$4 sm:$0xff]  }
  0x3a   : > { %2679 = vmatprep.subr.bf16.mxu0 %v3778_v43  ;;  %v3843_v43 = vld [vmem:[%s5640_s3 + $0x72c] ss:$48 sps:$4 sm:$0xff]  }
  0x3b   : > { %2719 = vmatpush2.bf16.msra.mxu1 %v3777_v42  ;;  %v3835_v42 = vld [vmem:[%s5640_s3 + $0x788] ss:$48 sps:$4 sm:$0xff]  }
  0x3c   : > { %2720 = vmatprep.subr.bf16.mxu1 %v3781_v44  ;;  %v3838_v44 = vld [vmem:[%s5640_s3 + $0x128] ss:$48 sps:$4 sm:$0xff]  }
  0x3d   : > { %2680 = vmatpush2.bf16.msra.mxu0 %v3780_v45  ;;  %v3846_v45 = vld [vmem:[%s5640_s3 + $0xcc] ss:$48 sps:$4 sm:$0xff]  }
  0x3e   : > { %2681 = vmatprep.subr.bf16.mxu0 %v3784_v47  ;;  %v3849_v47 = vld [vmem:[%s5640_s3 + $0x6cc] ss:$48 sps:$4 sm:$0xff]  }
  0x3f   : > { %2721 = vmatpush2.bf16.msra.mxu1 %v3783_v46  ;;  %v3841_v46 = vld [vmem:[%s5640_s3 + $0x728] ss:$48 sps:$4 sm:$0xff]  }
  0x40   : > { %2722 = vmatprep.subr.bf16.mxu1 %v3787_v48  ;;  %v3844_v48 = vld [vmem:[%s5640_s3 + $0xc8] ss:$48 sps:$4 sm:$0xff]  }
  0x41   : > { %2682 = vmatpush2.bf16.msra.mxu0 %v3786_v49  ;;  %v3852_v49 = vld [vmem:[%s5640_s3 + $0x6c] ss:$48 sps:$4 sm:$0xff]  }
  0x42   : > { %2683 = vmatprep.subr.bf16.mxu0 %v3790_v51  ;;  %v3855_v51 = vld [vmem:[%s5640_s3 + $0x66c] ss:$48 sps:$4 sm:$0xff]  }
  0x43   : > { %2723 = vmatpush2.bf16.msra.mxu1 %v3789_v50  ;;  %v3847_v50 = vld [vmem:[%s5640_s3 + $0x6c8] ss:$48 sps:$4 sm:$0xff]  }
  0x44   : > { %2724 = vmatprep.subr.bf16.mxu1 %v3793_v52  ;;  %v3850_v52 = vld [vmem:[%s5640_s3 + $0x68] ss:$48 sps:$4 sm:$0xff]  }
  0x45   : > { %2684 = vmatpush2.bf16.msra.mxu0 %v3792_v53  ;;  %v3858_v53 = vld [vmem:[%s5640_s3 + $0xc] ss:$48 sps:$4 sm:$0xff]  }
  0x46   : > { %2685 = vmatprep.subr.bf16.mxu0 %v3796_v55  ;;  %v3861_v55 = vld [vmem:[%s5640_s3 + $0x60c] ss:$48 sps:$4 sm:$0xff]  }
  0x47   : > { %2725 = vmatpush2.bf16.msra.mxu1 %v3795_v54  ;;  %v3853_v54 = vld [vmem:[%s5640_s3 + $0x668] ss:$48 sps:$4 sm:$0xff]  }
  0x48   : > { %2726 = vmatprep.subr.bf16.mxu1 %v3799_v56  ;;  %v3856_v56 = vld [vmem:[%s5640_s3 + $0x8] ss:$48 sps:$4 sm:$0xff]  }
  0x49   : > { %2686 = vmatpush2.bf16.msra.mxu0 %v3798_v57  ;;  %v3864_v57 = vld [vmem:[%s5640_s3 + $0x5ac] ss:$48 sps:$4 sm:$0xff]  }
  0x4a   : > { %2687 = vmatprep.subr.bf16.mxu0 %v3802_v59  ;;  %v3867_v59 = vld [vmem:[%s5640_s3 + $0xbac] ss:$48 sps:$4 sm:$0xff]  }
  0x4b   : > { %2727 = vmatpush2.bf16.msra.mxu1 %v3801_v58  ;;  %v3859_v58 = vld [vmem:[%s5640_s3 + $0x608] ss:$48 sps:$4 sm:$0xff]  }
  0x4c   : > { %2728 = vmatprep.subr.bf16.mxu1 %v3805_v60  ;;  %v3862_v60 = vld [vmem:[%s5640_s3 + $0x5a8] ss:$48 sps:$4 sm:$0xff]  }
  0x4d   : > { %2688 = vmatpush2.bf16.msra.mxu0 %v3804_v61  ;;  %v3870_v61 = vld [vmem:[%s5640_s3 + $0x54c] ss:$48 sps:$4 sm:$0xff]  }
  0x4e   : > { %2689 = vmatprep.subr.bf16.mxu0 %v3808_v63  ;;  %v3873_v63 = vld [vmem:[%s5640_s3 + $0xb4c] ss:$48 sps:$4 sm:$0xff]  }
  0x4f   : > { %2729 = vmatpush2.bf16.msra.mxu1 %v3807_v62  ;;  %v3865_v62 = vld [vmem:[%s5640_s3 + $0xba8] ss:$48 sps:$4 sm:$0xff]  }
  0x50   : > { %2730 = vmatprep.subr.bf16.mxu1 %v3811_v0  ;;  %v3868_v0 = vld [vmem:[%s5640_s3 + $0x548] ss:$48 sps:$4 sm:$0xff]  }
  0x51   : > { %2690 = vmatpush2.bf16.msra.mxu0 %v3810_v1  ;;  %v3876_v1 = vld [vmem:[%s5640_s3 + $0x4ec] ss:$48 sps:$4 sm:$0xff]  }
  0x52   : > { %2741 = vmatprep.subr.bf16.mxu0 %v3816_v3  ;;  %v3879_v3 = vld [vmem:[%s5640_s3 + $0xaec] ss:$48 sps:$4 sm:$0xff]  }
  0x53   : > { %2731 = vmatpush2.bf16.msra.mxu1 %v3813_v2  ;;  %v3871_v2 = vld [vmem:[%s5640_s3 + $0xb48] ss:$48 sps:$4 sm:$0xff]  }
  0x54   : > { %2782 = vmatprep.subr.bf16.mxu1 %v3819_v4  ;;  %v3874_v4 = vld [vmem:[%s5640_s3 + $0x4e8] ss:$48 sps:$4 sm:$0xff]  }
  0x90   : > { %v250_v14 = vpop.permute.xlu0 %249 }
  0x91   : > { %v257_v17 = vrot.slane %v250_v14, %v256_v12  ;;  %v3891_v12 = vld [vmem:[%s5640_s3 + $0xa2c] ss:$48 sps:$4 sm:$0xff]  }
  0x92   : > { %v3894_v14 = vld [vmem:[%s5640_s3 + $0x3cc] ss:$48 sps:$4 sm:$0xff]  }
  0x93   : > { %v4573_v18 = vmul.f32 %v257_v17, %v245_v15  ;;  %v3889_v15 = vld [vmem:[%s5640_s3 + $0xa28] ss:$48 sps:$4 sm:$0xff]   ;;  %v3897_v17 = vld [vmem:[%s5640_s3 + $0x9cc] ss:$48 sps:$4 sm:$0xff]  }
  0x95   : > { %v266_v19 = vcombine.high %v4573_v18, %v4573_v18  ;;  %v273_v20 = vrot.slane %v4573_v18, %v4571_v16 }
  0x97   : > { %v280_v21 = vrot.slane %v266_v19, %v4571_v16  ;;  %v281_v22 = vcombine.high %v273_v20, %v273_v20  ;;  %v4585_v26 = vpack.c.bf16 %v273_v20, %v273_v20  ;;  %v3892_v19 = vld [vmem:[%s5640_s3 + $0x3c8] ss:$48 sps:$4 sm:$0xff]   ;;  %v3900_v20 = vld [vmem:[%s5640_s3 + $0x36c] ss:$48 sps:$4 sm:$0xff]  }
  0x99   : > { %v282_v23 = vcombine.high %v280_v21, %v280_v21  ;;  %v4580_v24 = vpack.c.bf16 %v281_v22, %v281_v22  ;;  %v4596_v30 = vpack.c.bf16 %v280_v21, %v280_v21  ;;  %v3895_v21 = vld [vmem:[%s5640_s3 + $0x9c8] ss:$48 sps:$4 sm:$0xff]   ;;  %v3903_v22 = vld [vmem:[%s5640_s3 + $0x96c] ss:$48 sps:$4 sm:$0xff]  }
  0x9b   : > { %v4590_v28 = vpack.c.bf16 %v282_v23, %v282_v23  ;;  %2691 = vmatprep.mubr.bf16.mxu0 %v4580_v24  ;;  %v3898_v23 = vld [vmem:[%s5640_s3 + $0x368] ss:$48 sps:$4 sm:$0xff]  }
  0x9c   : > { %2692 = vmatmul.mubr.bf16.vlgmr.msra.gmra.mxu0 %v4585_v26 }
  0x9d   : > { %2742 = vmatpush1.bf16.msra.mxu0 %v3814_v25  ;;  %2732 = vmatprep.mubr.bf16.mxu1 %v4590_v28  ;;  %v3906_v25 = vld [vmem:[%s5640_s3 + $0x30c] ss:$48 sps:$4 sm:$0xff]  }
  0x9e   : > { %2773 = vmatprep.mubr.bf16.mxu0 %v4580_v24  ;;  %2733 = vmatmul.mubr.bf16.vlgmr.msra.gmra.mxu1 %v4596_v30 }
  0x9f   : > { %2783 = vmatpush1.bf16.msra.mxu1 %v3817_v27  ;;  %2743 = vmatprep.subr.bf16.mxu0 %v3822_v29  ;;  %v3901_v27 = vld [vmem:[%s5640_s3 + $0x968] ss:$48 sps:$4 sm:$0xff]   ;;  %v3909_v29 = vld [vmem:[%s5640_s3 + $0x90c] ss:$48 sps:$4 sm:$0xff]  }
  0xa0   : > { %2814 = vmatprep.mubr.bf16.mxu1 %v4590_v28  ;;  %2784 = vmatprep.subr.bf16.mxu1 %v3825_v31  ;;  %v3904_v31 = vld [vmem:[%s5640_s3 + $0x308] ss:$48 sps:$4 sm:$0xff]  }
  0xa1   : > { %2744 = vmatpush1.bf16.msra.mxu0 %v3820_v32  ;;  %v3912_v32 = vld [vmem:[%s5640_s3 + $0x2b4] ss:$48 sps:$4 sm:$0xff]  }
  0xa2   : > { %2745 = vmatprep.subr.bf16.mxu0 %v3828_v33  ;;  %v3907_v33 = vld [vmem:[%s5640_s3 + $0x908] ss:$48 sps:$4 sm:$0xff]  }
  0xa3   : > { %2785 = vmatpush1.bf16.msra.mxu1 %v3823_v34  ;;  %v3915_v34 = vld [vmem:[%s5640_s3 + $0x8b4] ss:$48 sps:$4 sm:$0xff]  }
  0xa4   : > { %2786 = vmatprep.subr.bf16.mxu1 %v3831_v35  ;;  %v3910_v35 = vld [vmem:[%s5640_s3 + $0x2b0] ss:$48 sps:$4 sm:$0xff]  }
  0xa5   : > { %2746 = vmatpush1.bf16.msra.mxu0 %v3826_v36  ;;  %v3918_v36 = vld [vmem:[%s5640_s3 + $0x254] ss:$48 sps:$4 sm:$0xff]  }
  0xa6   : > { %2747 = vmatprep.subr.bf16.mxu0 %v3834_v37  ;;  %v3913_v37 = vld [vmem:[%s5640_s3 + $0x8b0] ss:$48 sps:$4 sm:$0xff]  }
  0xa7   : > { %2787 = vmatpush1.bf16.msra.mxu1 %v3829_v38  ;;  %v3921_v38 = vld [vmem:[%s5640_s3 + $0x854] ss:$48 sps:$4 sm:$0xff]  }
  0xa8   : > { %2788 = vmatprep.subr.bf16.mxu1 %v3837_v39  ;;  %v3916_v39 = vld [vmem:[%s5640_s3 + $0x250] ss:$48 sps:$4 sm:$0xff]  }
  0xa9   : > { %2748 = vmatpush1.bf16.msra.mxu0 %v3832_v40  ;;  %v3924_v40 = vld [vmem:[%s5640_s3 + $0x1f4] ss:$48 sps:$4 sm:$0xff]  }
  0xaa   : > { %2749 = vmatprep.subr.bf16.mxu0 %v3840_v41  ;;  %v3919_v41 = vld [vmem:[%s5640_s3 + $0x850] ss:$48 sps:$4 sm:$0xff]  }
  0xab   : > { %2789 = vmatpush1.bf16.msra.mxu1 %v3835_v42  ;;  %v3927_v42 = vld [vmem:[%s5640_s3 + $0x7f4] ss:$48 sps:$4 sm:$0xff]  }
  0xac   : > { %2790 = vmatprep.subr.bf16.mxu1 %v3843_v43  ;;  %v3922_v43 = vld [vmem:[%s5640_s3 + $0x1f0] ss:$48 sps:$4 sm:$0xff]  }
  0xad   : > { %2750 = vmatpush1.bf16.msra.mxu0 %v3838_v44  ;;  %v3930_v44 = vld [vmem:[%s5640_s3 + $0x194] ss:$48 sps:$4 sm:$0xff]  }
  0xae   : > { %2751 = vmatprep.subr.bf16.mxu0 %v3846_v45  ;;  %v3925_v45 = vld [vmem:[%s5640_s3 + $0x7f0] ss:$48 sps:$4 sm:$0xff]  }
  0xaf   : > { %2791 = vmatpush1.bf16.msra.mxu1 %v3841_v46  ;;  %v3933_v46 = vld [vmem:[%s5640_s3 + $0x794] ss:$48 sps:$4 sm:$0xff]  }
  0xb0   : > { %2792 = vmatprep.subr.bf16.mxu1 %v3849_v47  ;;  %v3928_v47 = vld [vmem:[%s5640_s3 + $0x190] ss:$48 sps:$4 sm:$0xff]  }
  0xb1   : > { %2752 = vmatpush1.bf16.msra.mxu0 %v3844_v48  ;;  %v3936_v48 = vld [vmem:[%s5640_s3 + $0x134] ss:$48 sps:$4 sm:$0xff]  }
  0xb2   : > { %2753 = vmatprep.subr.bf16.mxu0 %v3852_v49  ;;  %v3931_v49 = vld [vmem:[%s5640_s3 + $0x790] ss:$48 sps:$4 sm:$0xff]  }
  0xb3   : > { %2793 = vmatpush1.bf16.msra.mxu1 %v3847_v50  ;;  %v3939_v50 = vld [vmem:[%s5640_s3 + $0x734] ss:$48 sps:$4 sm:$0xff]  }
  0xb4   : > { %2794 = vmatprep.subr.bf16.mxu1 %v3855_v51  ;;  %v3934_v51 = vld [vmem:[%s5640_s3 + $0x130] ss:$48 sps:$4 sm:$0xff]  }
  0xb5   : > { %2754 = vmatpush1.bf16.msra.mxu0 %v3850_v52  ;;  %v3942_v52 = vld [vmem:[%s5640_s3 + $0xd4] ss:$48 sps:$4 sm:$0xff]  }
  0xb6   : > { %2755 = vmatprep.subr.bf16.mxu0 %v3858_v53  ;;  %v3937_v53 = vld [vmem:[%s5640_s3 + $0x730] ss:$48 sps:$4 sm:$0xff]  }
  0xb7   : > { %2795 = vmatpush1.bf16.msra.mxu1 %v3853_v54  ;;  %v3945_v54 = vld [vmem:[%s5640_s3 + $0x6d4] ss:$48 sps:$4 sm:$0xff]  }
  0xb8   : > { %2796 = vmatprep.subr.bf16.mxu1 %v3861_v55  ;;  %v3940_v55 = vld [vmem:[%s5640_s3 + $0xd0] ss:$48 sps:$4 sm:$0xff]  }
  0xb9   : > { %2756 = vmatpush1.bf16.msra.mxu0 %v3856_v56  ;;  %v3948_v56 = vld [vmem:[%s5640_s3 + $0x74] ss:$48 sps:$4 sm:$0xff]  }
  0xba   : > { %2757 = vmatprep.subr.bf16.mxu0 %v3864_v57  ;;  %v3943_v57 = vld [vmem:[%s5640_s3 + $0x6d0] ss:$48 sps:$4 sm:$0xff]  }
  0xbb   : > { %2797 = vmatpush1.bf16.msra.mxu1 %v3859_v58  ;;  %v3951_v58 = vld [vmem:[%s5640_s3 + $0x674] ss:$48 sps:$4 sm:$0xff]  }
  0xbc   : > { %2798 = vmatprep.subr.bf16.mxu1 %v3867_v59  ;;  %v3946_v59 = vld [vmem:[%s5640_s3 + $0x70] ss:$48 sps:$4 sm:$0xff]  }
  0xbd   : > { %2758 = vmatpush2.bf16.msra.mxu0 %v3862_v60  ;;  %v3954_v60 = vld [vmem:[%s5640_s3 + $0x14] ss:$48 sps:$4 sm:$0xff]  }
  0xbe   : > { %2759 = vmatprep.subr.bf16.mxu0 %v3870_v61  ;;  %v3949_v61 = vld [vmem:[%s5640_s3 + $0x670] ss:$48 sps:$4 sm:$0xff]  }
  0xbf   : > { %2799 = vmatpush2.bf16.msra.mxu1 %v3865_v62  ;;  %v3957_v62 = vld [vmem:[%s5640_s3 + $0x614] ss:$48 sps:$4 sm:$0xff]  }
  0xc0   : > { %2800 = vmatprep.subr.bf16.mxu1 %v3873_v63  ;;  %v3952_v63 = vld [vmem:[%s5640_s3 + $0x10] ss:$48 sps:$4 sm:$0xff]  }
  0xc1   : > { %2760 = vmatpush2.bf16.msra.mxu0 %v3868_v0  ;;  %v3960_v0 = vld [vmem:[%s5640_s3 + $0x5b4] ss:$48 sps:$4 sm:$0xff]  }
  0xc2   : > { %2761 = vmatprep.subr.bf16.mxu0 %v3876_v1  ;;  %v3955_v1 = vld [vmem:[%s5640_s3 + $0x610] ss:$48 sps:$4 sm:$0xff]  }
  0xc3   : > { %2801 = vmatpush2.bf16.msra.mxu1 %v3871_v2  ;;  %v3963_v2 = vld [vmem:[%s5640_s3 + $0xbb4] ss:$48 sps:$4 sm:$0xff]  }
  0xc4   : > { %2802 = vmatprep.subr.bf16.mxu1 %v3879_v3  ;;  %v3958_v3 = vld [vmem:[%s5640_s3 + $0x5b0] ss:$48 sps:$4 sm:$0xff]  }
  0xc5   : > { %2762 = vmatpush2.bf16.msra.mxu0 %v3874_v4  ;;  %v3966_v4 = vld [vmem:[%s5640_s3 + $0x554] ss:$48 sps:$4 sm:$0xff]  }
  0xc6   : > { %2763 = vmatprep.subr.bf16.mxu0 %v3882_v5  ;;  %v3961_v5 = vld [vmem:[%s5640_s3 + $0xbb0] ss:$48 sps:$4 sm:$0xff]  }
  0xc7   : > { %2803 = vmatpush2.bf16.msra.mxu1 %v3877_v6  ;;  %v3969_v6 = vld [vmem:[%s5640_s3 + $0xb54] ss:$48 sps:$4 sm:$0xff]  }
  0xc8   : > { %2804 = vmatprep.subr.bf16.mxu1 %v3885_v7  ;;  %v3964_v7 = vld [vmem:[%s5640_s3 + $0x550] ss:$48 sps:$4 sm:$0xff]  }
  0xc9   : > { %2764 = vmatpush2.bf16.msra.mxu0 %v3880_v8  ;;  %v3972_v8 = vld [vmem:[%s5640_s3 + $0x4f4] ss:$48 sps:$4 sm:$0xff]  }
  0xca   : > { %2765 = vmatprep.subr.bf16.mxu0 %v3888_v10  ;;  %v3967_v10 = vld [vmem:[%s5640_s3 + $0xb50] ss:$48 sps:$4 sm:$0xff]  }
  0xcb   : > { %2805 = vmatpush2.bf16.msra.mxu1 %v3883_v11  ;;  %v3975_v11 = vld [vmem:[%s5640_s3 + $0xaf4] ss:$48 sps:$4 sm:$0xff]  }
  0xcc   : > { %2806 = vmatprep.subr.bf16.mxu1 %v3891_v12  ;;  %v3970_v12 = vld [vmem:[%s5640_s3 + $0x4f0] ss:$48 sps:$4 sm:$0xff]  }
  0xcd   : > { %2766 = vmatpush2.bf16.msra.mxu0 %v3886_v13  ;;  %v3978_v13 = vld [vmem:[%s5640_s3 + $0x494] ss:$48 sps:$4 sm:$0xff]  }
  0xce   : > { %2767 = vmatprep.subr.bf16.mxu0 %v3894_v14  ;;  %v3973_v14 = vld [vmem:[%s5640_s3 + $0xaf0] ss:$48 sps:$4 sm:$0xff]  }
  0xcf   : > { %2807 = vmatpush2.bf16.msra.mxu1 %v3889_v15  ;;  %v3981_v15 = vld [vmem:[%s5640_s3 + $0xa94] ss:$48 sps:$4 sm:$0xff]  }
  0xd0   : > { %2808 = vmatprep.subr.bf16.mxu1 %v3897_v17  ;;  %v3976_v17 = vld [vmem:[%s5640_s3 + $0x490] ss:$48 sps:$4 sm:$0xff]  }
  0xd1   : > { %2768 = vmatpush2.bf16.msra.mxu0 %v3892_v19  ;;  %v3984_v19 = vld [vmem:[%s5640_s3 + $0x434] ss:$48 sps:$4 sm:$0xff]  }
  0xd2   : > { %2769 = vmatprep.subr.bf16.mxu0 %v3900_v20  ;;  %v3979_v20 = vld [vmem:[%s5640_s3 + $0xa90] ss:$48 sps:$4 sm:$0xff]  }
  0xd3   : > { %2809 = vmatpush2.bf16.msra.mxu1 %v3895_v21  ;;  %v3987_v21 = vld [vmem:[%s5640_s3 + $0xa34] ss:$48 sps:$4 sm:$0xff]  }
  0xd4   : > { %2810 = vmatprep.subr.bf16.mxu1 %v3903_v22  ;;  %v3982_v22 = vld [vmem:[%s5640_s3 + $0x430] ss:$48 sps:$4 sm:$0xff]  }
  0xd5   : > { %2770 = vmatpush2.bf16.msra.mxu0 %v3898_v23  ;;  %v3990_v23 = vld [vmem:[%s5640_s3 + $0x3d4] ss:$48 sps:$4 sm:$0xff]  }
  0xd6   : > { %2771 = vmatprep.subr.bf16.mxu0 %v3906_v25  ;;  %v3985_v25 = vld [vmem:[%s5640_s3 + $0xa30] ss:$48 sps:$4 sm:$0xff]  }
  0xd7   : > { %2811 = vmatpush2.bf16.msra.mxu1 %v3901_v27  ;;  %v3993_v27 = vld [vmem:[%s5640_s3 + $0x9d4] ss:$48 sps:$4 sm:$0xff]  }
  0xd8   : > { %2812 = vmatprep.subr.bf16.mxu1 %v3909_v29  ;;  %v3988_v29 = vld [vmem:[%s5640_s3 + $0x3d0] ss:$48 sps:$4 sm:$0xff]  }
  0xd9   : > { %2772 = vmatpush2.bf16.msra.mxu0 %v3904_v31  ;;  %v3996_v31 = vld [vmem:[%s5640_s3 + $0x374] ss:$48 sps:$4 sm:$0xff]  }
  0xda   : > { %2823 = vmatprep.subr.bf16.mxu0 %v3912_v32  ;;  %v3991_v32 = vld [vmem:[%s5640_s3 + $0x9d0] ss:$48 sps:$4 sm:$0xff]  }
  0xdb   : > { %2813 = vmatpush2.bf16.msra.mxu1 %v3907_v33  ;;  %v3999_v33 = vld [vmem:[%s5640_s3 + $0x974] ss:$48 sps:$4 sm:$0xff]  }
  0xdc   : > { %2774 = vmatmul.mubr.bf16.vlgmr.msra.gmra.mxu0 %v4585_v26  ;;  %2864 = vmatprep.subr.bf16.mxu1 %v3915_v34  ;;  %v3994_v34 = vld [vmem:[%s5640_s3 + $0x370] ss:$48 sps:$4 sm:$0xff]  }
  0xdd   : > { %2824 = vmatpush1.bf16.msra.mxu0 %v3910_v35  ;;  %2855 = vmatprep.mubr.bf16.mxu0 %v4580_v24  ;;  %v4002_v35 = vld [vmem:[%s5640_s3 + $0x314] ss:$48 sps:$4 sm:$0xff]  }
  0xde   : > { %2815 = vmatmul.mubr.bf16.vlgmr.msra.gmra.mxu1 %v4596_v30  ;;  %2825 = vmatprep.subr.bf16.mxu0 %v3918_v36  ;;  %v3997_v36 = vld [vmem:[%s5640_s3 + $0x970] ss:$48 sps:$4 sm:$0xff]  }
  0xdf   : > { %2865 = vmatpush1.bf16.msra.mxu1 %v3913_v37  ;;  %2896 = vmatprep.mubr.bf16.mxu1 %v4590_v28  ;;  %v4005_v37 = vld [vmem:[%s5640_s3 + $0x914] ss:$48 sps:$4 sm:$0xff]  }
  0xe0   : > { %2866 = vmatprep.subr.bf16.mxu1 %v3921_v38  ;;  %v4000_v38 = vld [vmem:[%s5640_s3 + $0x310] ss:$48 sps:$4 sm:$0xff]  }
  0xe1   : > { %2826 = vmatpush1.bf16.msra.mxu0 %v3916_v39  ;;  %v4008_v39 = vld [vmem:[%s5640_s3 + $0x2bc] ss:$48 sps:$4 sm:$0xff]  }
  0xe2   : > { %2827 = vmatprep.subr.bf16.mxu0 %v3924_v40  ;;  %v4003_v40 = vld [vmem:[%s5640_s3 + $0x910] ss:$48 sps:$4 sm:$0xff]  }
  0xe3   : > { %2867 = vmatpush1.bf16.msra.mxu1 %v3919_v41  ;;  %v4011_v41 = vld [vmem:[%s5640_s3 + $0x8bc] ss:$48 sps:$4 sm:$0xff]  }
  0xe4   : > { %2868 = vmatprep.subr.bf16.mxu1 %v3927_v42  ;;  %v4006_v42 = vld [vmem:[%s5640_s3 + $0x2b8] ss:$48 sps:$4 sm:$0xff]  }
  0xe5   : > { %2828 = vmatpush1.bf16.msra.mxu0 %v3922_v43  ;;  %v4014_v43 = vld [vmem:[%s5640_s3 + $0x25c] ss:$48 sps:$4 sm:$0xff]  }
  0xe6   : > { %2829 = vmatprep.subr.bf16.mxu0 %v3930_v44  ;;  %v4009_v44 = vld [vmem:[%s5640_s3 + $0x8b8] ss:$48 sps:$4 sm:$0xff]  }
  0xe7   : > { %2869 = vmatpush1.bf16.msra.mxu1 %v3925_v45  ;;  %v4017_v45 = vld [vmem:[%s5640_s3 + $0x85c] ss:$48 sps:$4 sm:$0xff]  }
  0xe8   : > { %2870 = vmatprep.subr.bf16.mxu1 %v3933_v46  ;;  %v4012_v46 = vld [vmem:[%s5640_s3 + $0x258] ss:$48 sps:$4 sm:$0xff]  }
  0xe9   : > { %2830 = vmatpush1.bf16.msra.mxu0 %v3928_v47  ;;  %v4020_v47 = vld [vmem:[%s5640_s3 + $0x1fc] ss:$48 sps:$4 sm:$0xff]  }
  0xea   : > { %2831 = vmatprep.subr.bf16.mxu0 %v3936_v48  ;;  %v4015_v48 = vld [vmem:[%s5640_s3 + $0x858] ss:$48 sps:$4 sm:$0xff]  }
  0xeb   : > { %2871 = vmatpush1.bf16.msra.mxu1 %v3931_v49  ;;  %v4023_v49 = vld [vmem:[%s5640_s3 + $0x7fc] ss:$48 sps:$4 sm:$0xff]  }
  0xec   : > { %2872 = vmatprep.subr.bf16.mxu1 %v3939_v50  ;;  %v4018_v50 = vld [vmem:[%s5640_s3 + $0x1f8] ss:$48 sps:$4 sm:$0xff]  }
  0xed   : > { %2832 = vmatpush1.bf16.msra.mxu0 %v3934_v51  ;;  %v4026_v51 = vld [vmem:[%s5640_s3 + $0x19c] ss:$48 sps:$4 sm:$0xff]  }
  0xee   : > { %2833 = vmatprep.subr.bf16.mxu0 %v3942_v52  ;;  %v4021_v52 = vld [vmem:[%s5640_s3 + $0x7f8] ss:$48 sps:$4 sm:$0xff]  }
  0xef   : > { %2873 = vmatpush1.bf16.msra.mxu1 %v3937_v53  ;;  %v4029_v53 = vld [vmem:[%s5640_s3 + $0x79c] ss:$48 sps:$4 sm:$0xff]  }
  0xf0   : > { %2874 = vmatprep.subr.bf16.mxu1 %v3945_v54  ;;  %v4024_v54 = vld [vmem:[%s5640_s3 + $0x198] ss:$48 sps:$4 sm:$0xff]  }
  0xf1   : > { %2834 = vmatpush1.bf16.msra.mxu0 %v3940_v55  ;;  %v4032_v55 = vld [vmem:[%s5640_s3 + $0x13c] ss:$48 sps:$4 sm:$0xff]  }
  0xf2   : > { %2835 = vmatprep.subr.bf16.mxu0 %v3948_v56  ;;  %v4027_v56 = vld [vmem:[%s5640_s3 + $0x798] ss:$48 sps:$4 sm:$0xff]  }
  0xf3   : > { %2875 = vmatpush1.bf16.msra.mxu1 %v3943_v57  ;;  %v4035_v57 = vld [vmem:[%s5640_s3 + $0x73c] ss:$48 sps:$4 sm:$0xff]  }
  0xf4   : > { %2876 = vmatprep.subr.bf16.mxu1 %v3951_v58  ;;  %v4030_v58 = vld [vmem:[%s5640_s3 + $0x138] ss:$48 sps:$4 sm:$0xff]  }
  0xf5   : > { %2836 = vmatpush1.bf16.msra.mxu0 %v3946_v59  ;;  %v4038_v59 = vld [vmem:[%s5640_s3 + $0xdc] ss:$48 sps:$4 sm:$0xff]  }
  0xf6   : > { %2837 = vmatprep.subr.bf16.mxu0 %v3954_v60  ;;  %v4033_v60 = vld [vmem:[%s5640_s3 + $0x738] ss:$48 sps:$4 sm:$0xff]  }
  0xf7   : > { %2877 = vmatpush1.bf16.msra.mxu1 %v3949_v61  ;;  %v4041_v61 = vld [vmem:[%s5640_s3 + $0x6dc] ss:$48 sps:$4 sm:$0xff]  }
  0xf8   : > { %2878 = vmatprep.subr.bf16.mxu1 %v3957_v62  ;;  %v4036_v62 = vld [vmem:[%s5640_s3 + $0xd8] ss:$48 sps:$4 sm:$0xff]  }
  0xf9   : > { %2838 = vmatpush1.bf16.msra.mxu0 %v3952_v63  ;;  %v4044_v63 = vld [vmem:[%s5640_s3 + $0x7c] ss:$48 sps:$4 sm:$0xff]  }
  0xfa   : > { %2839 = vmatprep.subr.bf16.mxu0 %v3960_v0  ;;  %v4039_v0 = vld [vmem:[%s5640_s3 + $0x6d8] ss:$48 sps:$4 sm:$0xff]  }
  0xfb   : > { %2879 = vmatpush1.bf16.msra.mxu1 %v3955_v1  ;;  %v4047_v1 = vld [vmem:[%s5640_s3 + $0x67c] ss:$48 sps:$4 sm:$0xff]  }
  0xfc   : > { %2880 = vmatprep.subr.bf16.mxu1 %v3963_v2  ;;  %v4042_v2 = vld [vmem:[%s5640_s3 + $0x78] ss:$48 sps:$4 sm:$0xff]  }
  0xfd   : > { %2840 = vmatpush2.bf16.msra.mxu0 %v3958_v3  ;;  %v4050_v3 = vld [vmem:[%s5640_s3 + $0x1c] ss:$48 sps:$4 sm:$0xff]  }
  0xfe   : > { %2841 = vmatprep.subr.bf16.mxu0 %v3966_v4  ;;  %v4045_v4 = vld [vmem:[%s5640_s3 + $0x678] ss:$48 sps:$4 sm:$0xff]  }
  0xff   : > { %2881 = vmatpush2.bf16.msra.mxu1 %v3961_v5  ;;  %v4053_v5 = vld [vmem:[%s5640_s3 + $0x61c] ss:$48 sps:$4 sm:$0xff]  }
 0x100   : > { %2882 = vmatprep.subr.bf16.mxu1 %v3969_v6  ;;  %v4048_v6 = vld [vmem:[%s5640_s3 + $0x18] ss:$48 sps:$4 sm:$0xff]  }
 0x101   : > { %2842 = vmatpush2.bf16.msra.mxu0 %v3964_v7  ;;  %v4056_v7 = vld [vmem:[%s5640_s3 + $0x5bc] ss:$48 sps:$4 sm:$0xff]  }
 0x102   : > { %2843 = vmatprep.subr.bf16.mxu0 %v3972_v8  ;;  %v4051_v8 = vld [vmem:[%s5640_s3 + $0x618] ss:$48 sps:$4 sm:$0xff]  }
 0x103   : > { %2883 = vmatpush2.bf16.msra.mxu1 %v3967_v10  ;;  %v4059_v10 = vld [vmem:[%s5640_s3 + $0xbbc] ss:$48 sps:$4 sm:$0xff]  }
 0x104   : > { %2884 = vmatprep.subr.bf16.mxu1 %v3975_v11  ;;  %v4054_v11 = vld [vmem:[%s5640_s3 + $0x5b8] ss:$48 sps:$4 sm:$0xff]  }
 0x105   : > { %2844 = vmatpush2.bf16.msra.mxu0 %v3970_v12  ;;  %v4062_v12 = vld [vmem:[%s5640_s3 + $0x55c] ss:$48 sps:$4 sm:$0xff]  }
 0x106   : > { %2845 = vmatprep.subr.bf16.mxu0 %v3978_v13  ;;  %v4057_v13 = vld [vmem:[%s5640_s3 + $0xbb8] ss:$48 sps:$4 sm:$0xff]  }
 0x107   : > { %2885 = vmatpush2.bf16.msra.mxu1 %v3973_v14  ;;  %v4065_v14 = vld [vmem:[%s5640_s3 + $0xb5c] ss:$48 sps:$4 sm:$0xff]  }
 0x108   : > { %2886 = vmatprep.subr.bf16.mxu1 %v3981_v15  ;;  %v4060_v15 = vld [vmem:[%s5640_s3 + $0x558] ss:$48 sps:$4 sm:$0xff]  }
 0x109   : > { %2846 = vmatpush2.bf16.msra.mxu0 %v3976_v17  ;;  %v4068_v17 = vld [vmem:[%s5640_s3 + $0x4fc] ss:$48 sps:$4 sm:$0xff]  }
 0x10a   : > { %2847 = vmatprep.subr.bf16.mxu0 %v3984_v19  ;;  %v4063_v19 = vld [vmem:[%s5640_s3 + $0xb58] ss:$48 sps:$4 sm:$0xff]  }
 0x10b   : > { %2887 = vmatpush2.bf16.msra.mxu1 %v3979_v20  ;;  %v4071_v20 = vld [vmem:[%s5640_s3 + $0xafc] ss:$48 sps:$4 sm:$0xff]  }
 0x10c   : > { %2888 = vmatprep.subr.bf16.mxu1 %v3987_v21  ;;  %v4066_v21 = vld [vmem:[%s5640_s3 + $0x4f8] ss:$48 sps:$4 sm:$0xff]  }
 0x10d   : > { %2848 = vmatpush2.bf16.msra.mxu0 %v3982_v22  ;;  %v4074_v22 = vld [vmem:[%s5640_s3 + $0x49c] ss:$48 sps:$4 sm:$0xff]  }
 0x10e   : > { %2849 = vmatprep.subr.bf16.mxu0 %v3990_v23  ;;  %v4069_v23 = vld [vmem:[%s5640_s3 + $0xaf8] ss:$48 sps:$4 sm:$0xff]  }
 0x10f   : > { %2889 = vmatpush2.bf16.msra.mxu1 %v3985_v25  ;;  %v4077_v25 = vld [vmem:[%s5640_s3 + $0xa9c] ss:$48 sps:$4 sm:$0xff]  }
 0x110   : > { %2890 = vmatprep.subr.bf16.mxu1 %v3993_v27  ;;  %v4072_v27 = vld [vmem:[%s5640_s3 + $0x498] ss:$48 sps:$4 sm:$0xff]  }
 0x111   : > { %2850 = vmatpush2.bf16.msra.mxu0 %v3988_v29  ;;  %v4080_v29 = vld [vmem:[%s5640_s3 + $0x43c] ss:$48 sps:$4 sm:$0xff]  }
 0x112   : > { %2851 = vmatprep.subr.bf16.mxu0 %v3996_v31  ;;  %v4075_v31 = vld [vmem:[%s5640_s3 + $0xa98] ss:$48 sps:$4 sm:$0xff]  }
 0x113   : > { %2891 = vmatpush2.bf16.msra.mxu1 %v3991_v32  ;;  %v4083_v32 = vld [vmem:[%s5640_s3 + $0xa3c] ss:$48 sps:$4 sm:$0xff]  }
 0x114   : > { %2892 = vmatprep.subr.bf16.mxu1 %v3999_v33  ;;  %v4078_v33 = vld [vmem:[%s5640_s3 + $0x438] ss:$48 sps:$4 sm:$0xff]  }
 0x115   : > { %2852 = vmatpush2.bf16.msra.mxu0 %v3994_v34  ;;  %v4086_v34 = vld [vmem:[%s5640_s3 + $0x3dc] ss:$48 sps:$4 sm:$0xff]  }
 0x116   : > { %2853 = vmatprep.subr.bf16.mxu0 %v4002_v35  ;;  %v4081_v35 = vld [vmem:[%s5640_s3 + $0xa38] ss:$48 sps:$4 sm:$0xff]  }
 0x117   : > { %2893 = vmatpush2.bf16.msra.mxu1 %v3997_v36  ;;  %v4089_v36 = vld [vmem:[%s5640_s3 + $0x9dc] ss:$48 sps:$4 sm:$0xff]  }
 0x118   : > { %2894 = vmatprep.subr.bf16.mxu1 %v4005_v37  ;;  %v4084_v37 = vld [vmem:[%s5640_s3 + $0x3d8] ss:$48 sps:$4 sm:$0xff]  }
 0x119   : > { %2854 = vmatpush2.bf16.msra.mxu0 %v4000_v38  ;;  %v4092_v38 = vld [vmem:[%s5640_s3 + $0x37c] ss:$48 sps:$4 sm:$0xff]  }
 0x11a   : > { %2905 = vmatprep.subr.bf16.mxu0 %v4008_v39  ;;  %v4087_v39 = vld [vmem:[%s5640_s3 + $0x9d8] ss:$48 sps:$4 sm:$0xff]  }
 0x11b   : > { %2895 = vmatpush2.bf16.msra.mxu1 %v4003_v40  ;;  %v4095_v40 = vld [vmem:[%s5640_s3 + $0x97c] ss:$48 sps:$4 sm:$0xff]  }
 0x11c   : > { %2856 = vmatmul.mubr.bf16.vlgmr.msra.gmra.mxu0 %v4585_v26  ;;  %2946 = vmatprep.subr.bf16.mxu1 %v4011_v41  ;;  %v4090_v41 = vld [vmem:[%s5640_s3 + $0x378] ss:$48 sps:$4 sm:$0xff]  }
 0x11d   : > { %2906 = vmatpush1.bf16.msra.mxu0 %v4006_v42  ;;  %2937 = vmatprep.mubr.bf16.mxu0 %v4580_v24  ;;  %v4098_v42 = vld [vmem:[%s5640_s3 + $0x31c] ss:$48 sps:$4 sm:$0xff]  }
 0x11e   : > { %2897 = vmatmul.mubr.bf16.vlgmr.msra.gmra.mxu1 %v4596_v30  ;;  %2907 = vmatprep.subr.bf16.mxu0 %v4014_v43  ;;  %v4093_v43 = vld [vmem:[%s5640_s3 + $0x978] ss:$48 sps:$4 sm:$0xff]  }
 0x11f   : > { %2947 = vmatpush1.bf16.msra.mxu1 %v4009_v44  ;;  %2978 = vmatprep.mubr.bf16.mxu1 %v4590_v28  ;;  %v4101_v44 = vld [vmem:[%s5640_s3 + $0x91c] ss:$48 sps:$4 sm:$0xff]  }
 0x120   : > { %2948 = vmatprep.subr.bf16.mxu1 %v4017_v45  ;;  %v4096_v45 = vld [vmem:[%s5640_s3 + $0x318] ss:$48 sps:$4 sm:$0xff]  }
 0x121   : > { %2908 = vmatpush1.bf16.msra.mxu0 %v4012_v46  ;;  %v681_v46 = vsub.s32 0, %v4567_v9 }
 0x122   : > { %2909 = vmatprep.subr.bf16.mxu0 %v4020_v47  ;;  %v4104_v47 = vld [vmem:[%s5640_s3 + $0x2c4] ss:$48 sps:$4 sm:$0xff]  }
 0x123   : > { %2949 = vmatpush1.bf16.msra.mxu1 %v4015_v48  ;;  %v5176_v48 = vld [vmem:[%s5641_s4] sm:$0xff] }
 0x124   : > { %2950 = vmatprep.subr.bf16.mxu1 %v4023_v49  ;;  %v4099_v49 = vld [vmem:[%s5640_s3 + $0x918] ss:$48 sps:$4 sm:$0xff]  }
 0x125   : > { %2910 = vmatpush1.bf16.msra.mxu0 %v4018_v50  ;;  %v685_v50 = vsub.s32 1, %v4567_v9 }
 0x126   : > { %2911 = vmatprep.subr.bf16.mxu0 %v4026_v51  ;;  %v4107_v51 = vld [vmem:[%s5640_s3 + $0x8c4] ss:$48 sps:$4 sm:$0xff]  }
 0x127   : > { %2951 = vmatpush1.bf16.msra.mxu1 %v4021_v52  ;;  %v4102_v52 = vld [vmem:[%s5640_s3 + $0x2c0] ss:$48 sps:$4 sm:$0xff]  }
 0x128   : > { %2952 = vmatprep.subr.bf16.mxu1 %v4029_v53  ;;  %v682_v53 = vrot.slane %v5176_v48, %v681_v46 }
 0x129   : > { %2912 = vmatpush1.bf16.msra.mxu0 %v4024_v54  ;;  %v4110_v54 = vld [vmem:[%s5640_s3 + $0x264] ss:$48 sps:$4 sm:$0xff]  }
 0x12a   : > { %2913 = vmatprep.subr.bf16.mxu0 %v4032_v55  ;;  %v4105_v55 = vld [vmem:[%s5640_s3 + $0x8c0] ss:$48 sps:$4 sm:$0xff]  }
 0x12b   : > { %2953 = vmatpush1.bf16.msra.mxu1 %v4027_v56  ;;  %v686_v56 = vrot.slane %v5176_v48, %v685_v50 }
 0x12c   : > { %2954 = vmatprep.subr.bf16.mxu1 %v4035_v57 }
 0x12d   : > { %2914 = vmatpush1.bf16.msra.mxu0 %v4030_v58  ;;  %v4113_v58 = vld [vmem:[%s5640_s3 + $0x864] ss:$48 sps:$4 sm:$0xff]  }
 0x12e   : > { %2915 = vmatprep.subr.bf16.mxu0 %v4038_v59 }
 0x12f   : > { %2955 = vmatpush1.bf16.msra.mxu1 %v4033_v60  ;;  %v4108_v60 = vld [vmem:[%s5640_s3 + $0x260] ss:$48 sps:$4 sm:$0xff]  }
 0x130   : > { %2956 = vmatprep.subr.bf16.mxu1 %v4041_v61 }
 0x131   : > { %2916 = vmatpush1.bf16.msra.mxu0 %v4036_v62 }
 0x132   : > { %2917 = vmatprep.subr.bf16.mxu0 %v4044_v63  ;;  %v4116_v63 = vld [vmem:[%s5640_s3 + $0x204] ss:$48 sps:$4 sm:$0xff]  }
 0x133   : > { %2957 = vmatpush1.bf16.msra.mxu1 %v4039_v0 }
 0x134   : > { %2958 = vmatprep.subr.bf16.mxu1 %v4047_v1 }
 0x135   : > { %2918 = vmatpush1.bf16.msra.mxu0 %v4042_v2  ;;  %v4111_v2 = vld [vmem:[%s5640_s3 + $0x860] ss:$48 sps:$4 sm:$0xff]  }
 0x136   : > { %2919 = vmatprep.subr.bf16.mxu0 %v4050_v3 }
 0x137   : > { %2959 = vmatpush1.bf16.msra.mxu1 %v4045_v4 }
 0x138   : > { %2960 = vmatprep.subr.bf16.mxu1 %v4053_v5  ;;  %v4119_v5 = vld [vmem:[%s5640_s3 + $0x804] ss:$48 sps:$4 sm:$0xff]  }
 0x139   : > { %2920 = vmatpush1.bf16.msra.mxu0 %v4048_v6 }
 0x13a   : > { %2921 = vmatprep.subr.bf16.mxu0 %v4056_v7  ;;  %v4114_v7 = vld [vmem:[%s5640_s3 + $0x200] ss:$48 sps:$4 sm:$0xff]  }
 0x13b   : > { %2961 = vmatpush1.bf16.msra.mxu1 %v4051_v8 }
 0x13c   : > { %2962 = vmatprep.subr.bf16.mxu1 %v4059_v10 }
 0x13d   : > { %2922 = vmatpush2.bf16.msra.mxu0 %v4054_v11  ;;  %v4122_v11 = vld [vmem:[%s5640_s3 + $0x1a4] ss:$48 sps:$4 sm:$0xff]  }
 0x13e   : > { %2923 = vmatprep.subr.bf16.mxu0 %v4062_v12 }
 0x13f   : > { %2963 = vmatpush2.bf16.msra.mxu1 %v4057_v13  ;;  %v4117_v13 = vld [vmem:[%s5640_s3 + $0x800] ss:$48 sps:$4 sm:$0xff]  }
 0x140   : > { %2964 = vmatprep.subr.bf16.mxu1 %v4065_v14 }
 0x141   : > { %2924 = vmatpush2.bf16.msra.mxu0 %v4060_v15  ;;  %v4125_v15 = vld [vmem:[%s5640_s3 + $0x7a4] ss:$48 sps:$4 sm:$0xff]  }
 0x142   : > { %2925 = vmatprep.subr.bf16.mxu0 %v4068_v17  ;;  %v4120_v17 = vld [vmem:[%s5640_s3 + $0x1a0] ss:$48 sps:$4 sm:$0xff]  }
 0x143   : > { %2965 = vmatpush2.bf16.msra.mxu1 %v4063_v19  ;;  %v4128_v19 = vld [vmem:[%s5640_s3 + $0x144] ss:$48 sps:$4 sm:$0xff]  }
 0x144   : > { %2966 = vmatprep.subr.bf16.mxu1 %v4071_v20  ;;  %v4123_v20 = vld [vmem:[%s5640_s3 + $0x7a0] ss:$48 sps:$4 sm:$0xff]  }
 0x145   : > { %2926 = vmatpush2.bf16.msra.mxu0 %v4066_v21  ;;  %v4131_v21 = vld [vmem:[%s5640_s3 + $0x744] ss:$48 sps:$4 sm:$0xff]  }
 0x146   : > { %2927 = vmatprep.subr.bf16.mxu0 %v4074_v22  ;;  %v4126_v22 = vld [vmem:[%s5640_s3 + $0x140] ss:$48 sps:$4 sm:$0xff]  }
 0x147   : > { %2967 = vmatpush2.bf16.msra.mxu1 %v4069_v23  ;;  %v4134_v23 = vld [vmem:[%s5640_s3 + $0xe4] ss:$48 sps:$4 sm:$0xff]  }
 0x148   : > { %2968 = vmatprep.subr.bf16.mxu1 %v4077_v25  ;;  %v4129_v25 = vld [vmem:[%s5640_s3 + $0x740] ss:$48 sps:$4 sm:$0xff]  }
 0x149   : > { %2928 = vmatpush2.bf16.msra.mxu0 %v4072_v27  ;;  %v4137_v27 = vld [vmem:[%s5640_s3 + $0x6e4] ss:$48 sps:$4 sm:$0xff]  }
 0x14a   : > { %2929 = vmatprep.subr.bf16.mxu0 %v4080_v29  ;;  %v4132_v29 = vld [vmem:[%s5640_s3 + $0xe0] ss:$48 sps:$4 sm:$0xff]  }
 0x14b   : > { %2969 = vmatpush2.bf16.msra.mxu1 %v4075_v31  ;;  %v4140_v31 = vld [vmem:[%s5640_s3 + $0x84] ss:$48 sps:$4 sm:$0xff]  }
 0x14c   : > { %2970 = vmatprep.subr.bf16.mxu1 %v4083_v32  ;;  %v4135_v32 = vld [vmem:[%s5640_s3 + $0x6e0] ss:$48 sps:$4 sm:$0xff]  }
 0x14d   : > { %2930 = vmatpush2.bf16.msra.mxu0 %v4078_v33  ;;  %v4143_v33 = vld [vmem:[%s5640_s3 + $0x684] ss:$48 sps:$4 sm:$0xff]  }
 0x14e   : > { %2931 = vmatprep.subr.bf16.mxu0 %v4086_v34  ;;  %v4138_v34 = vld [vmem:[%s5640_s3 + $0x80] ss:$48 sps:$4 sm:$0xff]  }
 0x14f   : > { %2971 = vmatpush2.bf16.msra.mxu1 %v4081_v35  ;;  %v4146_v35 = vld [vmem:[%s5640_s3 + $0x24] ss:$48 sps:$4 sm:$0xff]  }
 0x150   : > { %2972 = vmatprep.subr.bf16.mxu1 %v4089_v36  ;;  %v4141_v36 = vld [vmem:[%s5640_s3 + $0x680] ss:$48 sps:$4 sm:$0xff]  }
 0x151   : > { %2932 = vmatpush2.bf16.msra.mxu0 %v4084_v37  ;;  %v4149_v37 = vld [vmem:[%s5640_s3 + $0x624] ss:$48 sps:$4 sm:$0xff]  }
 0x152   : > { %2933 = vmatprep.subr.bf16.mxu0 %v4092_v38  ;;  %v4144_v38 = vld [vmem:[%s5640_s3 + $0x20] ss:$48 sps:$4 sm:$0xff]  }
 0x153   : > { %2973 = vmatpush2.bf16.msra.mxu1 %v4087_v39  ;;  %v4152_v39 = vld [vmem:[%s5640_s3 + $0x5c4] ss:$48 sps:$4 sm:$0xff]  }
 0x154   : > { %2974 = vmatprep.subr.bf16.mxu1 %v4095_v40  ;;  %v4147_v40 = vld [vmem:[%s5640_s3 + $0x620] ss:$48 sps:$4 sm:$0xff]  }
 0x155   : > { %2934 = vmatpush2.bf16.msra.mxu0 %v4090_v41  ;;  %v4155_v41 = vld [vmem:[%s5640_s3 + $0xbc4] ss:$48 sps:$4 sm:$0xff]  }
 0x156   : > { %2935 = vmatprep.subr.bf16.mxu0 %v4098_v42  ;;  %v4150_v42 = vld [vmem:[%s5640_s3 + $0x5c0] ss:$48 sps:$4 sm:$0xff]  }
 0x157   : > { %2975 = vmatpush2.bf16.msra.mxu1 %v4093_v43  ;;  %v4158_v43 = vld [vmem:[%s5640_s3 + $0x564] ss:$48 sps:$4 sm:$0xff]  }
 0x158   : > { %2976 = vmatprep.subr.bf16.mxu1 %v4101_v44  ;;  %v4153_v44 = vld [vmem:[%s5640_s3 + $0xbc0] ss:$48 sps:$4 sm:$0xff]  }
 0x159   : > { %2936 = vmatpush2.bf16.msra.mxu0 %v4096_v45  ;;  %v4161_v45 = vld [vmem:[%s5640_s3 + $0xb64] ss:$48 sps:$4 sm:$0xff]  }
 0x15a   : > { %2987 = vmatprep.subr.bf16.mxu0 %v4104_v47  ;;  %v4156_v47 = vld [vmem:[%s5640_s3 + $0x560] ss:$48 sps:$4 sm:$0xff]  }
 0x15b   : > { %2977 = vmatpush2.bf16.msra.mxu1 %v4099_v49  ;;  %v4164_v49 = vld [vmem:[%s5640_s3 + $0x504] ss:$48 sps:$4 sm:$0xff]  }
 0x15c   : > { %2938 = vmatmul.mubr.bf16.vlgmr.msra.gmra.mxu0 %v4585_v26  ;;  %v2693_v57 = vpop.f32.mrf.mxu0  ;;  %3028 = vmatprep.subr.bf16.mxu1 %v4107_v51  ;;  %v4159_v51 = vld [vmem:[%s5640_s3 + $0xb60] ss:$48 sps:$4 sm:$0xff]  }
 0x15d   : > { %v2694_v59 = vadd.f32 %v2693_v57, %v682_v53  ;;  %2988 = vmatpush1.bf16.msra.mxu0 %v4102_v52  ;;  %3019 = vmatprep.mubr.bf16.mxu0 %v4580_v24  ;;  %v4167_v52 = vld [vmem:[%s5640_s3 + $0xb04] ss:$48 sps:$4 sm:$0xff]   ;;  %v4162_v53 = vld [vmem:[%s5640_s3 + $0x500] ss:$48 sps:$4 sm:$0xff]  }
 0x15e   : > { %2979 = vmatmul.mubr.bf16.vlgmr.msra.gmra.mxu1 %v4596_v30  ;;  %v2695_v61 = vpop.f32.mrf.mxu0  ;;  %v2734_v62 = vpop.f32.mrf.mxu1  ;;  %2989 = vmatprep.subr.bf16.mxu0 %v4110_v54  ;;  %v4170_v54 = vld [vmem:[%s5640_s3 + $0x4a4] ss:$48 sps:$4 sm:$0xff]   ;;  %v4168_v57 = vld [vmem:[%s5640_s3 + $0x4a0] ss:$48 sps:$4 sm:$0xff]  }
 0x15f   : > { %v2696_v0 = vadd.f32 %v2695_v61, %v686_v56  ;;  %v5212_v1 = vadd.f32 %v2734_v62, %v2694_v59  ;;  %3029 = vmatpush1.bf16.msra.mxu1 %v4105_v55  ;;  %3060 = vmatprep.mubr.bf16.mxu1 %v4590_v28  ;;  %v4165_v55 = vld [vmem:[%s5640_s3 + $0xb00] ss:$48 sps:$4 sm:$0xff]   ;;  %v4173_v56 = vld [vmem:[%s5640_s3 + $0xaa4] ss:$48 sps:$4 sm:$0xff]  }
 0x160   : > { %v2697_v3 = vpop.f32.mrf.mxu0  ;;  %v2736_v4 = vpop.f32.mrf.mxu1  ;;  %3030 = vmatprep.subr.bf16.mxu1 %v4113_v58  ;;  %v4176_v58 = vld [vmem:[%s5640_s3 + $0x444] ss:$48 sps:$4 sm:$0xff]   ;;  %v4171_v59 = vld [vmem:[%s5640_s3 + $0xaa0] ss:$48 sps:$4 sm:$0xff]  }
 0x161   : > { %v5221_v6 = vadd.f32 %v2736_v4, %v2696_v0  ;;  %2990 = vmatpush1.bf16.msra.mxu0 %v4108_v60  ;;  %v4179_v60 = vld [vmem:[%s5640_s3 + $0xa44] ss:$48 sps:$4 sm:$0xff]   ;;  %v4174_v61 = vld [vmem:[%s5640_s3 + $0x440] ss:$48 sps:$4 sm:$0xff]  }
 0x162   : > { %v2698_v8 = vpop.f32.mrf.mxu0  ;;  %v2738_v10 = vpop.f32.mrf.mxu1  ;;  %2991 = vmatprep.subr.bf16.mxu0 %v4116_v63  ;;  %v4182_v62 = vld [vmem:[%s5640_s3 + $0x3e4] ss:$48 sps:$4 sm:$0xff]   ;;  %v4177_v63 = vld [vmem:[%s5640_s3 + $0xa40] ss:$48 sps:$4 sm:$0xff]  }
 0x163   : > { %v3155_v12 = vcombine.low %v5212_v1, %v5221_v6  ;;  %3031 = vmatpush1.bf16.msra.mxu1 %v4111_v2  ;;  %v4185_v0 = vld [vmem:[%s5640_s3 + $0x9e4] ss:$48 sps:$4 sm:$0xff]   ;;  %v4180_v2 = vld [vmem:[%s5640_s3 + $0x3e0] ss:$48 sps:$4 sm:$0xff]   ;;  %v4219_v1 = vld [vmem:[%s5640_s3 + $0x7a8] ss:$48 sps:$4 sm:$0xff]  }
 0x164   : > { %v2739_v14 = vpop.f32.mrf.mxu1  ;;  %3032 = vmatprep.subr.bf16.mxu1 %v4119_v5  ;;  %v4188_v3 = vld [vmem:[%s5640_s3 + $0x384] ss:$48 sps:$4 sm:$0xff]   ;;  %v4183_v4 = vld [vmem:[%s5640_s3 + $0x9e0] ss:$48 sps:$4 sm:$0xff]   ;;  %v4227_v6 = vld [vmem:[%s5640_s3 + $0x74c] ss:$48 sps:$4 sm:$0xff]  }
 0x165   : > { %2992 = vmatpush1.bf16.msra.mxu0 %v4114_v7  ;;  %v4191_v5 = vld [vmem:[%s5640_s3 + $0x984] ss:$48 sps:$4 sm:$0xff]   ;;  %v4186_v7 = vld [vmem:[%s5640_s3 + $0x380] ss:$48 sps:$4 sm:$0xff]   ;;  %v689_v14 = vsub.s32 2, %v4567_v9 }
 0x166   : > { %2993 = vmatprep.subr.bf16.mxu0 %v4122_v11  ;;  %v4194_v8 = vld [vmem:[%s5640_s3 + $0x324] ss:$48 sps:$4 sm:$0xff]   ;;  %v4189_v10 = vld [vmem:[%s5640_s3 + $0x980] ss:$48 sps:$4 sm:$0xff]  }
 0x167   : > { %3033 = vmatpush1.bf16.msra.mxu1 %v4117_v13  ;;  %v4197_v11 = vld [vmem:[%s5640_s3 + $0x924] ss:$48 sps:$4 sm:$0xff]   ;;  %v4192_v13 = vld [vmem:[%s5640_s3 + $0x320] ss:$48 sps:$4 sm:$0xff]  }
 0x168   : > { %3034 = vmatprep.subr.bf16.mxu1 %v4125_v15  ;;  %v4200_v15 = vld [vmem:[%s5640_s3 + $0x2cc] ss:$48 sps:$4 sm:$0xff]  }
 0x169   : > { %2994 = vmatpush1.bf16.msra.mxu0 %v4120_v17  ;;  %v4195_v17 = vld [vmem:[%s5640_s3 + $0x920] ss:$48 sps:$4 sm:$0xff]  }
 0x16a   : > { %2995 = vmatprep.subr.bf16.mxu0 %v4128_v19  ;;  %v693_v19 = vsub.s32 3, %v4567_v9 }
 0x16b   : > { %3035 = vmatpush1.bf16.msra.mxu1 %v4123_v20  ;;  %v4203_v20 = vld [vmem:[%s5640_s3 + $0x8cc] ss:$48 sps:$4 sm:$0xff]  }
 0x16c   : > { %3036 = vmatprep.subr.bf16.mxu1 %v4131_v21  ;;  %v690_v21 = vrot.slane %v5176_v48, %v689_v14 }
 0x16d   : > { %2996 = vmatpush1.bf16.msra.mxu0 %v4126_v22  ;;  %v4198_v22 = vld [vmem:[%s5640_s3 + $0x2c8] ss:$48 sps:$4 sm:$0xff]  }
 0x16e   : > { %2997 = vmatprep.subr.bf16.mxu0 %v4134_v23  ;;  %v4206_v23 = vld [vmem:[%s5640_s3 + $0x26c] ss:$48 sps:$4 sm:$0xff]  }
 0x16f   : > { %3037 = vmatpush1.bf16.msra.mxu1 %v4129_v25  ;;  %v694_v25 = vrot.slane %v5176_v48, %v693_v19 }
 0x170   : > { %3038 = vmatprep.subr.bf16.mxu1 %v4137_v27  ;;  %v4201_v27 = vld [vmem:[%s5640_s3 + $0x8c8] ss:$48 sps:$4 sm:$0xff]  }
 0x171   : > { %2998 = vmatpush1.bf16.msra.mxu0 %v4132_v29 }
 0x172   : > { %2999 = vmatprep.subr.bf16.mxu0 %v4140_v31  ;;  %v4209_v31 = vld [vmem:[%s5640_s3 + $0x86c] ss:$48 sps:$4 sm:$0xff]  }
 0x173   : > { %3039 = vmatpush1.bf16.msra.mxu1 %v4135_v32 }
 0x174   : > { %3040 = vmatprep.subr.bf16.mxu1 %v4143_v33  ;;  %v4204_v33 = vld [vmem:[%s5640_s3 + $0x268] ss:$48 sps:$4 sm:$0xff]  }
 0x175   : > { %3000 = vmatpush1.bf16.msra.mxu0 %v4138_v34 }
 0x176   : > { %3001 = vmatprep.subr.bf16.mxu0 %v4146_v35 }
 0x177   : > { %3041 = vmatpush1.bf16.msra.mxu1 %v4141_v36  ;;  %v4212_v36 = vld [vmem:[%s5640_s3 + $0x20c] ss:$48 sps:$4 sm:$0xff]  }
 0x178   : > { %3042 = vmatprep.subr.bf16.mxu1 %v4149_v37 }
 0x179   : > { %3002 = vmatpush1.bf16.msra.mxu0 %v4144_v38 }
 0x17a   : > { %3003 = vmatprep.subr.bf16.mxu0 %v4152_v39 }
 0x17b   : > { %3043 = vmatpush1.bf16.msra.mxu1 %v4147_v40 }
 0x17c   : > { %3044 = vmatprep.subr.bf16.mxu1 %v4155_v41  ;;  %v4215_v41 = vld [vmem:[%s5640_s3 + $0x80c] ss:$48 sps:$4 sm:$0xff]  }
 0x17d   : > { %3004 = vmatpush2.bf16.msra.mxu0 %v4150_v42 }
 0x17e   : > { %3005 = vmatprep.subr.bf16.mxu0 %v4158_v43  ;;  %v4210_v43 = vld [vmem:[%s5640_s3 + $0x208] ss:$48 sps:$4 sm:$0xff]  }
 0x17f   : > { %3045 = vmatpush2.bf16.msra.mxu1 %v4153_v44 }
 0x180   : > { %3046 = vmatprep.subr.bf16.mxu1 %v4161_v45 }
 0x181   : > { %3006 = vmatpush2.bf16.msra.mxu0 %v4156_v47 }
 0x182   : > { %3007 = vmatprep.subr.bf16.mxu0 %v4164_v49  ;;  %v4213_v49 = vld [vmem:[%s5640_s3 + $0x808] ss:$48 sps:$4 sm:$0xff]  }
 0x183   : > { %3047 = vmatpush2.bf16.msra.mxu1 %v4159_v51 }
 0x184   : > { %3048 = vmatprep.subr.bf16.mxu1 %v4167_v52  ;;  %v4221_v52 = vld [vmem:[%s5640_s3 + $0x7ac] ss:$48 sps:$4 sm:$0xff]  }
 0x185   : > { %3008 = vmatpush2.bf16.msra.mxu0 %v4162_v53  ;;  %v5445_v53 = vrot.slane %v3155_v12, %v4571_v16  ;;  %v4222_v12 = vld [vmem:[%s5640_s3 + $0x148] ss:$48 sps:$4 sm:$0xff]  }
 0x186   : > { %3009 = vmatprep.subr.bf16.mxu0 %v4170_v54 }
 0x187   : > { %3049 = vmatpush2.bf16.msra.mxu1 %v4165_v55  ;;  %v4216_v55 = vld [vmem:[%s5640_s3 + $0x1a8] ss:$48 sps:$4 sm:$0xff]  }
 0x188   : > { %3050 = vmatprep.subr.bf16.mxu1 %v4173_v56  ;;  %v4224_v56 = vld [vmem:[%s5640_s3 + $0x14c] ss:$48 sps:$4 sm:$0xff]  }
 0x189   : > { %3010 = vmatpush2.bf16.msra.mxu0 %v4168_v57 }
 0x18a   : > { %3011 = vmatprep.subr.bf16.mxu0 %v4176_v58  ;;  %v4230_v58 = vld [vmem:[%s5640_s3 + $0xec] ss:$48 sps:$4 sm:$0xff]  }
 0x18b   : > { %3051 = vmatpush2.bf16.msra.mxu1 %v4171_v59  ;;  %v4225_v59 = vld [vmem:[%s5640_s3 + $0x748] ss:$48 sps:$4 sm:$0xff]  }
 0x18c   : > { %3052 = vmatprep.subr.bf16.mxu1 %v4179_v60  ;;  %v4233_v60 = vld [vmem:[%s5640_s3 + $0x6ec] ss:$48 sps:$4 sm:$0xff]  }
 0x18d   : > { %3012 = vmatpush2.bf16.msra.mxu0 %v4174_v61  ;;  %v4228_v61 = vld [vmem:[%s5640_s3 + $0xe8] ss:$48 sps:$4 sm:$0xff]  }
 0x18e   : > { %3013 = vmatprep.subr.bf16.mxu0 %v4182_v62  ;;  %v4236_v62 = vld [vmem:[%s5640_s3 + $0x8c] ss:$48 sps:$4 sm:$0xff]  }
 0x18f   : > { %3053 = vmatpush2.bf16.msra.mxu1 %v4177_v63  ;;  %v4231_v63 = vld [vmem:[%s5640_s3 + $0x6e8] ss:$48 sps:$4 sm:$0xff]  }
 0x190   : > { %3054 = vmatprep.subr.bf16.mxu1 %v4185_v0  ;;  %v4239_v0 = vld [vmem:[%s5640_s3 + $0x68c] ss:$48 sps:$4 sm:$0xff]  }
 0x191   : > { %3014 = vmatpush2.bf16.msra.mxu0 %v4180_v2  ;;  %v4234_v2 = vld [vmem:[%s5640_s3 + $0x88] ss:$48 sps:$4 sm:$0xff]  }
 0x192   : > { %3015 = vmatprep.subr.bf16.mxu0 %v4188_v3  ;;  %v4242_v3 = vld [vmem:[%s5640_s3 + $0x2c] ss:$48 sps:$4 sm:$0xff]  }
 0x193   : > { %3055 = vmatpush2.bf16.msra.mxu1 %v4183_v4  ;;  %v4237_v4 = vld [vmem:[%s5640_s3 + $0x688] ss:$48 sps:$4 sm:$0xff]  }
 0x194   : > { %3056 = vmatprep.subr.bf16.mxu1 %v4191_v5  ;;  %v4245_v5 = vld [vmem:[%s5640_s3 + $0x62c] ss:$48 sps:$4 sm:$0xff]  }
 0x195   : > { %3016 = vmatpush2.bf16.msra.mxu0 %v4186_v7  ;;  %v4240_v7 = vld [vmem:[%s5640_s3 + $0x28] ss:$48 sps:$4 sm:$0xff]  }
 0x196   : > { %3017 = vmatprep.subr.bf16.mxu0 %v4194_v8  ;;  %v4248_v8 = vld [vmem:[%s5640_s3 + $0x5cc] ss:$48 sps:$4 sm:$0xff]  }
 0x197   : > { %3057 = vmatpush2.bf16.msra.mxu1 %v4189_v10  ;;  %v4243_v10 = vld [vmem:[%s5640_s3 + $0x628] ss:$48 sps:$4 sm:$0xff]  }
 0x198   : > { %3058 = vmatprep.subr.bf16.mxu1 %v4197_v11  ;;  %v4251_v11 = vld [vmem:[%s5640_s3 + $0xbcc] ss:$48 sps:$4 sm:$0xff]  }
 0x199   : > { %3018 = vmatpush2.bf16.msra.mxu0 %v4192_v13  ;;  %v4246_v13 = vld [vmem:[%s5640_s3 + $0x5c8] ss:$48 sps:$4 sm:$0xff]  }
 0x19a   : > { %3069 = vmatprep.subr.bf16.mxu0 %v4200_v15  ;;  %v4254_v15 = vld [vmem:[%s5640_s3 + $0x56c] ss:$48 sps:$4 sm:$0xff]  }
 0x19b   : > { %3059 = vmatpush2.bf16.msra.mxu1 %v4195_v17  ;;  %v4249_v17 = vld [vmem:[%s5640_s3 + $0xbc8] ss:$48 sps:$4 sm:$0xff]  }
 0x19c   : > { %v2775_v29 = vpop.f32.mrf.mxu0  ;;  %3020 = vmatmul.mubr.bf16.vlgmr.msra.gmra.mxu0 %v4585_v26  ;;  %3110 = vmatprep.subr.bf16.mxu1 %v4203_v20  ;;  %v4257_v20 = vld [vmem:[%s5640_s3 + $0xb6c] ss:$48 sps:$4 sm:$0xff]  }
 0x19d   : > { %v2776_v32 = vadd.f32 %v2775_v29, %v690_v21  ;;  %3070 = vmatpush1.bf16.msra.mxu0 %v4198_v22  ;;  %3101 = vmatprep.mubr.bf16.mxu0 %v4580_v24  ;;  %v4207_v24 = vld [vmem:[%s5640_s3 + $0x868] ss:$48 sps:$4 sm:$0xff]   ;;  %v4260_v22 = vld [vmem:[%s5640_s3 + $0x50c] ss:$48 sps:$4 sm:$0xff]  }
 0x19e   : > { %v2777_v34 = vpop.f32.mrf.mxu0  ;;  %v2816_v35 = vpop.f32.mrf.mxu1  ;;  %3061 = vmatmul.mubr.bf16.vlgmr.msra.gmra.mxu1 %v4596_v30  ;;  %3071 = vmatprep.subr.bf16.mxu0 %v4206_v23  ;;  %v4252_v21 = vld [vmem:[%s5640_s3 + $0x568] ss:$48 sps:$4 sm:$0xff]   ;;  %v4266_v29 = vld [vmem:[%s5640_s3 + $0x4ac] ss:$48 sps:$4 sm:$0xff]  }
 0x19f   : > { %v2778_v37 = vadd.f32 %v2777_v34, %v694_v25  ;;  %v2817_v38 = vadd.f32 %v2816_v35, %v2776_v32  ;;  %3111 = vmatpush1.bf16.msra.mxu1 %v4201_v27  ;;  %3142 = vmatprep.mubr.bf16.mxu1 %v4590_v28  ;;  %v4218_v28 = vld [vmem:[%s5640_s3 + $0x1ac] ss:$48 sps:$4 sm:$0xff]   ;;  %v4255_v23 = vld [vmem:[%s5640_s3 + $0xb68] ss:$48 sps:$4 sm:$0xff]  }
 0x1a0   : > { %v2779_v39 = vpop.f32.mrf.mxu0  ;;  %v2818_v40 = vpop.f32.mrf.mxu1  ;;  %3112 = vmatprep.subr.bf16.mxu1 %v4209_v31  ;;  %v4263_v25 = vld [vmem:[%s5640_s3 + $0xb0c] ss:$48 sps:$4 sm:$0xff]   ;;  %v4258_v27 = vld [vmem:[%s5640_s3 + $0x508] ss:$48 sps:$4 sm:$0xff]  }
 0x1a1   : > { %v2819_v42 = vadd.f32 %v2818_v40, %v2778_v37  ;;  %3072 = vmatpush1.bf16.msra.mxu0 %v4204_v33  ;;  %v4261_v31 = vld [vmem:[%s5640_s3 + $0xb08] ss:$48 sps:$4 sm:$0xff]   ;;  %v4269_v32 = vld [vmem:[%s5640_s3 + $0xaac] ss:$48 sps:$4 sm:$0xff]  }
 0x1a2   : > { %v2780_v44 = vpop.f32.mrf.mxu0  ;;  %v2820_v45 = vpop.f32.mrf.mxu1  ;;  %3073 = vmatprep.subr.bf16.mxu0 %v4212_v36  ;;  %v4264_v33 = vld [vmem:[%s5640_s3 + $0x4a8] ss:$48 sps:$4 sm:$0xff]   ;;  %v4272_v34 = vld [vmem:[%s5640_s3 + $0x44c] ss:$48 sps:$4 sm:$0xff]  }
 0x1a3   : > { %v3156_v47 = vcombine.low %v2817_v38, %v2819_v42  ;;  %3113 = vmatpush1.bf16.msra.mxu1 %v4207_v24  ;;  %v4267_v35 = vld [vmem:[%s5640_s3 + $0xaa8] ss:$48 sps:$4 sm:$0xff]   ;;  %v4275_v36 = vld [vmem:[%s5640_s3 + $0xa4c] ss:$48 sps:$4 sm:$0xff]  }
 0x1a4   : > { %v2821_v51 = vpop.f32.mrf.mxu1  ;;  %3114 = vmatprep.subr.bf16.mxu1 %v4215_v41  ;;  %v4270_v37 = vld [vmem:[%s5640_s3 + $0x448] ss:$48 sps:$4 sm:$0xff]   ;;  %v4278_v38 = vld [vmem:[%s5640_s3 + $0x3ec] ss:$48 sps:$4 sm:$0xff]  }
 0x1a5   : > { %v5448_v54 = vrot.slane %v3156_v47, %v4571_v16  ;;  %3074 = vmatpush1.bf16.msra.mxu0 %v4210_v43  ;;  %v4273_v24 = vld [vmem:[%s5640_s3 + $0xa48] ss:$48 sps:$4 sm:$0xff]   ;;  %v4281_v39 = vld [vmem:[%s5640_s3 + $0x9ec] ss:$48 sps:$4 sm:$0xff]   ;;  %v697_v51 = vsub.s32 4, %v4567_v9 }
 0x1a6   : > { %3075 = vmatprep.subr.bf16.mxu0 %v4218_v28  ;;  %v4276_v40 = vld [vmem:[%s5640_s3 + $0x3e8] ss:$48 sps:$4 sm:$0xff]   ;;  %v4284_v41 = vld [vmem:[%s5640_s3 + $0x38c] ss:$48 sps:$4 sm:$0xff]  }
 0x1a7   : > { %v3171_v57 = vcombine.low %v5445_v53, %v5448_v54  ;;  %3115 = vmatpush1.bf16.msra.mxu1 %v4213_v49  ;;  %v4279_v42 = vld [vmem:[%s5640_s3 + $0x9e8] ss:$48 sps:$4 sm:$0xff]   ;;  %v4287_v43 = vld [vmem:[%s5640_s3 + $0x98c] ss:$48 sps:$4 sm:$0xff]  }
 0x1a8   : > { %3116 = vmatprep.subr.bf16.mxu1 %v4221_v52  ;;  %v4282_v44 = vld [vmem:[%s5640_s3 + $0x388] ss:$48 sps:$4 sm:$0xff]   ;;  %v4290_v45 = vld [vmem:[%s5640_s3 + $0x32c] ss:$48 sps:$4 sm:$0xff]  }
 0x1a9   : > { %3076 = vmatpush1.bf16.msra.mxu0 %v4216_v55  ;;  %v4285_v28 = vld [vmem:[%s5640_s3 + $0x988] ss:$48 sps:$4 sm:$0xff]   ;;  %v4293_v47 = vld [vmem:[%s5640_s3 + $0x92c] ss:$48 sps:$4 sm:$0xff]   ;;  %v701_v55 = vsub.s32 5, %v4567_v9 }
 0x1aa   : > { %3077 = vmatprep.subr.bf16.mxu0 %v4224_v56  ;;  %v4288_v49 = vld [vmem:[%s5640_s3 + $0x328] ss:$48 sps:$4 sm:$0xff]   ;;  %v698_v56 = vrot.slane %v5176_v48, %v697_v51  ;;  %v260_v51 = vld [vmem:[%s4359_s29] sm:$0xff] }
 0x1ab   : > { %3117 = vmatpush1.bf16.msra.mxu1 %v4219_v1  ;;  %v4291_v52 = vld [vmem:[%s5640_s3 + $0x928] ss:$48 sps:$4 sm:$0xff]   ;;  %v702_v1 = vrot.slane %v5176_v48, %v701_v55  ;;  %v263_v55 = vunpack.c.h.bf16 %v260_v51 }
 0x1ac   : > { %3118 = vmatprep.subr.bf16.mxu1 %v4227_v6 }
 0x1ad   : > { %3078 = vmatpush1.bf16.msra.mxu0 %v4222_v12 }
 0x1ae   : > { %3079 = vmatprep.subr.bf16.mxu0 %v4230_v58 }
 0x1af   : > { %3119 = vmatpush1.bf16.msra.mxu1 %v4225_v59 }
 0x1b0   : > { %3120 = vmatprep.subr.bf16.mxu1 %v4233_v60 }
 0x1b1   : > { %3080 = vmatpush1.bf16.msra.mxu0 %v4228_v61 }
 0x1b2   : > { %3081 = vmatprep.subr.bf16.mxu0 %v4236_v62 }
 0x1b3   : > { %3121 = vmatpush1.bf16.msra.mxu1 %v4231_v63 }
 0x1b4   : > { %3122 = vmatprep.subr.bf16.mxu1 %v4239_v0 }
 0x1b5   : > { %3082 = vmatpush1.bf16.msra.mxu0 %v4234_v2 }
 0x1b6   : > { %3083 = vmatprep.subr.bf16.mxu0 %v4242_v3 }
 0x1b7   : > { %3123 = vmatpush1.bf16.msra.mxu1 %v4237_v4 }
 0x1b8   : > { %3124 = vmatprep.subr.bf16.mxu1 %v4245_v5 }
 0x1b9   : > { %3084 = vmatpush1.bf16.msra.mxu0 %v4240_v7  ;;  %v705_v7 = vsub.s32 6, %v4567_v9 }
 0x1ba   : > { %3085 = vmatprep.subr.bf16.mxu0 %v4248_v8  ;;  %v709_v8 = vsub.s32 7, %v4567_v9 }
 0x1bb   : > { %3125 = vmatpush1.bf16.msra.mxu1 %v4243_v10 }
 0x1bc   : > { %3126 = vmatprep.subr.bf16.mxu1 %v4251_v11  ;;  %v710_v10 = vrot.slane %v5176_v48, %v709_v8  ;;  %v261_v8 = vld [vmem:[%s4359_s29 + $0x8] sm:$0xf] }
 0x1bd   : > { %3086 = vmatpush2.bf16.msra.mxu0 %v4246_v13 }
 0x1be   : > { %3087 = vmatprep.subr.bf16.mxu0 %v4254_v15 }
 0x1bf   : > { %3127 = vmatpush2.bf16.msra.mxu1 %v4249_v17 }
 0x1c0   : > { %3128 = vmatprep.subr.bf16.mxu1 %v4257_v20 }
 0x1c1   : > { %3088 = vmatpush2.bf16.msra.mxu0 %v4252_v21 }
 0x1c2   : > { %3089 = vmatprep.subr.bf16.mxu0 %v4260_v22 }
 0x1c3   : > { %3129 = vmatpush2.bf16.msra.mxu1 %v4255_v23 }
 0x1c4   : > { %3130 = vmatprep.subr.bf16.mxu1 %v4263_v25 }
 0x1c5   : > { %3090 = vmatpush2.bf16.msra.mxu0 %v4258_v27 }
 0x1c6   : > { %3091 = vmatprep.subr.bf16.mxu0 %v4266_v29 }
 0x1c7   : > { %3131 = vmatpush2.bf16.msra.mxu1 %v4261_v31 }
 0x1c8   : > { %3132 = vmatprep.subr.bf16.mxu1 %v4269_v32 }
 0x1c9   : > { %3092 = vmatpush2.bf16.msra.mxu0 %v4264_v33 }
 0x1ca   : > { %3093 = vmatprep.subr.bf16.mxu0 %v4272_v34 }
 0x1cb   : > { %3133 = vmatpush2.bf16.msra.mxu1 %v4267_v35 }
 0x1cc   : > { %3134 = vmatprep.subr.bf16.mxu1 %v4275_v36 }
 0x1cd   : > { %3094 = vmatpush2.bf16.msra.mxu0 %v4270_v37 }
 0x1ce   : > { %3095 = vmatprep.subr.bf16.mxu0 %v4278_v38 }
 0x1cf   : > { %3135 = vmatpush2.bf16.msra.mxu1 %v4273_v24 }
 0x1d0   : > { %3136 = vmatprep.subr.bf16.mxu1 %v4281_v39 }
 0x1d1   : > { %3096 = vmatpush2.bf16.msra.mxu0 %v4276_v40 }
 0x1d2   : > { %3097 = vmatprep.subr.bf16.mxu0 %v4284_v41 }
 0x1d3   : > { %3137 = vmatpush2.bf16.msra.mxu1 %v4279_v42 }
 0x1d4   : > { %3138 = vmatprep.subr.bf16.mxu1 %v4287_v43 }
 0x1d5   : > { %3098 = vmatpush2.bf16.msra.mxu0 %v4282_v44 }
 0x1d6   : > { %3099 = vmatprep.subr.bf16.mxu0 %v4290_v45 }
 0x1d7   : > { %3139 = vmatpush2.bf16.msra.mxu1 %v4285_v28 }
 0x1d8   : > { %3140 = vmatprep.subr.bf16.mxu1 %v4293_v47 }
 0x1d9   : > { %3100 = vmatpush2.bf16.msra.mxu0 %v4288_v49 }
 0x1db   : > { %3141 = vmatpush2.bf16.msra.mxu1 %v4291_v52  ;;  %v262_v52 = vunpack.c.l.bf16 %v260_v51 }
 0x1dc   : > { %v2857_v6 = vpop.f32.mrf.mxu0  ;;  %3102 = vmatmul.mubr.bf16.vlgmr.msra.gmra.mxu0 %v4585_v26  ;;  %v706_v26 = vrot.slane %v5176_v48, %v705_v7  ;;  %v676_v48 = vld [vmem:[%s5641_s4 + $0x8] sm:$0xf] }
 0x1dd   : > { %v2858_v12 = vadd.f32 %v2857_v6, %v698_v56  ;;  %v714_v35 = vrot.slane %v676_v48, %v681_v46  ;;  %v718_v36 = vrot.slane %v676_v48, %v685_v50  ;;  %v3173_v46 = vadd.f32 %v3171_v57, %v262_v52 }
 0x1de   : > { %v2859_v58 = vpop.f32.mrf.mxu0  ;;  %v2898_v59 = vpop.f32.mrf.mxu1  ;;  %3143 = vmatmul.mubr.bf16.vlgmr.msra.gmra.mxu1 %v4596_v30 }
 0x1df   : > { %v2860_v60 = vadd.f32 %v2859_v58, %v702_v1  ;;  %v2899_v61 = vadd.f32 %v2898_v59, %v2858_v12  ;;  %v3700_v50 = vmul.f32 -1.442695, %v3173_v46  ;;  %v722_v58 = vrot.slane %v676_v48, %v689_v14 }
 0x1e0   : > { %v2861_v62 = vpop.f32.mrf.mxu0  ;;  %v2900_v63 = vpop.f32.mrf.mxu1  ;;  %v726_v59 = vrot.slane %v676_v48, %v693_v19  ;;  %v264_v19 = vunpack.c.l.bf16 %v261_v8 }
 0x1e1   : > { %v2901_v0 = vadd.f32 %v2900_v63, %v2860_v60  ;;  %4294 = vpow2.f32 %v3700_v50 }
 0x1e2   : > { %v2862_v2 = vpop.f32.mrf.mxu0  ;;  %v2902_v3 = vpop.f32.mrf.mxu1 }
 0x1e3   : > { %v3184_v4 = vcombine.low %v2899_v61, %v2901_v0 }
 0x1e4   : > { %v2903_v5 = vpop.f32.mrf.mxu1 }
 0x1e5   : > { %v3192_v32 = vrot.slane %v3184_v4, %v4571_v16 }
 0x1ee   : > { %v4295_v6 = vpop.eup %4294 }
 0x1ef   : > { %v3177_v12 = vadd.f32 1.0, %v4295_v6 }
 0x21c   : > { %v2939_v11 = vpop.f32.mrf.mxu0 }
 0x21d   : > { %v2940_v13 = vadd.f32 %v2939_v11, %v706_v26 }
 0x21e   : > { %v2941_v30 = vpop.f32.mrf.mxu0  ;;  %v2980_v15 = vpop.f32.mrf.mxu1 }
 0x21f   : > { %v2942_v17 = vadd.f32 %v2941_v30, %v710_v10  ;;  %v2981_v20 = vadd.f32 %v2980_v15, %v2940_v13 }
 0x220   : > { %v2943_v21 = vpop.f32.mrf.mxu0  ;;  %v2982_v22 = vpop.f32.mrf.mxu1 }
 0x221   : > { %v2983_v23 = vadd.f32 %v2982_v22, %v2942_v17 }
 0x222   : > { %v2944_v25 = vpop.f32.mrf.mxu0  ;;  %v2984_v27 = vpop.f32.mrf.mxu1 }
 0x223   : > { %v3185_v29 = vcombine.low %v2981_v20, %v2983_v23 }
 0x224   : > { %v2985_v31 = vpop.f32.mrf.mxu1 }
 0x225   : > { %v3199_v33 = vrot.slane %v3185_v29, %v4571_v16 }
 0x227   : > { %v3200_v34 = vcombine.low %v3192_v32, %v3199_v33 }
 0x229   : > { %v3202_v56 = vadd.f32 %v3200_v34, %v263_v55 }
 0x22b   : > { %v3701_v1 = vmul.f32 -1.442695, %v3202_v56 }
 0x22d   : > { %4296 = vpow2.f32 %v3701_v1 }
 0x22e   : > { %4298 = vrcp.f32 %v3177_v12 }
 0x23a   : > { %v4297_v3 = vpop.eup %4296 }
 0x23b   : > { %v3206_v26 = vadd.f32 1.0, %v4297_v3  ;;  %v4299_v13 = vpop.eup %4298 }
 0x23d   : > { %4300 = vrcp.f32 %v3206_v26 }
 0x24a   : > { %v4301_v17 = vpop.eup %4300 }
 0x24b   : > { %v3234_v20 = vsub.f32 1.0, %v4301_v17  ;;  %v3236_v22 = vmul.f32 %v4301_v17, %v4573_v18 }
 0x25c   : > { %v3021_v37 = vpop.f32.mrf.mxu0 }
 0x25d   : > { %v3022_v38 = vadd.f32 %v3021_v37, %v714_v35 }
 0x25e   : > { %v3023_v24 = vpop.f32.mrf.mxu0  ;;  %v3062_v39 = vpop.f32.mrf.mxu1 }
 0x25f   : > { %v3024_v40 = vadd.f32 %v3023_v24, %v718_v36  ;;  %v3063_v41 = vadd.f32 %v3062_v39, %v3022_v38 }
 0x260   : > { %v3025_v42 = vpop.f32.mrf.mxu0  ;;  %v3064_v43 = vpop.f32.mrf.mxu1 }
 0x261   : > { %v3065_v44 = vadd.f32 %v3064_v43, %v3024_v40 }
 0x262   : > { %v3026_v45 = vpop.f32.mrf.mxu0  ;;  %v3066_v28 = vpop.f32.mrf.mxu1 }
 0x263   : > { %v3213_v47 = vcombine.low %v3063_v41, %v3065_v44 }
 0x264   : > { %v3067_v49 = vpop.f32.mrf.mxu1 }
 0x265   : > { %v3221_v10 = vrot.slane %v3213_v47, %v4571_v16 }
 0x29c   : > { %v3103_v60 = vpop.f32.mrf.mxu0 }
 0x29d   : > { %v3104_v61 = vadd.f32 %v3103_v60, %v722_v58 }
 0x29e   : > { %v3105_v53 = vpop.f32.mrf.mxu0  ;;  %v3144_v54 = vpop.f32.mrf.mxu1 }
 0x29f   : > { %v3106_v57 = vadd.f32 %v3105_v53, %v726_v59  ;;  %v3145_v0 = vadd.f32 %v3144_v54, %v3104_v61 }
 0x2a0   : > { %v3107_v62 = vpop.f32.mrf.mxu0  ;;  %v3146_v63 = vpop.f32.mrf.mxu1 }
 0x2a1   : > { %v3147_v2 = vadd.f32 %v3146_v63, %v3106_v57 }
 0x2a2   : > { %v3108_v4 = vpop.f32.mrf.mxu0  ;;  %v3148_v5 = vpop.f32.mrf.mxu1 }
 0x2a3   : > { %v3214_v7 = vcombine.low %v3145_v0, %v3147_v2 }
 0x2a4   : > { %v3149_v14 = vpop.f32.mrf.mxu1 }
 0x2a5   : > { %v3228_v9 = vrot.slane %v3214_v7, %v4571_v16 }
 0x2a7   : > { %v3229_v11 = vcombine.low %v3221_v10, %v3228_v9 }
 0x2a9   : > { %v3231_v30 = vmul.f32 %v4299_v13, %v3229_v11 }
 0x2ab   : > { %v3232_v15 = vadd.f32 %v3231_v30, %v264_v19 }
 0x2ad   : > { %4302 = vtanh.f32 %v3232_v15 }
 0x2ba   : > { %v4303_v21 = vpop.eup %4302 }
 0x2bb   : > { %v3235_v23 = vmul.f32 %v4303_v21, %v3234_v20 }
 0x2bd   : > { %v3237_v25 = vadd.f32 %v3236_v22, %v3235_v23 }
 0x2bf   : > { %3238 = vst [vmem:[#allocation2] sm:$0xff] %v3237_v25  ;;  %3239 = vst [vmem:[%s4364_s7] sm:$0xff] %v3237_v25 }
 0x2c0 PF: > { %s15_s18 = sadd.s32 1, %s4310_s18  }
 0x2c1   : > { %p12_p5 = scmp.ge.s32.totalorder %s15_s18, 6  }
 0x2c3   :  { %14 = sbr.rel (!%p12_p5) target bundleno = 1 (0x1), region = 77 }

</bundles_post_ra>
